<compile_context>
chip_gen: v6e
topology: v6e:2x2x1
jax: 0.10.0
libtpu: 0.0.40
codegen_flags: <defaults>
</compile_context>

<pallas_src>
import math

import jax
import jax.numpy as jnp
from jax.experimental import pallas as pl
from jax.experimental.pallas import tpu as pltpu

# ---------------- small, self-consistent config (ViT-like, shrunk) ----------------
BATCH = 2
IN_CH = 3
IMG = 16
PATCH = 4
HIDDEN = 32
NUM_HEADS = 4
HEAD_DIM = HIDDEN // NUM_HEADS
MLP_DIM = 64
NUM_LAYERS = 12          # Encoder hard-codes layer[:10], layer[10], layer[11]
NUM_PRE_LAYERS = 10
NUM_CLASSES = 10
GRID_HW = IMG // PATCH
N_PATCH = GRID_HW * GRID_HW
SEQ = N_PATCH + 1
EPS = 1e-6

# Matmul precision: DEFAULT per perf review (HIGHEST = 6-pass f32 decomposition on the
# MXU).  Restore jax.lax.Precision.HIGHEST in _dot / the einsums for bit-level parity.

_BLOCK_KEYS = ('ln1_w', 'ln1_b', 'wqkv', 'bqkv', 'wo', 'bo',
               'ln2_w', 'ln2_b', 'w1', 'b1', 'w2', 'b2')


# ---------------- in-kernel helpers (pure jnp, traced inside kernels) ----------------
def _dot(a, b):
    return jnp.dot(a, b, preferred_element_type=jnp.float32)


def _ln(x, w, b):
    mu = jnp.mean(x, axis=-1, keepdims=True)
    var = jnp.mean(jnp.square(x - mu), axis=-1, keepdims=True)
    return (x - mu) * jax.lax.rsqrt(var + EPS) * w + b      # rsqrt -> EUP slot


def _erf(x):
    # Abramowitz & Stegun 7.1.26 polynomial (|err| <= 1.5e-7), built from VPU/EUP ops
    # that are guaranteed to lower in Mosaic (avoids relying on an erf lowering).
    a1, a2, a3, a4, a5 = 0.254829592, -0.284496736, 1.421413741, -1.453152027, 1.061405429
    p = 0.3275911
    ax = jnp.abs(x)
    t = 1.0 / (1.0 + p * ax)
    poly = ((((a5 * t + a4) * t + a3) * t + a2) * t + a1) * t
    y = 1.0 - poly * jnp.exp(-ax * ax)
    return jnp.where(x >= 0, y, -y)


def _gelu_exact(x):
    # PyTorch F.gelu default (erf form)
    return 0.5 * x * (1.0 + _erf(x * (1.0 / math.sqrt(2.0))))


def _split_batch(x2d):
    """(B*SEQ, K) -> (B, SEQ, K) via static row slices + leading-dim stack."""
    return jnp.stack([x2d[b * SEQ:(b + 1) * SEQ, :] for b in range(BATCH)], axis=0)


def _merge_batch(x3d):
    """(B, SEQ, K) -> (B*SEQ, K)."""
    return jnp.concatenate([x3d[b] for b in range(BATCH)], axis=0)


def _block_body(x2, ln1w, ln1b, wqkv, bqkv, wo, bo, ln2w, ln2b, w1, b1, w2, b2):
    """One transformer block on a batch-folded (B*SEQ, D) token matrix.

    Returns (y2 (B*SEQ, D), probs (B*H, SEQ, SEQ)) with probs in b-major, h-minor order.
    """
    xn = _ln(x2, ln1w, ln1b)
    qkv = _dot(xn, wqkv) + bqkv                               # (B*S, 3D), one MXU push
    q3 = _split_batch(qkv[:, 0:HIDDEN])                       # (B, S, D)
    k3 = _split_batch(qkv[:, HIDDEN:2 * HIDDEN])
    v3 = _split_batch(qkv[:, 2 * HIDDEN:3 * HIDDEN])

    scale = 1.0 / math.sqrt(HEAD_DIM)
    probs_list, ctx_parts = [], []
    for hd in range(NUM_HEADS):                               # heads unrolled, batch fused
        sl = slice(hd * HEAD_DIM, (hd + 1) * HEAD_DIM)
        qh, kh, vh = q3[..., sl], k3[..., sl], v3[..., sl]
        scores = jnp.einsum('bqd,bkd->bqk', qh, kh,
                            preferred_element_type=jnp.float32) * scale   # (B, S, S)
        m = jnp.max(scores, axis=-1, keepdims=True)
        e = jnp.exp(scores - m)
        probs = e / jnp.sum(e, axis=-1, keepdims=True)        # exact divide (parity)
        probs_list.append(probs)
        ctx_parts.append(jnp.einsum('bqk,bkd->bqd', probs, vh,
                                    preferred_element_type=jnp.float32))  # (B, S, HD)
    ctx = _merge_batch(jnp.concatenate(ctx_parts, axis=-1))   # (B*S, D)

    attn_out = _dot(ctx, wo) + bo
    x2 = attn_out + x2
    y = _ln(x2, ln2w, ln2b)
    y = _gelu_exact(_dot(y, w1) + b1)
    y = _dot(y, w2) + b2
    y2 = y + x2

    probs_all = jnp.stack(probs_list, axis=1)                 # (B, H, S, S)
    probs_flat = probs_all.reshape(BATCH * NUM_HEADS, SEQ, SEQ)
    return y2, probs_flat


# ---------------- kernel 1: patch-embed + blocks 0..9 + attention rollout -------------
def _stack_kernel(patches_ref, pw_ref, pb_ref, cls_ref, pos_ref,
                  ln1w_ref, ln1b_ref, wqkv_ref, bqkv_ref, wo_ref, bo_ref,
                  ln2w_ref, ln2b_ref, w1_ref, b1_ref, w2_ref, b2_ref,
                  hid_ref, roll_ref, roll_sc):
    # --- patch embedding (Conv2d with stride==kernel == unfolded patches @ W + b) ---
    emb = _dot(patches_ref[...], pw_ref[...]) + pb_ref[...]   # (B*NP, D)
    cls = cls_ref[...]                                        # (1, D)
    pos = pos_ref[...]                                        # (SEQ, D)
    rows = []
    for b in range(BATCH):
        rows.append(cls + pos[0:1, :])
        rows.append(emb[b * N_PATCH:(b + 1) * N_PATCH, :] + pos[1:SEQ, :])
    hid_ref[...] = jnp.concatenate(rows, axis=0)              # one full-block store

    # attention-rollout accumulator starts at identity, one broadcast store
    rr = jax.lax.broadcasted_iota(jnp.int32, (SEQ, SEQ), 0)
    cc = jax.lax.broadcasted_iota(jnp.int32, (SEQ, SEQ), 1)
    eye = (rr == cc).astype(jnp.float32)
    roll_sc[...] = jnp.broadcast_to(eye[None, :, :], (BATCH * NUM_HEADS, SEQ, SEQ))

    def layer_step(l, carry):
        y, probs = _block_body(
            hid_ref[...],
            ln1w_ref[l], ln1b_ref[l], wqkv_ref[l], bqkv_ref[l],
            wo_ref[l], bo_ref[l], ln2w_ref[l], ln2b_ref[l],
            w1_ref[l], b1_ref[l], w2_ref[l], b2_ref[l])
        hid_ref[...] = y
        # rollout (AQS_Module_11 input): roll = A_l @ roll, batched over (B*H)
        roll_sc[...] = jnp.einsum('nij,njk->nik', probs, roll_sc[...],
                                  preferred_element_type=jnp.float32)
        return carry

    jax.lax.fori_loop(0, NUM_PRE_LAYERS, layer_step, 0)

    # only the cls row of the rollout is ever consumed by AQS
    roll_ref[...] = roll_sc[:, 0:1, :]


def encoder_stack(patches, params):
    st = params['stack']
    stacked = tuple(st[k] for k in _BLOCK_KEYS)
    out_shape = (jax.ShapeDtypeStruct((BATCH * SEQ, HIDDEN), jnp.float32),
                 jax.ShapeDtypeStruct((BATCH * NUM_HEADS, 1, SEQ), jnp.float32))
    return pl.pallas_call(
        _stack_kernel,
        out_shape=out_shape,
        scratch_shapes=[pltpu.VMEM((BATCH * NUM_HEADS, SEQ, SEQ), jnp.float32)],
    )(patches, params['patch_w'], params['patch_b'],
      params['cls_token'], params['pos_emb'], *stacked)


# ---------------- kernel 2: single transformer block (block 10) -----------------------
def _block_kernel(x_ref, ln1w_ref, ln1b_ref, wqkv_ref, bqkv_ref, wo_ref, bo_ref,
                  ln2w_ref, ln2b_ref, w1_ref, b1_ref, w2_ref, b2_ref,
                  y_ref, attn_ref):
    ws = tuple(r[...] for r in (ln1w_ref, ln1b_ref, wqkv_ref, bqkv_ref, wo_ref, bo_ref,
                                ln2w_ref, ln2b_ref, w1_ref, b1_ref, w2_ref, b2_ref))
    y, probs = _block_body(x_ref[...], *ws)
    y_ref[...] = y
    attn_ref[...] = probs[:, 0:1, :]          # AQS only reads the cls row


def single_block(x2, bp):
    ws = tuple(bp[k] for k in _BLOCK_KEYS)
    out_shape = (jax.ShapeDtypeStruct((BATCH * SEQ, HIDDEN), jnp.float32),
                 jax.ShapeDtypeStruct((BATCH * NUM_HEADS, 1, SEQ), jnp.float32))
    return pl.pallas_call(_block_kernel, out_shape=out_shape)(x2, *ws)


# ---------------- kernel 3: block 11 + encoder_norm + classification head -------------
def _final_kernel(x_ref, ln1w_ref, ln1b_ref, wqkv_ref, bqkv_ref, wo_ref, bo_ref,
                  ln2w_ref, ln2b_ref, w1_ref, b1_ref, w2_ref, b2_ref,
                  nw_ref, nb_ref, hw_ref, hb_ref,
                  logits_ref, attn_ref):
    ws = tuple(r[...] for r in (ln1w_ref, ln1b_ref, wqkv_ref, bqkv_ref, wo_ref, bo_ref,
                                ln2w_ref, ln2b_ref, w1_ref, b1_ref, w2_ref, b2_ref))
    y, probs = _block_body(x_ref[...], *ws)
    attn_ref[...] = probs.reshape(BATCH, NUM_HEADS, SEQ, SEQ)   # returned to caller
    # encoder_norm is per-token; applying it to the cls rows only is equivalent for logits.
    cls_rows = jnp.concatenate([y[b * SEQ:b * SEQ + 1, :] for b in range(BATCH)], axis=0)
    cls_n = _ln(cls_rows, nw_ref[...], nb_ref[...])
    logits_ref[...] = _dot(cls_n, hw_ref[...]) + hb_ref[...]


def final_block(x2, bp, norm_w, norm_b, head_w, head_b):
    ws = tuple(bp[k] for k in _BLOCK_KEYS)
    out_shape = (jax.ShapeDtypeStruct((BATCH, NUM_CLASSES), jnp.float32),
                 jax.ShapeDtypeStruct((BATCH, NUM_HEADS, SEQ, SEQ), jnp.float32))
    return pl.pallas_call(_final_kernel, out_shape=out_shape)(
        x2, *ws, norm_w, norm_b, head_w, head_b)


# ---------------- AQS_Module (data-dependent token selection: plain JAX glue) ---------
# TODO(synk): could be pulled in-kernel (iterative argmax top-k + one-hot gather matmul)
# to merge kernels 2+3; kept as XLA glue for robustness.
def aqs_module(attn_cls, hidden_states, threshold):
    # attn_cls: (B, H, SEQ) cls row of the (rolled-out) attention map.
    attn_map = attn_cls[:, :, 1:]                                   # (B, H, N-1)
    b, h, k = attn_map.shape
    flat = attn_map.reshape(b, h * k)
    top_values, top_indices = jax.lax.top_k(flat, k)
    col_indices = top_indices % k
    select_inx = col_indices + 1                                    # (B, k)
    noncls = hidden_states[jnp.arange(b)[:, None], select_inx]      # (B, k, D)
    attn_scores = top_values / jnp.sum(top_values, axis=-1, keepdims=True)
    filt = jnp.sign(attn_scores - threshold)
    filt = jnp.round((filt + 1.0) / 2.0)[..., None]
    new_noncls = (noncls * filt).astype(jnp.float16)                # matches .half()
    # compact non-zero tokens to the front (stable), zeros to the back
    nz_mask = jnp.any(new_noncls != 0, axis=-1)
    order = jnp.argsort(jnp.logical_not(nz_mask).astype(jnp.int32), axis=1)
    compacted = new_noncls[jnp.arange(b)[:, None], order]
    # TODO(synk): PyTorch pads/truncates to a data-dependent max_non_zero_tokens
    # (dynamic shape); with threshold initialized to 0 every token is kept, so the
    # static length k used here is exactly equivalent.
    filtered = compacted.astype(jnp.float32)   # torch.cat promotes half -> float32
    new_hidden = jnp.concatenate([hidden_states[:, :1], filtered], axis=1)
    threshold_loss = jnp.abs(threshold - 0.001)
    return new_hidden, threshold_loss


# ---------------- full forward --------------------------------------------------------
def vit_forward(x, params):
    b, c, him, wim = x.shape
    gh, gw = him // PATCH, wim // PATCH
    # Conv2d(stride == kernel) == unfold into patches (the matmul happens in kernel 1)
    patches = (x.reshape(b, c, gh, PATCH, gw, PATCH)
               .transpose(0, 2, 4, 1, 3, 5)
               .reshape(b * gh * gw, c * PATCH * PATCH))
    # dropout: eval mode -> identity

    # kernel 1: patch-embed + blocks 0..9 + attention rollout (AQS_11 input)
    hidden2, roll_cls = encoder_stack(patches, params)
    hidden = hidden2.reshape(BATCH, SEQ, HIDDEN)
    roll_cls = roll_cls.reshape(BATCH, NUM_HEADS, SEQ)
    new_hidden, tl1 = aqs_module(roll_cls, hidden, params['th11'])

    # kernel 2: block 10
    h2, attn10_cls = single_block(new_hidden.reshape(BATCH * SEQ, HIDDEN),
                                  params['block10'])
    hidden = h2.reshape(BATCH, SEQ, HIDDEN)
    attn10_cls = attn10_cls.reshape(BATCH, NUM_HEADS, SEQ)
    new_hidden, tl2 = aqs_module(attn10_cls, hidden, params['th12'])

    # kernel 3: block 11 + encoder_norm + head
    logits, attn11 = final_block(new_hidden.reshape(BATCH * SEQ, HIDDEN),
                                 params['block11'],
                                 params['enc_norm_w'], params['enc_norm_b'],
                                 params['head_w'], params['head_b'])
    _total_threshold_loss = tl1 + tl2   # only used in the labels-provided branch
    return logits, attn11               # labels=None path: (logits, attn_weights)


# ---------------- deterministic parameter init ----------------------------------------
def init_params(key):
    ks = jax.random.split(key, 8 + NUM_LAYERS)

    def nrm(k, shape, scale=0.02):
        return (scale * jax.random.normal(k, shape)).astype(jnp.float32)

    def block_params(k):
        kk = jax.random.split(k, 6)
        wq, wk, wv = (nrm(kk[0], (HIDDEN, HIDDEN)),
                      nrm(kk[1], (HIDDEN, HIDDEN)),
                      nrm(kk[2], (HIDDEN, HIDDEN)))
        return {
            'ln1_w': jnp.ones((1, HIDDEN), jnp.float32),
            'ln1_b': jnp.zeros((1, HIDDEN), jnp.float32),
            'wqkv': jnp.concatenate([wq, wk, wv], axis=1),           # fused (D, 3D)
            'bqkv': jnp.zeros((1, 3 * HIDDEN), jnp.float32),
            'wo': nrm(kk[3], (HIDDEN, HIDDEN)), 'bo': jnp.zeros((1, HIDDEN), jnp.float32),
            'ln2_w': jnp.ones((1, HIDDEN), jnp.float32),
            'ln2_b': jnp.zeros((1, HIDDEN), jnp.float32),
            'w1': nrm(kk[4], (HIDDEN, MLP_DIM)), 'b1': jnp.zeros((1, MLP_DIM), jnp.float32),
            'w2': nrm(kk[5], (MLP_DIM, HIDDEN)), 'b2': jnp.zeros((1, HIDDEN), jnp.float32),
        }

    blocks = [block_params(ks[8 + i]) for i in range(NUM_LAYERS)]
    # layers 0..9 stacked along a leading layer axis, VMEM-resident, indexed in-kernel
    stack = {name: jnp.stack([blocks[i][name] for i in range(NUM_PRE_LAYERS)], axis=0)
             for name in _BLOCK_KEYS}

    params = {
        'patch_w': nrm(ks[0], (IN_CH * PATCH * PATCH, HIDDEN)),
        'patch_b': jnp.zeros((1, HIDDEN), jnp.float32),
        'cls_token': nrm(ks[1], (1, HIDDEN)),
        'pos_emb': nrm(ks[2], (SEQ, HIDDEN)),
        'enc_norm_w': jnp.ones((1, HIDDEN), jnp.float32),
        'enc_norm_b': jnp.zeros((1, HIDDEN), jnp.float32),
        'head_w': nrm(ks[3], (HIDDEN, NUM_CLASSES)),
        'head_b': jnp.zeros((1, NUM_CLASSES), jnp.float32),
        'th11': jnp.float32(0.0),   # AQS_Module threshold init (torch.tensor(0.0))
        'th12': jnp.float32(0.0),
        'stack': stack,
        'block10': blocks[10],
        'block11': blocks[11],
    }
    return params


if __name__ == "__main__":
    key = jax.random.PRNGKey(0)
    pkey, xkey = jax.random.split(key)
    params = init_params(pkey)
    x = jax.random.normal(xkey, (BATCH, IN_CH, IMG, IMG), dtype=jnp.float32)

    logits, attn_weights = jax.jit(vit_forward)(x, params)
    jax.block_until_ready((logits, attn_weights))

    assert logits.shape == (BATCH, NUM_CLASSES)
    assert attn_weights.shape == (BATCH, NUM_HEADS, SEQ, SEQ)
    print("KERNEL_OK")
</pallas_src>

<mosaic_0001>
module attributes {stable_mosaic.version = 11 : i64} {
  func.func @_stack_kernel(%arg0: memref<32x48xf32, #tpu.memory_space<vmem>>, %arg1: memref<48x32xf32, #tpu.memory_space<vmem>>, %arg2: memref<1x32xf32, #tpu.memory_space<vmem>>, %arg3: memref<1x32xf32, #tpu.memory_space<vmem>>, %arg4: memref<17x32xf32, #tpu.memory_space<vmem>>, %arg5: memref<10x1x32xf32, #tpu.memory_space<vmem>>, %arg6: memref<10x1x32xf32, #tpu.memory_space<vmem>>, %arg7: memref<10x32x96xf32, #tpu.memory_space<vmem>>, %arg8: memref<10x1x96xf32, #tpu.memory_space<vmem>>, %arg9: memref<10x32x32xf32, #tpu.memory_space<vmem>>, %arg10: memref<10x1x32xf32, #tpu.memory_space<vmem>>, %arg11: memref<10x1x32xf32, #tpu.memory_space<vmem>>, %arg12: memref<10x1x32xf32, #tpu.memory_space<vmem>>, %arg13: memref<10x32x64xf32, #tpu.memory_space<vmem>>, %arg14: memref<10x1x64xf32, #tpu.memory_space<vmem>>, %arg15: memref<10x64x32xf32, #tpu.memory_space<vmem>>, %arg16: memref<10x1x32xf32, #tpu.memory_space<vmem>>, %arg17: memref<34x32xf32, #tpu.memory_space<vmem>>, %arg18: memref<8x1x17xf32, #tpu.memory_space<vmem>>, %arg19: memref<8x17x17xf32, #tpu.memory_space<vmem>>) attributes {dimension_semantics = [], scalar_prefetch = 0 : i64, scratch_operands = 1 : i64, tpu.core_type = #tpu.core_type<tc>} {
    %c0 = arith.constant 0 : index
    %c0_0 = arith.constant 0 : index
    %0 = vector.load %arg0[%c0, %c0_0] : memref<32x48xf32, #tpu.memory_space<vmem>>, vector<32x48xf32>
    %c0_1 = arith.constant 0 : index
    %c0_2 = arith.constant 0 : index
    %1 = vector.load %arg1[%c0_1, %c0_2] : memref<48x32xf32, #tpu.memory_space<vmem>>, vector<48x32xf32>
    %cst = arith.constant dense<0.000000e+00> : vector<32x32xf32>
    %2 = tpu.matmul %0, %1, %cst {dimension_numbers = #tpu.dot_dimension_numbers<[1], [0], [0], [1], [0, 0, 1, 1], [], []>} : vector<32x48xf32>, vector<48x32xf32>, vector<32x32xf32> -> vector<32x32xf32>
    %c0_3 = arith.constant 0 : index
    %c0_4 = arith.constant 0 : index
    %3 = vector.load %arg2[%c0_3, %c0_4] : memref<1x32xf32, #tpu.memory_space<vmem>>, vector<1x32xf32>
    %4 = vector.broadcast %3 : vector<1x32xf32> to vector<32x32xf32>
    %5 = arith.addf %2, %4 : vector<32x32xf32>
    %c0_5 = arith.constant 0 : index
    %c0_6 = arith.constant 0 : index
    %6 = vector.load %arg3[%c0_5, %c0_6] : memref<1x32xf32, #tpu.memory_space<vmem>>, vector<1x32xf32>
    %c0_7 = arith.constant 0 : index
    %c0_8 = arith.constant 0 : index
    %7 = vector.load %arg4[%c0_7, %c0_8] : memref<17x32xf32, #tpu.memory_space<vmem>>, vector<17x32xf32>
    %8 = vector.extract_strided_slice %7 {offsets = [0, 0], sizes = [1, 32], strides = [1, 1]} : vector<17x32xf32> to vector<1x32xf32>
    %9 = arith.addf %6, %8 : vector<1x32xf32>
    %10 = vector.extract_strided_slice %5 {offsets = [0, 0], sizes = [16, 32], strides = [1, 1]} : vector<32x32xf32> to vector<16x32xf32>
    %11 = vector.extract_strided_slice %7 {offsets = [1, 0], sizes = [16, 32], strides = [1, 1]} : vector<17x32xf32> to vector<16x32xf32>
    %12 = arith.addf %10, %11 : vector<16x32xf32>
    %13 = vector.extract_strided_slice %7 {offsets = [0, 0], sizes = [1, 32], strides = [1, 1]} : vector<17x32xf32> to vector<1x32xf32>
    %14 = arith.addf %6, %13 : vector<1x32xf32>
    %15 = vector.extract_strided_slice %5 {offsets = [16, 0], sizes = [16, 32], strides = [1, 1]} : vector<32x32xf32> to vector<16x32xf32>
    %16 = vector.extract_strided_slice %7 {offsets = [1, 0], sizes = [16, 32], strides = [1, 1]} : vector<17x32xf32> to vector<16x32xf32>
    %17 = arith.addf %15, %16 : vector<16x32xf32>
    %18 = tpu.concatenate %9, %12, %14, %17 in 0 : vector<1x32xf32>, vector<16x32xf32>, vector<1x32xf32>, vector<16x32xf32> -> vector<34x32xf32>
    %c0_9 = arith.constant 0 : index
    %c0_10 = arith.constant 0 : index
    %19 = vector.load %arg17[%c0_9, %c0_10] : memref<34x32xf32, #tpu.memory_space<vmem>>, vector<34x32xf32>
    tpu.vector_store %arg17[%c0_9, %c0_10], %18 {strides = array<i32>} : memref<34x32xf32, #tpu.memory_space<vmem>>, vector<34x32xf32>,
    %20 = tpu.iota {dimensions = array<i32: 0>} : vector<17x17xi32>
    %21 = tpu.iota {dimensions = array<i32: 1>} : vector<17x17xi32>
    %22 = arith.cmpi eq, %20, %21 : vector<17x17xi32>
    %23 = arith.extui %22 : vector<17x17xi1> to vector<17x17xi32>
    %24 = arith.sitofp %23 : vector<17x17xi32> to vector<17x17xf32>
    %25 = vector.shape_cast %24 : vector<17x17xf32> to vector<1x17x17xf32>
    %26 = vector.shape_cast %25 : vector<1x17x17xf32> to vector<1x17x17xf32>
    %27 = vector.broadcast %26 : vector<1x17x17xf32> to vector<8x17x17xf32>
    %c0_11 = arith.constant 0 : index
    %c0_12 = arith.constant 0 : index
    %c0_13 = arith.constant 0 : index
    %28 = vector.load %arg19[%c0_11, %c0_12, %c0_13] : memref<8x17x17xf32, #tpu.memory_space<vmem>>, vector<8x17x17xf32>
    tpu.vector_store %arg19[%c0_11, %c0_12, %c0_13], %27 {strides = array<i32>} : memref<8x17x17xf32, #tpu.memory_space<vmem>>, vector<8x17x17xf32>,
    %c0_i32 = arith.constant 0 : i32
    %c10_i32 = arith.constant 10 : i32
    %29 = arith.addi %c0_i32, %c10_i32 : i32
    %c1_i32 = arith.constant 1 : i32
    scf.for %arg20 = %c0_i32 to %29 step %c1_i32  : i32 {
      %c0_21 = arith.constant 0 : index
      %c0_22 = arith.constant 0 : index
      %32 = vector.load %arg17[%c0_21, %c0_22] : memref<34x32xf32, #tpu.memory_space<vmem>>, vector<34x32xf32>
      %33 = arith.index_cast %arg20 : i32 to index
      %c0_23 = arith.constant 0 : index
      %c0_24 = arith.constant 0 : index
      %34 = vector.load %arg5[%33, %c0_23, %c0_24] : memref<10x1x32xf32, #tpu.memory_space<vmem>>, vector<1x1x32xf32>
      %35 = vector.shape_cast %34 : vector<1x1x32xf32> to vector<1x32xf32>
      %36 = arith.index_cast %arg20 : i32 to index
      %c0_25 = arith.constant 0 : index
      %c0_26 = arith.constant 0 : index
      %37 = vector.load %arg6[%36, %c0_25, %c0_26] : memref<10x1x32xf32, #tpu.memory_space<vmem>>, vector<1x1x32xf32>
      %38 = vector.shape_cast %37 : vector<1x1x32xf32> to vector<1x32xf32>
      %39 = arith.index_cast %arg20 : i32 to index
      %c0_27 = arith.constant 0 : index
      %c0_28 = arith.constant 0 : index
      %40 = vector.load %arg7[%39, %c0_27, %c0_28] : memref<10x32x96xf32, #tpu.memory_space<vmem>>, vector<1x32x96xf32>
      %41 = vector.shape_cast %40 : vector<1x32x96xf32> to vector<32x96xf32>
      %42 = arith.index_cast %arg20 : i32 to index
      %c0_29 = arith.constant 0 : index
      %c0_30 = arith.constant 0 : index
      %43 = vector.load %arg8[%42, %c0_29, %c0_30] : memref<10x1x96xf32, #tpu.memory_space<vmem>>, vector<1x1x96xf32>
      %44 = vector.shape_cast %43 : vector<1x1x96xf32> to vector<1x96xf32>
      %45 = arith.index_cast %arg20 : i32 to index
      %c0_31 = arith.constant 0 : index
      %c0_32 = arith.constant 0 : index
      %46 = vector.load %arg9[%45, %c0_31, %c0_32] : memref<10x32x32xf32, #tpu.memory_space<vmem>>, vector<1x32x32xf32>
      %47 = vector.shape_cast %46 : vector<1x32x32xf32> to vector<32x32xf32>
      %48 = arith.index_cast %arg20 : i32 to index
      %c0_33 = arith.constant 0 : index
      %c0_34 = arith.constant 0 : index
      %49 = vector.load %arg10[%48, %c0_33, %c0_34] : memref<10x1x32xf32, #tpu.memory_space<vmem>>, vector<1x1x32xf32>
      %50 = vector.shape_cast %49 : vector<1x1x32xf32> to vector<1x32xf32>
      %51 = arith.index_cast %arg20 : i32 to index
      %c0_35 = arith.constant 0 : index
      %c0_36 = arith.constant 0 : index
      %52 = vector.load %arg11[%51, %c0_35, %c0_36] : memref<10x1x32xf32, #tpu.memory_space<vmem>>, vector<1x1x32xf32>
      %53 = vector.shape_cast %52 : vector<1x1x32xf32> to vector<1x32xf32>
      %54 = arith.index_cast %arg20 : i32 to index
      %c0_37 = arith.constant 0 : index
      %c0_38 = arith.constant 0 : index
      %55 = vector.load %arg12[%54, %c0_37, %c0_38] : memref<10x1x32xf32, #tpu.memory_space<vmem>>, vector<1x1x32xf32>
      %56 = vector.shape_cast %55 : vector<1x1x32xf32> to vector<1x32xf32>
      %57 = arith.index_cast %arg20 : i32 to index
      %c0_39 = arith.constant 0 : index
      %c0_40 = arith.constant 0 : index
      %58 = vector.load %arg13[%57, %c0_39, %c0_40] : memref<10x32x64xf32, #tpu.memory_space<vmem>>, vector<1x32x64xf32>
      %59 = vector.shape_cast %58 : vector<1x32x64xf32> to vector<32x64xf32>
      %60 = arith.index_cast %arg20 : i32 to index
      %c0_41 = arith.constant 0 : index
      %c0_42 = arith.constant 0 : index
      %61 = vector.load %arg14[%60, %c0_41, %c0_42] : memref<10x1x64xf32, #tpu.memory_space<vmem>>, vector<1x1x64xf32>
      %62 = vector.shape_cast %61 : vector<1x1x64xf32> to vector<1x64xf32>
      %63 = arith.index_cast %arg20 : i32 to index
      %c0_43 = arith.constant 0 : index
      %c0_44 = arith.constant 0 : index
      %64 = vector.load %arg15[%63, %c0_43, %c0_44] : memref<10x64x32xf32, #tpu.memory_space<vmem>>, vector<1x64x32xf32>
      %65 = vector.shape_cast %64 : vector<1x64x32xf32> to vector<64x32xf32>
      %66 = arith.index_cast %arg20 : i32 to index
      %c0_45 = arith.constant 0 : index
      %c0_46 = arith.constant 0 : index
      %67 = vector.load %arg16[%66, %c0_45, %c0_46] : memref<10x1x32xf32, #tpu.memory_space<vmem>>, vector<1x1x32xf32>
      %68 = vector.shape_cast %67 : vector<1x1x32xf32> to vector<1x32xf32>
      %cst_47 = arith.constant dense<0.000000e+00> : vector<34xf32>
      %69 = vector.multi_reduction <add>, %32, %cst_47 [1] : vector<34x32xf32> to vector<34xf32>
      %70 = vector.shape_cast %69 : vector<34xf32> to vector<34x1xf32>
      %cst_48 = arith.constant 3.200000e+01 : f32
      %71 = vector.broadcast %cst_48 : f32 to vector<34x1xf32>
      %72 = arith.divf %70, %71 : vector<34x1xf32>
      %73 = vector.broadcast %72 : vector<34x1xf32> to vector<34x32xf32>
      %74 = arith.subf %32, %73 : vector<34x32xf32>
      %75 = arith.mulf %74, %74 : vector<34x32xf32>
      %cst_49 = arith.constant dense<0.000000e+00> : vector<34xf32>
      %76 = vector.multi_reduction <add>, %75, %cst_49 [1] : vector<34x32xf32> to vector<34xf32>
      %77 = vector.shape_cast %76 : vector<34xf32> to vector<34x1xf32>
      %cst_50 = arith.constant 3.200000e+01 : f32
      %78 = vector.broadcast %cst_50 : f32 to vector<34x1xf32>
      %79 = arith.divf %77, %78 : vector<34x1xf32>
      %80 = vector.broadcast %72 : vector<34x1xf32> to vector<34x32xf32>
      %81 = arith.subf %32, %80 : vector<34x32xf32>
      %cst_51 = arith.constant 9.99999997E-7 : f32
      %82 = vector.broadcast %cst_51 : f32 to vector<34x1xf32>
      %83 = arith.addf %79, %82 : vector<34x1xf32>
      %84 = math.rsqrt %83 : vector<34x1xf32>
      %85 = vector.broadcast %84 : vector<34x1xf32> to vector<34x32xf32>
      %86 = arith.mulf %81, %85 : vector<34x32xf32>
      %87 = vector.broadcast %35 : vector<1x32xf32> to vector<34x32xf32>
      %88 = arith.mulf %86, %87 : vector<34x32xf32>
      %89 = vector.broadcast %38 : vector<1x32xf32> to vector<34x32xf32>
      %90 = arith.addf %88, %89 : vector<34x32xf32>
      %cst_52 = arith.constant dense<0.000000e+00> : vector<34x96xf32>
      %91 = tpu.matmul %90, %41, %cst_52 {dimension_numbers = #tpu.dot_dimension_numbers<[1], [0], [0], [1], [0, 0, 1, 1], [], []>} : vector<34x32xf32>, vector<32x96xf32>, vector<34x96xf32> -> vector<34x96xf32>
      %92 = vector.broadcast %44 : vector<1x96xf32> to vector<34x96xf32>
      %93 = arith.addf %91, %92 : vector<34x96xf32>
      %94 = vector.extract_strided_slice %93 {offsets = [0, 0], sizes = [34, 32], strides = [1, 1]} : vector<34x96xf32> to vector<34x32xf32>
      %95 = vector.extract_strided_slice %94 {offsets = [0, 0], sizes = [17, 32], strides = [1, 1]} : vector<34x32xf32> to vector<17x32xf32>
      %96 = vector.extract_strided_slice %94 {offsets = [17, 0], sizes = [17, 32], strides = [1, 1]} : vector<34x32xf32> to vector<17x32xf32>
      %97 = vector.shape_cast %95 : vector<17x32xf32> to vector<1x17x32xf32>
      %98 = vector.shape_cast %96 : vector<17x32xf32> to vector<1x17x32xf32>
      %99 = tpu.concatenate %97, %98 in 0 : vector<1x17x32xf32>, vector<1x17x32xf32> -> vector<2x17x32xf32>
      %100 = vector.extract_strided_slice %93 {offsets = [0, 32], sizes = [34, 32], strides = [1, 1]} : vector<34x96xf32> to vector<34x32xf32>
      %101 = vector.extract_strided_slice %100 {offsets = [0, 0], sizes = [17, 32], strides = [1, 1]} : vector<34x32xf32> to vector<17x32xf32>
      %102 = vector.extract_strided_slice %100 {offsets = [17, 0], sizes = [17, 32], strides = [1, 1]} : vector<34x32xf32> to vector<17x32xf32>
      %103 = vector.shape_cast %101 : vector<17x32xf32> to vector<1x17x32xf32>
      %104 = vector.shape_cast %102 : vector<17x32xf32> to vector<1x17x32xf32>
      %105 = tpu.concatenate %103, %104 in 0 : vector<1x17x32xf32>, vector<1x17x32xf32> -> vector<2x17x32xf32>
      %106 = vector.extract_strided_slice %93 {offsets = [0, 64], sizes = [34, 32], strides = [1, 1]} : vector<34x96xf32> to vector<34x32xf32>
      %107 = vector.extract_strided_slice %106 {offsets = [0, 0], sizes = [17, 32], strides = [1, 1]} : vector<34x32xf32> to vector<17x32xf32>
      %108 = vector.extract_strided_slice %106 {offsets = [17, 0], sizes = [17, 32], strides = [1, 1]} : vector<34x32xf32> to vector<17x32xf32>
      %109 = vector.shape_cast %107 : vector<17x32xf32> to vector<1x17x32xf32>
      %110 = vector.shape_cast %108 : vector<17x32xf32> to vector<1x17x32xf32>
      %111 = tpu.concatenate %109, %110 in 0 : vector<1x17x32xf32>, vector<1x17x32xf32> -> vector<2x17x32xf32>
      %112 = vector.extract_strided_slice %99 {offsets = [0, 0, 0], sizes = [2, 17, 8], strides = [1, 1, 1]} : vector<2x17x32xf32> to vector<2x17x8xf32>
      %113 = vector.extract_strided_slice %105 {offsets = [0, 0, 0], sizes = [2, 17, 8], strides = [1, 1, 1]} : vector<2x17x32xf32> to vector<2x17x8xf32>
      %114 = vector.extract_strided_slice %111 {offsets = [0, 0, 0], sizes = [2, 17, 8], strides = [1, 1, 1]} : vector<2x17x32xf32> to vector<2x17x8xf32>
      "tpu.trace_start"() <{level = 10 : i32, message = "bqd,bkd->bqk"}> : () -> ()
      %cst_53 = arith.constant dense<0.000000e+00> : vector<2x17x17xf32>
      %115 = tpu.matmul %112, %113, %cst_53 {dimension_numbers = #tpu.dot_dimension_numbers<[2], [2], [1], [1], [0, 0, 0, 1, 1, 1], [0], [0]>} : vector<2x17x8xf32>, vector<2x17x8xf32>, vector<2x17x17xf32> -> vector<2x17x17xf32>
      "tpu.trace_stop"() : () -> ()
      %cst_54 = arith.constant 0.353553385 : f32
      %116 = vector.broadcast %cst_54 : f32 to vector<2x17x17xf32>
      %117 = arith.mulf %115, %116 : vector<2x17x17xf32>
      %cst_55 = arith.constant dense<0xFF800000> : vector<2x17xf32>
      %118 = vector.multi_reduction <maximumf>, %117, %cst_55 [2] : vector<2x17x17xf32> to vector<2x17xf32>
      %119 = vector.shape_cast %118 : vector<2x17xf32> to vector<2x17x1xf32>
      %120 = vector.broadcast %119 : vector<2x17x1xf32> to vector<2x17x17xf32>
      %121 = arith.subf %117, %120 : vector<2x17x17xf32>
      %122 = math.exp %121 : vector<2x17x17xf32>
      %cst_56 = arith.constant dense<0.000000e+00> : vector<2x17xf32>
      %123 = vector.multi_reduction <add>, %122, %cst_56 [2] : vector<2x17x17xf32> to vector<2x17xf32>
      %124 = vector.shape_cast %123 : vector<2x17xf32> to vector<2x17x1xf32>
      %125 = vector.broadcast %124 : vector<2x17x1xf32> to vector<2x17x17xf32>
      %126 = arith.divf %122, %125 : vector<2x17x17xf32>
      "tpu.trace_start"() <{level = 10 : i32, message = "bqk,bkd->bqd"}> : () -> ()
      %cst_57 = arith.constant dense<0.000000e+00> : vector<2x17x8xf32>
      %127 = tpu.matmul %126, %114, %cst_57 {dimension_numbers = #tpu.dot_dimension_numbers<[2], [1], [1], [2], [0, 0, 0, 1, 1, 2], [0], [0]>} : vector<2x17x17xf32>, vector<2x17x8xf32>, vector<2x17x8xf32> -> vector<2x17x8xf32>
      "tpu.trace_stop"() : () -> ()
      %128 = vector.extract_strided_slice %99 {offsets = [0, 0, 8], sizes = [2, 17, 8], strides = [1, 1, 1]} : vector<2x17x32xf32> to vector<2x17x8xf32>
      %129 = vector.extract_strided_slice %105 {offsets = [0, 0, 8], sizes = [2, 17, 8], strides = [1, 1, 1]} : vector<2x17x32xf32> to vector<2x17x8xf32>
      %130 = vector.extract_strided_slice %111 {offsets = [0, 0, 8], sizes = [2, 17, 8], strides = [1, 1, 1]} : vector<2x17x32xf32> to vector<2x17x8xf32>
      "tpu.trace_start"() <{level = 10 : i32, message = "bqd,bkd->bqk"}> : () -> ()
      %cst_58 = arith.constant dense<0.000000e+00> : vector<2x17x17xf32>
      %131 = tpu.matmul %128, %129, %cst_58 {dimension_numbers = #tpu.dot_dimension_numbers<[2], [2], [1], [1], [0, 0, 0, 1, 1, 1], [0], [0]>} : vector<2x17x8xf32>, vector<2x17x8xf32>, vector<2x17x17xf32> -> vector<2x17x17xf32>
      "tpu.trace_stop"() : () -> ()
      %cst_59 = arith.constant 0.353553385 : f32
      %132 = vector.broadcast %cst_59 : f32 to vector<2x17x17xf32>
      %133 = arith.mulf %131, %132 : vector<2x17x17xf32>
      %cst_60 = arith.constant dense<0xFF800000> : vector<2x17xf32>
      %134 = vector.multi_reduction <maximumf>, %133, %cst_60 [2] : vector<2x17x17xf32> to vector<2x17xf32>
      %135 = vector.shape_cast %134 : vector<2x17xf32> to vector<2x17x1xf32>
      %136 = vector.broadcast %135 : vector<2x17x1xf32> to vector<2x17x17xf32>
      %137 = arith.subf %133, %136 : vector<2x17x17xf32>
      %138 = math.exp %137 : vector<2x17x17xf32>
      %cst_61 = arith.constant dense<0.000000e+00> : vector<2x17xf32>
      %139 = vector.multi_reduction <add>, %138, %cst_61 [2] : vector<2x17x17xf32> to vector<2x17xf32>
      %140 = vector.shape_cast %139 : vector<2x17xf32> to vector<2x17x1xf32>
      %141 = vector.broadcast %140 : vector<2x17x1xf32> to vector<2x17x17xf32>
      %142 = arith.divf %138, %141 : vector<2x17x17xf32>
      "tpu.trace_start"() <{level = 10 : i32, message = "bqk,bkd->bqd"}> : () -> ()
      %cst_62 = arith.constant dense<0.000000e+00> : vector<2x17x8xf32>
      %143 = tpu.matmul %142, %130, %cst_62 {dimension_numbers = #tpu.dot_dimension_numbers<[2], [1], [1], [2], [0, 0, 0, 1, 1, 2], [0], [0]>} : vector<2x17x17xf32>, vector<2x17x8xf32>, vector<2x17x8xf32> -> vector<2x17x8xf32>
      "tpu.trace_stop"() : () -> ()
      %144 = vector.extract_strided_slice %99 {offsets = [0, 0, 16], sizes = [2, 17, 8], strides = [1, 1, 1]} : vector<2x17x32xf32> to vector<2x17x8xf32>
      %145 = vector.extract_strided_slice %105 {offsets = [0, 0, 16], sizes = [2, 17, 8], strides = [1, 1, 1]} : vector<2x17x32xf32> to vector<2x17x8xf32>
      %146 = vector.extract_strided_slice %111 {offsets = [0, 0, 16], sizes = [2, 17, 8], strides = [1, 1, 1]} : vector<2x17x32xf32> to vector<2x17x8xf32>
      "tpu.trace_start"() <{level = 10 : i32, message = "bqd,bkd->bqk"}> : () -> ()
      %cst_63 = arith.constant dense<0.000000e+00> : vector<2x17x17xf32>
      %147 = tpu.matmul %144, %145, %cst_63 {dimension_numbers = #tpu.dot_dimension_numbers<[2], [2], [1], [1], [0, 0, 0, 1, 1, 1], [0], [0]>} : vector<2x17x8xf32>, vector<2x17x8xf32>, vector<2x17x17xf32> -> vector<2x17x17xf32>
      "tpu.trace_stop"() : () -> ()
      %cst_64 = arith.constant 0.353553385 : f32
      %148 = vector.broadcast %cst_64 : f32 to vector<2x17x17xf32>
      %149 = arith.mulf %147, %148 : vector<2x17x17xf32>
      %cst_65 = arith.constant dense<0xFF800000> : vector<2x17xf32>
      %150 = vector.multi_reduction <maximumf>, %149, %cst_65 [2] : vector<2x17x17xf32> to vector<2x17xf32>
      %151 = vector.shape_cast %150 : vector<2x17xf32> to vector<2x17x1xf32>
      %152 = vector.broadcast %151 : vector<2x17x1xf32> to vector<2x17x17xf32>
      %153 = arith.subf %149, %152 : vector<2x17x17xf32>
      %154 = math.exp %153 : vector<2x17x17xf32>
      %cst_66 = arith.constant dense<0.000000e+00> : vector<2x17xf32>
      %155 = vector.multi_reduction <add>, %154, %cst_66 [2] : vector<2x17x17xf32> to vector<2x17xf32>
      %156 = vector.shape_cast %155 : vector<2x17xf32> to vector<2x17x1xf32>
      %157 = vector.broadcast %156 : vector<2x17x1xf32> to vector<2x17x17xf32>
      %158 = arith.divf %154, %157 : vector<2x17x17xf32>
      "tpu.trace_start"() <{level = 10 : i32, message = "bqk,bkd->bqd"}> : () -> ()
      %cst_67 = arith.constant dense<0.000000e+00> : vector<2x17x8xf32>
      %159 = tpu.matmul %158, %146, %cst_67 {dimension_numbers = #tpu.dot_dimension_numbers<[2], [1], [1], [2], [0, 0, 0, 1, 1, 2], [0], [0]>} : vector<2x17x17xf32>, vector<2x17x8xf32>, vector<2x17x8xf32> -> vector<2x17x8xf32>
      "tpu.trace_stop"() : () -> ()
      %160 = vector.extract_strided_slice %99 {offsets = [0, 0, 24], sizes = [2, 17, 8], strides = [1, 1, 1]} : vector<2x17x32xf32> to vector<2x17x8xf32>
      %161 = vector.extract_strided_slice %105 {offsets = [0, 0, 24], sizes = [2, 17, 8], strides = [1, 1, 1]} : vector<2x17x32xf32> to vector<2x17x8xf32>
      %162 = vector.extract_strided_slice %111 {offsets = [0, 0, 24], sizes = [2, 17, 8], strides = [1, 1, 1]} : vector<2x17x32xf32> to vector<2x17x8xf32>
      "tpu.trace_start"() <{level = 10 : i32, message = "bqd,bkd->bqk"}> : () -> ()
      %cst_68 = arith.constant dense<0.000000e+00> : vector<2x17x17xf32>
      %163 = tpu.matmul %160, %161, %cst_68 {dimension_numbers = #tpu.dot_dimension_numbers<[2], [2], [1], [1], [0, 0, 0, 1, 1, 1], [0], [0]>} : vector<2x17x8xf32>, vector<2x17x8xf32>, vector<2x17x17xf32> -> vector<2x17x17xf32>
      "tpu.trace_stop"() : () -> ()
      %cst_69 = arith.constant 0.353553385 : f32
      %164 = vector.broadcast %cst_69 : f32 to vector<2x17x17xf32>
      %165 = arith.mulf %163, %164 : vector<2x17x17xf32>
      %cst_70 = arith.constant dense<0xFF800000> : vector<2x17xf32>
      %166 = vector.multi_reduction <maximumf>, %165, %cst_70 [2] : vector<2x17x17xf32> to vector<2x17xf32>
      %167 = vector.shape_cast %166 : vector<2x17xf32> to vector<2x17x1xf32>
      %168 = vector.broadcast %167 : vector<2x17x1xf32> to vector<2x17x17xf32>
      %169 = arith.subf %165, %168 : vector<2x17x17xf32>
      %170 = math.exp %169 : vector<2x17x17xf32>
      %cst_71 = arith.constant dense<0.000000e+00> : vector<2x17xf32>
      %171 = vector.multi_reduction <add>, %170, %cst_71 [2] : vector<2x17x17xf32> to vector<2x17xf32>
      %172 = vector.shape_cast %171 : vector<2x17xf32> to vector<2x17x1xf32>
      %173 = vector.broadcast %172 : vector<2x17x1xf32> to vector<2x17x17xf32>
      %174 = arith.divf %170, %173 : vector<2x17x17xf32>
      "tpu.trace_start"() <{level = 10 : i32, message = "bqk,bkd->bqd"}> : () -> ()
      %cst_72 = arith.constant dense<0.000000e+00> : vector<2x17x8xf32>
      %175 = tpu.matmul %174, %162, %cst_72 {dimension_numbers = #tpu.dot_dimension_numbers<[2], [1], [1], [2], [0, 0, 0, 1, 1, 2], [0], [0]>} : vector<2x17x17xf32>, vector<2x17x8xf32>, vector<2x17x8xf32> -> vector<2x17x8xf32>
      "tpu.trace_stop"() : () -> ()
      %176 = tpu.concatenate %127, %143, %159, %175 in 2 : vector<2x17x8xf32>, vector<2x17x8xf32>, vector<2x17x8xf32>, vector<2x17x8xf32> -> vector<2x17x32xf32>
      %177 = vector.extract_strided_slice %176 {offsets = [0, 0, 0], sizes = [1, 17, 32], strides = [1, 1, 1]} : vector<2x17x32xf32> to vector<1x17x32xf32>
      %178 = vector.shape_cast %177 : vector<1x17x32xf32> to vector<17x32xf32>
      %179 = vector.extract_strided_slice %176 {offsets = [1, 0, 0], sizes = [1, 17, 32], strides = [1, 1, 1]} : vector<2x17x32xf32> to vector<1x17x32xf32>
      %180 = vector.shape_cast %179 : vector<1x17x32xf32> to vector<17x32xf32>
      %181 = tpu.concatenate %178, %180 in 0 : vector<17x32xf32>, vector<17x32xf32> -> vector<34x32xf32>
      %cst_73 = arith.constant dense<0.000000e+00> : vector<34x32xf32>
      %182 = tpu.matmul %181, %47, %cst_73 {dimension_numbers = #tpu.dot_dimension_numbers<[1], [0], [0], [1], [0, 0, 1, 1], [], []>} : vector<34x32xf32>, vector<32x32xf32>, vector<34x32xf32> -> vector<34x32xf32>
      %183 = vector.broadcast %50 : vector<1x32xf32> to vector<34x32xf32>
      %184 = arith.addf %182, %183 : vector<34x32xf32>
      %185 = arith.addf %184, %32 : vector<34x32xf32>
      %cst_74 = arith.constant dense<0.000000e+00> : vector<34xf32>
      %186 = vector.multi_reduction <add>, %185, %cst_74 [1] : vector<34x32xf32> to vector<34xf32>
      %187 = vector.shape_cast %186 : vector<34xf32> to vector<34x1xf32>
      %cst_75 = arith.constant 3.200000e+01 : f32
      %188 = vector.broadcast %cst_75 : f32 to vector<34x1xf32>
      %189 = arith.divf %187, %188 : vector<34x1xf32>
      %190 = vector.broadcast %189 : vector<34x1xf32> to vector<34x32xf32>
      %191 = arith.subf %185, %190 : vector<34x32xf32>
      %192 = arith.mulf %191, %191 : vector<34x32xf32>
      %cst_76 = arith.constant dense<0.000000e+00> : vector<34xf32>
      %193 = vector.multi_reduction <add>, %192, %cst_76 [1] : vector<34x32xf32> to vector<34xf32>
      %194 = vector.shape_cast %193 : vector<34xf32> to vector<34x1xf32>
      %cst_77 = arith.constant 3.200000e+01 : f32
      %195 = vector.broadcast %cst_77 : f32 to vector<34x1xf32>
      %196 = arith.divf %194, %195 : vector<34x1xf32>
      %197 = vector.broadcast %189 : vector<34x1xf32> to vector<34x32xf32>
      %198 = arith.subf %185, %197 : vector<34x32xf32>
      %cst_78 = arith.constant 9.99999997E-7 : f32
      %199 = vector.broadcast %cst_78 : f32 to vector<34x1xf32>
      %200 = arith.addf %196, %199 : vector<34x1xf32>
      %201 = math.rsqrt %200 : vector<34x1xf32>
      %202 = vector.broadcast %201 : vector<34x1xf32> to vector<34x32xf32>
      %203 = arith.mulf %198, %202 : vector<34x32xf32>
      %204 = vector.broadcast %53 : vector<1x32xf32> to vector<34x32xf32>
      %205 = arith.mulf %203, %204 : vector<34x32xf32>
      %206 = vector.broadcast %56 : vector<1x32xf32> to vector<34x32xf32>
      %207 = arith.addf %205, %206 : vector<34x32xf32>
      %cst_79 = arith.constant dense<0.000000e+00> : vector<34x64xf32>
      %208 = tpu.matmul %207, %59, %cst_79 {dimension_numbers = #tpu.dot_dimension_numbers<[1], [0], [0], [1], [0, 0, 1, 1], [], []>} : vector<34x32xf32>, vector<32x64xf32>, vector<34x64xf32> -> vector<34x64xf32>
      %209 = vector.broadcast %62 : vector<1x64xf32> to vector<34x64xf32>
      %210 = arith.addf %208, %209 : vector<34x64xf32>
      %cst_80 = arith.constant 5.000000e-01 : f32
      %211 = vector.broadcast %cst_80 : f32 to vector<34x64xf32>
      %212 = arith.mulf %211, %210 : vector<34x64xf32>
      %cst_81 = arith.constant 0.707106769 : f32
      %213 = vector.broadcast %cst_81 : f32 to vector<34x64xf32>
      %214 = arith.mulf %210, %213 : vector<34x64xf32>
      %215 = math.absf %214 : vector<34x64xf32>
      %cst_82 = arith.constant 0.327591091 : f32
      %216 = vector.broadcast %cst_82 : f32 to vector<34x64xf32>
      %217 = arith.mulf %216, %215 : vector<34x64xf32>
      %cst_83 = arith.constant 1.000000e+00 : f32
      %218 = vector.broadcast %cst_83 : f32 to vector<34x64xf32>
      %219 = arith.addf %218, %217 : vector<34x64xf32>
      %cst_84 = arith.constant 1.000000e+00 : f32
      %220 = vector.broadcast %cst_84 : f32 to vector<34x64xf32>
      %221 = arith.divf %220, %219 : vector<34x64xf32>
      %cst_85 = arith.constant 1.06140542 : f32
      %222 = vector.broadcast %cst_85 : f32 to vector<34x64xf32>
      %223 = arith.mulf %222, %221 : vector<34x64xf32>
      %cst_86 = arith.constant -1.45315206 : f32
      %224 = vector.broadcast %cst_86 : f32 to vector<34x64xf32>
      %225 = arith.addf %223, %224 : vector<34x64xf32>
      %226 = arith.mulf %225, %221 : vector<34x64xf32>
      %cst_87 = arith.constant 1.42141378 : f32
      %227 = vector.broadcast %cst_87 : f32 to vector<34x64xf32>
      %228 = arith.addf %226, %227 : vector<34x64xf32>
      %229 = arith.mulf %228, %221 : vector<34x64xf32>
      %cst_88 = arith.constant -0.284496725 : f32
      %230 = vector.broadcast %cst_88 : f32 to vector<34x64xf32>
      %231 = arith.addf %229, %230 : vector<34x64xf32>
      %232 = arith.mulf %231, %221 : vector<34x64xf32>
      %cst_89 = arith.constant 0.254829586 : f32
      %233 = vector.broadcast %cst_89 : f32 to vector<34x64xf32>
      %234 = arith.addf %232, %233 : vector<34x64xf32>
      %235 = arith.mulf %234, %221 : vector<34x64xf32>
      %cst_90 = arith.constant 0.000000e+00 : f32
      %236 = vector.broadcast %cst_90 : f32 to vector<34x64xf32>
      %237 = arith.subf %236, %215 : vector<34x64xf32>
      %238 = arith.mulf %237, %215 : vector<34x64xf32>
      %239 = math.exp %238 : vector<34x64xf32>
      %240 = arith.mulf %235, %239 : vector<34x64xf32>
      %cst_91 = arith.constant 1.000000e+00 : f32
      %241 = vector.broadcast %cst_91 : f32 to vector<34x64xf32>
      %242 = arith.subf %241, %240 : vector<34x64xf32>
      %cst_92 = arith.constant 0.000000e+00 : f32
      %243 = vector.broadcast %cst_92 : f32 to vector<34x64xf32>
      %244 = arith.cmpf oge, %214, %243 : vector<34x64xf32>
      %cst_93 = arith.constant 0.000000e+00 : f32
      %245 = vector.broadcast %cst_93 : f32 to vector<34x64xf32>
      %246 = arith.subf %245, %242 : vector<34x64xf32>
      %247 = arith.select %244, %242, %246 : vector<34x64xi1>, vector<34x64xf32>
      %cst_94 = arith.constant 1.000000e+00 : f32
      %248 = vector.broadcast %cst_94 : f32 to vector<34x64xf32>
      %249 = arith.addf %248, %247 : vector<34x64xf32>
      %250 = arith.mulf %212, %249 : vector<34x64xf32>
      %cst_95 = arith.constant dense<0.000000e+00> : vector<34x32xf32>
      %251 = tpu.matmul %250, %65, %cst_95 {dimension_numbers = #tpu.dot_dimension_numbers<[1], [0], [0], [1], [0, 0, 1, 1], [], []>} : vector<34x64xf32>, vector<64x32xf32>, vector<34x32xf32> -> vector<34x32xf32>
      %252 = vector.broadcast %68 : vector<1x32xf32> to vector<34x32xf32>
      %253 = arith.addf %251, %252 : vector<34x32xf32>
      %254 = arith.addf %253, %185 : vector<34x32xf32>
      %255 = vector.shape_cast %126 : vector<2x17x17xf32> to vector<2x1x17x17xf32>
      %256 = vector.shape_cast %142 : vector<2x17x17xf32> to vector<2x1x17x17xf32>
      %257 = vector.shape_cast %158 : vector<2x17x17xf32> to vector<2x1x17x17xf32>
      %258 = vector.shape_cast %174 : vector<2x17x17xf32> to vector<2x1x17x17xf32>
      %259 = tpu.concatenate %255, %256, %257, %258 in 1 : vector<2x1x17x17xf32>, vector<2x1x17x17xf32>, vector<2x1x17x17xf32>, vector<2x1x17x17xf32> -> vector<2x4x17x17xf32>
      %260 = vector.shape_cast %259 : vector<2x4x17x17xf32> to vector<8x17x17xf32>
      %c0_96 = arith.constant 0 : index
      %c0_97 = arith.constant 0 : index
      %261 = vector.load %arg17[%c0_96, %c0_97] : memref<34x32xf32, #tpu.memory_space<vmem>>, vector<34x32xf32>
      tpu.vector_store %arg17[%c0_96, %c0_97], %254 {strides = array<i32>} : memref<34x32xf32, #tpu.memory_space<vmem>>, vector<34x32xf32>,
      %c0_98 = arith.constant 0 : index
      %c0_99 = arith.constant 0 : index
      %c0_100 = arith.constant 0 : index
      %262 = vector.load %arg19[%c0_98, %c0_99, %c0_100] : memref<8x17x17xf32, #tpu.memory_space<vmem>>, vector<8x17x17xf32>
      "tpu.trace_start"() <{level = 10 : i32, message = "nij,njk->nik"}> : () -> ()
      %cst_101 = arith.constant dense<0.000000e+00> : vector<8x17x17xf32>
      %263 = tpu.matmul %260, %262, %cst_101 {dimension_numbers = #tpu.dot_dimension_numbers<[2], [1], [1], [2], [0, 0, 0, 1, 1, 2], [0], [0]>} : vector<8x17x17xf32>, vector<8x17x17xf32>, vector<8x17x17xf32> -> vector<8x17x17xf32>
      "tpu.trace_stop"() : () -> ()
      %c0_102 = arith.constant 0 : index
      %c0_103 = arith.constant 0 : index
      %c0_104 = arith.constant 0 : index
      %264 = vector.load %arg19[%c0_102, %c0_103, %c0_104] : memref<8x17x17xf32, #tpu.memory_space<vmem>>, vector<8x17x17xf32>
      tpu.vector_store %arg19[%c0_102, %c0_103, %c0_104], %263 {strides = array<i32>} : memref<8x17x17xf32, #tpu.memory_space<vmem>>, vector<8x17x17xf32>,
    }
    %c10_i32_14 = arith.constant 10 : i32
    %c0_15 = arith.constant 0 : index
    %c0_16 = arith.constant 0 : index
    %c0_17 = arith.constant 0 : index
    %30 = vector.load %arg19[%c0_15, %c0_16, %c0_17] : memref<8x17x17xf32, #tpu.memory_space<vmem>>, vector<8x1x17xf32>
    %c0_18 = arith.constant 0 : index
    %c0_19 = arith.constant 0 : index
    %c0_20 = arith.constant 0 : index
    %31 = vector.load %arg18[%c0_18, %c0_19, %c0_20] : memref<8x1x17xf32, #tpu.memory_space<vmem>>, vector<8x1x17xf32>
    tpu.vector_store %arg18[%c0_18, %c0_19, %c0_20], %30 {strides = array<i32>} : memref<8x1x17xf32, #tpu.memory_space<vmem>>, vector<8x1x17xf32>,
    return
  }
}

module attributes {stable_mosaic.version = 11 : i64} {
  func.func @_block_kernel(%arg0: memref<34x32xf32, #tpu.memory_space<vmem>>, %arg1: memref<1x32xf32, #tpu.memory_space<vmem>>, %arg2: memref<1x32xf32, #tpu.memory_space<vmem>>, %arg3: memref<32x96xf32, #tpu.memory_space<vmem>>, %arg4: memref<1x96xf32, #tpu.memory_space<vmem>>, %arg5: memref<32x32xf32, #tpu.memory_space<vmem>>, %arg6: memref<1x32xf32, #tpu.memory_space<vmem>>, %arg7: memref<1x32xf32, #tpu.memory_space<vmem>>, %arg8: memref<1x32xf32, #tpu.memory_space<vmem>>, %arg9: memref<32x64xf32, #tpu.memory_space<vmem>>, %arg10: memref<1x64xf32, #tpu.memory_space<vmem>>, %arg11: memref<64x32xf32, #tpu.memory_space<vmem>>, %arg12: memref<1x32xf32, #tpu.memory_space<vmem>>, %arg13: memref<34x32xf32, #tpu.memory_space<vmem>>, %arg14: memref<8x1x17xf32, #tpu.memory_space<vmem>>) attributes {dimension_semantics = [], scalar_prefetch = 0 : i64, scratch_operands = 0 : i64, tpu.core_type = #tpu.core_type<tc>} {
    %c0 = arith.constant 0 : index
    %c0_0 = arith.constant 0 : index
    %0 = vector.load %arg1[%c0, %c0_0] : memref<1x32xf32, #tpu.memory_space<vmem>>, vector<1x32xf32>
    %c0_1 = arith.constant 0 : index
    %c0_2 = arith.constant 0 : index
    %1 = vector.load %arg2[%c0_1, %c0_2] : memref<1x32xf32, #tpu.memory_space<vmem>>, vector<1x32xf32>
    %c0_3 = arith.constant 0 : index
    %c0_4 = arith.constant 0 : index
    %2 = vector.load %arg3[%c0_3, %c0_4] : memref<32x96xf32, #tpu.memory_space<vmem>>, vector<32x96xf32>
    %c0_5 = arith.constant 0 : index
    %c0_6 = arith.constant 0 : index
    %3 = vector.load %arg4[%c0_5, %c0_6] : memref<1x96xf32, #tpu.memory_space<vmem>>, vector<1x96xf32>
    %c0_7 = arith.constant 0 : index
    %c0_8 = arith.constant 0 : index
    %4 = vector.load %arg5[%c0_7, %c0_8] : memref<32x32xf32, #tpu.memory_space<vmem>>, vector<32x32xf32>
    %c0_9 = arith.constant 0 : index
    %c0_10 = arith.constant 0 : index
    %5 = vector.load %arg6[%c0_9, %c0_10] : memref<1x32xf32, #tpu.memory_space<vmem>>, vector<1x32xf32>
    %c0_11 = arith.constant 0 : index
    %c0_12 = arith.constant 0 : index
    %6 = vector.load %arg7[%c0_11, %c0_12] : memref<1x32xf32, #tpu.memory_space<vmem>>, vector<1x32xf32>
    %c0_13 = arith.constant 0 : index
    %c0_14 = arith.constant 0 : index
    %7 = vector.load %arg8[%c0_13, %c0_14] : memref<1x32xf32, #tpu.memory_space<vmem>>, vector<1x32xf32>
    %c0_15 = arith.constant 0 : index
    %c0_16 = arith.constant 0 : index
    %8 = vector.load %arg9[%c0_15, %c0_16] : memref<32x64xf32, #tpu.memory_space<vmem>>, vector<32x64xf32>
    %c0_17 = arith.constant 0 : index
    %c0_18 = arith.constant 0 : index
    %9 = vector.load %arg10[%c0_17, %c0_18] : memref<1x64xf32, #tpu.memory_space<vmem>>, vector<1x64xf32>
    %c0_19 = arith.constant 0 : index
    %c0_20 = arith.constant 0 : index
    %10 = vector.load %arg11[%c0_19, %c0_20] : memref<64x32xf32, #tpu.memory_space<vmem>>, vector<64x32xf32>
    %c0_21 = arith.constant 0 : index
    %c0_22 = arith.constant 0 : index
    %11 = vector.load %arg12[%c0_21, %c0_22] : memref<1x32xf32, #tpu.memory_space<vmem>>, vector<1x32xf32>
    %c0_23 = arith.constant 0 : index
    %c0_24 = arith.constant 0 : index
    %12 = vector.load %arg0[%c0_23, %c0_24] : memref<34x32xf32, #tpu.memory_space<vmem>>, vector<34x32xf32>
    %cst = arith.constant dense<0.000000e+00> : vector<34xf32>
    %13 = vector.multi_reduction <add>, %12, %cst [1] : vector<34x32xf32> to vector<34xf32>
    %14 = vector.shape_cast %13 : vector<34xf32> to vector<34x1xf32>
    %cst_25 = arith.constant 3.200000e+01 : f32
    %15 = vector.broadcast %cst_25 : f32 to vector<34x1xf32>
    %16 = arith.divf %14, %15 : vector<34x1xf32>
    %17 = vector.broadcast %16 : vector<34x1xf32> to vector<34x32xf32>
    %18 = arith.subf %12, %17 : vector<34x32xf32>
    %19 = arith.mulf %18, %18 : vector<34x32xf32>
    %cst_26 = arith.constant dense<0.000000e+00> : vector<34xf32>
    %20 = vector.multi_reduction <add>, %19, %cst_26 [1] : vector<34x32xf32> to vector<34xf32>
    %21 = vector.shape_cast %20 : vector<34xf32> to vector<34x1xf32>
    %cst_27 = arith.constant 3.200000e+01 : f32
    %22 = vector.broadcast %cst_27 : f32 to vector<34x1xf32>
    %23 = arith.divf %21, %22 : vector<34x1xf32>
    %24 = vector.broadcast %16 : vector<34x1xf32> to vector<34x32xf32>
    %25 = arith.subf %12, %24 : vector<34x32xf32>
    %cst_28 = arith.constant 9.99999997E-7 : f32
    %26 = vector.broadcast %cst_28 : f32 to vector<34x1xf32>
    %27 = arith.addf %23, %26 : vector<34x1xf32>
    %28 = math.rsqrt %27 : vector<34x1xf32>
    %29 = vector.broadcast %28 : vector<34x1xf32> to vector<34x32xf32>
    %30 = arith.mulf %25, %29 : vector<34x32xf32>
    %31 = vector.broadcast %0 : vector<1x32xf32> to vector<34x32xf32>
    %32 = arith.mulf %30, %31 : vector<34x32xf32>
    %33 = vector.broadcast %1 : vector<1x32xf32> to vector<34x32xf32>
    %34 = arith.addf %32, %33 : vector<34x32xf32>
    %cst_29 = arith.constant dense<0.000000e+00> : vector<34x96xf32>
    %35 = tpu.matmul %34, %2, %cst_29 {dimension_numbers = #tpu.dot_dimension_numbers<[1], [0], [0], [1], [0, 0, 1, 1], [], []>} : vector<34x32xf32>, vector<32x96xf32>, vector<34x96xf32> -> vector<34x96xf32>
    %36 = vector.broadcast %3 : vector<1x96xf32> to vector<34x96xf32>
    %37 = arith.addf %35, %36 : vector<34x96xf32>
    %38 = vector.extract_strided_slice %37 {offsets = [0, 0], sizes = [34, 32], strides = [1, 1]} : vector<34x96xf32> to vector<34x32xf32>
    %39 = vector.extract_strided_slice %38 {offsets = [0, 0], sizes = [17, 32], strides = [1, 1]} : vector<34x32xf32> to vector<17x32xf32>
    %40 = vector.extract_strided_slice %38 {offsets = [17, 0], sizes = [17, 32], strides = [1, 1]} : vector<34x32xf32> to vector<17x32xf32>
    %41 = vector.shape_cast %39 : vector<17x32xf32> to vector<1x17x32xf32>
    %42 = vector.shape_cast %40 : vector<17x32xf32> to vector<1x17x32xf32>
    %43 = tpu.concatenate %41, %42 in 0 : vector<1x17x32xf32>, vector<1x17x32xf32> -> vector<2x17x32xf32>
    %44 = vector.extract_strided_slice %37 {offsets = [0, 32], sizes = [34, 32], strides = [1, 1]} : vector<34x96xf32> to vector<34x32xf32>
    %45 = vector.extract_strided_slice %44 {offsets = [0, 0], sizes = [17, 32], strides = [1, 1]} : vector<34x32xf32> to vector<17x32xf32>
    %46 = vector.extract_strided_slice %44 {offsets = [17, 0], sizes = [17, 32], strides = [1, 1]} : vector<34x32xf32> to vector<17x32xf32>
    %47 = vector.shape_cast %45 : vector<17x32xf32> to vector<1x17x32xf32>
    %48 = vector.shape_cast %46 : vector<17x32xf32> to vector<1x17x32xf32>
    %49 = tpu.concatenate %47, %48 in 0 : vector<1x17x32xf32>, vector<1x17x32xf32> -> vector<2x17x32xf32>
    %50 = vector.extract_strided_slice %37 {offsets = [0, 64], sizes = [34, 32], strides = [1, 1]} : vector<34x96xf32> to vector<34x32xf32>
    %51 = vector.extract_strided_slice %50 {offsets = [0, 0], sizes = [17, 32], strides = [1, 1]} : vector<34x32xf32> to vector<17x32xf32>
    %52 = vector.extract_strided_slice %50 {offsets = [17, 0], sizes = [17, 32], strides = [1, 1]} : vector<34x32xf32> to vector<17x32xf32>
    %53 = vector.shape_cast %51 : vector<17x32xf32> to vector<1x17x32xf32>
    %54 = vector.shape_cast %52 : vector<17x32xf32> to vector<1x17x32xf32>
    %55 = tpu.concatenate %53, %54 in 0 : vector<1x17x32xf32>, vector<1x17x32xf32> -> vector<2x17x32xf32>
    %56 = vector.extract_strided_slice %43 {offsets = [0, 0, 0], sizes = [2, 17, 8], strides = [1, 1, 1]} : vector<2x17x32xf32> to vector<2x17x8xf32>
    %57 = vector.extract_strided_slice %49 {offsets = [0, 0, 0], sizes = [2, 17, 8], strides = [1, 1, 1]} : vector<2x17x32xf32> to vector<2x17x8xf32>
    %58 = vector.extract_strided_slice %55 {offsets = [0, 0, 0], sizes = [2, 17, 8], strides = [1, 1, 1]} : vector<2x17x32xf32> to vector<2x17x8xf32>
    "tpu.trace_start"() <{level = 10 : i32, message = "bqd,bkd->bqk"}> : () -> ()
    %cst_30 = arith.constant dense<0.000000e+00> : vector<2x17x17xf32>
    %59 = tpu.matmul %56, %57, %cst_30 {dimension_numbers = #tpu.dot_dimension_numbers<[2], [2], [1], [1], [0, 0, 0, 1, 1, 1], [0], [0]>} : vector<2x17x8xf32>, vector<2x17x8xf32>, vector<2x17x17xf32> -> vector<2x17x17xf32>
    "tpu.trace_stop"() : () -> ()
    %cst_31 = arith.constant 0.353553385 : f32
    %60 = vector.broadcast %cst_31 : f32 to vector<2x17x17xf32>
    %61 = arith.mulf %59, %60 : vector<2x17x17xf32>
    %cst_32 = arith.constant dense<0xFF800000> : vector<2x17xf32>
    %62 = vector.multi_reduction <maximumf>, %61, %cst_32 [2] : vector<2x17x17xf32> to vector<2x17xf32>
    %63 = vector.shape_cast %62 : vector<2x17xf32> to vector<2x17x1xf32>
    %64 = vector.broadcast %63 : vector<2x17x1xf32> to vector<2x17x17xf32>
    %65 = arith.subf %61, %64 : vector<2x17x17xf32>
    %66 = math.exp %65 : vector<2x17x17xf32>
    %cst_33 = arith.constant dense<0.000000e+00> : vector<2x17xf32>
    %67 = vector.multi_reduction <add>, %66, %cst_33 [2] : vector<2x17x17xf32> to vector<2x17xf32>
    %68 = vector.shape_cast %67 : vector<2x17xf32> to vector<2x17x1xf32>
    %69 = vector.broadcast %68 : vector<2x17x1xf32> to vector<2x17x17xf32>
    %70 = arith.divf %66, %69 : vector<2x17x17xf32>
    "tpu.trace_start"() <{level = 10 : i32, message = "bqk,bkd->bqd"}> : () -> ()
    %cst_34 = arith.constant dense<0.000000e+00> : vector<2x17x8xf32>
    %71 = tpu.matmul %70, %58, %cst_34 {dimension_numbers = #tpu.dot_dimension_numbers<[2], [1], [1], [2], [0, 0, 0, 1, 1, 2], [0], [0]>} : vector<2x17x17xf32>, vector<2x17x8xf32>, vector<2x17x8xf32> -> vector<2x17x8xf32>
    "tpu.trace_stop"() : () -> ()
    %72 = vector.extract_strided_slice %43 {offsets = [0, 0, 8], sizes = [2, 17, 8], strides = [1, 1, 1]} : vector<2x17x32xf32> to vector<2x17x8xf32>
    %73 = vector.extract_strided_slice %49 {offsets = [0, 0, 8], sizes = [2, 17, 8], strides = [1, 1, 1]} : vector<2x17x32xf32> to vector<2x17x8xf32>
    %74 = vector.extract_strided_slice %55 {offsets = [0, 0, 8], sizes = [2, 17, 8], strides = [1, 1, 1]} : vector<2x17x32xf32> to vector<2x17x8xf32>
    "tpu.trace_start"() <{level = 10 : i32, message = "bqd,bkd->bqk"}> : () -> ()
    %cst_35 = arith.constant dense<0.000000e+00> : vector<2x17x17xf32>
    %75 = tpu.matmul %72, %73, %cst_35 {dimension_numbers = #tpu.dot_dimension_numbers<[2], [2], [1], [1], [0, 0, 0, 1, 1, 1], [0], [0]>} : vector<2x17x8xf32>, vector<2x17x8xf32>, vector<2x17x17xf32> -> vector<2x17x17xf32>
    "tpu.trace_stop"() : () -> ()
    %cst_36 = arith.constant 0.353553385 : f32
    %76 = vector.broadcast %cst_36 : f32 to vector<2x17x17xf32>
    %77 = arith.mulf %75, %76 : vector<2x17x17xf32>
    %cst_37 = arith.constant dense<0xFF800000> : vector<2x17xf32>
    %78 = vector.multi_reduction <maximumf>, %77, %cst_37 [2] : vector<2x17x17xf32> to vector<2x17xf32>
    %79 = vector.shape_cast %78 : vector<2x17xf32> to vector<2x17x1xf32>
    %80 = vector.broadcast %79 : vector<2x17x1xf32> to vector<2x17x17xf32>
    %81 = arith.subf %77, %80 : vector<2x17x17xf32>
    %82 = math.exp %81 : vector<2x17x17xf32>
    %cst_38 = arith.constant dense<0.000000e+00> : vector<2x17xf32>
    %83 = vector.multi_reduction <add>, %82, %cst_38 [2] : vector<2x17x17xf32> to vector<2x17xf32>
    %84 = vector.shape_cast %83 : vector<2x17xf32> to vector<2x17x1xf32>
    %85 = vector.broadcast %84 : vector<2x17x1xf32> to vector<2x17x17xf32>
    %86 = arith.divf %82, %85 : vector<2x17x17xf32>
    "tpu.trace_start"() <{level = 10 : i32, message = "bqk,bkd->bqd"}> : () -> ()
    %cst_39 = arith.constant dense<0.000000e+00> : vector<2x17x8xf32>
    %87 = tpu.matmul %86, %74, %cst_39 {dimension_numbers = #tpu.dot_dimension_numbers<[2], [1], [1], [2], [0, 0, 0, 1, 1, 2], [0], [0]>} : vector<2x17x17xf32>, vector<2x17x8xf32>, vector<2x17x8xf32> -> vector<2x17x8xf32>
    "tpu.trace_stop"() : () -> ()
    %88 = vector.extract_strided_slice %43 {offsets = [0, 0, 16], sizes = [2, 17, 8], strides = [1, 1, 1]} : vector<2x17x32xf32> to vector<2x17x8xf32>
    %89 = vector.extract_strided_slice %49 {offsets = [0, 0, 16], sizes = [2, 17, 8], strides = [1, 1, 1]} : vector<2x17x32xf32> to vector<2x17x8xf32>
    %90 = vector.extract_strided_slice %55 {offsets = [0, 0, 16], sizes = [2, 17, 8], strides = [1, 1, 1]} : vector<2x17x32xf32> to vector<2x17x8xf32>
    "tpu.trace_start"() <{level = 10 : i32, message = "bqd,bkd->bqk"}> : () -> ()
    %cst_40 = arith.constant dense<0.000000e+00> : vector<2x17x17xf32>
    %91 = tpu.matmul %88, %89, %cst_40 {dimension_numbers = #tpu.dot_dimension_numbers<[2], [2], [1], [1], [0, 0, 0, 1, 1, 1], [0], [0]>} : vector<2x17x8xf32>, vector<2x17x8xf32>, vector<2x17x17xf32> -> vector<2x17x17xf32>
    "tpu.trace_stop"() : () -> ()
    %cst_41 = arith.constant 0.353553385 : f32
    %92 = vector.broadcast %cst_41 : f32 to vector<2x17x17xf32>
    %93 = arith.mulf %91, %92 : vector<2x17x17xf32>
    %cst_42 = arith.constant dense<0xFF800000> : vector<2x17xf32>
    %94 = vector.multi_reduction <maximumf>, %93, %cst_42 [2] : vector<2x17x17xf32> to vector<2x17xf32>
    %95 = vector.shape_cast %94 : vector<2x17xf32> to vector<2x17x1xf32>
    %96 = vector.broadcast %95 : vector<2x17x1xf32> to vector<2x17x17xf32>
    %97 = arith.subf %93, %96 : vector<2x17x17xf32>
    %98 = math.exp %97 : vector<2x17x17xf32>
    %cst_43 = arith.constant dense<0.000000e+00> : vector<2x17xf32>
    %99 = vector.multi_reduction <add>, %98, %cst_43 [2] : vector<2x17x17xf32> to vector<2x17xf32>
    %100 = vector.shape_cast %99 : vector<2x17xf32> to vector<2x17x1xf32>
    %101 = vector.broadcast %100 : vector<2x17x1xf32> to vector<2x17x17xf32>
    %102 = arith.divf %98, %101 : vector<2x17x17xf32>
    "tpu.trace_start"() <{level = 10 : i32, message = "bqk,bkd->bqd"}> : () -> ()
    %cst_44 = arith.constant dense<0.000000e+00> : vector<2x17x8xf32>
    %103 = tpu.matmul %102, %90, %cst_44 {dimension_numbers = #tpu.dot_dimension_numbers<[2], [1], [1], [2], [0, 0, 0, 1, 1, 2], [0], [0]>} : vector<2x17x17xf32>, vector<2x17x8xf32>, vector<2x17x8xf32> -> vector<2x17x8xf32>
    "tpu.trace_stop"() : () -> ()
    %104 = vector.extract_strided_slice %43 {offsets = [0, 0, 24], sizes = [2, 17, 8], strides = [1, 1, 1]} : vector<2x17x32xf32> to vector<2x17x8xf32>
    %105 = vector.extract_strided_slice %49 {offsets = [0, 0, 24], sizes = [2, 17, 8], strides = [1, 1, 1]} : vector<2x17x32xf32> to vector<2x17x8xf32>
    %106 = vector.extract_strided_slice %55 {offsets = [0, 0, 24], sizes = [2, 17, 8], strides = [1, 1, 1]} : vector<2x17x32xf32> to vector<2x17x8xf32>
    "tpu.trace_start"() <{level = 10 : i32, message = "bqd,bkd->bqk"}> : () -> ()
    %cst_45 = arith.constant dense<0.000000e+00> : vector<2x17x17xf32>
    %107 = tpu.matmul %104, %105, %cst_45 {dimension_numbers = #tpu.dot_dimension_numbers<[2], [2], [1], [1], [0, 0, 0, 1, 1, 1], [0], [0]>} : vector<2x17x8xf32>, vector<2x17x8xf32>, vector<2x17x17xf32> -> vector<2x17x17xf32>
    "tpu.trace_stop"() : () -> ()
    %cst_46 = arith.constant 0.353553385 : f32
    %108 = vector.broadcast %cst_46 : f32 to vector<2x17x17xf32>
    %109 = arith.mulf %107, %108 : vector<2x17x17xf32>
    %cst_47 = arith.constant dense<0xFF800000> : vector<2x17xf32>
    %110 = vector.multi_reduction <maximumf>, %109, %cst_47 [2] : vector<2x17x17xf32> to vector<2x17xf32>
    %111 = vector.shape_cast %110 : vector<2x17xf32> to vector<2x17x1xf32>
    %112 = vector.broadcast %111 : vector<2x17x1xf32> to vector<2x17x17xf32>
    %113 = arith.subf %109, %112 : vector<2x17x17xf32>
    %114 = math.exp %113 : vector<2x17x17xf32>
    %cst_48 = arith.constant dense<0.000000e+00> : vector<2x17xf32>
    %115 = vector.multi_reduction <add>, %114, %cst_48 [2] : vector<2x17x17xf32> to vector<2x17xf32>
    %116 = vector.shape_cast %115 : vector<2x17xf32> to vector<2x17x1xf32>
    %117 = vector.broadcast %116 : vector<2x17x1xf32> to vector<2x17x17xf32>
    %118 = arith.divf %114, %117 : vector<2x17x17xf32>
    "tpu.trace_start"() <{level = 10 : i32, message = "bqk,bkd->bqd"}> : () -> ()
    %cst_49 = arith.constant dense<0.000000e+00> : vector<2x17x8xf32>
    %119 = tpu.matmul %118, %106, %cst_49 {dimension_numbers = #tpu.dot_dimension_numbers<[2], [1], [1], [2], [0, 0, 0, 1, 1, 2], [0], [0]>} : vector<2x17x17xf32>, vector<2x17x8xf32>, vector<2x17x8xf32> -> vector<2x17x8xf32>
    "tpu.trace_stop"() : () -> ()
    %120 = tpu.concatenate %71, %87, %103, %119 in 2 : vector<2x17x8xf32>, vector<2x17x8xf32>, vector<2x17x8xf32>, vector<2x17x8xf32> -> vector<2x17x32xf32>
    %121 = vector.extract_strided_slice %120 {offsets = [0, 0, 0], sizes = [1, 17, 32], strides = [1, 1, 1]} : vector<2x17x32xf32> to vector<1x17x32xf32>
    %122 = vector.shape_cast %121 : vector<1x17x32xf32> to vector<17x32xf32>
    %123 = vector.extract_strided_slice %120 {offsets = [1, 0, 0], sizes = [1, 17, 32], strides = [1, 1, 1]} : vector<2x17x32xf32> to vector<1x17x32xf32>
    %124 = vector.shape_cast %123 : vector<1x17x32xf32> to vector<17x32xf32>
    %125 = tpu.concatenate %122, %124 in 0 : vector<17x32xf32>, vector<17x32xf32> -> vector<34x32xf32>
    %cst_50 = arith.constant dense<0.000000e+00> : vector<34x32xf32>
    %126 = tpu.matmul %125, %4, %cst_50 {dimension_numbers = #tpu.dot_dimension_numbers<[1], [0], [0], [1], [0, 0, 1, 1], [], []>} : vector<34x32xf32>, vector<32x32xf32>, vector<34x32xf32> -> vector<34x32xf32>
    %127 = vector.broadcast %5 : vector<1x32xf32> to vector<34x32xf32>
    %128 = arith.addf %126, %127 : vector<34x32xf32>
    %129 = arith.addf %128, %12 : vector<34x32xf32>
    %cst_51 = arith.constant dense<0.000000e+00> : vector<34xf32>
    %130 = vector.multi_reduction <add>, %129, %cst_51 [1] : vector<34x32xf32> to vector<34xf32>
    %131 = vector.shape_cast %130 : vector<34xf32> to vector<34x1xf32>
    %cst_52 = arith.constant 3.200000e+01 : f32
    %132 = vector.broadcast %cst_52 : f32 to vector<34x1xf32>
    %133 = arith.divf %131, %132 : vector<34x1xf32>
    %134 = vector.broadcast %133 : vector<34x1xf32> to vector<34x32xf32>
    %135 = arith.subf %129, %134 : vector<34x32xf32>
    %136 = arith.mulf %135, %135 : vector<34x32xf32>
    %cst_53 = arith.constant dense<0.000000e+00> : vector<34xf32>
    %137 = vector.multi_reduction <add>, %136, %cst_53 [1] : vector<34x32xf32> to vector<34xf32>
    %138 = vector.shape_cast %137 : vector<34xf32> to vector<34x1xf32>
    %cst_54 = arith.constant 3.200000e+01 : f32
    %139 = vector.broadcast %cst_54 : f32 to vector<34x1xf32>
    %140 = arith.divf %138, %139 : vector<34x1xf32>
    %141 = vector.broadcast %133 : vector<34x1xf32> to vector<34x32xf32>
    %142 = arith.subf %129, %141 : vector<34x32xf32>
    %cst_55 = arith.constant 9.99999997E-7 : f32
    %143 = vector.broadcast %cst_55 : f32 to vector<34x1xf32>
    %144 = arith.addf %140, %143 : vector<34x1xf32>
    %145 = math.rsqrt %144 : vector<34x1xf32>
    %146 = vector.broadcast %145 : vector<34x1xf32> to vector<34x32xf32>
    %147 = arith.mulf %142, %146 : vector<34x32xf32>
    %148 = vector.broadcast %6 : vector<1x32xf32> to vector<34x32xf32>
    %149 = arith.mulf %147, %148 : vector<34x32xf32>
    %150 = vector.broadcast %7 : vector<1x32xf32> to vector<34x32xf32>
    %151 = arith.addf %149, %150 : vector<34x32xf32>
    %cst_56 = arith.constant dense<0.000000e+00> : vector<34x64xf32>
    %152 = tpu.matmul %151, %8, %cst_56 {dimension_numbers = #tpu.dot_dimension_numbers<[1], [0], [0], [1], [0, 0, 1, 1], [], []>} : vector<34x32xf32>, vector<32x64xf32>, vector<34x64xf32> -> vector<34x64xf32>
    %153 = vector.broadcast %9 : vector<1x64xf32> to vector<34x64xf32>
    %154 = arith.addf %152, %153 : vector<34x64xf32>
    %cst_57 = arith.constant 5.000000e-01 : f32
    %155 = vector.broadcast %cst_57 : f32 to vector<34x64xf32>
    %156 = arith.mulf %155, %154 : vector<34x64xf32>
    %cst_58 = arith.constant 0.707106769 : f32
    %157 = vector.broadcast %cst_58 : f32 to vector<34x64xf32>
    %158 = arith.mulf %154, %157 : vector<34x64xf32>
    %159 = math.absf %158 : vector<34x64xf32>
    %cst_59 = arith.constant 0.327591091 : f32
    %160 = vector.broadcast %cst_59 : f32 to vector<34x64xf32>
    %161 = arith.mulf %160, %159 : vector<34x64xf32>
    %cst_60 = arith.constant 1.000000e+00 : f32
    %162 = vector.broadcast %cst_60 : f32 to vector<34x64xf32>
    %163 = arith.addf %162, %161 : vector<34x64xf32>
    %cst_61 = arith.constant 1.000000e+00 : f32
    %164 = vector.broadcast %cst_61 : f32 to vector<34x64xf32>
    %165 = arith.divf %164, %163 : vector<34x64xf32>
    %cst_62 = arith.constant 1.06140542 : f32
    %166 = vector.broadcast %cst_62 : f32 to vector<34x64xf32>
    %167 = arith.mulf %166, %165 : vector<34x64xf32>
    %cst_63 = arith.constant -1.45315206 : f32
    %168 = vector.broadcast %cst_63 : f32 to vector<34x64xf32>
    %169 = arith.addf %167, %168 : vector<34x64xf32>
    %170 = arith.mulf %169, %165 : vector<34x64xf32>
    %cst_64 = arith.constant 1.42141378 : f32
    %171 = vector.broadcast %cst_64 : f32 to vector<34x64xf32>
    %172 = arith.addf %170, %171 : vector<34x64xf32>
    %173 = arith.mulf %172, %165 : vector<34x64xf32>
    %cst_65 = arith.constant -0.284496725 : f32
    %174 = vector.broadcast %cst_65 : f32 to vector<34x64xf32>
    %175 = arith.addf %173, %174 : vector<34x64xf32>
    %176 = arith.mulf %175, %165 : vector<34x64xf32>
    %cst_66 = arith.constant 0.254829586 : f32
    %177 = vector.broadcast %cst_66 : f32 to vector<34x64xf32>
    %178 = arith.addf %176, %177 : vector<34x64xf32>
    %179 = arith.mulf %178, %165 : vector<34x64xf32>
    %cst_67 = arith.constant 0.000000e+00 : f32
    %180 = vector.broadcast %cst_67 : f32 to vector<34x64xf32>
    %181 = arith.subf %180, %159 : vector<34x64xf32>
    %182 = arith.mulf %181, %159 : vector<34x64xf32>
    %183 = math.exp %182 : vector<34x64xf32>
    %184 = arith.mulf %179, %183 : vector<34x64xf32>
    %cst_68 = arith.constant 1.000000e+00 : f32
    %185 = vector.broadcast %cst_68 : f32 to vector<34x64xf32>
    %186 = arith.subf %185, %184 : vector<34x64xf32>
    %cst_69 = arith.constant 0.000000e+00 : f32
    %187 = vector.broadcast %cst_69 : f32 to vector<34x64xf32>
    %188 = arith.cmpf oge, %158, %187 : vector<34x64xf32>
    %cst_70 = arith.constant 0.000000e+00 : f32
    %189 = vector.broadcast %cst_70 : f32 to vector<34x64xf32>
    %190 = arith.subf %189, %186 : vector<34x64xf32>
    %191 = arith.select %188, %186, %190 : vector<34x64xi1>, vector<34x64xf32>
    %cst_71 = arith.constant 1.000000e+00 : f32
    %192 = vector.broadcast %cst_71 : f32 to vector<34x64xf32>
    %193 = arith.addf %192, %191 : vector<34x64xf32>
    %194 = arith.mulf %156, %193 : vector<34x64xf32>
    %cst_72 = arith.constant dense<0.000000e+00> : vector<34x32xf32>
    %195 = tpu.matmul %194, %10, %cst_72 {dimension_numbers = #tpu.dot_dimension_numbers<[1], [0], [0], [1], [0, 0, 1, 1], [], []>} : vector<34x64xf32>, vector<64x32xf32>, vector<34x32xf32> -> vector<34x32xf32>
    %196 = vector.broadcast %11 : vector<1x32xf32> to vector<34x32xf32>
    %197 = arith.addf %195, %196 : vector<34x32xf32>
    %198 = arith.addf %197, %129 : vector<34x32xf32>
    %199 = vector.shape_cast %70 : vector<2x17x17xf32> to vector<2x1x17x17xf32>
    %200 = vector.shape_cast %86 : vector<2x17x17xf32> to vector<2x1x17x17xf32>
    %201 = vector.shape_cast %102 : vector<2x17x17xf32> to vector<2x1x17x17xf32>
    %202 = vector.shape_cast %118 : vector<2x17x17xf32> to vector<2x1x17x17xf32>
    %203 = tpu.concatenate %199, %200, %201, %202 in 1 : vector<2x1x17x17xf32>, vector<2x1x17x17xf32>, vector<2x1x17x17xf32>, vector<2x1x17x17xf32> -> vector<2x4x17x17xf32>
    %204 = vector.shape_cast %203 : vector<2x4x17x17xf32> to vector<8x17x17xf32>
    %c0_73 = arith.constant 0 : index
    %c0_74 = arith.constant 0 : index
    %205 = vector.load %arg13[%c0_73, %c0_74] : memref<34x32xf32, #tpu.memory_space<vmem>>, vector<34x32xf32>
    tpu.vector_store %arg13[%c0_73, %c0_74], %198 {strides = array<i32>} : memref<34x32xf32, #tpu.memory_space<vmem>>, vector<34x32xf32>,
    %206 = vector.extract_strided_slice %204 {offsets = [0, 0, 0], sizes = [8, 1, 17], strides = [1, 1, 1]} : vector<8x17x17xf32> to vector<8x1x17xf32>
    %c0_75 = arith.constant 0 : index
    %c0_76 = arith.constant 0 : index
    %c0_77 = arith.constant 0 : index
    %207 = vector.load %arg14[%c0_75, %c0_76, %c0_77] : memref<8x1x17xf32, #tpu.memory_space<vmem>>, vector<8x1x17xf32>
    tpu.vector_store %arg14[%c0_75, %c0_76, %c0_77], %206 {strides = array<i32>} : memref<8x1x17xf32, #tpu.memory_space<vmem>>, vector<8x1x17xf32>,
    return
  }
}

module attributes {stable_mosaic.version = 11 : i64} {
  func.func @_final_kernel(%arg0: memref<34x32xf32, #tpu.memory_space<vmem>>, %arg1: memref<1x32xf32, #tpu.memory_space<vmem>>, %arg2: memref<1x32xf32, #tpu.memory_space<vmem>>, %arg3: memref<32x96xf32, #tpu.memory_space<vmem>>, %arg4: memref<1x96xf32, #tpu.memory_space<vmem>>, %arg5: memref<32x32xf32, #tpu.memory_space<vmem>>, %arg6: memref<1x32xf32, #tpu.memory_space<vmem>>, %arg7: memref<1x32xf32, #tpu.memory_space<vmem>>, %arg8: memref<1x32xf32, #tpu.memory_space<vmem>>, %arg9: memref<32x64xf32, #tpu.memory_space<vmem>>, %arg10: memref<1x64xf32, #tpu.memory_space<vmem>>, %arg11: memref<64x32xf32, #tpu.memory_space<vmem>>, %arg12: memref<1x32xf32, #tpu.memory_space<vmem>>, %arg13: memref<1x32xf32, #tpu.memory_space<vmem>>, %arg14: memref<1x32xf32, #tpu.memory_space<vmem>>, %arg15: memref<32x10xf32, #tpu.memory_space<vmem>>, %arg16: memref<1x10xf32, #tpu.memory_space<vmem>>, %arg17: memref<2x10xf32, #tpu.memory_space<vmem>>, %arg18: memref<2x4x17x17xf32, #tpu.memory_space<vmem>>) attributes {dimension_semantics = [], scalar_prefetch = 0 : i64, scratch_operands = 0 : i64, tpu.core_type = #tpu.core_type<tc>} {
    %c0 = arith.constant 0 : index
    %c0_0 = arith.constant 0 : index
    %0 = vector.load %arg1[%c0, %c0_0] : memref<1x32xf32, #tpu.memory_space<vmem>>, vector<1x32xf32>
    %c0_1 = arith.constant 0 : index
    %c0_2 = arith.constant 0 : index
    %1 = vector.load %arg2[%c0_1, %c0_2] : memref<1x32xf32, #tpu.memory_space<vmem>>, vector<1x32xf32>
    %c0_3 = arith.constant 0 : index
    %c0_4 = arith.constant 0 : index
    %2 = vector.load %arg3[%c0_3, %c0_4] : memref<32x96xf32, #tpu.memory_space<vmem>>, vector<32x96xf32>
    %c0_5 = arith.constant 0 : index
    %c0_6 = arith.constant 0 : index
    %3 = vector.load %arg4[%c0_5, %c0_6] : memref<1x96xf32, #tpu.memory_space<vmem>>, vector<1x96xf32>
    %c0_7 = arith.constant 0 : index
    %c0_8 = arith.constant 0 : index
    %4 = vector.load %arg5[%c0_7, %c0_8] : memref<32x32xf32, #tpu.memory_space<vmem>>, vector<32x32xf32>
    %c0_9 = arith.constant 0 : index
    %c0_10 = arith.constant 0 : index
    %5 = vector.load %arg6[%c0_9, %c0_10] : memref<1x32xf32, #tpu.memory_space<vmem>>, vector<1x32xf32>
    %c0_11 = arith.constant 0 : index
    %c0_12 = arith.constant 0 : index
    %6 = vector.load %arg7[%c0_11, %c0_12] : memref<1x32xf32, #tpu.memory_space<vmem>>, vector<1x32xf32>
    %c0_13 = arith.constant 0 : index
    %c0_14 = arith.constant 0 : index
    %7 = vector.load %arg8[%c0_13, %c0_14] : memref<1x32xf32, #tpu.memory_space<vmem>>, vector<1x32xf32>
    %c0_15 = arith.constant 0 : index
    %c0_16 = arith.constant 0 : index
    %8 = vector.load %arg9[%c0_15, %c0_16] : memref<32x64xf32, #tpu.memory_space<vmem>>, vector<32x64xf32>
    %c0_17 = arith.constant 0 : index
    %c0_18 = arith.constant 0 : index
    %9 = vector.load %arg10[%c0_17, %c0_18] : memref<1x64xf32, #tpu.memory_space<vmem>>, vector<1x64xf32>
    %c0_19 = arith.constant 0 : index
    %c0_20 = arith.constant 0 : index
    %10 = vector.load %arg11[%c0_19, %c0_20] : memref<64x32xf32, #tpu.memory_space<vmem>>, vector<64x32xf32>
    %c0_21 = arith.constant 0 : index
    %c0_22 = arith.constant 0 : index
    %11 = vector.load %arg12[%c0_21, %c0_22] : memref<1x32xf32, #tpu.memory_space<vmem>>, vector<1x32xf32>
    %c0_23 = arith.constant 0 : index
    %c0_24 = arith.constant 0 : index
    %12 = vector.load %arg0[%c0_23, %c0_24] : memref<34x32xf32, #tpu.memory_space<vmem>>, vector<34x32xf32>
    %cst = arith.constant dense<0.000000e+00> : vector<34xf32>
    %13 = vector.multi_reduction <add>, %12, %cst [1] : vector<34x32xf32> to vector<34xf32>
    %14 = vector.shape_cast %13 : vector<34xf32> to vector<34x1xf32>
    %cst_25 = arith.constant 3.200000e+01 : f32
    %15 = vector.broadcast %cst_25 : f32 to vector<34x1xf32>
    %16 = arith.divf %14, %15 : vector<34x1xf32>
    %17 = vector.broadcast %16 : vector<34x1xf32> to vector<34x32xf32>
    %18 = arith.subf %12, %17 : vector<34x32xf32>
    %19 = arith.mulf %18, %18 : vector<34x32xf32>
    %cst_26 = arith.constant dense<0.000000e+00> : vector<34xf32>
    %20 = vector.multi_reduction <add>, %19, %cst_26 [1] : vector<34x32xf32> to vector<34xf32>
    %21 = vector.shape_cast %20 : vector<34xf32> to vector<34x1xf32>
    %cst_27 = arith.constant 3.200000e+01 : f32
    %22 = vector.broadcast %cst_27 : f32 to vector<34x1xf32>
    %23 = arith.divf %21, %22 : vector<34x1xf32>
    %24 = vector.broadcast %16 : vector<34x1xf32> to vector<34x32xf32>
    %25 = arith.subf %12, %24 : vector<34x32xf32>
    %cst_28 = arith.constant 9.99999997E-7 : f32
    %26 = vector.broadcast %cst_28 : f32 to vector<34x1xf32>
    %27 = arith.addf %23, %26 : vector<34x1xf32>
    %28 = math.rsqrt %27 : vector<34x1xf32>
    %29 = vector.broadcast %28 : vector<34x1xf32> to vector<34x32xf32>
    %30 = arith.mulf %25, %29 : vector<34x32xf32>
    %31 = vector.broadcast %0 : vector<1x32xf32> to vector<34x32xf32>
    %32 = arith.mulf %30, %31 : vector<34x32xf32>
    %33 = vector.broadcast %1 : vector<1x32xf32> to vector<34x32xf32>
    %34 = arith.addf %32, %33 : vector<34x32xf32>
    %cst_29 = arith.constant dense<0.000000e+00> : vector<34x96xf32>
    %35 = tpu.matmul %34, %2, %cst_29 {dimension_numbers = #tpu.dot_dimension_numbers<[1], [0], [0], [1], [0, 0, 1, 1], [], []>} : vector<34x32xf32>, vector<32x96xf32>, vector<34x96xf32> -> vector<34x96xf32>
    %36 = vector.broadcast %3 : vector<1x96xf32> to vector<34x96xf32>
    %37 = arith.addf %35, %36 : vector<34x96xf32>
    %38 = vector.extract_strided_slice %37 {offsets = [0, 0], sizes = [34, 32], strides = [1, 1]} : vector<34x96xf32> to vector<34x32xf32>
    %39 = vector.extract_strided_slice %38 {offsets = [0, 0], sizes = [17, 32], strides = [1, 1]} : vector<34x32xf32> to vector<17x32xf32>
    %40 = vector.extract_strided_slice %38 {offsets = [17, 0], sizes = [17, 32], strides = [1, 1]} : vector<34x32xf32> to vector<17x32xf32>
    %41 = vector.shape_cast %39 : vector<17x32xf32> to vector<1x17x32xf32>
    %42 = vector.shape_cast %40 : vector<17x32xf32> to vector<1x17x32xf32>
    %43 = tpu.concatenate %41, %42 in 0 : vector<1x17x32xf32>, vector<1x17x32xf32> -> vector<2x17x32xf32>
    %44 = vector.extract_strided_slice %37 {offsets = [0, 32], sizes = [34, 32], strides = [1, 1]} : vector<34x96xf32> to vector<34x32xf32>
    %45 = vector.extract_strided_slice %44 {offsets = [0, 0], sizes = [17, 32], strides = [1, 1]} : vector<34x32xf32> to vector<17x32xf32>
    %46 = vector.extract_strided_slice %44 {offsets = [17, 0], sizes = [17, 32], strides = [1, 1]} : vector<34x32xf32> to vector<17x32xf32>
    %47 = vector.shape_cast %45 : vector<17x32xf32> to vector<1x17x32xf32>
    %48 = vector.shape_cast %46 : vector<17x32xf32> to vector<1x17x32xf32>
    %49 = tpu.concatenate %47, %48 in 0 : vector<1x17x32xf32>, vector<1x17x32xf32> -> vector<2x17x32xf32>
    %50 = vector.extract_strided_slice %37 {offsets = [0, 64], sizes = [34, 32], strides = [1, 1]} : vector<34x96xf32> to vector<34x32xf32>
    %51 = vector.extract_strided_slice %50 {offsets = [0, 0], sizes = [17, 32], strides = [1, 1]} : vector<34x32xf32> to vector<17x32xf32>
    %52 = vector.extract_strided_slice %50 {offsets = [17, 0], sizes = [17, 32], strides = [1, 1]} : vector<34x32xf32> to vector<17x32xf32>
    %53 = vector.shape_cast %51 : vector<17x32xf32> to vector<1x17x32xf32>
    %54 = vector.shape_cast %52 : vector<17x32xf32> to vector<1x17x32xf32>
    %55 = tpu.concatenate %53, %54 in 0 : vector<1x17x32xf32>, vector<1x17x32xf32> -> vector<2x17x32xf32>
    %56 = vector.extract_strided_slice %43 {offsets = [0, 0, 0], sizes = [2, 17, 8], strides = [1, 1, 1]} : vector<2x17x32xf32> to vector<2x17x8xf32>
    %57 = vector.extract_strided_slice %49 {offsets = [0, 0, 0], sizes = [2, 17, 8], strides = [1, 1, 1]} : vector<2x17x32xf32> to vector<2x17x8xf32>
    %58 = vector.extract_strided_slice %55 {offsets = [0, 0, 0], sizes = [2, 17, 8], strides = [1, 1, 1]} : vector<2x17x32xf32> to vector<2x17x8xf32>
    "tpu.trace_start"() <{level = 10 : i32, message = "bqd,bkd->bqk"}> : () -> ()
    %cst_30 = arith.constant dense<0.000000e+00> : vector<2x17x17xf32>
    %59 = tpu.matmul %56, %57, %cst_30 {dimension_numbers = #tpu.dot_dimension_numbers<[2], [2], [1], [1], [0, 0, 0, 1, 1, 1], [0], [0]>} : vector<2x17x8xf32>, vector<2x17x8xf32>, vector<2x17x17xf32> -> vector<2x17x17xf32>
    "tpu.trace_stop"() : () -> ()
    %cst_31 = arith.constant 0.353553385 : f32
    %60 = vector.broadcast %cst_31 : f32 to vector<2x17x17xf32>
    %61 = arith.mulf %59, %60 : vector<2x17x17xf32>
    %cst_32 = arith.constant dense<0xFF800000> : vector<2x17xf32>
    %62 = vector.multi_reduction <maximumf>, %61, %cst_32 [2] : vector<2x17x17xf32> to vector<2x17xf32>
    %63 = vector.shape_cast %62 : vector<2x17xf32> to vector<2x17x1xf32>
    %64 = vector.broadcast %63 : vector<2x17x1xf32> to vector<2x17x17xf32>
    %65 = arith.subf %61, %64 : vector<2x17x17xf32>
    %66 = math.exp %65 : vector<2x17x17xf32>
    %cst_33 = arith.constant dense<0.000000e+00> : vector<2x17xf32>
    %67 = vector.multi_reduction <add>, %66, %cst_33 [2] : vector<2x17x17xf32> to vector<2x17xf32>
    %68 = vector.shape_cast %67 : vector<2x17xf32> to vector<2x17x1xf32>
    %69 = vector.broadcast %68 : vector<2x17x1xf32> to vector<2x17x17xf32>
    %70 = arith.divf %66, %69 : vector<2x17x17xf32>
    "tpu.trace_start"() <{level = 10 : i32, message = "bqk,bkd->bqd"}> : () -> ()
    %cst_34 = arith.constant dense<0.000000e+00> : vector<2x17x8xf32>
    %71 = tpu.matmul %70, %58, %cst_34 {dimension_numbers = #tpu.dot_dimension_numbers<[2], [1], [1], [2], [0, 0, 0, 1, 1, 2], [0], [0]>} : vector<2x17x17xf32>, vector<2x17x8xf32>, vector<2x17x8xf32> -> vector<2x17x8xf32>
    "tpu.trace_stop"() : () -> ()
    %72 = vector.extract_strided_slice %43 {offsets = [0, 0, 8], sizes = [2, 17, 8], strides = [1, 1, 1]} : vector<2x17x32xf32> to vector<2x17x8xf32>
    %73 = vector.extract_strided_slice %49 {offsets = [0, 0, 8], sizes = [2, 17, 8], strides = [1, 1, 1]} : vector<2x17x32xf32> to vector<2x17x8xf32>
    %74 = vector.extract_strided_slice %55 {offsets = [0, 0, 8], sizes = [2, 17, 8], strides = [1, 1, 1]} : vector<2x17x32xf32> to vector<2x17x8xf32>
    "tpu.trace_start"() <{level = 10 : i32, message = "bqd,bkd->bqk"}> : () -> ()
    %cst_35 = arith.constant dense<0.000000e+00> : vector<2x17x17xf32>
    %75 = tpu.matmul %72, %73, %cst_35 {dimension_numbers = #tpu.dot_dimension_numbers<[2], [2], [1], [1], [0, 0, 0, 1, 1, 1], [0], [0]>} : vector<2x17x8xf32>, vector<2x17x8xf32>, vector<2x17x17xf32> -> vector<2x17x17xf32>
    "tpu.trace_stop"() : () -> ()
    %cst_36 = arith.constant 0.353553385 : f32
    %76 = vector.broadcast %cst_36 : f32 to vector<2x17x17xf32>
    %77 = arith.mulf %75, %76 : vector<2x17x17xf32>
    %cst_37 = arith.constant dense<0xFF800000> : vector<2x17xf32>
    %78 = vector.multi_reduction <maximumf>, %77, %cst_37 [2] : vector<2x17x17xf32> to vector<2x17xf32>
    %79 = vector.shape_cast %78 : vector<2x17xf32> to vector<2x17x1xf32>
    %80 = vector.broadcast %79 : vector<2x17x1xf32> to vector<2x17x17xf32>
    %81 = arith.subf %77, %80 : vector<2x17x17xf32>
    %82 = math.exp %81 : vector<2x17x17xf32>
    %cst_38 = arith.constant dense<0.000000e+00> : vector<2x17xf32>
    %83 = vector.multi_reduction <add>, %82, %cst_38 [2] : vector<2x17x17xf32> to vector<2x17xf32>
    %84 = vector.shape_cast %83 : vector<2x17xf32> to vector<2x17x1xf32>
    %85 = vector.broadcast %84 : vector<2x17x1xf32> to vector<2x17x17xf32>
    %86 = arith.divf %82, %85 : vector<2x17x17xf32>
    "tpu.trace_start"() <{level = 10 : i32, message = "bqk,bkd->bqd"}> : () -> ()
    %cst_39 = arith.constant dense<0.000000e+00> : vector<2x17x8xf32>
    %87 = tpu.matmul %86, %74, %cst_39 {dimension_numbers = #tpu.dot_dimension_numbers<[2], [1], [1], [2], [0, 0, 0, 1, 1, 2], [0], [0]>} : vector<2x17x17xf32>, vector<2x17x8xf32>, vector<2x17x8xf32> -> vector<2x17x8xf32>
    "tpu.trace_stop"() : () -> ()
    %88 = vector.extract_strided_slice %43 {offsets = [0, 0, 16], sizes = [2, 17, 8], strides = [1, 1, 1]} : vector<2x17x32xf32> to vector<2x17x8xf32>
    %89 = vector.extract_strided_slice %49 {offsets = [0, 0, 16], sizes = [2, 17, 8], strides = [1, 1, 1]} : vector<2x17x32xf32> to vector<2x17x8xf32>
    %90 = vector.extract_strided_slice %55 {offsets = [0, 0, 16], sizes = [2, 17, 8], strides = [1, 1, 1]} : vector<2x17x32xf32> to vector<2x17x8xf32>
    "tpu.trace_start"() <{level = 10 : i32, message = "bqd,bkd->bqk"}> : () -> ()
    %cst_40 = arith.constant dense<0.000000e+00> : vector<2x17x17xf32>
    %91 = tpu.matmul %88, %89, %cst_40 {dimension_numbers = #tpu.dot_dimension_numbers<[2], [2], [1], [1], [0, 0, 0, 1, 1, 1], [0], [0]>} : vector<2x17x8xf32>, vector<2x17x8xf32>, vector<2x17x17xf32> -> vector<2x17x17xf32>
    "tpu.trace_stop"() : () -> ()
    %cst_41 = arith.constant 0.353553385 : f32
    %92 = vector.broadcast %cst_41 : f32 to vector<2x17x17xf32>
    %93 = arith.mulf %91, %92 : vector<2x17x17xf32>
    %cst_42 = arith.constant dense<0xFF800000> : vector<2x17xf32>
    %94 = vector.multi_reduction <maximumf>, %93, %cst_42 [2] : vector<2x17x17xf32> to vector<2x17xf32>
    %95 = vector.shape_cast %94 : vector<2x17xf32> to vector<2x17x1xf32>
    %96 = vector.broadcast %95 : vector<2x17x1xf32> to vector<2x17x17xf32>
    %97 = arith.subf %93, %96 : vector<2x17x17xf32>
    %98 = math.exp %97 : vector<2x17x17xf32>
    %cst_43 = arith.constant dense<0.000000e+00> : vector<2x17xf32>
    %99 = vector.multi_reduction <add>, %98, %cst_43 [2] : vector<2x17x17xf32> to vector<2x17xf32>
    %100 = vector.shape_cast %99 : vector<2x17xf32> to vector<2x17x1xf32>
    %101 = vector.broadcast %100 : vector<2x17x1xf32> to vector<2x17x17xf32>
    %102 = arith.divf %98, %101 : vector<2x17x17xf32>
    "tpu.trace_start"() <{level = 10 : i32, message = "bqk,bkd->bqd"}> : () -> ()
    %cst_44 = arith.constant dense<0.000000e+00> : vector<2x17x8xf32>
    %103 = tpu.matmul %102, %90, %cst_44 {dimension_numbers = #tpu.dot_dimension_numbers<[2], [1], [1], [2], [0, 0, 0, 1, 1, 2], [0], [0]>} : vector<2x17x17xf32>, vector<2x17x8xf32>, vector<2x17x8xf32> -> vector<2x17x8xf32>
    "tpu.trace_stop"() : () -> ()
    %104 = vector.extract_strided_slice %43 {offsets = [0, 0, 24], sizes = [2, 17, 8], strides = [1, 1, 1]} : vector<2x17x32xf32> to vector<2x17x8xf32>
    %105 = vector.extract_strided_slice %49 {offsets = [0, 0, 24], sizes = [2, 17, 8], strides = [1, 1, 1]} : vector<2x17x32xf32> to vector<2x17x8xf32>
    %106 = vector.extract_strided_slice %55 {offsets = [0, 0, 24], sizes = [2, 17, 8], strides = [1, 1, 1]} : vector<2x17x32xf32> to vector<2x17x8xf32>
    "tpu.trace_start"() <{level = 10 : i32, message = "bqd,bkd->bqk"}> : () -> ()
    %cst_45 = arith.constant dense<0.000000e+00> : vector<2x17x17xf32>
    %107 = tpu.matmul %104, %105, %cst_45 {dimension_numbers = #tpu.dot_dimension_numbers<[2], [2], [1], [1], [0, 0, 0, 1, 1, 1], [0], [0]>} : vector<2x17x8xf32>, vector<2x17x8xf32>, vector<2x17x17xf32> -> vector<2x17x17xf32>
    "tpu.trace_stop"() : () -> ()
    %cst_46 = arith.constant 0.353553385 : f32
    %108 = vector.broadcast %cst_46 : f32 to vector<2x17x17xf32>
    %109 = arith.mulf %107, %108 : vector<2x17x17xf32>
    %cst_47 = arith.constant dense<0xFF800000> : vector<2x17xf32>
    %110 = vector.multi_reduction <maximumf>, %109, %cst_47 [2] : vector<2x17x17xf32> to vector<2x17xf32>
    %111 = vector.shape_cast %110 : vector<2x17xf32> to vector<2x17x1xf32>
    %112 = vector.broadcast %111 : vector<2x17x1xf32> to vector<2x17x17xf32>
    %113 = arith.subf %109, %112 : vector<2x17x17xf32>
    %114 = math.exp %113 : vector<2x17x17xf32>
    %cst_48 = arith.constant dense<0.000000e+00> : vector<2x17xf32>
    %115 = vector.multi_reduction <add>, %114, %cst_48 [2] : vector<2x17x17xf32> to vector<2x17xf32>
    %116 = vector.shape_cast %115 : vector<2x17xf32> to vector<2x17x1xf32>
    %117 = vector.broadcast %116 : vector<2x17x1xf32> to vector<2x17x17xf32>
    %118 = arith.divf %114, %117 : vector<2x17x17xf32>
    "tpu.trace_start"() <{level = 10 : i32, message = "bqk,bkd->bqd"}> : () -> ()
    %cst_49 = arith.constant dense<0.000000e+00> : vector<2x17x8xf32>
    %119 = tpu.matmul %118, %106, %cst_49 {dimension_numbers = #tpu.dot_dimension_numbers<[2], [1], [1], [2], [0, 0, 0, 1, 1, 2], [0], [0]>} : vector<2x17x17xf32>, vector<2x17x8xf32>, vector<2x17x8xf32> -> vector<2x17x8xf32>
    "tpu.trace_stop"() : () -> ()
    %120 = tpu.concatenate %71, %87, %103, %119 in 2 : vector<2x17x8xf32>, vector<2x17x8xf32>, vector<2x17x8xf32>, vector<2x17x8xf32> -> vector<2x17x32xf32>
    %121 = vector.extract_strided_slice %120 {offsets = [0, 0, 0], sizes = [1, 17, 32], strides = [1, 1, 1]} : vector<2x17x32xf32> to vector<1x17x32xf32>
    %122 = vector.shape_cast %121 : vector<1x17x32xf32> to vector<17x32xf32>
    %123 = vector.extract_strided_slice %120 {offsets = [1, 0, 0], sizes = [1, 17, 32], strides = [1, 1, 1]} : vector<2x17x32xf32> to vector<1x17x32xf32>
    %124 = vector.shape_cast %123 : vector<1x17x32xf32> to vector<17x32xf32>
    %125 = tpu.concatenate %122, %124 in 0 : vector<17x32xf32>, vector<17x32xf32> -> vector<34x32xf32>
    %cst_50 = arith.constant dense<0.000000e+00> : vector<34x32xf32>
    %126 = tpu.matmul %125, %4, %cst_50 {dimension_numbers = #tpu.dot_dimension_numbers<[1], [0], [0], [1], [0, 0, 1, 1], [], []>} : vector<34x32xf32>, vector<32x32xf32>, vector<34x32xf32> -> vector<34x32xf32>
    %127 = vector.broadcast %5 : vector<1x32xf32> to vector<34x32xf32>
    %128 = arith.addf %126, %127 : vector<34x32xf32>
    %129 = arith.addf %128, %12 : vector<34x32xf32>
    %cst_51 = arith.constant dense<0.000000e+00> : vector<34xf32>
    %130 = vector.multi_reduction <add>, %129, %cst_51 [1] : vector<34x32xf32> to vector<34xf32>
    %131 = vector.shape_cast %130 : vector<34xf32> to vector<34x1xf32>
    %cst_52 = arith.constant 3.200000e+01 : f32
    %132 = vector.broadcast %cst_52 : f32 to vector<34x1xf32>
    %133 = arith.divf %131, %132 : vector<34x1xf32>
    %134 = vector.broadcast %133 : vector<34x1xf32> to vector<34x32xf32>
    %135 = arith.subf %129, %134 : vector<34x32xf32>
    %136 = arith.mulf %135, %135 : vector<34x32xf32>
    %cst_53 = arith.constant dense<0.000000e+00> : vector<34xf32>
    %137 = vector.multi_reduction <add>, %136, %cst_53 [1] : vector<34x32xf32> to vector<34xf32>
    %138 = vector.shape_cast %137 : vector<34xf32> to vector<34x1xf32>
    %cst_54 = arith.constant 3.200000e+01 : f32
    %139 = vector.broadcast %cst_54 : f32 to vector<34x1xf32>
    %140 = arith.divf %138, %139 : vector<34x1xf32>
    %141 = vector.broadcast %133 : vector<34x1xf32> to vector<34x32xf32>
    %142 = arith.subf %129, %141 : vector<34x32xf32>
    %cst_55 = arith.constant 9.99999997E-7 : f32
    %143 = vector.broadcast %cst_55 : f32 to vector<34x1xf32>
    %144 = arith.addf %140, %143 : vector<34x1xf32>
    %145 = math.rsqrt %144 : vector<34x1xf32>
    %146 = vector.broadcast %145 : vector<34x1xf32> to vector<34x32xf32>
    %147 = arith.mulf %142, %146 : vector<34x32xf32>
    %148 = vector.broadcast %6 : vector<1x32xf32> to vector<34x32xf32>
    %149 = arith.mulf %147, %148 : vector<34x32xf32>
    %150 = vector.broadcast %7 : vector<1x32xf32> to vector<34x32xf32>
    %151 = arith.addf %149, %150 : vector<34x32xf32>
    %cst_56 = arith.constant dense<0.000000e+00> : vector<34x64xf32>
    %152 = tpu.matmul %151, %8, %cst_56 {dimension_numbers = #tpu.dot_dimension_numbers<[1], [0], [0], [1], [0, 0, 1, 1], [], []>} : vector<34x32xf32>, vector<32x64xf32>, vector<34x64xf32> -> vector<34x64xf32>
    %153 = vector.broadcast %9 : vector<1x64xf32> to vector<34x64xf32>
    %154 = arith.addf %152, %153 : vector<34x64xf32>
    %cst_57 = arith.constant 5.000000e-01 : f32
    %155 = vector.broadcast %cst_57 : f32 to vector<34x64xf32>
    %156 = arith.mulf %155, %154 : vector<34x64xf32>
    %cst_58 = arith.constant 0.707106769 : f32
    %157 = vector.broadcast %cst_58 : f32 to vector<34x64xf32>
    %158 = arith.mulf %154, %157 : vector<34x64xf32>
    %159 = math.absf %158 : vector<34x64xf32>
    %cst_59 = arith.constant 0.327591091 : f32
    %160 = vector.broadcast %cst_59 : f32 to vector<34x64xf32>
    %161 = arith.mulf %160, %159 : vector<34x64xf32>
    %cst_60 = arith.constant 1.000000e+00 : f32
    %162 = vector.broadcast %cst_60 : f32 to vector<34x64xf32>
    %163 = arith.addf %162, %161 : vector<34x64xf32>
    %cst_61 = arith.constant 1.000000e+00 : f32
    %164 = vector.broadcast %cst_61 : f32 to vector<34x64xf32>
    %165 = arith.divf %164, %163 : vector<34x64xf32>
    %cst_62 = arith.constant 1.06140542 : f32
    %166 = vector.broadcast %cst_62 : f32 to vector<34x64xf32>
    %167 = arith.mulf %166, %165 : vector<34x64xf32>
    %cst_63 = arith.constant -1.45315206 : f32
    %168 = vector.broadcast %cst_63 : f32 to vector<34x64xf32>
    %169 = arith.addf %167, %168 : vector<34x64xf32>
    %170 = arith.mulf %169, %165 : vector<34x64xf32>
    %cst_64 = arith.constant 1.42141378 : f32
    %171 = vector.broadcast %cst_64 : f32 to vector<34x64xf32>
    %172 = arith.addf %170, %171 : vector<34x64xf32>
    %173 = arith.mulf %172, %165 : vector<34x64xf32>
    %cst_65 = arith.constant -0.284496725 : f32
    %174 = vector.broadcast %cst_65 : f32 to vector<34x64xf32>
    %175 = arith.addf %173, %174 : vector<34x64xf32>
    %176 = arith.mulf %175, %165 : vector<34x64xf32>
    %cst_66 = arith.constant 0.254829586 : f32
    %177 = vector.broadcast %cst_66 : f32 to vector<34x64xf32>
    %178 = arith.addf %176, %177 : vector<34x64xf32>
    %179 = arith.mulf %178, %165 : vector<34x64xf32>
    %cst_67 = arith.constant 0.000000e+00 : f32
    %180 = vector.broadcast %cst_67 : f32 to vector<34x64xf32>
    %181 = arith.subf %180, %159 : vector<34x64xf32>
    %182 = arith.mulf %181, %159 : vector<34x64xf32>
    %183 = math.exp %182 : vector<34x64xf32>
    %184 = arith.mulf %179, %183 : vector<34x64xf32>
    %cst_68 = arith.constant 1.000000e+00 : f32
    %185 = vector.broadcast %cst_68 : f32 to vector<34x64xf32>
    %186 = arith.subf %185, %184 : vector<34x64xf32>
    %cst_69 = arith.constant 0.000000e+00 : f32
    %187 = vector.broadcast %cst_69 : f32 to vector<34x64xf32>
    %188 = arith.cmpf oge, %158, %187 : vector<34x64xf32>
    %cst_70 = arith.constant 0.000000e+00 : f32
    %189 = vector.broadcast %cst_70 : f32 to vector<34x64xf32>
    %190 = arith.subf %189, %186 : vector<34x64xf32>
    %191 = arith.select %188, %186, %190 : vector<34x64xi1>, vector<34x64xf32>
    %cst_71 = arith.constant 1.000000e+00 : f32
    %192 = vector.broadcast %cst_71 : f32 to vector<34x64xf32>
    %193 = arith.addf %192, %191 : vector<34x64xf32>
    %194 = arith.mulf %156, %193 : vector<34x64xf32>
    %cst_72 = arith.constant dense<0.000000e+00> : vector<34x32xf32>
    %195 = tpu.matmul %194, %10, %cst_72 {dimension_numbers = #tpu.dot_dimension_numbers<[1], [0], [0], [1], [0, 0, 1, 1], [], []>} : vector<34x64xf32>, vector<64x32xf32>, vector<34x32xf32> -> vector<34x32xf32>
    %196 = vector.broadcast %11 : vector<1x32xf32> to vector<34x32xf32>
    %197 = arith.addf %195, %196 : vector<34x32xf32>
    %198 = arith.addf %197, %129 : vector<34x32xf32>
    %199 = vector.shape_cast %70 : vector<2x17x17xf32> to vector<2x1x17x17xf32>
    %200 = vector.shape_cast %86 : vector<2x17x17xf32> to vector<2x1x17x17xf32>
    %201 = vector.shape_cast %102 : vector<2x17x17xf32> to vector<2x1x17x17xf32>
    %202 = vector.shape_cast %118 : vector<2x17x17xf32> to vector<2x1x17x17xf32>
    %203 = tpu.concatenate %199, %200, %201, %202 in 1 : vector<2x1x17x17xf32>, vector<2x1x17x17xf32>, vector<2x1x17x17xf32>, vector<2x1x17x17xf32> -> vector<2x4x17x17xf32>
    %204 = vector.shape_cast %203 : vector<2x4x17x17xf32> to vector<8x17x17xf32>
    %205 = vector.shape_cast %204 : vector<8x17x17xf32> to vector<2x4x17x17xf32>
    %c0_73 = arith.constant 0 : index
    %c0_74 = arith.constant 0 : index
    %c0_75 = arith.constant 0 : index
    %c0_76 = arith.constant 0 : index
    %206 = vector.load %arg18[%c0_73, %c0_74, %c0_75, %c0_76] : memref<2x4x17x17xf32, #tpu.memory_space<vmem>>, vector<2x4x17x17xf32>
    tpu.vector_store %arg18[%c0_73, %c0_74, %c0_75, %c0_76], %205 {strides = array<i32>} : memref<2x4x17x17xf32, #tpu.memory_space<vmem>>, vector<2x4x17x17xf32>,
    %207 = vector.extract_strided_slice %198 {offsets = [0, 0], sizes = [1, 32], strides = [1, 1]} : vector<34x32xf32> to vector<1x32xf32>
    %208 = vector.extract_strided_slice %198 {offsets = [17, 0], sizes = [1, 32], strides = [1, 1]} : vector<34x32xf32> to vector<1x32xf32>
    %209 = tpu.concatenate %207, %208 in 0 : vector<1x32xf32>, vector<1x32xf32> -> vector<2x32xf32>
    %c0_77 = arith.constant 0 : index
    %c0_78 = arith.constant 0 : index
    %210 = vector.load %arg13[%c0_77, %c0_78] : memref<1x32xf32, #tpu.memory_space<vmem>>, vector<1x32xf32>
    %c0_79 = arith.constant 0 : index
    %c0_80 = arith.constant 0 : index
    %211 = vector.load %arg14[%c0_79, %c0_80] : memref<1x32xf32, #tpu.memory_space<vmem>>, vector<1x32xf32>
    %cst_81 = arith.constant dense<0.000000e+00> : vector<2xf32>
    %212 = vector.multi_reduction <add>, %209, %cst_81 [1] : vector<2x32xf32> to vector<2xf32>
    %213 = vector.shape_cast %212 : vector<2xf32> to vector<2x1xf32>
    %cst_82 = arith.constant 3.200000e+01 : f32
    %214 = vector.broadcast %cst_82 : f32 to vector<2x1xf32>
    %215 = arith.divf %213, %214 : vector<2x1xf32>
    %216 = vector.broadcast %215 : vector<2x1xf32> to vector<2x32xf32>
    %217 = arith.subf %209, %216 : vector<2x32xf32>
    %218 = arith.mulf %217, %217 : vector<2x32xf32>
    %cst_83 = arith.constant dense<0.000000e+00> : vector<2xf32>
    %219 = vector.multi_reduction <add>, %218, %cst_83 [1] : vector<2x32xf32> to vector<2xf32>
    %220 = vector.shape_cast %219 : vector<2xf32> to vector<2x1xf32>
    %cst_84 = arith.constant 3.200000e+01 : f32
    %221 = vector.broadcast %cst_84 : f32 to vector<2x1xf32>
    %222 = arith.divf %220, %221 : vector<2x1xf32>
    %223 = vector.broadcast %215 : vector<2x1xf32> to vector<2x32xf32>
    %224 = arith.subf %209, %223 : vector<2x32xf32>
    %cst_85 = arith.constant 9.99999997E-7 : f32
    %225 = vector.broadcast %cst_85 : f32 to vector<2x1xf32>
    %226 = arith.addf %222, %225 : vector<2x1xf32>
    %227 = math.rsqrt %226 : vector<2x1xf32>
    %228 = vector.broadcast %227 : vector<2x1xf32> to vector<2x32xf32>
    %229 = arith.mulf %224, %228 : vector<2x32xf32>
    %230 = vector.broadcast %210 : vector<1x32xf32> to vector<2x32xf32>
    %231 = arith.mulf %229, %230 : vector<2x32xf32>
    %232 = vector.broadcast %211 : vector<1x32xf32> to vector<2x32xf32>
    %233 = arith.addf %231, %232 : vector<2x32xf32>
    %c0_86 = arith.constant 0 : index
    %c0_87 = arith.constant 0 : index
    %234 = vector.load %arg15[%c0_86, %c0_87] : memref<32x10xf32, #tpu.memory_space<vmem>>, vector<32x10xf32>
    %cst_88 = arith.constant dense<0.000000e+00> : vector<2x10xf32>
    %235 = tpu.matmul %233, %234, %cst_88 {dimension_numbers = #tpu.dot_dimension_numbers<[1], [0], [0], [1], [0, 0, 1, 1], [], []>} : vector<2x32xf32>, vector<32x10xf32>, vector<2x10xf32> -> vector<2x10xf32>
    %c0_89 = arith.constant 0 : index
    %c0_90 = arith.constant 0 : index
    %236 = vector.load %arg16[%c0_89, %c0_90] : memref<1x10xf32, #tpu.memory_space<vmem>>, vector<1x10xf32>
    %237 = vector.broadcast %236 : vector<1x10xf32> to vector<2x10xf32>
    %238 = arith.addf %235, %237 : vector<2x10xf32>
    %c0_91 = arith.constant 0 : index
    %c0_92 = arith.constant 0 : index
    %239 = vector.load %arg17[%c0_91, %c0_92] : memref<2x10xf32, #tpu.memory_space<vmem>>, vector<2x10xf32>
    tpu.vector_store %arg17[%c0_91, %c0_92], %238 {strides = array<i32>} : memref<2x10xf32, #tpu.memory_space<vmem>>, vector<2x10xf32>,
    return
  }
}

</mosaic_0001>

<bundles_post_ra>
// kernel: vit_forward.3
= control target key start
LH: loop header
LB: loop body
LE: loop exit
PB: predicated region body
PF: predicated region fallthrough
CT: control target
= control target key end

     0   :  { %vm75_vm0 = vcmask 392192   ;;  %v203_v10 = vlaneseq  ;;  %vm242_vm1 = vcmask 138240   ;;  %vm245_vm2 = vcmask 131072   ;;  %s6231_s1 = inlined_call_operand.vmem [shape: f32[48,32], index: 1, kind: input, shape index: {}]   ;;  %s6232_s5 = inlined_call_operand.vmem [shape: f32[10,1,32], index: 5, kind: input, shape index: {}]   ;;  %s6233_s6 = inlined_call_operand.vmem [shape: f32[10,1,32], index: 6, kind: input, shape index: {}]   ;;  %s6234_s7 = inlined_call_operand.vmem [shape: f32[10,32,96], index: 7, kind: input, shape index: {}]   ;;  %s6235_s8 = inlined_call_operand.vmem [shape: f32[10,1,96], index: 8, kind: input, shape index: {}]   ;;  %s6236_s9 = inlined_call_operand.vmem [shape: f32[10,32,32], index: 9, kind: input, shape index: {}]   ;;  %s6237_s10 = inlined_call_operand.vmem [shape: f32[10,1,32], index: 10, kind: input, shape index: {}]   ;;  %s6238_s11 = inlined_call_operand.vmem [shape: f32[10,1,32], index: 11, kind: input, shape index: {}]   ;;  %s6239_s12 = inlined_call_operand.vmem [shape: f32[10,1,32], index: 12, kind: input, shape index: {}]   ;;  %s6240_s13 = inlined_call_operand.vmem [shape: f32[10,32,64], index: 13, kind: input, shape index: {}]   ;;  %s6241_s14 = inlined_call_operand.vmem [shape: f32[10,1,64], index: 14, kind: input, shape index: {}]   ;;  %s6242_s15 = inlined_call_operand.vmem [shape: f32[10,64,32], index: 15, kind: input, shape index: {}]   ;;  %s6243_s16 = inlined_call_operand.vmem [shape: f32[10,1,32], index: 16, kind: input, shape index: {}]   ;;  %s6244_s18 = inlined_call_operand.vmem [shape: f32[8,1,17], index: 18, kind: output, shape index: {1}]   ;;  %s6245_s0 = inlined_call_operand.vmem [shape: f32[32,48], index: 0, kind: input, shape index: {}]   ;;  %s6246_s4 = inlined_call_operand.vmem [shape: f32[17,32], index: 4, kind: input, shape index: {}]   ;;  %s6247_s3 = inlined_call_operand.vmem [shape: f32[1,32], index: 3, kind: input, shape index: {}]   ;;  %s6248_s2 = inlined_call_operand.vmem [shape: f32[1,32], index: 2, kind: input, shape index: {}]   ;;  %s6249_s17 = inlined_call_operand.vmem [shape: f32[34,32], index: 17, kind: output, shape index: {0}]  }
   0x1   :  { %6251 = sst [smem:[#allocation3_spill]] %s6231_s1  ;;  %v58_v6 = vld [vmem:[%s6245_s0] sm:$0xff]  ;;  %v60_v7 = vld [vmem:[%s6245_s0 + $0x10] sm:$0xff]  ;;  %v59_v8 = vld [vmem:[%s6245_s0 + $0x8] sm:$0xff]  ;;  %v4881_v15 = vmov 0.0   ;;  %vm181_vm6 = vcmask 1046528  }
   0x2   :  { %6252 = sst [smem:[#allocation4_spill]] %s6232_s5  ;;  %v61_v9 = vld [vmem:[%s6245_s0 + $0x18] sm:$0xff]  ;;  %4215 = vmatprep.mubr.msk.f32.mxu0 %vm75_vm0, %v58_v6  ;;  %4218 = vmatprep.mubr.msk.f32.mxu1 %vm75_vm0, %v60_v7  ;;  %v204_v11 = vshrl.u32 %v203_v10, 7  ;;  %v232_v14 = vand.u32 127, %v203_v10  ;;  %v175_v19 = vld [vmem:[%s6246_s4 + $0x8] sm:$0xff]  ;;  %v174_v22 = vld [vmem:[%s6246_s4] sm:$0xff] }
   0x3   :  { %6253 = sst [smem:[#allocation5_spill]] %s6233_s6  ;;  %v176_v20 = vld [vmem:[%s6246_s4 + $0x10] sm:$0x1]  ;;  %v173_v21 = vld [vmem:[%s6247_s3] sm:$0x1]  ;;  %v183_v23 = vrot.slane %v175_v19, 1 }
   0x4   :  { %s6254_s29 = sld [smem:[#allocation3_spill]]  ;;  %v229_v12 = vadd.s32 8, %v204_v11  ;;  %v230_v13 = vadd.s32 16, %v204_v11  ;;  %vm233_vm3 = vcmp.eq.s32.totalorder %v204_v11, %v232_v14  ;;  %v185_v24 = vrot.slane %v176_v20, 1  ;;  %v3859_v25 = vld [vmem:[%s6248_s2] ss:$0 sm:$0xff] }
   0x5   :  { %v3864_v16 = vsel %vm233_vm3, 1.0, %v4881_v15  ;;  %v177_v26 = vadd.f32 %v174_v22, %v173_v21  ;;  %v205_v27 = vsub.s32 0, %v204_v11  ;;  %v182_v28 = vrot.slane %v174_v22, 1  ;;  %s5087_s5 = smov 0  }
   0x6   :  { %vm234_vm4 = vcmp.eq.s32.totalorder %v229_v12, %v232_v14  ;;  %vm235_vm5 = vcmp.eq.s32.totalorder %v230_v13, %v232_v14  ;;  %243 = vst.msk [vmem:[#allocation2] sm:$0xff] %vm242_vm1, %v3864_v16  ;;  %247 = vst.msk [vmem:[#allocation2 + $0x18] sm:$0xff] %vm242_vm1, %v3864_v16  ;;  %v186_v30 = vsel %vm181_vm6, %v183_v23, %v185_v24  ;;  %vm195_vm7 = vcmask 1040384  }
   0x7   :  { %v3865_v17 = vsel %vm234_vm4, 1.0, %v4881_v15  ;;  %v3866_v18 = vsel %vm235_vm5, 1.0, %v4881_v15  ;;  %250 = vst.msk [vmem:[#allocation2 + $0x30] sm:$0xff] %vm242_vm1, %v3864_v16  ;;  %253 = vst.msk [vmem:[#allocation2 + $0x48] sm:$0xff] %vm242_vm1, %v3864_v16  ;;  %v206_v34 = vrot.slane %v177_v26, %v205_v27  ;;  %v184_v36 = vsel %vm181_vm6, %v182_v28, %v183_v23 }
   0x8   :  { %244 = vst.msk [vmem:[#allocation2 + $0x8] sm:$0xff] %vm242_vm1, %v3865_v17  ;;  %248 = vst.msk [vmem:[#allocation2 + $0x20] sm:$0xff] %vm242_vm1, %v3865_v17  ;;  %vm225_vm8 = vcmask 254976   ;;  %vm210_vm9 = vcmask 1041408   ;;  %vm220_vm10 = vcmask 261120  }
   0x9   :  { %246 = vst.msk [vmem:[#allocation2 + $0x10] sm:$0x1] %vm245_vm2, %v3866_v18  ;;  %249 = vst.msk [vmem:[#allocation2 + $0x28] sm:$0x1] %vm245_vm2, %v3866_v18 }
   0xa   :  { %v67_v0 = vld [vmem:[%s6254_s29 + $0x28] sm:$0xff]  ;;  %v66_v1 = vld [vmem:[%s6254_s29 + $0x20] sm:$0xff]  ;;  %v65_v2 = vld [vmem:[%s6254_s29 + $0x18] sm:$0xff]  ;;  %251 = vst.msk [vmem:[#allocation2 + $0x38] sm:$0xff] %vm242_vm1, %v3865_v17 }
   0xb   :  { %4203 = vmatprep.subr.mxu0 %v67_v0  ;;  %4681 = vmatprep.subr.mxu1 %v67_v0  ;;  %v64_v3 = vld [vmem:[%s6254_s29 + $0x10] sm:$0xff]  ;;  %v63_v4 = vld [vmem:[%s6254_s29 + $0x8] sm:$0xff]  ;;  %v62_v5 = vld [vmem:[%s6254_s29] sm:$0xff]  ;;  %252 = vst.msk [vmem:[#allocation2 + $0x40] sm:$0x1] %vm245_vm2, %v3866_v18 }
   0xc   :  { %4204 = vmatpush3.msra.mxu0 %v67_v0  ;;  %4687 = vmatpush3.msra.mxu1 %v67_v0  ;;  %254 = vst.msk [vmem:[#allocation2 + $0x50] sm:$0xff] %vm242_vm1, %v3865_v17  ;;  %256 = vst.msk [vmem:[#allocation2 + $0x60] sm:$0xff] %vm242_vm1, %v3864_v16 }
   0xd   :  { %4205 = vmatprep.subr.mxu0 %v66_v1  ;;  %4682 = vmatprep.subr.mxu1 %v66_v1  ;;  %255 = vst.msk [vmem:[#allocation2 + $0x58] sm:$0x1] %vm245_vm2, %v3866_v18  ;;  %258 = vst.msk [vmem:[#allocation2 + $0x70] sm:$0x1] %vm245_vm2, %v3866_v18 }
   0xe   :  { %4206 = vmatpush3.msra.mxu0 %v66_v1  ;;  %4688 = vmatpush3.msra.mxu1 %v66_v1  ;;  %257 = vst.msk [vmem:[#allocation2 + $0x68] sm:$0xff] %vm242_vm1, %v3865_v17  ;;  %259 = vst.msk [vmem:[#allocation2 + $0x78] sm:$0xff] %vm242_vm1, %v3864_v16 }
   0xf   :  { %4207 = vmatprep.subr.mxu0 %v65_v2  ;;  %4683 = vmatprep.subr.mxu1 %v65_v2  ;;  %260 = vst.msk [vmem:[#allocation2 + $0x80] sm:$0xff] %vm242_vm1, %v3865_v17  ;;  %262 = vst.msk [vmem:[#allocation2 + $0x90] sm:$0xff] %vm242_vm1, %v3864_v16 }
  0x10   :  { %4208 = vmatpush3.msra.mxu0 %v65_v2  ;;  %4689 = vmatpush3.msra.mxu1 %v65_v2  ;;  %261 = vst.msk [vmem:[#allocation2 + $0x88] sm:$0x1] %vm245_vm2, %v3866_v18  ;;  %264 = vst.msk [vmem:[#allocation2 + $0xa0] sm:$0x1] %vm245_vm2, %v3866_v18 }
  0x11   :  { %4209 = vmatprep.subr.mxu0 %v64_v3  ;;  %4684 = vmatprep.subr.mxu1 %v64_v3  ;;  %263 = vst.msk [vmem:[#allocation2 + $0x98] sm:$0xff] %vm242_vm1, %v3865_v17  ;;  %265 = vst.msk [vmem:[#allocation2 + $0xa8] sm:$0xff] %vm242_vm1, %v3864_v16 }
  0x12   :  { %4210 = vmatpush3.msra.mxu0 %v64_v3  ;;  %4690 = vmatpush3.msra.mxu1 %v64_v3  ;;  %266 = vst.msk [vmem:[#allocation2 + $0xb0] sm:$0xff] %vm242_vm1, %v3865_v17 }
  0x13   :  { %4211 = vmatprep.subr.mxu0 %v63_v4  ;;  %4685 = vmatprep.subr.mxu1 %v63_v4  ;;  %267 = vst.msk [vmem:[#allocation2 + $0xb8] sm:$0x1] %vm245_vm2, %v3866_v18 }
  0x14   :  { %4212 = vmatpush3.msra.mxu0 %v63_v4  ;;  %4691 = vmatpush3.msra.mxu1 %v63_v4 }
  0x15   :  { %4213 = vmatprep.subr.mxu0 %v62_v5  ;;  %4686 = vmatprep.subr.mxu1 %v62_v5 }
  0x16   :  { %4214 = vmatpush3.msra.mxu0 %v62_v5  ;;  %4692 = vmatpush3.msra.mxu1 %v62_v5 }
  0x17   :  { %4216 = vmatmul.mubr.msk.f32.vlgmr.msra.gmra.mxu0 %vm75_vm0, %v59_v8  ;;  %4219 = vmatmul.mubr.msk.f32.vlgmr.msra.gmra.mxu1 %vm75_vm0, %v61_v9 }
  0xd7   :  { %v4217_v29 = vpop.f32.mrf.mxu0  ;;  %v4220_v31 = vpop.f32.mrf.mxu1 }
  0xd8   :  { %v160_v32 = vadd.f32 %v4217_v29, %v3859_v25  ;;  %v170_v33 = vadd.f32 %v4220_v31, %v3859_v25 }
  0xd9   :  { %v154_v35 = vpop.f32.mrf.mxu0  ;;  %v164_v37 = vpop.f32.mrf.mxu1 }
  0xda   :  { %v190_v38 = vadd.f32 %v186_v30, %v160_v32  ;;  %v192_v39 = vadd.f32 %v186_v30, %v170_v33  ;;  %v155_v40 = vadd.f32 %v3859_v25, %v154_v35  ;;  %v165_v41 = vadd.f32 %v3859_v25, %v164_v37 }
  0xdc   :  { %v197_v42 = vrot.slane %v190_v38, 7  ;;  %v212_v43 = vrot.slane %v192_v39, 6  ;;  %v189_v44 = vadd.f32 %v184_v36, %v155_v40  ;;  %v191_v45 = vadd.f32 %v184_v36, %v165_v41 }
  0xde   :  { %v218_v46 = vsel %vm195_vm7, %v197_v42, %v206_v34  ;;  %226 = vst.msk [vmem:[%s6249_s17 + $0x20] sm:$0x3] %vm225_vm8, %v212_v43  ;;  %v196_v47 = vrot.slane %v189_v44, 7  ;;  %v211_v48 = vrot.slane %v191_v45, 6 }
  0xe0   :  { %v198_v49 = vsel %vm195_vm7, %v196_v47, %v197_v42  ;;  %v217_v50 = vsel %vm195_vm7, %v177_v26, %v196_v47  ;;  %v213_v51 = vsel %vm210_vm9, %v211_v48, %v212_v43  ;;  %v219_v52 = vsel %vm210_vm9, %v218_v46, %v211_v48 }
  0xe1   :  { %221 = vst.msk [vmem:[%s6249_s17] sm:$0xff] %vm220_vm10, %v217_v50  ;;  %222 = vst.msk [vmem:[%s6249_s17 + $0x8] sm:$0xff] %vm220_vm10, %v198_v49 }
  0xe2   :  { %223 = vst.msk [vmem:[%s6249_s17 + $0x10] sm:$0xff] %vm220_vm10, %v219_v52  ;;  %224 = vst.msk [vmem:[%s6249_s17 + $0x18] sm:$0xff] %vm220_vm10, %v213_v51 }
  0xe3 LB: > { %v4882_v24 = vmov 0.0   ;;  %s5140_s4 = sshll.u32 %s4879_s5, 5  ;;  %vm4883_vm11 = vmmov 0   ;;  %s6255_s19 = sld [smem:[#allocation4_spill]]  ;;  %vm536_vm12 = vcmask 64512   ;;  %vm2509_vm13 = vcmask 130048   ;;  %s4879_s5 = sphi %s5087_s5, %s273_s5  }
  0xe4   : > { %4221 = vmatprep.subr.mxu0 %v4882_v24  ;;  %4693 = vmatprep.subr.mxu1 %v4882_v24  ;;  %s284_s30 = scalar_lea.vmem %s6234_s7, %s5140_s4  ;;  %s6256_s22 = sld [smem:[#allocation5_spill]]  ;;  %vm2516_vm14 = vcmask 195584   ;;  %vm2986_vm0 = vcmask 523264  }
  0xe5   : > { %v278_v61 = vld [vmem:[%s6249_s17 + $0x20] sm:$0x3]  ;;  %4229 = vmatprep.mubr.msk.f32.mxu0 %vm4883_vm11, %v4882_v24  ;;  %4235 = vmatprep.mubr.msk.f32.mxu1 %vm4883_vm11, %v4882_v24  ;;  %v288_v25 = vld [vmem:[%s284_s30 + $0x18] sm:$0xff]  ;;  %v287_v26 = vld [vmem:[%s284_s30 + $0x10] sm:$0xff]  ;;  %s289_s25 = scalar_lea.vmem %s6235_s8, %s4879_s5  ;;  %s4884_s26 = smov 96  }
  0xe6   : > { %v333_v62 = vsel %vm225_vm8, %v278_v61, 0.0  ;;  %4222 = vmatpush3.msra.mxu0 %v288_v25  ;;  %4697 = vmatpush3.msra.mxu1 %v288_v25  ;;  %v286_v27 = vld [vmem:[%s284_s30 + $0x8] sm:$0xff]  ;;  %v285_v28 = vld [vmem:[%s284_s30] sm:$0xff]  ;;  %s4885_s2 = smov 64   ;;  %s4886_s3 = smov 88  }
  0xe7   : > { %4223 = vmatprep.subr.mxu0 %v4882_v24  ;;  %4694 = vmatprep.subr.mxu1 %v4882_v24  ;;  %s4887_s27 = smov 120   ;;  %s4888_s28 = smov 56  }
  0xe8   : > { %v274_v53 = vld [vmem:[%s6249_s17] sm:$0xff]  ;;  %v275_v54 = vld [vmem:[%s6249_s17 + $0x8] sm:$0xff]  ;;  %4224 = vmatpush3.msra.mxu0 %v287_v26  ;;  %4698 = vmatpush3.msra.mxu1 %v287_v26  ;;  %s4889_s30 = smov 80   ;;  %s4890_s1 = smov 112  }
  0xe9   : > { %v276_v55 = vld [vmem:[%s6249_s17 + $0x10] sm:$0xff]  ;;  %v321_v56 = vsel %vm220_vm10, %v274_v53, 0.0  ;;  %v324_v57 = vsel %vm220_vm10, %v275_v54, 0.0  ;;  %v277_v58 = vld [vmem:[%s6249_s17 + $0x18] sm:$0xff]  ;;  %4225 = vmatprep.subr.mxu0 %v4882_v24  ;;  %4695 = vmatprep.subr.mxu1 %v4882_v24  ;;  %s279_s0 = scalar_lea.vmem %s6255_s19, %s4879_s5  ;;  %s4891_s29 = smov 48  }
  0xea   : > { %322 = vadd.xlane.f32.xlu0 %v321_v56  ;;  %325 = vadd.xlane.f32.xlu1 %v324_v57  ;;  %v327_v59 = vsel %vm220_vm10, %v276_v55, 0.0  ;;  %v330_v60 = vsel %vm220_vm10, %v277_v58, 0.0  ;;  %s281_s6 = scalar_lea.vmem %s6256_s22, %s4879_s5  ;;  %v3869_v45 = vld [vmem:[%s279_s0] ss:$0 sm:$0xff]  ;;  %s4892_s19 = smov 72  }
  0xeb   : > { %4226 = vmatpush3.msra.mxu0 %v286_v27  ;;  %4699 = vmatpush3.msra.mxu1 %v286_v27  ;;  %v3870_v47 = vld [vmem:[%s281_s6] ss:$0 sm:$0xff]  ;;  %s4893_s0 = smov 104   ;;  %s4894_s20 = smov 40  }
  0xec   : > { %4227 = vmatprep.subr.mxu0 %v4882_v24  ;;  %4696 = vmatprep.subr.mxu1 %v4882_v24  ;;  %s4895_s21 = smov 16   ;;  %s4896_s22 = smov 8  }
  0xed   : > { %4228 = vmatpush3.msra.mxu0 %v285_v28  ;;  %4700 = vmatpush3.msra.mxu1 %v285_v28  ;;  %s291_s24 = scalar_lea.vmem %s6236_s9, %s5140_s4  ;;  %s319_s6 = scalar_lea.vmem %s6243_s16, %s4879_s5 }
  0xee   : > { %328 = vadd.xlane.f32.xlu0 %v327_v59  ;;  %331 = vadd.xlane.f32.xlu1 %v330_v60 }
  0xef   : > { %4244 = vmatprep.subr.mxu1 %v4882_v24  ;;  %4274 = vmatprep.subr.mxu0 %v4882_v24 }
  0xf2   : > { %334 = vadd.xlane.f32.xlu0 %v333_v62 }
 0x173   : > { %v323_v63 = vpop.xlane.xlu0 %322  ;;  %v326_v0 = vpop.xlane.xlu1 %325 }
 0x174   : > { %v337_v1 = vmul.f32 0.03125, %v323_v63  ;;  %v338_v2 = vmul.f32 0.03125, %v326_v0 }
 0x176   : > { %v5112_v3 = vsub.f32 %v274_v53, %v337_v1  ;;  %v5114_v4 = vsub.f32 %v275_v54, %v338_v2 }
 0x177   : > { %v329_v5 = vpop.xlane.xlu0 %328  ;;  %v332_v6 = vpop.xlane.xlu1 %331 }
 0x178   : > { %v339_v7 = vmul.f32 0.03125, %v329_v5  ;;  %v340_v8 = vmul.f32 0.03125, %v332_v6  ;;  %v347_v9 = vmul.f32 %v5112_v3, %v5112_v3  ;;  %v348_v10 = vmul.f32 %v5114_v4, %v5114_v4 }
 0x17a   : > { %v352_v11 = vsel %vm220_vm10, %v347_v9, 0.0  ;;  %v5121_v12 = vsub.f32 %v276_v55, %v339_v7  ;;  %v5123_v13 = vsub.f32 %v277_v58, %v340_v8  ;;  %v355_v16 = vsel %vm220_vm10, %v348_v10, 0.0 }
 0x17b   : > { %353 = vadd.xlane.f32.xlu1 %v352_v11  ;;  %v335_v14 = vpop.xlane.xlu0 %334 }
 0x17c   : > { %v341_v15 = vmul.f32 0.03125, %v335_v14  ;;  %v349_v17 = vmul.f32 %v5121_v12, %v5121_v12  ;;  %v350_v18 = vmul.f32 %v5123_v13, %v5123_v13 }
 0x17e   : > { %v358_v19 = vsel %vm220_vm10, %v349_v17, 0.0  ;;  %v5131_v20 = vsub.f32 %v278_v61, %v341_v15  ;;  %v361_v21 = vsel %vm220_vm10, %v350_v18, 0.0 }
 0x17f   : > { %356 = vadd.xlane.f32.xlu1 %v355_v16  ;;  %359 = vadd.xlane.f32.xlu0 %v358_v19 }
 0x180   : > { %v351_v22 = vmul.f32 %v5131_v20, %v5131_v20 }
 0x182   : > { %v364_v23 = vsel %vm225_vm8, %v351_v22, 0.0 }
 0x183   : > { %362 = vadd.xlane.f32.xlu0 %v361_v21  ;;  %365 = vadd.xlane.f32.xlu1 %v364_v23 }
 0x204   : > { %v354_v29 = vpop.xlane.xlu1 %353 }
 0x205   : > { %v367_v30 = vmul.f32 0.03125, %v354_v29 }
 0x207   : > { %v372_v31 = vadd.f32 1e-06, %v367_v30 }
 0x208   : > { %v357_v32 = vpop.xlane.xlu1 %356  ;;  %v360_v33 = vpop.xlane.xlu0 %359 }
 0x209   : > { %4732 = vrsqrt.f32 %v372_v31  ;;  %v368_v34 = vmul.f32 0.03125, %v357_v32  ;;  %v369_v35 = vmul.f32 0.03125, %v360_v33 }
 0x20b   : > { %v373_v36 = vadd.f32 1e-06, %v368_v34  ;;  %v374_v37 = vadd.f32 1e-06, %v369_v35 }
 0x20c   : > { %v366_v38 = vpop.xlane.xlu1 %365  ;;  %v363_v39 = vpop.xlane.xlu0 %362 }
 0x20d   : > { %4734 = vrsqrt.f32 %v373_v36  ;;  %v371_v40 = vmul.f32 0.03125, %v366_v38  ;;  %v370_v41 = vmul.f32 0.03125, %v363_v39 }
 0x20e   : > { %4736 = vrsqrt.f32 %v374_v37 }
 0x20f   : > { %v376_v42 = vadd.f32 1e-06, %v371_v40  ;;  %v375_v43 = vadd.f32 1e-06, %v370_v41 }
 0x211   : > { %4738 = vrsqrt.f32 %v376_v42 }
 0x212   : > { %4740 = vrsqrt.f32 %v375_v43 }
 0x216   : > { %v4733_v44 = vpop.eup %4732 }
 0x217   : > { %v382_v46 = vmul.f32 %v4733_v44, %v5112_v3 }
 0x219   : > { %v393_v48 = vmul.f32 %v3869_v45, %v382_v46 }
 0x21a   : > { %v4735_v49 = vpop.eup %4734 }
 0x21b   : > { %v4737_v50 = vpop.eup %4736  ;;  %v404_v51 = vadd.f32 %v3870_v47, %v393_v48  ;;  %v383_v52 = vmul.f32 %v4735_v49, %v5114_v4  ;;  %v3871_v4 = vld [vmem:[%s289_s25] ss:$0 sm:$0xff]  ;;  %s4897_s25 = smov 24  }
 0x21c   : > { %v384_v53 = vmul.f32 %v4737_v50, %v5121_v12 }
 0x21d   : > { %4230 = vmatmul.mubr.msk.f32.vlgmr.msra.gmra.mxu0 %vm220_vm10, %v404_v51  ;;  %v394_v54 = vmul.f32 %v3869_v45, %v383_v52 }
 0x21e   : > { %v4739_v55 = vpop.eup %4738  ;;  %4232 = vmatprep.mubr.msk.f32.mxu0 %vm4883_vm11, %v4882_v24  ;;  %v395_v56 = vmul.f32 %v3869_v45, %v384_v53 }
 0x21f   : > { %v4741_v57 = vpop.eup %4740  ;;  %v405_v58 = vadd.f32 %v3870_v47, %v394_v54  ;;  %v386_v61 = vmul.f32 %v4739_v55, %v5131_v20 }
 0x220   : > { %v406_v59 = vadd.f32 %v3870_v47, %v395_v56  ;;  %v385_v60 = vmul.f32 %v4741_v57, %v5123_v13 }
 0x221   : > { %4233 = vmatmul.mubr.msk.f32.gmra.mxu0 %vm220_vm10, %v405_v58  ;;  %v397_v0 = vmul.f32 %v3869_v45, %v386_v61 }
 0x222   : > { %4236 = vmatmul.mubr.msk.f32.vlgmr.msra.gmra.mxu1 %vm220_vm10, %v406_v59  ;;  %v396_v62 = vmul.f32 %v3869_v45, %v385_v60  ;;  %4280 = vmatprep.mubr.msk.f32.mxu0 %vm4883_vm11, %v4882_v24 }
 0x223   : > { %4238 = vmatprep.mubr.msk.f32.mxu1 %vm4883_vm11, %v4882_v24  ;;  %v408_v1 = vadd.f32 %v3870_v47, %v397_v0 }
 0x224   : > { %v407_v63 = vadd.f32 %v3870_v47, %v396_v62 }
 0x226   : > { %4239 = vmatmul.mubr.msk.f32.gmra.mxu1 %vm220_vm10, %v407_v63 }
 0x227   : > { %4241 = vmatprep.mubr.msk.f32.mxu1 %vm4883_vm11, %v4882_v24 }
 0x22a   : > { %4242 = vmatmul.mubr.msk.f32.gmra.mxu1 %vm220_vm10, %v408_v1 }
 0x22b   : > { %4250 = vmatprep.mubr.msk.f32.mxu1 %vm4883_vm11, %v4882_v24 }
 0x2dd   : > { %v496_v2 = vpop.f32.mrf.mxu0 }
 0x2de   : > { %v5196_v11 = vadd.f32 %v3871_v4, %v496_v2 }
 0x2df   : > { %v4231_v3 = vpop.f32.mrf.mxu0 }
 0x2e1   : > { %v501_v5 = vpop.f32.mrf.mxu0 }
 0x2e2   : > { %v5190_v6 = vadd.f32 %v3871_v4, %v501_v5  ;;  %v506_v7 = vpop.f32.mrf.mxu1 }
 0x2e3   : > { %v5192_v8 = vadd.f32 %v3871_v4, %v506_v7  ;;  %v4234_v9 = vpop.f32.mrf.mxu0 }
 0x2e4   : > { %v4237_v10 = vpop.f32.mrf.mxu1  ;;  %532 = vrot.lane.b32.xlu1 %v5190_v6, %s4884_s26 }
 0x2e5   : > { %534 = vrot.lane.b32.xlu0 %v5192_v8, %s4884_s26  ;;  %v523_v21 = vrot.slane %v5192_v8, 1 }
 0x2e6   : > { %v511_v12 = vpop.f32.mrf.mxu1 }
 0x2e7   : > { %v512_v14 = vadd.f32 %v3871_v4, %v511_v12 }
 0x2e8   : > { %v4240_v13 = vpop.f32.mrf.mxu1  ;;  %530 = vrot.lane.b32.xlu1 %v5196_v11, %s4884_s26 }
 0x2e9   : > { %v524_v18 = vrot.slane %v512_v14, 1 }
 0x2ea   : > { %v516_v15 = vpop.f32.mrf.mxu1 }
 0x2eb   : > { %v517_v16 = vadd.f32 %v3871_v4, %v516_v15  ;;  %v5209_v22 = vsel %vm181_vm6, %v523_v21, %v524_v18 }
 0x2ec   : > { %v4243_v17 = vpop.f32.mrf.mxu1 }
 0x2ed   : > { %v5199_v19 = vrot.slane %v517_v16, 1 }
 0x2ef   : > { %633 = vrot.lane.b32.xlu1 %v5199_v19, %s4884_s26  ;;  %v5204_v20 = vsel %vm181_vm6, %v524_v18, %v5199_v19 }
 0x2f0   : > { %631 = vrot.lane.b32.xlu0 %v5204_v20, %s4884_s26 }
 0x2f3   : > { %629 = vrot.lane.b32.xlu1 %v5209_v22, %s4884_s26  ;;  %s298_s26 = scalar_lea.vmem %s6238_s11, %s4879_s5 }
 0x2f4   : > { %801 = vrot.lane.b32.xlu0 %v5190_v6, %s4885_s2 }
 0x2f7   : > { %803 = vrot.lane.b32.xlu1 %v5192_v8, %s4885_s2 }
 0x2f8   : > { %902 = vrot.lane.b32.xlu0 %v5199_v19, %s4885_s2 }
 0x2fb   : > { %799 = vrot.lane.b32.xlu1 %v5196_v11, %s4885_s2 }
 0x2fc   : > { %900 = vrot.lane.b32.xlu0 %v5204_v20, %s4885_s2 }
 0x2ff   : > { %1007 = vrot.lane.b32.xlu1 %v5192_v8, %s4886_s3 }
 0x303   : > { %1005 = vrot.lane.b32.xlu1 %v5190_v6, %s4886_s3 }
 0x307   : > { %1003 = vrot.lane.b32.xlu1 %v5196_v11, %s4886_s3 }
 0x30b   : > { %997 = vrot.lane.b32.xlu1 %v5196_v11, %s4887_s27 }
 0x30f   : > { %1111 = vrot.lane.b32.xlu1 %v5199_v19, %s4886_s3 }
 0x356   : > { %v533_v25 = vpop.permute.xlu1 %532 }
 0x357   : > { %v535_v23 = vpop.permute.xlu0 %534 }
 0x358   : > { %4245 = vmatpush3.xpose.msk.msra.mxu1 %vm536_vm12, %v535_v23 }
 0x359   : > { %4246 = vmatprep.subr.mxu1 %v4882_v24 }
 0x35a   : > { %v531_v26 = vpop.permute.xlu1 %530 }
 0x35c   : > { %4247 = vmatpush3.xpose.msk.msra.mxu1 %vm536_vm12, %v533_v25 }
 0x35d   : > { %4248 = vmatprep.subr.mxu1 %v4882_v24 }
 0x360   : > { %4249 = vmatpush3.xpose.msk.msra.mxu1 %vm536_vm12, %v531_v26 }
 0x361   : > { %v634_v27 = vpop.permute.xlu1 %633  ;;  %4259 = vmatprep.subr.mxu1 %v4882_v24 }
 0x362   : > { %v632_v28 = vpop.permute.xlu0 %631 }
 0x363   : > { %4251 = vmatmul.mubr.msk.f32.vlgmr.msra.gmra.mxu1 %vm536_vm12, %v5196_v11 }
 0x364   : > { %4260 = vmatpush3.xpose.msk.msra.mxu1 %vm536_vm12, %v634_v27  ;;  %4253 = vmatprep.mubr.msk.f32.mxu1 %vm4883_vm11, %v4882_v24 }
 0x365   : > { %v630_v29 = vpop.permute.xlu1 %629  ;;  %4261 = vmatprep.subr.mxu1 %v4882_v24 }
 0x366   : > { %v802_v30 = vpop.permute.xlu0 %801 }
 0x367   : > { %4254 = vmatmul.mubr.msk.f32.gmra.mxu1 %vm536_vm12, %v5190_v6 }
 0x368   : > { %4262 = vmatpush3.xpose.msk.msra.mxu1 %vm536_vm12, %v632_v28  ;;  %4256 = vmatprep.mubr.msk.f32.mxu1 %vm4883_vm11, %v4882_v24 }
 0x369   : > { %v804_v31 = vpop.permute.xlu1 %803  ;;  %4263 = vmatprep.subr.mxu1 %v4882_v24 }
 0x36a   : > { %4275 = vmatpush3.msk.msra.mxu0 %vm195_vm7, %v804_v31  ;;  %v903_v32 = vpop.permute.xlu0 %902 }
 0x36b   : > { %4257 = vmatmul.mubr.msk.f32.gmra.mxu1 %vm536_vm12, %v5192_v8  ;;  %4276 = vmatprep.subr.mxu0 %v4882_v24 }
 0x36c   : > { %4264 = vmatpush3.xpose.msk.msra.mxu1 %vm536_vm12, %v630_v29  ;;  %4277 = vmatpush3.msra.mxu0 %v802_v30 }
 0x36d   : > { %4278 = vmatprep.subr.mxu0 %v4882_v24  ;;  %v800_v33 = vpop.permute.xlu1 %799  ;;  %4265 = vmatprep.mubr.msk.f32.mxu1 %vm4883_vm11, %v4882_v24 }
 0x36e   : > { %4279 = vmatpush3.msra.mxu0 %v800_v33  ;;  %4289 = vmatprep.subr.mxu1 %v4882_v24  ;;  %v901_v34 = vpop.permute.xlu0 %900 }
 0x36f   : > { %4266 = vmatmul.mubr.msk.f32.vlgmr.msra.gmra.mxu1 %vm536_vm12, %v5209_v22  ;;  %4304 = vmatprep.subr.mxu0 %v4882_v24 }
 0x370   : > { %4290 = vmatpush3.msk.msra.mxu1 %vm195_vm7, %v903_v32  ;;  %4268 = vmatprep.mubr.msk.f32.mxu1 %vm4883_vm11, %v4882_v24 }
 0x371   : > { %4291 = vmatprep.subr.mxu1 %v4882_v24  ;;  %v5285_v59 = vpop.permute.xlu1 %1007 }
 0x372   : > { %4292 = vmatpush3.msra.mxu1 %v901_v34 }
 0x373   : > { %4269 = vmatmul.mubr.msk.f32.gmra.mxu1 %vm536_vm12, %v5204_v20  ;;  %4293 = vmatprep.subr.mxu1 %v4882_v24 }
 0x374   : > { %4271 = vmatprep.mubr.msk.f32.mxu1 %vm4883_vm11, %v4882_v24 }
 0x375   : > { %v5287_v60 = vpop.permute.xlu1 %1005 }
 0x377   : > { %4272 = vmatmul.mubr.msk.f32.gmra.mxu1 %vm536_vm12, %v5199_v19 }
 0x378   : > { %4295 = vmatprep.mubr.msk.f32.mxu1 %vm4883_vm11, %v4882_v24 }
 0x379   : > { %v5289_v61 = vpop.permute.xlu1 %1003 }
 0x37d   : > { %v5291_v62 = vpop.permute.xlu1 %997 }
 0x381   : > { %v5293_v63 = vpop.permute.xlu1 %1111 }
 0x423   : > { %v615_v35 = vpop.f32.mrf.mxu1 }
 0x424   : > { %v727_v36 = vmul.f32 0.35355338, %v615_v35 }
 0x425   : > { %v4252_v37 = vpop.f32.mrf.mxu1 }
 0x426   : > { %v733_v38 = vsel %vm242_vm1, %v727_v36, -inf }
 0x427   : > { %734 = vmax.xlane.f32.xlu0 %v733_v38  ;;  %v620_v39 = vpop.f32.mrf.mxu1 }
 0x428   : > { %v728_v40 = vmul.f32 0.35355338, %v620_v39 }
 0x429   : > { %v4255_v41 = vpop.f32.mrf.mxu1 }
 0x42a   : > { %v736_v42 = vsel %vm242_vm1, %v728_v40, -inf }
 0x42b   : > { %737 = vmax.xlane.f32.xlu1 %v736_v42  ;;  %v625_v43 = vpop.f32.mrf.mxu1 }
 0x42c   : > { %v729_v44 = vmul.f32 0.35355338, %v625_v43 }
 0x42d   : > { %v4258_v45 = vpop.f32.mrf.mxu1 }
 0x42e   : > { %v739_v46 = vsel %vm245_vm2, %v729_v44, -inf }
 0x42f   : > { %740 = vmax.xlane.f32.xlu0 %v739_v46  ;;  %v713_v47 = vpop.f32.mrf.mxu1 }
 0x430   : > { %v730_v48 = vmul.f32 0.35355338, %v713_v47 }
 0x431   : > { %v4267_v49 = vpop.f32.mrf.mxu1 }
 0x432   : > { %v742_v50 = vsel %vm242_vm1, %v730_v48, -inf }
 0x433   : > { %743 = vmax.xlane.f32.xlu0 %v742_v50  ;;  %v718_v51 = vpop.f32.mrf.mxu1 }
 0x434   : > { %v731_v52 = vmul.f32 0.35355338, %v718_v51 }
 0x435   : > { %v4270_v53 = vpop.f32.mrf.mxu1 }
 0x436   : > { %v745_v54 = vsel %vm242_vm1, %v731_v52, -inf }
 0x437   : > { %746 = vmax.xlane.f32.xlu0 %v745_v54  ;;  %v723_v55 = vpop.f32.mrf.mxu1 }
 0x438   : > { %v732_v56 = vmul.f32 0.35355338, %v723_v55 }
 0x439   : > { %v4273_v57 = vpop.f32.mrf.mxu1 }
 0x43a   : > { %v748_v58 = vsel %vm245_vm2, %v732_v56, -inf }
 0x43b   : > { %749 = vmax.xlane.f32.xlu1 %v748_v58 }
 0x44c   : > { %999 = vrot.lane.b32.xlu1 %v5190_v6, %s4887_s27 }
 0x44d   : > { %898 = vrot.lane.b32.xlu0 %v5209_v22, %s4885_s2 }
 0x4b0   : > { %v735_v0 = vpop.xlane.xlu0 %734 }
 0x4b1   : > { %v751_v1 = vsub.f32 %v727_v36, %v735_v0 }
 0x4b3   : > { %v757_v2 = vmul.f32 1.442695, %v751_v1 }
 0x4b4   : > { %v738_v3 = vpop.xlane.xlu1 %737 }
 0x4b5   : > { %4742 = vpow2.f32 %v757_v2  ;;  %v752_v4 = vsub.f32 %v728_v40, %v738_v3 }
 0x4b7   : > { %v759_v5 = vmul.f32 1.442695, %v752_v4 }
 0x4b8   : > { %v741_v7 = vpop.xlane.xlu0 %740 }
 0x4b9   : > { %4744 = vpow2.f32 %v759_v5  ;;  %v753_v9 = vsub.f32 %v729_v44, %v741_v7 }
 0x4bb   : > { %v761_v10 = vmul.f32 1.442695, %v753_v9 }
 0x4bc   : > { %v744_v12 = vpop.xlane.xlu0 %743 }
 0x4bd   : > { %4746 = vpow2.f32 %v761_v10  ;;  %v754_v25 = vsub.f32 %v730_v48, %v744_v12 }
 0x4bf   : > { %v763_v26 = vmul.f32 1.442695, %v754_v25 }
 0x4c0   : > { %v747_v13 = vpop.xlane.xlu0 %746 }
 0x4c1   : > { %v755_v27 = vsub.f32 %v731_v52, %v747_v13  ;;  %4748 = vpow2.f32 %v763_v26 }
 0x4c2   : > { %v4743_v14 = vpop.eup %4742 }
 0x4c3   : > { %v769_v15 = vsel %vm242_vm1, %v4743_v14, 0.0  ;;  %v765_v29 = vmul.f32 1.442695, %v755_v27 }
 0x4c4   : > { %770 = vadd.xlane.f32.xlu0 %v769_v15  ;;  %v899_v16 = vpop.permute.xlu0 %898  ;;  %v750_v28 = vpop.xlane.xlu1 %749 }
 0x4c5   : > { %4294 = vmatpush3.msra.mxu1 %v899_v16  ;;  %v756_v30 = vsub.f32 %v732_v56, %v750_v28  ;;  %4750 = vpow2.f32 %v765_v29 }
 0x4c6   : > { %v4745_v17 = vpop.eup %4744  ;;  %4701 = vmatprep.subr.mxu1 %v4882_v24 }
 0x4c7   : > { %v772_v18 = vsel %vm242_vm1, %v4745_v17, 0.0  ;;  %v767_v31 = vmul.f32 1.442695, %v756_v30 }
 0x4c8   : > { %773 = vadd.xlane.f32.xlu1 %v772_v18  ;;  %v1000_v38 = vpop.permute.xlu1 %999 }
 0x4c9   : > { %4752 = vpow2.f32 %v767_v31 }
 0x4ca   : > { %v4747_v21 = vpop.eup %4746 }
 0x4cb   : > { %v775_v23 = vsel %vm245_vm2, %v4747_v21, 0.0 }
 0x4cc   : > { %776 = vadd.xlane.f32.xlu0 %v775_v23 }
 0x4ce   : > { %v4749_v32 = vpop.eup %4748 }
 0x4cf   : > { %v778_v33 = vsel %vm242_vm1, %v4749_v32, 0.0 }
 0x4d2   : > { %v5304_v34 = vpop.eup %4750 }
 0x4d3   : > { %v781_v35 = vsel %vm242_vm1, %v5304_v34, 0.0 }
 0x4d6   : > { %v5308_v36 = vpop.eup %4752 }
 0x4d7   : > { %v784_v37 = vsel %vm245_vm2, %v5308_v36, 0.0 }
 0x4d9   : > { %1001 = vrot.lane.b32.xlu1 %v5192_v8, %s4887_s27 }
 0x4e2   : > { %1109 = vrot.lane.b32.xlu0 %v5204_v20, %s4886_s3 }
 0x4fd   : > { %779 = vadd.xlane.f32.xlu1 %v778_v33 }
 0x501   : > { %782 = vadd.xlane.f32.xlu0 %v781_v35 }
 0x505   : > { %785 = vadd.xlane.f32.xlu0 %v784_v37 }
 0x50e   : > { %1101 = vrot.lane.b32.xlu1 %v5209_v22, %s4887_s27 }
 0x512   : > { %1105 = vrot.lane.b32.xlu1 %v5199_v19, %s4887_s27 }
 0x51b   : > { %1107 = vrot.lane.b32.xlu0 %v5209_v22, %s4886_s3  ;;  %s296_s3 = scalar_lea.vmem %s6237_s10, %s4879_s5 }
 0x51f   : > { %1103 = vrot.lane.b32.xlu0 %v5204_v20, %s4887_s27  ;;  %s300_s27 = scalar_lea.vmem %s6239_s12, %s4879_s5 }
 0x54d   : > { %v771_v39 = vpop.xlane.xlu0 %770 }
 0x54e   : > { %4754 = vrcp.f32 %v771_v39 }
 0x551   : > { %v774_v40 = vpop.xlane.xlu1 %773 }
 0x552   : > { %4756 = vrcp.f32 %v774_v40 }
 0x555   : > { %v777_v41 = vpop.xlane.xlu0 %776  ;;  %v1002_v49 = vpop.permute.xlu1 %1001 }
 0x556   : > { %4758 = vrcp.f32 %v777_v41 }
 0x559   : > { %v1110_v48 = vpop.permute.xlu0 %1109 }
 0x55b   : > { %v4755_v42 = vpop.eup %4754 }
 0x55c   : > { %v5320_v43 = vmul.f32 %v4755_v42, %v4743_v14 }
 0x55e   : > { %4281 = vmatmul.mubr.msk.f32.vlgmr.msra.gmra.mxu0 %vm242_vm1, %v5320_v43 }
 0x55f   : > { %v4757_v44 = vpop.eup %4756  ;;  %4305 = vmatpush3.xpose.msk.msra.mxu0 %vm536_vm12, %v5285_v59  ;;  %4283 = vmatprep.mubr.msk.f32.mxu0 %vm4883_vm11, %v4882_v24 }
 0x560   : > { %4306 = vmatprep.subr.mxu0 %v4882_v24  ;;  %v5329_v45 = vmul.f32 %v4757_v44, %v4745_v17 }
 0x562   : > { %4284 = vmatmul.mubr.msk.f32.gmra.mxu0 %vm242_vm1, %v5329_v45 }
 0x563   : > { %v4759_v46 = vpop.eup %4758  ;;  %4307 = vmatpush3.xpose.msk.msra.mxu0 %vm536_vm12, %v5287_v60  ;;  %4286 = vmatprep.mubr.msk.f32.mxu0 %vm4883_vm11, %v4882_v24 }
 0x564   : > { %4308 = vmatprep.subr.mxu0 %v4882_v24  ;;  %v5338_v47 = vmul.f32 %v4759_v46, %v4747_v21 }
 0x566   : > { %4287 = vmatmul.mubr.msk.f32.gmra.mxu0 %vm242_vm1, %v5338_v47 }
 0x567   : > { %4309 = vmatpush3.xpose.msk.msra.mxu0 %vm536_vm12, %v5289_v61  ;;  %4310 = vmatprep.mubr.msk.f32.mxu0 %vm4883_vm11, %v4882_v24 }
 0x568   : > { %4319 = vmatprep.subr.mxu0 %v4882_v24 }
 0x56a   : > { %4311 = vmatmul.mubr.msk.f32.vlgmr.msra.gmra.mxu0 %vm536_vm12, %v5291_v62 }
 0x56b   : > { %4320 = vmatpush3.xpose.msk.msra.mxu0 %vm536_vm12, %v5293_v63  ;;  %4313 = vmatprep.mubr.msk.f32.mxu0 %vm4883_vm11, %v4882_v24 }
 0x56c   : > { %4321 = vmatprep.subr.mxu0 %v4882_v24 }
 0x56e   : > { %4314 = vmatmul.mubr.msk.f32.gmra.mxu0 %vm536_vm12, %v1000_v38 }
 0x56f   : > { %4322 = vmatpush3.xpose.msk.msra.mxu0 %vm536_vm12, %v1110_v48  ;;  %4316 = vmatprep.mubr.msk.f32.mxu0 %vm4883_vm11, %v4882_v24 }
 0x570   : > { %4323 = vmatprep.subr.mxu0 %v4882_v24 }
 0x572   : > { %4317 = vmatmul.mubr.msk.f32.gmra.mxu0 %vm536_vm12, %v1002_v49 }
 0x573   : > { %4325 = vmatprep.mubr.msk.f32.mxu0 %vm4883_vm11, %v4882_v24 }
 0x586   : > { %v780_v50 = vpop.xlane.xlu1 %779 }
 0x587   : > { %4760 = vrcp.f32 %v780_v50 }
 0x58a   : > { %v783_v51 = vpop.xlane.xlu0 %782  ;;  %v1102_v55 = vpop.permute.xlu1 %1101 }
 0x58b   : > { %4762 = vrcp.f32 %v783_v51 }
 0x58e   : > { %v786_v52 = vpop.xlane.xlu0 %785  ;;  %v1106_v62 = vpop.permute.xlu1 %1105 }
 0x58f   : > { %4764 = vrcp.f32 %v786_v52 }
 0x592   : > { %v1108_v53 = vpop.permute.xlu0 %1107 }
 0x593   : > { %4324 = vmatpush3.xpose.msk.msra.mxu0 %vm536_vm12, %v1108_v53 }
 0x594   : > { %v4761_v54 = vpop.eup %4760  ;;  %4334 = vmatprep.subr.mxu0 %v4882_v24 }
 0x595   : > { %v5364_v56 = vmul.f32 %v4761_v54, %v4749_v32 }
 0x596   : > { %4326 = vmatmul.mubr.msk.f32.vlgmr.msra.gmra.mxu0 %vm536_vm12, %v1102_v55  ;;  %v1104_v61 = vpop.permute.xlu0 %1103 }
 0x597   : > { %4296 = vmatmul.mubr.msk.f32.vlgmr.msra.gmra.mxu1 %vm242_vm1, %v5364_v56  ;;  %4340 = vmatprep.mubr.msk.f32.mxu0 %vm4883_vm11, %v4882_v24 }
 0x598   : > { %v4763_v57 = vpop.eup %4762  ;;  %4704 = vmatpush3.xpose.msk.msra.mxu1 %vm536_vm12, %v5293_v63  ;;  %4298 = vmatprep.mubr.msk.f32.mxu1 %vm4883_vm11, %v4882_v24 }
 0x599   : > { %4702 = vmatprep.subr.mxu1 %v4882_v24  ;;  %v5377_v58 = vmul.f32 %v4763_v57, %v5304_v34 }
 0x59b   : > { %4299 = vmatmul.mubr.msk.f32.gmra.mxu1 %vm242_vm1, %v5377_v58 }
 0x59c   : > { %v4765_v59 = vpop.eup %4764  ;;  %4705 = vmatpush3.xpose.msk.msra.mxu1 %vm536_vm12, %v1110_v48  ;;  %4301 = vmatprep.mubr.msk.f32.mxu1 %vm4883_vm11, %v4882_v24 }
 0x59d   : > { %4703 = vmatprep.subr.mxu1 %v4882_v24  ;;  %v5386_v60 = vmul.f32 %v4765_v59, %v5308_v36 }
 0x59f   : > { %4302 = vmatmul.mubr.msk.f32.gmra.mxu1 %vm242_vm1, %v5386_v60 }
 0x5a0   : > { %4706 = vmatpush3.xpose.msk.msra.mxu1 %vm536_vm12, %v1108_v53  ;;  %4328 = vmatprep.mubr.msk.f32.mxu1 %vm4883_vm11, %v4882_v24 }
 0x5a1   : > { %4349 = vmatprep.subr.mxu1 %v4882_v24 }
 0x5a3   : > { %4329 = vmatmul.mubr.msk.f32.vlgmr.msra.gmra.mxu1 %vm536_vm12, %v1104_v61 }
 0x5a4   : > { %4331 = vmatprep.mubr.msk.f32.mxu1 %vm4883_vm11, %v4882_v24 }
 0x5a7   : > { %4332 = vmatmul.mubr.msk.f32.gmra.mxu1 %vm536_vm12, %v1106_v62 }
 0x5a8   : > { %4355 = vmatprep.mubr.msk.f32.mxu1 %vm4883_vm11, %v4882_v24 }
 0x61e   : > { %v5400_v63 = vpop.f32.mrf.mxu0 }
 0x620   : > { %v4282_v0 = vpop.f32.mrf.mxu0 }
 0x622   : > { %v5402_v1 = vpop.f32.mrf.mxu0 }
 0x624   : > { %v4285_v2 = vpop.f32.mrf.mxu0 }
 0x626   : > { %v5404_v3 = vpop.f32.mrf.mxu0 }
 0x628   : > { %v4288_v4 = vpop.f32.mrf.mxu0 }
 0x62a   : > { %v1087_v5 = vpop.f32.mrf.mxu0 }
 0x62b   : > { %v1205_v7 = vmul.f32 0.35355338, %v1087_v5 }
 0x62c   : > { %v4312_v9 = vpop.f32.mrf.mxu0 }
 0x62d   : > { %v1211_v10 = vsel %vm242_vm1, %v1205_v7, -inf }
 0x62e   : > { %1212 = vmax.xlane.f32.xlu0 %v1211_v10  ;;  %v1092_v12 = vpop.f32.mrf.mxu0 }
 0x62f   : > { %v1206_v13 = vmul.f32 0.35355338, %v1092_v12 }
 0x630   : > { %v4315_v14 = vpop.f32.mrf.mxu0 }
 0x631   : > { %v1214_v15 = vsel %vm242_vm1, %v1206_v13, -inf }
 0x632   : > { %1215 = vmax.xlane.f32.xlu1 %v1214_v15  ;;  %v1097_v16 = vpop.f32.mrf.mxu0 }
 0x633   : > { %v1207_v17 = vmul.f32 0.35355338, %v1097_v16 }
 0x634   : > { %v4318_v18 = vpop.f32.mrf.mxu0 }
 0x635   : > { %v1217_v21 = vsel %vm245_vm2, %v1207_v17, -inf }
 0x636   : > { %1218 = vmax.xlane.f32.xlu0 %v1217_v21 }
 0x643   : > { %1279 = vrot.lane.b32.xlu1 %v5190_v6, %s4888_s28 }
 0x647   : > { %1277 = vrot.lane.b32.xlu1 %v5196_v11, %s4888_s28 }
 0x64b   : > { %1380 = vrot.lane.b32.xlu1 %v5199_v19, %s4888_s28 }
 0x64f   : > { %1378 = vrot.lane.b32.xlu1 %v5204_v20, %s4888_s28 }
 0x653   : > { %1483 = vrot.lane.b32.xlu1 %v5190_v6, %s4889_s30 }
 0x656   : > { %v1191_v23 = vpop.f32.mrf.mxu0 }
 0x657   : > { %v1208_v25 = vmul.f32 0.35355338, %v1191_v23  ;;  %v5419_v26 = vpop.f32.mrf.mxu1 }
 0x658   : > { %v4327_v27 = vpop.f32.mrf.mxu0 }
 0x659   : > { %v4297_v28 = vpop.f32.mrf.mxu1  ;;  %v1220_v29 = vsel %vm242_vm1, %v1208_v25, -inf }
 0x65a   : > { %1221 = vmax.xlane.f32.xlu0 %v1220_v29 }
 0x65b   : > { %v5422_v30 = vpop.f32.mrf.mxu1 }
 0x65d   : > { %v4300_v31 = vpop.f32.mrf.mxu1 }
 0x65f   : > { %v5424_v32 = vpop.f32.mrf.mxu1 }
 0x661   : > { %v4303_v33 = vpop.f32.mrf.mxu1 }
 0x663   : > { %v1196_v34 = vpop.f32.mrf.mxu1 }
 0x664   : > { %v1209_v35 = vmul.f32 0.35355338, %v1196_v34 }
 0x665   : > { %v4330_v36 = vpop.f32.mrf.mxu1 }
 0x666   : > { %v1223_v37 = vsel %vm242_vm1, %v1209_v35, -inf }
 0x667   : > { %v1201_v38 = vpop.f32.mrf.mxu1  ;;  %1224 = vmax.xlane.f32.xlu0 %v1223_v37 }
 0x668   : > { %v5427_v40 = vmul.f32 0.35355338, %v1201_v38 }
 0x669   : > { %v4333_v39 = vpop.f32.mrf.mxu1 }
 0x66a   : > { %v1226_v41 = vsel %vm245_vm2, %v5427_v40, -inf }
 0x677   : > { %1227 = vmax.xlane.f32.xlu1 %v1226_v41 }
 0x67d   : > { %1281 = vrot.lane.b32.xlu0 %v5192_v8, %s4888_s28 }
 0x681   : > { %1485 = vrot.lane.b32.xlu0 %v5192_v8, %s4889_s30 }
 0x685   : > { %1376 = vrot.lane.b32.xlu0 %v5209_v22, %s4888_s28  ;;  %s3868_s28 = sshll.u32 %s4879_s5, 6 }
 0x688   : > { %1481 = vrot.lane.b32.xlu1 %v5196_v11, %s4889_s30 }
 0x689   : > { %1589 = vrot.lane.b32.xlu0 %v5199_v19, %s4889_s30 }
 0x6b7   : > { %v1213_v42 = vpop.xlane.xlu0 %1212 }
 0x6b8   : > { %v1229_v44 = vsub.f32 %v1205_v7, %v1213_v42 }
 0x6ba   : > { %v1235_v46 = vmul.f32 1.442695, %v1229_v44 }
 0x6bb   : > { %v1216_v48 = vpop.xlane.xlu1 %1215 }
 0x6bc   : > { %4766 = vpow2.f32 %v1235_v46  ;;  %v1230_v49 = vsub.f32 %v1206_v13, %v1216_v48 }
 0x6be   : > { %v1237_v50 = vmul.f32 1.442695, %v1230_v49 }
 0x6bf   : > { %v1280_v51 = vpop.permute.xlu1 %1279  ;;  %v1219_v52 = vpop.xlane.xlu0 %1218 }
 0x6c0   : > { %4768 = vpow2.f32 %v1237_v50  ;;  %v1231_v53 = vsub.f32 %v1207_v17, %v1219_v52 }
 0x6c2   : > { %v1239_v54 = vmul.f32 1.442695, %v1231_v53 }
 0x6c3   : > { %v1278_v55 = vpop.permute.xlu1 %1277 }
 0x6c4   : > { %4770 = vpow2.f32 %v1239_v54 }
 0x6c7   : > { %v1381_v57 = vpop.permute.xlu1 %1380 }
 0x6c8   : > { %4350 = vmatpush3.msk.msra.mxu1 %vm195_vm7, %v1381_v57 }
 0x6c9   : > { %v5442_v59 = vpop.eup %4766  ;;  %4351 = vmatprep.subr.mxu1 %v4882_v24 }
 0x6ca   : > { %v1247_v61 = vsel %vm242_vm1, %v5442_v59, 0.0 }
 0x6cb   : > { %v1379_v62 = vpop.permute.xlu1 %1378  ;;  %1248 = vadd.xlane.f32.xlu0 %v1247_v61 }
 0x6cc   : > { %4352 = vmatpush3.msra.mxu1 %v1379_v62 }
 0x6cd   : > { %v5447_v0 = vpop.eup %4768  ;;  %4353 = vmatprep.subr.mxu1 %v4882_v24 }
 0x6ce   : > { %v1250_v2 = vsel %vm242_vm1, %v5447_v0, 0.0 }
 0x6cf   : > { %1251 = vadd.xlane.f32.xlu1 %v1250_v2  ;;  %v1484_v21 = vpop.permute.xlu1 %1483 }
 0x6d1   : > { %v5452_v4 = vpop.eup %4770 }
 0x6d2   : > { %v1253_v5 = vsel %vm245_vm2, %v5452_v4, 0.0 }
 0x6d3   : > { %1254 = vadd.xlane.f32.xlu1 %v1253_v5 }
 0x6e3   : > { %v1222_v7 = vpop.xlane.xlu0 %1221 }
 0x6e4   : > { %v1232_v9 = vsub.f32 %v1208_v25, %v1222_v7  ;;  %1475 = vrot.lane.b32.xlu1 %v5196_v11, %s4890_s1 }
 0x6e6   : > { %v1241_v10 = vmul.f32 1.442695, %v1232_v9 }
 0x6e8   : > { %4772 = vpow2.f32 %v1241_v10  ;;  %1477 = vrot.lane.b32.xlu1 %v5190_v6, %s4890_s1 }
 0x6f0   : > { %v1225_v12 = vpop.xlane.xlu0 %1224 }
 0x6f1   : > { %v1233_v13 = vsub.f32 %v1209_v35, %v1225_v12 }
 0x6f3   : > { %v1243_v14 = vmul.f32 1.442695, %v1233_v13 }
 0x6f4   : > { %v1282_v15 = vpop.permute.xlu0 %1281 }
 0x6f5   : > { %v5460_v16 = vpop.eup %4772  ;;  %4774 = vpow2.f32 %v1243_v14  ;;  %4335 = vmatpush3.msk.msra.mxu0 %vm195_vm7, %v1282_v15 }
 0x6f6   : > { %4336 = vmatprep.subr.mxu0 %v4882_v24  ;;  %v1256_v17 = vsel %vm242_vm1, %v5460_v16, 0.0 }
 0x6f7   : > { %1257 = vadd.xlane.f32.xlu0 %v1256_v17  ;;  %4337 = vmatpush3.msra.mxu0 %v1280_v51 }
 0x6f8   : > { %4338 = vmatprep.subr.mxu0 %v4882_v24  ;;  %v1486_v18 = vpop.permute.xlu0 %1485 }
 0x6f9   : > { %4339 = vmatpush3.msra.mxu0 %v1278_v55 }
 0x6fa   : > { %4364 = vmatprep.subr.mxu0 %v4882_v24 }
 0x6fc   : > { %v1377_v23 = vpop.permute.xlu0 %1376 }
 0x6fd   : > { %4354 = vmatpush3.msra.mxu1 %v1377_v23 }
 0x6fe   : > { %4379 = vmatprep.subr.mxu1 %v4882_v24 }
 0x700   : > { %v1228_v25 = vpop.xlane.xlu1 %1227  ;;  %v1590_v35 = vpop.permute.xlu0 %1589 }
 0x701   : > { %v1234_v27 = vsub.f32 %v5427_v40, %v1228_v25 }
 0x702   : > { %v5470_v28 = vpop.eup %4774 }
 0x703   : > { %v1245_v29 = vmul.f32 1.442695, %v1234_v27  ;;  %v1259_v31 = vsel %vm242_vm1, %v5470_v28, 0.0 }
 0x704   : > { %1260 = vadd.xlane.f32.xlu0 %v1259_v31  ;;  %v1482_v36 = vpop.permute.xlu1 %1481 }
 0x705   : > { %4776 = vpow2.f32 %v1245_v29 }
 0x712   : > { %v5474_v33 = vpop.eup %4776 }
 0x713   : > { %v1262_v34 = vsel %vm245_vm2, %v5474_v33, 0.0 }
 0x714   : > { %1263 = vadd.xlane.f32.xlu1 %v1262_v34 }
 0x71a   : > { %1587 = vrot.lane.b32.xlu0 %v5204_v20, %s4889_s30 }
 0x71e   : > { %1585 = vrot.lane.b32.xlu0 %v5209_v22, %s4889_s30 }
 0x722   : > { %1579 = vrot.lane.b32.xlu0 %v5209_v22, %s4890_s1 }
 0x725   : > { %1479 = vrot.lane.b32.xlu1 %v5192_v8, %s4890_s1 }
 0x726   : > { %1581 = vrot.lane.b32.xlu0 %v5204_v20, %s4890_s1 }
 0x729   : > { %1583 = vrot.lane.b32.xlu1 %v5199_v19, %s4890_s1 }
 0x754   : > { %v1249_v37 = vpop.xlane.xlu0 %1248 }
 0x755   : > { %4778 = vrcp.f32 %v1249_v37 }
 0x758   : > { %v1252_v38 = vpop.xlane.xlu1 %1251 }
 0x759   : > { %4780 = vrcp.f32 %v1252_v38 }
 0x75c   : > { %v1255_v39 = vpop.xlane.xlu1 %1254 }
 0x75d   : > { %4782 = vrcp.f32 %v1255_v39 }
 0x760   : > { %v1476_v49 = vpop.permute.xlu1 %1475 }
 0x762   : > { %v4779_v40 = vpop.eup %4778 }
 0x763   : > { %v5491_v41 = vmul.f32 %v4779_v40, %v5442_v59 }
 0x764   : > { %v1478_v50 = vpop.permute.xlu1 %1477 }
 0x765   : > { %4341 = vmatmul.mubr.msk.f32.vlgmr.msra.gmra.mxu0 %vm242_vm1, %v5491_v41 }
 0x766   : > { %v4781_v42 = vpop.eup %4780  ;;  %4365 = vmatpush3.xpose.msk.msra.mxu0 %vm536_vm12, %v1486_v18  ;;  %4343 = vmatprep.mubr.msk.f32.mxu0 %vm4883_vm11, %v4882_v24 }
 0x767   : > { %4366 = vmatprep.subr.mxu0 %v4882_v24  ;;  %v5500_v44 = vmul.f32 %v4781_v42, %v5447_v0 }
 0x769   : > { %4344 = vmatmul.mubr.msk.f32.gmra.mxu0 %vm242_vm1, %v5500_v44 }
 0x76a   : > { %v4783_v46 = vpop.eup %4782  ;;  %4367 = vmatpush3.xpose.msk.msra.mxu0 %vm536_vm12, %v1484_v21  ;;  %4346 = vmatprep.mubr.msk.f32.mxu0 %vm4883_vm11, %v4882_v24 }
 0x76b   : > { %4368 = vmatprep.subr.mxu0 %v4882_v24  ;;  %v5509_v48 = vmul.f32 %v4783_v46, %v5452_v4 }
 0x76d   : > { %4347 = vmatmul.mubr.msk.f32.gmra.mxu0 %vm242_vm1, %v5509_v48 }
 0x76e   : > { %4369 = vmatpush3.xpose.msk.msra.mxu0 %vm536_vm12, %v1482_v36  ;;  %4370 = vmatprep.mubr.msk.f32.mxu0 %vm4883_vm11, %v4882_v24 }
 0x76f   : > { %4394 = vmatprep.subr.mxu0 %v4882_v24 }
 0x771   : > { %4371 = vmatmul.mubr.msk.f32.vlgmr.msra.gmra.mxu0 %vm536_vm12, %v1476_v49 }
 0x772   : > { %4373 = vmatprep.mubr.msk.f32.mxu0 %vm4883_vm11, %v4882_v24 }
 0x775   : > { %4374 = vmatmul.mubr.msk.f32.gmra.mxu0 %vm536_vm12, %v1478_v50 }
 0x776   : > { %4376 = vmatprep.mubr.msk.f32.mxu0 %vm4883_vm11, %v4882_v24 }
 0x780   : > { %v1258_v51 = vpop.xlane.xlu0 %1257 }
 0x781   : > { %4784 = vrcp.f32 %v1258_v51 }
 0x78d   : > { %v1261_v52 = vpop.xlane.xlu0 %1260 }
 0x78e   : > { %v4785_v53 = vpop.eup %4784  ;;  %4786 = vrcp.f32 %v1261_v52 }
 0x78f   : > { %v5524_v54 = vmul.f32 %v4785_v53, %v5460_v16 }
 0x791   : > { %4356 = vmatmul.mubr.msk.f32.vlgmr.msra.gmra.mxu1 %vm242_vm1, %v5524_v54  ;;  %v1588_v55 = vpop.permute.xlu0 %1587 }
 0x792   : > { %4380 = vmatpush3.xpose.msk.msra.mxu1 %vm536_vm12, %v1590_v35  ;;  %4358 = vmatprep.mubr.msk.f32.mxu1 %vm4883_vm11, %v4882_v24 }
 0x793   : > { %4381 = vmatprep.subr.mxu1 %v4882_v24 }
 0x795   : > { %v1586_v57 = vpop.permute.xlu0 %1585 }
 0x796   : > { %4382 = vmatpush3.xpose.msk.msra.mxu1 %vm536_vm12, %v1588_v55 }
 0x797   : > { %4383 = vmatprep.subr.mxu1 %v4882_v24 }
 0x799   : > { %v1580_v5 = vpop.permute.xlu0 %1579 }
 0x79a   : > { %4384 = vmatpush3.xpose.msk.msra.mxu1 %vm536_vm12, %v1586_v57 }
 0x79b   : > { %v4787_v59 = vpop.eup %4786  ;;  %4409 = vmatprep.subr.mxu1 %v4882_v24 }
 0x79c   : > { %v5537_v61 = vmul.f32 %v4787_v59, %v5470_v28 }
 0x79d   : > { %v1264_v62 = vpop.xlane.xlu1 %1263  ;;  %v1582_v7 = vpop.permute.xlu0 %1581 }
 0x79e   : > { %4788 = vrcp.f32 %v1264_v62  ;;  %4359 = vmatmul.mubr.msk.f32.gmra.mxu1 %vm242_vm1, %v5537_v61 }
 0x79f   : > { %4361 = vmatprep.mubr.msk.f32.mxu1 %vm4883_vm11, %v4882_v24 }
 0x7a1   : > { %v1480_v0 = vpop.permute.xlu1 %1479 }
 0x7a2   : > { %4377 = vmatmul.mubr.msk.f32.gmra.mxu0 %vm536_vm12, %v1480_v0 }
 0x7a3   : > { %4400 = vmatprep.mubr.msk.f32.mxu0 %vm4883_vm11, %v4882_v24 }
 0x7a5   : > { %v1584_v9 = vpop.permute.xlu1 %1583 }
 0x7ab   : > { %v4789_v2 = vpop.eup %4788 }
 0x7ac   : > { %v5547_v4 = vmul.f32 %v4789_v2, %v5474_v33 }
 0x7ae   : > { %4362 = vmatmul.mubr.msk.f32.gmra.mxu1 %vm242_vm1, %v5547_v4 }
 0x7af   : > { %4385 = vmatprep.mubr.msk.f32.mxu1 %vm4883_vm11, %v4882_v24 }
 0x7b2   : > { %4386 = vmatmul.mubr.msk.f32.vlgmr.msra.gmra.mxu1 %vm536_vm12, %v1580_v5 }
 0x7b3   : > { %4388 = vmatprep.mubr.msk.f32.mxu1 %vm4883_vm11, %v4882_v24 }
 0x7b6   : > { %4389 = vmatmul.mubr.msk.f32.gmra.mxu1 %vm536_vm12, %v1582_v7 }
 0x7b7   : > { %4391 = vmatprep.mubr.msk.f32.mxu1 %vm4883_vm11, %v4882_v24 }
 0x7ba   : > { %4392 = vmatmul.mubr.msk.f32.gmra.mxu1 %vm536_vm12, %v1584_v9 }
 0x7bb   : > { %4415 = vmatprep.mubr.msk.f32.mxu1 %vm4883_vm11, %v4882_v24 }
 0x825   : > { %v5562_v10 = vpop.f32.mrf.mxu0 }
 0x827   : > { %v4342_v12 = vpop.f32.mrf.mxu0 }
 0x829   : > { %v5564_v13 = vpop.f32.mrf.mxu0 }
 0x82b   : > { %v4345_v14 = vpop.f32.mrf.mxu0 }
 0x82d   : > { %v5566_v15 = vpop.f32.mrf.mxu0 }
 0x82f   : > { %v4348_v16 = vpop.f32.mrf.mxu0 }
 0x831   : > { %v1565_v17 = vpop.f32.mrf.mxu0 }
 0x832   : > { %v1683_v18 = vmul.f32 0.35355338, %v1565_v17 }
 0x833   : > { %v4372_v21 = vpop.f32.mrf.mxu0 }
 0x834   : > { %v1689_v23 = vsel %vm242_vm1, %v1683_v18, -inf }
 0x835   : > { %1690 = vmax.xlane.f32.xlu0 %v1689_v23  ;;  %v1570_v25 = vpop.f32.mrf.mxu0 }
 0x836   : > { %v1684_v27 = vmul.f32 0.35355338, %v1570_v25 }
 0x837   : > { %v4375_v28 = vpop.f32.mrf.mxu0 }
 0x838   : > { %v1692_v29 = vsel %vm242_vm1, %v1684_v27, -inf }
 0x839   : > { %1693 = vmax.xlane.f32.xlu1 %v1692_v29 }
 0x84a   : > { %1757 = vrot.lane.b32.xlu1 %v5190_v6, %s4891_s29 }
 0x84e   : > { %1755 = vrot.lane.b32.xlu1 %v5196_v11, %s4891_s29 }
 0x851   : > { %v5574_v31 = vpop.f32.mrf.mxu1 }
 0x852   : > { %1858 = vrot.lane.b32.xlu1 %v5199_v19, %s4891_s29 }
 0x853   : > { %v4357_v33 = vpop.f32.mrf.mxu1 }
 0x856   : > { %1856 = vrot.lane.b32.xlu1 %v5204_v20, %s4891_s29 }
 0x85a   : > { %1961 = vrot.lane.b32.xlu1 %v5190_v6, %s4892_s19 }
 0x85e   : > { %v5582_v34 = vpop.f32.mrf.mxu1 }
 0x860   : > { %v4360_v35 = vpop.f32.mrf.mxu1 }
 0x862   : > { %v1575_v36 = vpop.f32.mrf.mxu0 }
 0x863   : > { %v1685_v37 = vmul.f32 0.35355338, %v1575_v36 }
 0x864   : > { %v4378_v38 = vpop.f32.mrf.mxu0 }
 0x865   : > { %v1695_v39 = vsel %vm245_vm2, %v1685_v37, -inf }
 0x866   : > { %1696 = vmax.xlane.f32.xlu0 %v1695_v39 }
 0x86e   : > { %v5585_v40 = vpop.f32.mrf.mxu1 }
 0x870   : > { %v4363_v42 = vpop.f32.mrf.mxu1 }
 0x872   : > { %v1669_v46 = vpop.f32.mrf.mxu1 }
 0x873   : > { %v1686_v49 = vmul.f32 0.35355338, %v1669_v46 }
 0x874   : > { %v4387_v50 = vpop.f32.mrf.mxu1 }
 0x875   : > { %v1698_v51 = vsel %vm242_vm1, %v1686_v49, -inf }
 0x876   : > { %v1674_v52 = vpop.f32.mrf.mxu1  ;;  %1699 = vmax.xlane.f32.xlu0 %v1698_v51 }
 0x877   : > { %v1687_v53 = vmul.f32 0.35355338, %v1674_v52 }
 0x878   : > { %v4390_v55 = vpop.f32.mrf.mxu1 }
 0x879   : > { %v1701_v57 = vsel %vm242_vm1, %v1687_v53, -inf }
 0x87a   : > { %v1679_v59 = vpop.f32.mrf.mxu1  ;;  %1702 = vmax.xlane.f32.xlu0 %v1701_v57 }
 0x87b   : > { %v5589_v62 = vmul.f32 0.35355338, %v1679_v59 }
 0x87c   : > { %v4393_v0 = vpop.f32.mrf.mxu1 }
 0x87d   : > { %v1704_v2 = vsel %vm245_vm2, %v5589_v62, -inf }
 0x87e   : > { %1705 = vmax.xlane.f32.xlu1 %v1704_v2 }
 0x88f   : > { %1959 = vrot.lane.b32.xlu1 %v5196_v11, %s4892_s19 }
 0x890   : > { %1759 = vrot.lane.b32.xlu0 %v5192_v8, %s4891_s29 }
 0x894   : > { %1963 = vrot.lane.b32.xlu0 %v5192_v8, %s4892_s19 }
 0x898   : > { %1854 = vrot.lane.b32.xlu0 %v5209_v22, %s4891_s29  ;;  %s310_s29 = scalar_lea.vmem %s6242_s15, %s3868_s28 }
 0x89c   : > { %2067 = vrot.lane.b32.xlu0 %v5199_v19, %s4892_s19 }
 0x8be   : > { %v1691_v5 = vpop.xlane.xlu0 %1690 }
 0x8bf   : > { %v1707_v7 = vsub.f32 %v1683_v18, %v1691_v5 }
 0x8c1   : > { %v1713_v9 = vmul.f32 1.442695, %v1707_v7 }
 0x8c2   : > { %v1694_v12 = vpop.xlane.xlu1 %1693 }
 0x8c3   : > { %4790 = vpow2.f32 %v1713_v9  ;;  %v1708_v14 = vsub.f32 %v1684_v27, %v1694_v12 }
 0x8c5   : > { %v1715_v16 = vmul.f32 1.442695, %v1708_v14 }
 0x8c6   : > { %v1758_v17 = vpop.permute.xlu1 %1757 }
 0x8c7   : > { %4792 = vpow2.f32 %v1715_v16 }
 0x8ca   : > { %v1756_v21 = vpop.permute.xlu1 %1755 }
 0x8ce   : > { %v1859_v23 = vpop.permute.xlu1 %1858 }
 0x8cf   : > { %4410 = vmatpush3.msk.msra.mxu1 %vm195_vm7, %v1859_v23 }
 0x8d0   : > { %v5604_v25 = vpop.eup %4790  ;;  %4411 = vmatprep.subr.mxu1 %v4882_v24 }
 0x8d1   : > { %v1725_v28 = vsel %vm242_vm1, %v5604_v25, 0.0 }
 0x8d2   : > { %v1857_v29 = vpop.permute.xlu1 %1856  ;;  %1726 = vadd.xlane.f32.xlu0 %v1725_v28 }
 0x8d3   : > { %4412 = vmatpush3.msra.mxu1 %v1857_v29 }
 0x8d4   : > { %v5609_v18 = vpop.eup %4792  ;;  %4413 = vmatprep.subr.mxu1 %v4882_v24 }
 0x8d5   : > { %v1728_v27 = vsel %vm242_vm1, %v5609_v18, 0.0 }
 0x8d6   : > { %1729 = vadd.xlane.f32.xlu1 %v1728_v27  ;;  %v1962_v5 = vpop.permute.xlu1 %1961 }
 0x8ef   : > { %v1697_v33 = vpop.xlane.xlu0 %1696 }
 0x8f0   : > { %v1709_v35 = vsub.f32 %v1685_v37, %v1697_v33 }
 0x8f2   : > { %v1717_v36 = vmul.f32 1.442695, %v1709_v35 }
 0x8f4   : > { %4794 = vpow2.f32 %v1717_v36 }
 0x8ff   : > { %v1700_v38 = vpop.xlane.xlu0 %1699 }
 0x900   : > { %v1710_v39 = vsub.f32 %v1686_v49, %v1700_v38 }
 0x901   : > { %v5614_v42 = vpop.eup %4794 }
 0x902   : > { %v1719_v46 = vmul.f32 1.442695, %v1710_v39  ;;  %v1731_v50 = vsel %vm245_vm2, %v5614_v42, 0.0 }
 0x903   : > { %1732 = vadd.xlane.f32.xlu1 %v1731_v50  ;;  %v1703_v51 = vpop.xlane.xlu0 %1702 }
 0x904   : > { %4796 = vpow2.f32 %v1719_v46  ;;  %v1711_v52 = vsub.f32 %v1687_v53, %v1703_v51 }
 0x906   : > { %v1721_v55 = vmul.f32 1.442695, %v1711_v52 }
 0x907   : > { %v1760_v57 = vpop.permute.xlu0 %1759  ;;  %v1706_v7 = vpop.xlane.xlu1 %1705 }
 0x908   : > { %4798 = vpow2.f32 %v1721_v55  ;;  %4395 = vmatpush3.msk.msra.mxu0 %vm195_vm7, %v1760_v57  ;;  %v1712_v9 = vsub.f32 %v5589_v62, %v1706_v7 }
 0x909   : > { %4396 = vmatprep.subr.mxu0 %v4882_v24 }
 0x90a   : > { %4397 = vmatpush3.msra.mxu0 %v1758_v17  ;;  %v1723_v12 = vmul.f32 1.442695, %v1712_v9 }
 0x90b   : > { %4398 = vmatprep.subr.mxu0 %v4882_v24  ;;  %v1964_v37 = vpop.permute.xlu0 %1963  ;;  %v1960_v17 = vpop.permute.xlu1 %1959 }
 0x90c   : > { %4399 = vmatpush3.msra.mxu0 %v1756_v21  ;;  %4800 = vpow2.f32 %v1723_v12 }
 0x90d   : > { %4424 = vmatprep.subr.mxu0 %v4882_v24 }
 0x90f   : > { %v1855_v49 = vpop.permute.xlu0 %1854 }
 0x910   : > { %4414 = vmatpush3.msra.mxu1 %v1855_v49 }
 0x911   : > { %v4797_v59 = vpop.eup %4796  ;;  %4439 = vmatprep.subr.mxu1 %v4882_v24 }
 0x912   : > { %v1734_v53 = vsel %vm242_vm1, %v4797_v59, 0.0 }
 0x913   : > { %1735 = vadd.xlane.f32.xlu0 %v1734_v53  ;;  %v2068_v62 = vpop.permute.xlu0 %2067 }
 0x914   : > { %1953 = vrot.lane.b32.xlu1 %v5196_v11, %s4893_s0 }
 0x915   : > { %v4799_v0 = vpop.eup %4798 }
 0x916   : > { %v1737_v2 = vsel %vm242_vm1, %v4799_v0, 0.0 }
 0x917   : > { %1738 = vadd.xlane.f32.xlu0 %v1737_v2 }
 0x918   : > { %1955 = vrot.lane.b32.xlu1 %v5190_v6, %s4893_s0 }
 0x919   : > { %v5633_v14 = vpop.eup %4800 }
 0x91a   : > { %v1740_v16 = vsel %vm245_vm2, %v5633_v14, 0.0 }
 0x92d   : > { %2065 = vrot.lane.b32.xlu0 %v5204_v20, %s4892_s19 }
 0x931   : > { %2063 = vrot.lane.b32.xlu0 %v5209_v22, %s4892_s19 }
 0x935   : > { %2057 = vrot.lane.b32.xlu0 %v5209_v22, %s4893_s0 }
 0x939   : > { %2059 = vrot.lane.b32.xlu0 %v5204_v20, %s4893_s0 }
 0x93c   : > { %1741 = vadd.xlane.f32.xlu1 %v1740_v16 }
 0x94d   : > { %1957 = vrot.lane.b32.xlu1 %v5192_v8, %s4893_s0 }
 0x951   : > { %2061 = vrot.lane.b32.xlu1 %v5199_v19, %s4893_s0 }
 0x95b   : > { %v1727_v21 = vpop.xlane.xlu0 %1726 }
 0x95c   : > { %4802 = vrcp.f32 %v1727_v21 }
 0x95f   : > { %v1730_v23 = vpop.xlane.xlu1 %1729 }
 0x960   : > { %4804 = vrcp.f32 %v1730_v23 }
 0x969   : > { %v4803_v28 = vpop.eup %4802 }
 0x96a   : > { %v5641_v29 = vmul.f32 %v4803_v28, %v5604_v25 }
 0x96c   : > { %4401 = vmatmul.mubr.msk.f32.vlgmr.msra.gmra.mxu0 %vm242_vm1, %v5641_v29 }
 0x96d   : > { %v4805_v27 = vpop.eup %4804  ;;  %4425 = vmatpush3.xpose.msk.msra.mxu0 %vm536_vm12, %v1964_v37  ;;  %4403 = vmatprep.mubr.msk.f32.mxu0 %vm4883_vm11, %v4882_v24 }
 0x96e   : > { %4426 = vmatprep.subr.mxu0 %v4882_v24  ;;  %v5650_v33 = vmul.f32 %v4805_v27, %v5609_v18 }
 0x970   : > { %4404 = vmatmul.mubr.msk.f32.gmra.mxu0 %vm242_vm1, %v5650_v33 }
 0x971   : > { %4427 = vmatpush3.xpose.msk.msra.mxu0 %vm536_vm12, %v1962_v5  ;;  %4406 = vmatprep.mubr.msk.f32.mxu0 %vm4883_vm11, %v4882_v24 }
 0x972   : > { %4428 = vmatprep.subr.mxu0 %v4882_v24 }
 0x975   : > { %4429 = vmatpush3.xpose.msk.msra.mxu0 %vm536_vm12, %v1960_v17 }
 0x976   : > { %4454 = vmatprep.subr.mxu0 %v4882_v24 }
 0x98c   : > { %v1733_v25 = vpop.xlane.xlu1 %1732 }
 0x98d   : > { %4806 = vrcp.f32 %v1733_v25 }
 0x990   : > { %v1954_v38 = vpop.permute.xlu1 %1953 }
 0x994   : > { %v1956_v46 = vpop.permute.xlu1 %1955 }
 0x99a   : > { %v4807_v35 = vpop.eup %4806 }
 0x99b   : > { %v5661_v18 = vmul.f32 %v4807_v35, %v5614_v42 }
 0x99c   : > { %v1736_v36 = vpop.xlane.xlu0 %1735 }
 0x99d   : > { %4808 = vrcp.f32 %v1736_v36  ;;  %4407 = vmatmul.mubr.msk.f32.gmra.mxu0 %vm242_vm1, %v5661_v18 }
 0x99e   : > { %4430 = vmatprep.mubr.msk.f32.mxu0 %vm4883_vm11, %v4882_v24 }
 0x9a0   : > { %v1739_v39 = vpop.xlane.xlu0 %1738 }
 0x9a1   : > { %4810 = vrcp.f32 %v1739_v39  ;;  %4431 = vmatmul.mubr.msk.f32.vlgmr.msra.gmra.mxu0 %vm536_vm12, %v1954_v38 }
 0x9a2   : > { %4433 = vmatprep.mubr.msk.f32.mxu0 %vm4883_vm11, %v4882_v24 }
 0x9a4   : > { %v2066_v52 = vpop.permute.xlu0 %2065 }
 0x9a5   : > { %4434 = vmatmul.mubr.msk.f32.gmra.mxu0 %vm536_vm12, %v1956_v46 }
 0x9a6   : > { %4436 = vmatprep.mubr.msk.f32.mxu0 %vm4883_vm11, %v4882_v24 }
 0x9a8   : > { %v2064_v57 = vpop.permute.xlu0 %2063 }
 0x9aa   : > { %v4809_v42 = vpop.eup %4808 }
 0x9ab   : > { %v5673_v50 = vmul.f32 %v4809_v42, %v4797_v59 }
 0x9ad   : > { %4416 = vmatmul.mubr.msk.f32.vlgmr.msra.gmra.mxu1 %vm242_vm1, %v5673_v50 }
 0x9ae   : > { %v4811_v51 = vpop.eup %4810  ;;  %4440 = vmatpush3.xpose.msk.msra.mxu1 %vm536_vm12, %v2068_v62  ;;  %4418 = vmatprep.mubr.msk.f32.mxu1 %vm4883_vm11, %v4882_v24 }
 0x9af   : > { %4441 = vmatprep.subr.mxu1 %v4882_v24  ;;  %v5681_v55 = vmul.f32 %v4811_v51, %v4799_v0  ;;  %v2058_v0 = vpop.permute.xlu0 %2057 }
 0x9b1   : > { %4419 = vmatmul.mubr.msk.f32.gmra.mxu1 %vm242_vm1, %v5681_v55 }
 0x9b2   : > { %4442 = vmatpush3.xpose.msk.msra.mxu1 %vm536_vm12, %v2066_v52  ;;  %4421 = vmatprep.mubr.msk.f32.mxu1 %vm4883_vm11, %v4882_v24 }
 0x9b3   : > { %4443 = vmatprep.subr.mxu1 %v4882_v24  ;;  %v2060_v2 = vpop.permute.xlu0 %2059 }
 0x9b6   : > { %4444 = vmatpush3.xpose.msk.msra.mxu1 %vm536_vm12, %v2064_v57 }
 0x9b7   : > { %4469 = vmatprep.subr.mxu1 %v4882_v24 }
 0x9c5   : > { %v1742_v37 = vpop.xlane.xlu1 %1741 }
 0x9c6   : > { %4812 = vrcp.f32 %v1742_v37 }
 0x9c9   : > { %v1958_v49 = vpop.permute.xlu1 %1957 }
 0x9ca   : > { %4437 = vmatmul.mubr.msk.f32.gmra.mxu0 %vm536_vm12, %v1958_v49 }
 0x9cb   : > { %4460 = vmatprep.mubr.msk.f32.mxu0 %vm4883_vm11, %v4882_v24 }
 0x9cd   : > { %v2062_v5 = vpop.permute.xlu1 %2061 }
 0x9d3   : > { %v4813_v59 = vpop.eup %4812 }
 0x9d4   : > { %v5695_v53 = vmul.f32 %v4813_v59, %v5633_v14 }
 0x9d6   : > { %4422 = vmatmul.mubr.msk.f32.gmra.mxu1 %vm242_vm1, %v5695_v53 }
 0x9d7   : > { %4445 = vmatprep.mubr.msk.f32.mxu1 %vm4883_vm11, %v4882_v24 }
 0x9da   : > { %4446 = vmatmul.mubr.msk.f32.vlgmr.msra.gmra.mxu1 %vm536_vm12, %v2058_v0 }
 0x9db   : > { %4448 = vmatprep.mubr.msk.f32.mxu1 %vm4883_vm11, %v4882_v24 }
 0x9de   : > { %4449 = vmatmul.mubr.msk.f32.gmra.mxu1 %vm536_vm12, %v2060_v2 }
 0x9df   : > { %4451 = vmatprep.mubr.msk.f32.mxu1 %vm4883_vm11, %v4882_v24 }
 0x9e2   : > { %4452 = vmatmul.mubr.msk.f32.gmra.mxu1 %vm536_vm12, %v2062_v5 }
 0x9e3   : > { %4475 = vmatprep.mubr.msk.f32.mxu1 %vm4883_vm11, %v4882_v24 }
 0xa2c   : > { %v5710_v7 = vpop.f32.mrf.mxu0 }
 0xa2e   : > { %v4402_v9 = vpop.f32.mrf.mxu0 }
 0xa30   : > { %v5712_v12 = vpop.f32.mrf.mxu0 }
 0xa32   : > { %v4405_v14 = vpop.f32.mrf.mxu0 }
 0xa5d   : > { %v5714_v16 = vpop.f32.mrf.mxu0 }
 0xa5f   : > { %v4408_v62 = vpop.f32.mrf.mxu0 }
 0xa61   : > { %v2043_v17 = vpop.f32.mrf.mxu0 }
 0xa62   : > { %v2161_v21 = vmul.f32 0.35355338, %v2043_v17 }
 0xa63   : > { %v4432_v23 = vpop.f32.mrf.mxu0 }
 0xa64   : > { %v2167_v28 = vsel %vm242_vm1, %v2161_v21, -inf }
 0xa65   : > { %2168 = vmax.xlane.f32.xlu0 %v2167_v28  ;;  %v2048_v27 = vpop.f32.mrf.mxu0 }
 0xa66   : > { %v2162_v25 = vmul.f32 0.35355338, %v2048_v27 }
 0xa67   : > { %v4435_v35 = vpop.f32.mrf.mxu0 }
 0xa68   : > { %v2170_v36 = vsel %vm242_vm1, %v2162_v25, -inf }
 0xa69   : > { %2171 = vmax.xlane.f32.xlu1 %v2170_v36 }
 0xa6d   : > { %v5718_v38 = vpop.f32.mrf.mxu1 }
 0xa6f   : > { %v4417_v39 = vpop.f32.mrf.mxu1 }
 0xa71   : > { %v5720_v46 = vpop.f32.mrf.mxu1 }
 0xa73   : > { %v4420_v42 = vpop.f32.mrf.mxu1 }
 0xa8a   : > { %v2053_v51 = vpop.f32.mrf.mxu0 }
 0xa8b   : > { %v2163_v52 = vmul.f32 0.35355338, %v2053_v51 }
 0xa8c   : > { %v4438_v57 = vpop.f32.mrf.mxu0 }
 0xa8d   : > { %v2173_v37 = vsel %vm245_vm2, %v2163_v52, -inf }
 0xa8e   : > { %2174 = vmax.xlane.f32.xlu0 %v2173_v37 }
 0xa96   : > { %v5723_v49 = vpop.f32.mrf.mxu1 }
 0xa98   : > { %v4423_v59 = vpop.f32.mrf.mxu1 }
 0xa9a   : > { %v2147_v0 = vpop.f32.mrf.mxu1 }
 0xa9b   : > { %v2164_v2 = vmul.f32 0.35355338, %v2147_v0 }
 0xa9c   : > { %v4447_v5 = vpop.f32.mrf.mxu1 }
 0xa9d   : > { %v2176_v9 = vsel %vm242_vm1, %v2164_v2, -inf }
 0xa9e   : > { %v2152_v14 = vpop.f32.mrf.mxu1  ;;  %2177 = vmax.xlane.f32.xlu0 %v2176_v9 }
 0xa9f   : > { %v2165_v62 = vmul.f32 0.35355338, %v2152_v14 }
 0xaa0   : > { %v4450_v17 = vpop.f32.mrf.mxu1 }
 0xaa1   : > { %v2179_v23 = vsel %vm242_vm1, %v2165_v62, -inf }
 0xaa2   : > { %v2157_v28 = vpop.f32.mrf.mxu1  ;;  %2180 = vmax.xlane.f32.xlu0 %v2179_v23 }
 0xaa3   : > { %v2166_v27 = vmul.f32 0.35355338, %v2157_v28 }
 0xaa4   : > { %v4453_v35 = vpop.f32.mrf.mxu1 }
 0xaa5   : > { %v2182_v36 = vsel %vm245_vm2, %v2166_v27, -inf }
 0xaa6   : > { %2183 = vmax.xlane.f32.xlu1 %v2182_v36 }
 0xab7   : > { %2235 = vrot.lane.b32.xlu1 %v5190_v6, %s4894_s20 }
 0xab8   : > { %2237 = vrot.lane.b32.xlu0 %v5192_v8, %s4894_s20 }
 0xabb   : > { %2233 = vrot.lane.b32.xlu1 %v5196_v11, %s4894_s20 }
 0xabf   : > { %2336 = vrot.lane.b32.xlu1 %v5199_v19, %s4894_s20 }
 0xaee   : > { %v2169_v39 = vpop.xlane.xlu0 %2168 }
 0xaef   : > { %v2185_v42 = vsub.f32 %v2161_v21, %v2169_v39 }
 0xaf1   : > { %v2191_v51 = vmul.f32 1.442695, %v2185_v42 }
 0xaf2   : > { %v2172_v57 = vpop.xlane.xlu1 %2171 }
 0xaf3   : > { %4814 = vpow2.f32 %v2191_v51  ;;  %v2186_v37 = vsub.f32 %v2162_v25, %v2172_v57 }
 0xaf5   : > { %v2193_v59 = vmul.f32 1.442695, %v2186_v37 }
 0xaf7   : > { %4816 = vpow2.f32 %v2193_v59 }
 0xb00   : > { %v5736_v0 = vpop.eup %4814 }
 0xb01   : > { %v2203_v6 = vsel %vm242_vm1, %v5736_v0, 0.0 }
 0xb02   : > { %2204 = vadd.xlane.f32.xlu0 %v2203_v6 }
 0xb04   : > { %v5740_v8 = vpop.eup %4816 }
 0xb05   : > { %v2206_v11 = vsel %vm242_vm1, %v5740_v8, 0.0 }
 0xb06   : > { %2207 = vadd.xlane.f32.xlu1 %v2206_v11 }
 0xb17   : > { %v2175_v19 = vpop.xlane.xlu0 %2174 }
 0xb18   : > { %v2187_v21 = vsub.f32 %v2163_v52, %v2175_v19 }
 0xb1a   : > { %v2195_v5 = vmul.f32 1.442695, %v2187_v21 }
 0xb1c   : > { %4818 = vpow2.f32 %v2195_v5 }
 0xb27   : > { %v2178_v9 = vpop.xlane.xlu0 %2177 }
 0xb28   : > { %v2188_v25 = vsub.f32 %v2164_v2, %v2178_v9 }
 0xb29   : > { %v5744_v14 = vpop.eup %4818 }
 0xb2a   : > { %v2197_v17 = vmul.f32 1.442695, %v2188_v25  ;;  %v2209_v23 = vsel %vm245_vm2, %v5744_v14, 0.0 }
 0xb2b   : > { %2210 = vadd.xlane.f32.xlu1 %v2209_v23  ;;  %v2181_v28 = vpop.xlane.xlu0 %2180 }
 0xb2c   : > { %4820 = vpow2.f32 %v2197_v17  ;;  %v2189_v35 = vsub.f32 %v2165_v62, %v2181_v28 }
 0xb2e   : > { %v2199_v36 = vmul.f32 1.442695, %v2189_v35 }
 0xb2f   : > { %v2184_v39 = vpop.xlane.xlu1 %2183  ;;  %v2238_v42 = vpop.permute.xlu0 %2237 }
 0xb30   : > { %4822 = vpow2.f32 %v2199_v36  ;;  %v2190_v51 = vsub.f32 %v2166_v27, %v2184_v39  ;;  %4455 = vmatpush3.msk.msra.mxu0 %vm195_vm7, %v2238_v42  ;;  %v294_v42 = vld [vmem:[%s291_s24 + $0x10] sm:$0xff] }
 0xb31   : > { %4456 = vmatprep.subr.mxu0 %v4882_v24 }
 0xb32   : > { %v2201_v52 = vmul.f32 1.442695, %v2190_v51  ;;  %v293_v51 = vld [vmem:[%s291_s24 + $0x8] sm:$0xff] }
 0xb33   : > { %v2236_v2 = vpop.permute.xlu1 %2235 }
 0xb34   : > { %4824 = vpow2.f32 %v2201_v52  ;;  %4457 = vmatpush3.msra.mxu0 %v2236_v2  ;;  %v292_v52 = vld [vmem:[%s291_s24] sm:$0xff] }
 0xb35   : > { %4458 = vmatprep.subr.mxu0 %v4882_v24 }
 0xb37   : > { %v2234_v57 = vpop.permute.xlu1 %2233 }
 0xb38   : > { %4459 = vmatpush3.msra.mxu0 %v2234_v57 }
 0xb39   : > { %v4821_v37 = vpop.eup %4820  ;;  %4484 = vmatprep.subr.mxu0 %v4882_v24 }
 0xb3a   : > { %v2212_v62 = vsel %vm242_vm1, %v4821_v37, 0.0 }
 0xb3b   : > { %v2337_v59 = vpop.permute.xlu1 %2336  ;;  %2213 = vadd.xlane.f32.xlu0 %v2212_v62 }
 0xb3c   : > { %4470 = vmatpush3.msk.msra.mxu1 %vm195_vm7, %v2337_v59 }
 0xb3d   : > { %v4823_v27 = vpop.eup %4822  ;;  %4471 = vmatprep.subr.mxu1 %v4882_v24 }
 0xb3e   : > { %v2215_v6 = vsel %vm242_vm1, %v4823_v27, 0.0 }
 0xb3f   : > { %2216 = vadd.xlane.f32.xlu0 %v2215_v6 }
 0xb41   : > { %v4825_v11 = vpop.eup %4824 }
 0xb42   : > { %v2218_v19 = vsel %vm245_vm2, %v4825_v11, 0.0 }
 0xb43   : > { %2219 = vadd.xlane.f32.xlu1 %v2218_v19 }
 0xb54   : > { %2332 = vrot.lane.b32.xlu1 %v5209_v22, %s4894_s20 }
 0xb55   : > { %2334 = vrot.lane.b32.xlu0 %v5204_v20, %s4894_s20  ;;  %s307_s20 = scalar_lea.vmem %s6241_s14, %s4879_s5  ;;  %s273_s5 = sadd.s32 1, %s4879_s5  }
 0xb56   : > { %p270_p0 = scmp.ge.s32.totalorder %s273_s5, 10  }
 0xb58   : > { %2461 = vrot.lane.b32.xlu1 %v5710_v7, %s4895_s21 }
 0xb59   : > { %2437 = vrot.lane.b32.xlu0 %v5562_v10, %s4896_s22 }
 0xb5c   : > { %2439 = vrot.lane.b32.xlu1 %v5564_v13, %s4896_s22 }
 0xb5d   : > { %2443 = vrot.lane.b32.xlu0 %v5574_v31, %s4896_s22 }
 0xb60   : > { %2463 = vrot.lane.b32.xlu1 %v5712_v12, %s4895_s21 }
 0xb61   : > { %2467 = vrot.lane.b32.xlu0 %v5718_v38, %s4895_s21 }
 0xb64   : > { %2445 = vrot.lane.b32.xlu1 %v5582_v34, %s4896_s22 }
 0xb65   : > { %2441 = vrot.lane.b32.xlu0 %v5566_v15, %s4896_s22 }
 0xb68   : > { %2469 = vrot.lane.b32.xlu1 %v5720_v46, %s4895_s21 }
 0xb69   : > { %2465 = vrot.lane.b32.xlu0 %v5714_v16, %s4895_s21 }
 0xb8b   : > { %v2205_v20 = vpop.xlane.xlu0 %2204 }
 0xb8c   : > { %4826 = vrcp.f32 %v2205_v20 }
 0xb8f   : > { %v2208_v22 = vpop.xlane.xlu1 %2207 }
 0xb90   : > { %4828 = vrcp.f32 %v2208_v22 }
 0xb99   : > { %v4827_v10 = vpop.eup %4826 }
 0xb9a   : > { %v5782_v13 = vmul.f32 %v4827_v10, %v5736_v0 }
 0xb9c   : > { %4461 = vmatmul.mubr.msk.f32.vlgmr.msra.gmra.mxu0 %vm242_vm1, %v5782_v13 }
 0xb9d   : > { %v4829_v31 = vpop.eup %4828  ;;  %4463 = vmatprep.mubr.msk.f32.mxu0 %vm4883_vm11, %v4882_v24 }
 0xb9e   : > { %v5789_v15 = vmul.f32 %v4829_v31, %v5740_v8 }
 0xba0   : > { %4464 = vmatmul.mubr.msk.f32.gmra.mxu0 %vm242_vm1, %v5789_v15 }
 0xba1   : > { %4466 = vmatprep.mubr.msk.f32.mxu0 %vm4883_vm11, %v4882_v24 }
 0xbb4   : > { %v2211_v34 = vpop.xlane.xlu1 %2210 }
 0xbb5   : > { %4830 = vrcp.f32 %v2211_v34 }
 0xbc2   : > { %v4831_v7 = vpop.eup %4830 }
 0xbc3   : > { %v5796_v12 = vmul.f32 %v4831_v7, %v5744_v14 }
 0xbc4   : > { %v2214_v16 = vpop.xlane.xlu0 %2213 }
 0xbc5   : > { %4832 = vrcp.f32 %v2214_v16  ;;  %4467 = vmatmul.mubr.msk.f32.gmra.mxu0 %vm242_vm1, %v5796_v12 }
 0xbc6   : > { %4492 = vmatprep.mubr.msk.f32.mxu0 %vm4883_vm11, %v4882_v24 }
 0xbc8   : > { %v2217_v38 = vpop.xlane.xlu0 %2216 }
 0xbc9   : > { %4834 = vrcp.f32 %v2217_v38 }
 0xbcc   : > { %v2220_v46 = vpop.xlane.xlu1 %2219  ;;  %v2335_v0 = vpop.permute.xlu0 %2334 }
 0xbcd   : > { %4836 = vrcp.f32 %v2220_v46  ;;  %4472 = vmatpush3.msra.mxu1 %v2335_v0 }
 0xbce   : > { %4473 = vmatprep.subr.mxu1 %v4882_v24 }
 0xbd0   : > { %v2333_v8 = vpop.permute.xlu1 %2332  ;;  %v2438_v21 = vpop.permute.xlu0 %2437 }
 0xbd1   : > { %4474 = vmatpush3.msra.mxu1 %v2333_v8  ;;  %v2503_v0 = vsel %vm536_vm12, %v5400_v63, %v2438_v21 }
 0xbd2   : > { %v4833_v5 = vpop.eup %4832  ;;  %4507 = vmatprep.subr.mxu1 %v4882_v24 }
 0xbd3   : > { %v5804_v9 = vmul.f32 %v4833_v5, %v4821_v37 }
 0xbd4   : > { %v2444_v25 = vpop.permute.xlu0 %2443  ;;  %v2462_v31 = vpop.permute.xlu1 %2461 }
 0xbd5   : > { %4476 = vmatmul.mubr.msk.f32.vlgmr.msra.gmra.mxu1 %vm242_vm1, %v5804_v9  ;;  %v2506_v23 = vsel %vm536_vm12, %v5419_v26, %v2444_v25  ;;  %v295_v26 = vld [vmem:[%s291_s24 + $0x18] sm:$0xff]  ;;  %s302_s24 = scalar_lea.vmem %s6240_s13, %s5140_s4 }
 0xbd6   : > { %v4835_v14 = vpop.eup %4834  ;;  %4478 = vmatprep.mubr.msk.f32.mxu1 %vm4883_vm11, %v4882_v24  ;;  %4485 = vmatpush3.msra.mxu0 %v295_v26 }
 0xbd7   : > { %v5810_v17 = vmul.f32 %v4835_v14, %v4823_v27  ;;  %4486 = vmatprep.subr.mxu0 %v4882_v24 }
 0xbd8   : > { %v2468_v28 = vpop.permute.xlu0 %2467  ;;  %4487 = vmatpush3.msra.mxu0 %v294_v42  ;;  %v2440_v34 = vpop.permute.xlu1 %2439 }
 0xbd9   : > { %v5815_v35 = vsel %vm2509_vm13, %v2506_v23, %v2468_v28  ;;  %4479 = vmatmul.mubr.msk.f32.gmra.mxu1 %vm242_vm1, %v5810_v17  ;;  %4488 = vmatprep.subr.mxu0 %v4882_v24 }
 0xbda   : > { %v4837_v36 = vpop.eup %4836  ;;  %4481 = vmatprep.mubr.msk.f32.mxu1 %vm4883_vm11, %v4882_v24  ;;  %4489 = vmatpush3.msra.mxu0 %v293_v51 }
 0xbdb   : > { %v5821_v39 = vmul.f32 %v4837_v36, %v4825_v11  ;;  %4490 = vmatprep.subr.mxu0 %v4882_v24 }
 0xbdc   : > { %4491 = vmatpush3.msra.mxu0 %v292_v52  ;;  %v2464_v7 = vpop.permute.xlu1 %2463  ;;  %v2442_v16 = vpop.permute.xlu0 %2441 }
 0xbdd   : > { %4482 = vmatmul.mubr.msk.f32.gmra.mxu1 %vm242_vm1, %v5821_v39  ;;  %4530 = vmatprep.subr.mxu0 %v4882_v24  ;;  %v2505_v36 = vsel %vm536_vm12, %v5404_v3, %v2442_v16 }
 0xbde   : > { %4515 = vmatprep.mubr.msk.f32.mxu1 %vm4883_vm11, %v4882_v24 }
 0xbe0   : > { %v2446_v38 = vpop.permute.xlu1 %2445  ;;  %v2466_v46 = vpop.permute.xlu0 %2465 }
 0xbe1   : > { %v2512_v26 = vsel %vm2509_vm13, %v2505_v36, %v2466_v46  ;;  %v2507_v51 = vsel %vm536_vm12, %v5422_v30, %v2446_v38 }
 0xbe4   : > { %v2470_v8 = vpop.permute.xlu1 %2469 }
 0xc5c   : > { %v2318_v2 = vpop.f32.mrf.mxu0 }
 0xc5d   : > { %2485 = vrot.lane.b32.xlu0 %v2318_v2, %s4897_s25  ;;  %v2514_v2 = vsel %vm2509_vm13, %v2507_v51, %v2470_v8  ;;  %v4869_v8 = vld [vmem:[%s6249_s17 + $0x8] sm:$0xff] }
 0xc5e   : > { %v4462_v57 = vpop.f32.mrf.mxu0 }
 0xc60   : > { %v2323_v37 = vpop.f32.mrf.mxu0 }
 0xc61   : > { %2487 = vrot.lane.b32.xlu1 %v2323_v37, %s4897_s25 }
 0xc62   : > { %v4465_v62 = vpop.f32.mrf.mxu0 }
 0xc85   : > { %v2328_v59 = vpop.f32.mrf.mxu0 }
 0xc86   : > { %2489 = vrot.lane.b32.xlu0 %v2328_v59, %s4897_s25 }
 0xc87   : > { %v4468_v27 = vpop.f32.mrf.mxu0 }
 0xc95   : > { %v2417_v6 = vpop.f32.mrf.mxu1 }
 0xc96   : > { %2491 = vrot.lane.b32.xlu1 %v2417_v6, %s4897_s25 }
 0xc97   : > { %v4477_v11 = vpop.f32.mrf.mxu1 }
 0xc99   : > { %v2422_v19 = vpop.f32.mrf.mxu1 }
 0xc9a   : > { %2447 = vrot.lane.b32.xlu1 %v5585_v40, %s4896_s22  ;;  %2493 = vrot.lane.b32.xlu0 %v2422_v19, %s4897_s25  ;;  %v2510_v40 = vsel %vm2509_vm13, %v2503_v0, %v2462_v31 }
 0xc9b   : > { %v4480_v20 = vpop.f32.mrf.mxu1 }
 0xc9d   : > { %v2427_v22 = vpop.f32.mrf.mxu1 }
 0xc9e   : > { %2495 = vrot.lane.b32.xlu1 %v2427_v22, %s4897_s25  ;;  %2471 = vrot.lane.b32.xlu0 %v5723_v49, %s4895_s21  ;;  %v2504_v49 = vsel %vm536_vm12, %v5402_v1, %v2440_v34 }
 0xc9f   : > { %v4483_v10 = vpop.f32.mrf.mxu1  ;;  %v2511_v14 = vsel %vm2509_vm13, %v2504_v49, %v2464_v7  ;;  %v4868_v7 = vld [vmem:[%s6249_s17] sm:$0xff] }
 0xccf   : > { %v2486_v5 = vpop.permute.xlu0 %2485 }
 0xcd0   : > { %v2517_v25 = vsel %vm2516_vm14, %v2510_v40, %v2486_v5 }
 0xcd1   : > { %4493 = vmatmul.mubr.msk.f32.vlgmr.msra.gmra.mxu0 %vm220_vm10, %v2517_v25 }
 0xcd2   : > { %4495 = vmatprep.mubr.msk.f32.mxu0 %vm4883_vm11, %v4882_v24 }
 0xcd3   : > { %v2488_v23 = vpop.permute.xlu1 %2487 }
 0xcd4   : > { %v2518_v28 = vsel %vm2516_vm14, %v2511_v14, %v2488_v23 }
 0xcd5   : > { %4496 = vmatmul.mubr.msk.f32.gmra.mxu0 %vm220_vm10, %v2518_v28  ;;  %v4870_v28 = vld [vmem:[%s6249_s17 + $0x10] sm:$0xff] }
 0xcd6   : > { %4498 = vmatprep.mubr.msk.f32.mxu0 %vm4883_vm11, %v4882_v24 }
 0xcf8   : > { %v2490_v63 = vpop.permute.xlu0 %2489 }
 0xcf9   : > { %v2519_v52 = vsel %vm2516_vm14, %v2512_v26, %v2490_v63 }
 0xd08   : > { %v2492_v21 = vpop.permute.xlu1 %2491 }
 0xd09   : > { %v2520_v1 = vsel %vm2516_vm14, %v5815_v35, %v2492_v21 }
 0xd0a   : > { %v2526_v42 = vrot.slane %v2520_v1, 7 }
 0xd0c   : > { %v2448_v57 = vpop.permute.xlu1 %2447  ;;  %v2494_v37 = vpop.permute.xlu0 %2493  ;;  %v2532_v62 = vsel %vm195_vm7, %v2519_v52, %v2526_v42 }
 0xd0d   : > { %v2521_v59 = vsel %vm2516_vm14, %v2514_v2, %v2494_v37  ;;  %4499 = vmatmul.mubr.msk.f32.gmra.mxu0 %vm220_vm10, %v2532_v62  ;;  %v2508_v30 = vsel %vm536_vm12, %v5424_v32, %v2448_v57  ;;  %v3957_v32 = vld [vmem:[%s296_s3] ss:$0 sm:$0xff] }
 0xd0e   : > { %v2527_v3 = vrot.slane %v2521_v59, 7  ;;  %4501 = vmatprep.mubr.msk.f32.mxu0 %vm4883_vm11, %v4882_v24  ;;  %v4872_v62 = vld [vmem:[%s6249_s17 + $0x20] sm:$0x3] }
 0xd10   : > { %v2496_v35 = vpop.permute.xlu1 %2495  ;;  %v2472_v27 = vpop.permute.xlu0 %2471  ;;  %v2528_v6 = vsel %vm195_vm7, %v2526_v42, %v2527_v3  ;;  %v4871_v42 = vld [vmem:[%s6249_s17 + $0x18] sm:$0xff] }
 0xd11   : > { %v2515_v11 = vsel %vm2509_vm13, %v2508_v30, %v2472_v27  ;;  %4502 = vmatmul.mubr.msk.f32.gmra.mxu0 %vm220_vm10, %v2528_v6 }
 0xd12   : > { %4504 = vmatprep.mubr.msk.f32.mxu0 %vm4883_vm11, %v4882_v24  ;;  %v2522_v19 = vsel %vm2516_vm14, %v2515_v11, %v2496_v35 }
 0xd13   : > { %v2529_v20 = vrot.slane %v2522_v19, 7 }
 0xd15   : > { %v2530_v22 = vsel %vm195_vm7, %v2527_v3, %v2529_v20 }
 0xd16   : > { %4505 = vmatmul.mubr.msk.f32.gmra.mxu0 %vm220_vm10, %v2530_v22 }
 0xd17   : > { %4546 = vmatprep.mubr.msk.f32.mxu0 %vm4883_vm11, %v4882_v24 }
 0xd91   : > { %v2618_v10 = vpop.f32.mrf.mxu0 }
 0xd92   : > { %v2619_v31 = vadd.f32 %v3957_v32, %v2618_v10 }
 0xd93   : > { %v4494_v34 = vpop.f32.mrf.mxu0 }
 0xd94   : > { %v5886_v16 = vadd.f32 %v4868_v7, %v2619_v31  ;;  %v306_v31 = vld [vmem:[%s302_s24 + $0x18] sm:$0xff]  ;;  %v305_v34 = vld [vmem:[%s302_s24 + $0x10] sm:$0xff]  ;;  %v304_v7 = vld [vmem:[%s302_s24 + $0x8] sm:$0xff] }
 0xd95   : > { %v2623_v38 = vpop.f32.mrf.mxu0  ;;  %4508 = vmatpush3.msra.mxu1 %v306_v31 }
 0xd96   : > { %v2624_v46 = vadd.f32 %v3957_v32, %v2623_v38  ;;  %v2647_v0 = vsel %vm220_vm10, %v5886_v16, 0.0  ;;  %4509 = vmatprep.subr.mxu1 %v4882_v24  ;;  %v303_v38 = vld [vmem:[%s302_s24] sm:$0xff] }
 0xd97   : > { %2648 = vadd.xlane.f32.xlu0 %v2647_v0  ;;  %v4497_v40 = vpop.f32.mrf.mxu0  ;;  %4510 = vmatpush3.msra.mxu1 %v305_v34  ;;  %v3104_v34 = vld [vmem:[#allocation2 + $0x10] sm:$0x1] }
 0xd98   : > { %v5893_v5 = vadd.f32 %v4869_v8, %v2624_v46  ;;  %4511 = vmatprep.subr.mxu1 %v4882_v24 }
 0xd99   : > { %4512 = vmatpush3.msra.mxu1 %v304_v7 }
 0xd9a   : > { %v2650_v25 = vsel %vm220_vm10, %v5893_v5, 0.0  ;;  %4513 = vmatprep.subr.mxu1 %v4882_v24 }
 0xd9b   : > { %2651 = vadd.xlane.f32.xlu1 %v2650_v25  ;;  %4514 = vmatpush3.msra.mxu1 %v303_v38  ;;  %v3103_v38 = vld [vmem:[#allocation2 + $0x8] sm:$0xff] }
 0xd9c   : > { %4561 = vmatprep.subr.mxu1 %v4882_v24 }
 0xdcd   : > { %v2628_v49 = vpop.f32.mrf.mxu0 }
 0xdce   : > { %v2629_v14 = vadd.f32 %v3957_v32, %v2628_v49 }
 0xdcf   : > { %v4500_v23 = vpop.f32.mrf.mxu0 }
 0xdd0   : > { %v5900_v63 = vadd.f32 %v4870_v28, %v2629_v14 }
 0xdd1   : > { %v2633_v21 = vpop.f32.mrf.mxu0 }
 0xdd2   : > { %v2634_v36 = vadd.f32 %v3957_v32, %v2633_v21  ;;  %v2653_v1 = vsel %vm220_vm10, %v5900_v63, 0.0 }
 0xdd3   : > { %2654 = vadd.xlane.f32.xlu0 %v2653_v1  ;;  %v4503_v26 = vpop.f32.mrf.mxu0 }
 0xdd4   : > { %v5907_v51 = vadd.f32 %v4871_v42, %v2634_v36 }
 0xdd6   : > { %v2638_v52 = vpop.f32.mrf.mxu0  ;;  %v2656_v2 = vsel %vm220_vm10, %v5907_v51, 0.0 }
 0xdd7   : > { %v2639_v57 = vadd.f32 %v3957_v32, %v2638_v52  ;;  %2657 = vadd.xlane.f32.xlu0 %v2656_v2 }
 0xdd8   : > { %v4506_v37 = vpop.f32.mrf.mxu0 }
 0xdd9   : > { %v5914_v59 = vadd.f32 %v4872_v62, %v2639_v57 }
 0xddb   : > { %v2659_v3 = vsel %vm225_vm8, %v5914_v59, 0.0 }
 0xddc   : > { %2660 = vadd.xlane.f32.xlu0 %v2659_v3 }
 0xe20   : > { %v2649_v30 = vpop.xlane.xlu0 %2648 }
 0xe21   : > { %v2662_v35 = vmul.f32 0.03125, %v2649_v30 }
 0xe23   : > { %v2667_v27 = vsub.f32 %v5886_v16, %v2662_v35 }
 0xe24   : > { %v2652_v6 = vpop.xlane.xlu1 %2651 }
 0xe25   : > { %v2663_v11 = vmul.f32 0.03125, %v2652_v6  ;;  %v2672_v19 = vmul.f32 %v2667_v27, %v2667_v27  ;;  %v3963_v6 = vld [vmem:[%s298_s26] ss:$0 sm:$0xff] }
 0xe27   : > { %v2668_v20 = vsub.f32 %v5893_v5, %v2663_v11  ;;  %v2677_v22 = vsel %vm220_vm10, %v2672_v19, 0.0  ;;  %v3964_v19 = vld [vmem:[%s300_s27] ss:$0 sm:$0xff] }
 0xe28   : > { %2678 = vadd.xlane.f32.xlu1 %v2677_v22 }
 0xe29   : > { %v2673_v32 = vmul.f32 %v2668_v20, %v2668_v20 }
 0xe2b   : > { %v2680_v10 = vsel %vm220_vm10, %v2673_v32, 0.0 }
 0xe2c   : > { %2681 = vadd.xlane.f32.xlu0 %v2680_v10 }
 0xe5c   : > { %v2655_v46 = vpop.xlane.xlu0 %2654 }
 0xe5d   : > { %v2664_v0 = vmul.f32 0.03125, %v2655_v46 }
 0xe5f   : > { %v2669_v40 = vsub.f32 %v5900_v63, %v2664_v0  ;;  %v3102_v0 = vld [vmem:[#allocation2] sm:$0xff] }
 0xe60   : > { %v2658_v8 = vpop.xlane.xlu0 %2657 }
 0xe61   : > { %v2665_v25 = vmul.f32 0.03125, %v2658_v8  ;;  %v2674_v49 = vmul.f32 %v2669_v40, %v2669_v40 }
 0xe63   : > { %v2670_v14 = vsub.f32 %v5907_v51, %v2665_v25  ;;  %v2683_v23 = vsel %vm220_vm10, %v2674_v49, 0.0 }
 0xe64   : > { %2684 = vadd.xlane.f32.xlu1 %v2683_v23 }
 0xe65   : > { %v2661_v28 = vpop.xlane.xlu0 %2660  ;;  %v2675_v21 = vmul.f32 %v2670_v14, %v2670_v14 }
 0xe66   : > { %v2666_v36 = vmul.f32 0.03125, %v2661_v28 }
 0xe67   : > { %v2686_v1 = vsel %vm220_vm10, %v2675_v21, 0.0 }
 0xe68   : > { %v2671_v26 = vsub.f32 %v5914_v59, %v2666_v36  ;;  %2687 = vadd.xlane.f32.xlu0 %v2686_v1 }
 0xe6a   : > { %v2676_v42 = vmul.f32 %v2671_v26, %v2671_v26 }
 0xe6c   : > { %v2689_v52 = vsel %vm225_vm8, %v2676_v42, 0.0 }
 0xe6d   : > { %2690 = vadd.xlane.f32.xlu1 %v2689_v52 }
 0xeb1   : > { %v2679_v2 = vpop.xlane.xlu1 %2678 }
 0xeb2   : > { %v2692_v57 = vmul.f32 0.03125, %v2679_v2 }
 0xeb4   : > { %v2697_v37 = vadd.f32 1e-06, %v2692_v57 }
 0xeb5   : > { %v2682_v62 = vpop.xlane.xlu0 %2681 }
 0xeb6   : > { %4838 = vrsqrt.f32 %v2697_v37  ;;  %v2693_v3 = vmul.f32 0.03125, %v2682_v62 }
 0xeb8   : > { %v2698_v30 = vadd.f32 1e-06, %v2693_v3 }
 0xeba   : > { %4840 = vrsqrt.f32 %v2698_v30 }
 0xec3   : > { %v4839_v35 = vpop.eup %4838 }
 0xec4   : > { %v2707_v11 = vmul.f32 %v4839_v35, %v2667_v27 }
 0xec6   : > { %v2718_v22 = vmul.f32 %v3963_v6, %v2707_v11 }
 0xec7   : > { %v4841_v32 = vpop.eup %4840 }
 0xec8   : > { %v2729_v10 = vadd.f32 %v3964_v19, %v2718_v22  ;;  %v2708_v31 = vmul.f32 %v4841_v32, %v2668_v20  ;;  %v3109_v22 = vld [vmem:[#allocation2 + $0x38] sm:$0xff]  ;;  %v313_v32 = vld [vmem:[%s310_s29 + $0x10] sm:$0xff] }
 0xeca   : > { %4516 = vmatmul.mubr.msk.f32.vlgmr.msra.gmra.mxu1 %vm220_vm10, %v2729_v10  ;;  %v2719_v7 = vmul.f32 %v3963_v6, %v2708_v31  ;;  %v311_v10 = vld [vmem:[%s310_s29] sm:$0xff] }
 0xecb   : > { %4518 = vmatprep.mubr.msk.f32.mxu1 %vm4883_vm11, %v4882_v24  ;;  %4562 = vmatpush3.msk.msra.mxu1 %vm195_vm7, %v3104_v34 }
 0xecc   : > { %v2730_v46 = vadd.f32 %v3964_v19, %v2719_v7  ;;  %4563 = vmatprep.subr.mxu1 %v4882_v24 }
 0xecd   : > { %4564 = vmatpush3.msra.mxu1 %v3103_v38 }
 0xece   : > { %4519 = vmatmul.mubr.msk.f32.gmra.mxu1 %vm220_vm10, %v2730_v46  ;;  %4565 = vmatprep.subr.mxu1 %v4882_v24 }
 0xecf   : > { %4521 = vmatprep.mubr.msk.f32.mxu1 %vm4883_vm11, %v4882_v24  ;;  %4566 = vmatpush3.msra.mxu1 %v3102_v0 }
 0xed0   : > { %4591 = vmatprep.subr.mxu1 %v4882_v24 }
 0xeed   : > { %v2685_v27 = vpop.xlane.xlu1 %2684 }
 0xeee   : > { %v2694_v20 = vmul.f32 0.03125, %v2685_v27 }
 0xef0   : > { %v2699_v8 = vadd.f32 1e-06, %v2694_v20 }
 0xef1   : > { %v2688_v25 = vpop.xlane.xlu0 %2687 }
 0xef2   : > { %4842 = vrsqrt.f32 %v2699_v8  ;;  %v2695_v49 = vmul.f32 0.03125, %v2688_v25 }
 0xef4   : > { %v2700_v23 = vadd.f32 1e-06, %v2695_v49 }
 0xef6   : > { %4844 = vrsqrt.f32 %v2700_v23  ;;  %v2691_v28 = vpop.xlane.xlu1 %2690 }
 0xef7   : > { %v2696_v21 = vmul.f32 0.03125, %v2691_v28 }
 0xef9   : > { %v2701_v36 = vadd.f32 1e-06, %v2696_v21 }
 0xefb   : > { %4846 = vrsqrt.f32 %v2701_v36 }
 0xeff   : > { %v4843_v1 = vpop.eup %4842 }
 0xf00   : > { %v2709_v42 = vmul.f32 %v4843_v1, %v2669_v40 }
 0xf02   : > { %v2720_v52 = vmul.f32 %v3963_v6, %v2709_v42 }
 0xf03   : > { %v4845_v2 = vpop.eup %4844 }
 0xf04   : > { %v2731_v57 = vadd.f32 %v3964_v19, %v2720_v52  ;;  %v2710_v37 = vmul.f32 %v4845_v2, %v2670_v14  ;;  %v3110_v14 = vld [vmem:[#allocation2 + $0x40] sm:$0x1] }
 0xf06   : > { %4522 = vmatmul.mubr.msk.f32.gmra.mxu1 %vm220_vm10, %v2731_v57  ;;  %v2721_v62 = vmul.f32 %v3963_v6, %v2710_v37 }
 0xf07   : > { %4524 = vmatprep.mubr.msk.f32.mxu1 %vm4883_vm11, %v4882_v24 }
 0xf08   : > { %v4847_v3 = vpop.eup %4846  ;;  %v2732_v30 = vadd.f32 %v3964_v19, %v2721_v62 }
 0xf09   : > { %v2711_v35 = vmul.f32 %v4847_v3, %v2671_v26  ;;  %v3108_v26 = vld [vmem:[#allocation2 + $0x30] sm:$0xff] }
 0xf0a   : > { %4525 = vmatmul.mubr.msk.f32.gmra.mxu1 %vm220_vm10, %v2732_v30 }
 0xf0b   : > { %4527 = vmatprep.mubr.msk.f32.mxu1 %vm4883_vm11, %v4882_v24  ;;  %v2722_v11 = vmul.f32 %v3963_v6, %v2711_v35  ;;  %v3115_v6 = vld [vmem:[#allocation2 + $0x68] sm:$0xff] }
 0xf0d   : > { %v2733_v40 = vadd.f32 %v3964_v19, %v2722_v11  ;;  %v315_v19 = vld [vmem:[%s310_s29 + $0x20] sm:$0xff] }
 0xf0f   : > { %4528 = vmatmul.mubr.msk.f32.gmra.mxu1 %vm220_vm10, %v2733_v40 }
 0xf10   : > { %4567 = vmatprep.mubr.msk.f32.mxu1 %vm4883_vm11, %v4882_v24 }
 0xf13   : > { %4568 = vmatmul.mubr.msk.f32.vlgmr.msra.gmra.mxu1 %vm242_vm1, %v5320_v43  ;;  %v3116_v43 = vld [vmem:[#allocation2 + $0x70] sm:$0x1] }
 0xf14   : > { %4570 = vmatprep.mubr.msk.f32.mxu1 %vm4883_vm11, %v4882_v24  ;;  %4592 = vmatpush3.msk.msra.mxu1 %vm195_vm7, %v3110_v14 }
 0xf15   : > { %4593 = vmatprep.subr.mxu1 %v4882_v24 }
 0xf16   : > { %4594 = vmatpush3.msra.mxu1 %v3109_v22 }
 0xf17   : > { %4571 = vmatmul.mubr.msk.f32.gmra.mxu1 %vm242_vm1, %v5329_v45  ;;  %4595 = vmatprep.subr.mxu1 %v4882_v24  ;;  %v3114_v45 = vld [vmem:[#allocation2 + $0x60] sm:$0xff] }
 0xf18   : > { %4573 = vmatprep.mubr.msk.f32.mxu1 %vm4883_vm11, %v4882_v24  ;;  %4596 = vmatpush3.msra.mxu1 %v3108_v26 }
 0xf19   : > { %4621 = vmatprep.subr.mxu1 %v4882_v24 }
 0xf1b   : > { %4574 = vmatmul.mubr.msk.f32.gmra.mxu1 %vm242_vm1, %v5338_v47  ;;  %v3122_v47 = vld [vmem:[#allocation2 + $0xa0] sm:$0x1] }
 0xf1c   : > { %4597 = vmatprep.mubr.msk.f32.mxu1 %vm4883_vm11, %v4882_v24 }
 0xf1f   : > { %4598 = vmatmul.mubr.msk.f32.vlgmr.msra.gmra.mxu1 %vm242_vm1, %v5641_v29  ;;  %v3121_v29 = vld [vmem:[#allocation2 + $0x98] sm:$0xff] }
 0xf20   : > { %4600 = vmatprep.mubr.msk.f32.mxu1 %vm4883_vm11, %v4882_v24  ;;  %4622 = vmatpush3.msk.msra.mxu1 %vm195_vm7, %v3116_v43 }
 0xf21   : > { %4623 = vmatprep.subr.mxu1 %v4882_v24 }
 0xf22   : > { %4624 = vmatpush3.msra.mxu1 %v3115_v6 }
 0xf23   : > { %4601 = vmatmul.mubr.msk.f32.gmra.mxu1 %vm242_vm1, %v5650_v33  ;;  %4625 = vmatprep.subr.mxu1 %v4882_v24  ;;  %v3120_v33 = vld [vmem:[#allocation2 + $0x90] sm:$0xff] }
 0xf24   : > { %4603 = vmatprep.mubr.msk.f32.mxu1 %vm4883_vm11, %v4882_v24  ;;  %4626 = vmatpush3.msra.mxu1 %v3114_v45 }
 0xf25   : > { %4651 = vmatprep.subr.mxu1 %v4882_v24 }
 0xf27   : > { %4604 = vmatmul.mubr.msk.f32.gmra.mxu1 %vm242_vm1, %v5661_v18  ;;  %v317_v18 = vld [vmem:[%s310_s29 + $0x30] sm:$0xff] }
 0xf28   : > { %4627 = vmatprep.mubr.msk.f32.mxu1 %vm4883_vm11, %v4882_v24 }
 0xf2b   : > { %4628 = vmatmul.mubr.msk.f32.vlgmr.msra.gmra.mxu1 %vm242_vm1, %v5364_v56  ;;  %v318_v56 = vld [vmem:[%s310_s29 + $0x38] sm:$0xff] }
 0xf2c   : > { %4630 = vmatprep.mubr.msk.f32.mxu1 %vm4883_vm11, %v4882_v24  ;;  %4652 = vmatpush3.msk.msra.mxu1 %vm195_vm7, %v3122_v47 }
 0xf2d   : > { %4653 = vmatprep.subr.mxu1 %v4882_v24  ;;  %4531 = vmatpush3.msra.mxu0 %v318_v56 }
 0xf2e   : > { %4654 = vmatpush3.msra.mxu1 %v3121_v29  ;;  %4532 = vmatprep.subr.mxu0 %v4882_v24 }
 0xf2f   : > { %4631 = vmatmul.mubr.msk.f32.gmra.mxu1 %vm242_vm1, %v5377_v58  ;;  %4655 = vmatprep.subr.mxu1 %v4882_v24  ;;  %v316_v58 = vld [vmem:[%s310_s29 + $0x28] sm:$0xff] }
 0xf30   : > { %4633 = vmatprep.mubr.msk.f32.mxu1 %vm4883_vm11, %v4882_v24  ;;  %4656 = vmatpush3.msra.mxu1 %v3120_v33 }
 0xf31   : > { %4533 = vmatpush3.msra.mxu0 %v317_v18 }
 0xf32   : > { %4534 = vmatprep.subr.mxu0 %v4882_v24 }
 0xf33   : > { %4634 = vmatmul.mubr.msk.f32.gmra.mxu1 %vm242_vm1, %v5386_v60  ;;  %4535 = vmatpush3.msra.mxu0 %v316_v58  ;;  %v314_v60 = vld [vmem:[%s310_s29 + $0x18] sm:$0xff] }
 0xf34   : > { %4657 = vmatprep.mubr.msk.f32.mxu1 %vm4883_vm11, %v4882_v24  ;;  %4536 = vmatprep.subr.mxu0 %v4882_v24 }
 0xf35   : > { %4537 = vmatpush3.msra.mxu0 %v315_v19 }
 0xf36   : > { %4538 = vmatprep.subr.mxu0 %v4882_v24 }
 0xf37   : > { %4658 = vmatmul.mubr.msk.f32.vlgmr.msra.gmra.mxu1 %vm242_vm1, %v5673_v50  ;;  %4539 = vmatpush3.msra.mxu0 %v314_v60  ;;  %v312_v50 = vld [vmem:[%s310_s29 + $0x8] sm:$0xff] }
 0xf38   : > { %4660 = vmatprep.mubr.msk.f32.mxu1 %vm4883_vm11, %v4882_v24  ;;  %4540 = vmatprep.subr.mxu0 %v4882_v24 }
 0xf39   : > { %4541 = vmatpush3.msra.mxu0 %v313_v32 }
 0xf3a   : > { %4542 = vmatprep.subr.mxu0 %v4882_v24 }
 0xf3b   : > { %4661 = vmatmul.mubr.msk.f32.gmra.mxu1 %vm242_vm1, %v5681_v55  ;;  %4543 = vmatpush3.msra.mxu0 %v312_v50  ;;  %v6036_v55 = vld [vmem:[%s307_s20] ss:$0 sm:$0xff] }
 0xf3c   : > { %4663 = vmatprep.mubr.msk.f32.mxu1 %vm4883_vm11, %v4882_v24  ;;  %4544 = vmatprep.subr.mxu0 %v4882_v24 }
 0xf3d   : > { %4545 = vmatpush3.msra.mxu0 %v311_v10 }
 0xf3e   : > { %4576 = vmatprep.subr.mxu0 %v4882_v24 }
 0xf3f   : > { %4664 = vmatmul.mubr.msk.f32.gmra.mxu1 %vm242_vm1, %v5695_v53 }
 0xf8a   : > { %v2821_v31 = vpop.f32.mrf.mxu1 }
 0xf8b   : > { %v2822_v34 = vadd.f32 %v6036_v55, %v2821_v31 }
 0xf8c   : > { %v4517_v7 = vpop.f32.mrf.mxu1 }
 0xf8d   : > { %v2850_v38 = vmul.f32 0.70710677, %v2822_v34 }
 0xf8e   : > { %v2826_v46 = vpop.f32.mrf.mxu1 }
 0xf8f   : > { %v2855_v0 = vand.u32 2147483647, %v2850_v38  ;;  %v2827_v53 = vadd.f32 %v6036_v55, %v2826_v46  ;;  %vm2955_vm15 = vcmp.ge.f32.partialorder %v2850_v38, 0.0 }
 0xf90   : > { %v4520_v27 = vpop.f32.mrf.mxu1 }
 0xf91   : > { %v2860_v20 = vmul.f32 0.3275911, %v2855_v0  ;;  %v2851_v8 = vmul.f32 0.70710677, %v2827_v53  ;;  %v2925_v21 = vsub.f32 0.0, %v2855_v0 }
 0xf93   : > { %v2865_v25 = vadd.f32 1.0, %v2860_v20  ;;  %v2856_v49 = vand.u32 2147483647, %v2851_v8  ;;  %v2930_v36 = vmul.f32 %v2925_v21, %v2855_v0  ;;  %v2845_v0 = vmul.f32 0.5, %v2822_v34  ;;  %v3105_v34 = vld [vmem:[#allocation2 + $0x18] sm:$0xff] }
 0xf94   : > { %vm2956_vm3 = vcmp.ge.f32.partialorder %v2851_v8, 0.0 }
 0xf95   : > { %4848 = vrcp.f32 %v2865_v25  ;;  %v2861_v23 = vmul.f32 0.3275911, %v2856_v49  ;;  %v2926_v1 = vsub.f32 0.0, %v2856_v49  ;;  %v2935_v2 = vmul.f32 1.442695, %v2930_v36  ;;  %v3106_v36 = vld [vmem:[#allocation2 + $0x20] sm:$0xff] }
 0xf97   : > { %v2866_v28 = vadd.f32 1.0, %v2861_v23  ;;  %v2931_v57 = vmul.f32 %v2926_v1, %v2856_v49  ;;  %v3107_v49 = vld [vmem:[#allocation2 + $0x28] sm:$0x1] }
 0xf99   : > { %4850 = vrcp.f32 %v2866_v28  ;;  %v2937_v35 = vmul.f32 1.442695, %v2931_v57  ;;  %v2846_v28 = vmul.f32 0.5, %v2827_v53 }
 0xf9a   : > { %4852 = vpow2.f32 %v2935_v2 }
 0xf9b   : > { %4854 = vpow2.f32 %v2937_v35 }
 0xfa2   : > { %v4849_v42 = vpop.eup %4848 }
 0xfa3   : > { %v2880_v52 = vmul.f32 1.0614054, %v4849_v42 }
 0xfa5   : > { %v2885_v37 = vadd.f32 -1.4531521, %v2880_v52 }
 0xfa6   : > { %v4851_v62 = vpop.eup %4850 }
 0xfa7   : > { %v2890_v3 = vmul.f32 %v4849_v42, %v2885_v37  ;;  %v2881_v30 = vmul.f32 1.0614054, %v4851_v62  ;;  %v4853_v18 = vpop.eup %4852 }
 0xfa8   : > { %v4855_v50 = vpop.eup %4854 }
 0xfa9   : > { %v2895_v11 = vadd.f32 1.4214138, %v2890_v3  ;;  %v2886_v40 = vadd.f32 -1.4531521, %v2881_v30 }
 0xfab   : > { %v2900_v14 = vmul.f32 %v4849_v42, %v2895_v11  ;;  %v2891_v22 = vmul.f32 %v4851_v62, %v2886_v40 }
 0xfad   : > { %v2905_v26 = vadd.f32 -0.28449672, %v2900_v14  ;;  %v2896_v43 = vadd.f32 1.4214138, %v2891_v22 }
 0xfaf   : > { %v2910_v6 = vmul.f32 %v4849_v42, %v2905_v26  ;;  %v2901_v45 = vmul.f32 %v4851_v62, %v2896_v43 }
 0xfb1   : > { %v2915_v47 = vadd.f32 0.2548296, %v2910_v6  ;;  %v2906_v29 = vadd.f32 -0.28449672, %v2901_v45 }
 0xfb3   : > { %v2920_v33 = vmul.f32 %v4849_v42, %v2915_v47  ;;  %v2911_v56 = vmul.f32 %v4851_v62, %v2906_v29 }
 0xfb5   : > { %v2945_v58 = vmul.f32 %v4853_v18, %v2920_v33  ;;  %v2916_v19 = vadd.f32 0.2548296, %v2911_v56 }
 0xfb7   : > { %v2950_v60 = vsub.f32 1.0, %v2945_v58  ;;  %v2921_v32 = vmul.f32 %v4851_v62, %v2916_v19 }
 0xfb9   : > { %v2960_v10 = vsub.f32 0.0, %v2950_v60  ;;  %v2946_v31 = vmul.f32 %v4855_v50, %v2921_v32 }
 0xfbb   : > { %v2965_v7 = vsel %vm2955_vm15, %v2950_v60, %v2960_v10  ;;  %v2951_v46 = vsub.f32 1.0, %v2946_v31 }
 0xfbc   : > { %v2970_v27 = vadd.f32 1.0, %v2965_v7 }
 0xfbd   : > { %v2961_v20 = vsub.f32 0.0, %v2951_v46 }
 0xfbe   : > { %v2975_v25 = vmul.f32 %v2970_v27, %v2845_v0 }
 0xfbf   : > { %v2966_v23 = vsel %vm2956_vm3, %v2951_v46, %v2961_v20 }
 0xfc0   : > { %v2971_v21 = vadd.f32 1.0, %v2966_v23  ;;  %4547 = vmatmul.mubr.msk.f32.vlgmr.msra.gmra.mxu0 %vm2986_vm0, %v2975_v25 }
 0xfc1   : > { %4549 = vmatprep.mubr.msk.f32.mxu0 %vm4883_vm11, %v4882_v24  ;;  %4577 = vmatpush3.msk.msra.mxu0 %vm195_vm7, %v3107_v49 }
 0xfc2   : > { %v2976_v38 = vmul.f32 %v2971_v21, %v2846_v28  ;;  %4578 = vmatprep.subr.mxu0 %v4882_v24 }
 0xfc3   : > { %4579 = vmatpush3.msra.mxu0 %v3106_v36 }
 0xfc4   : > { %4550 = vmatmul.mubr.msk.f32.gmra.mxu0 %vm2986_vm0, %v2976_v38  ;;  %4580 = vmatprep.subr.mxu0 %v4882_v24 }
 0xfc5   : > { %4552 = vmatprep.mubr.msk.f32.mxu0 %vm4883_vm11, %v4882_v24  ;;  %4581 = vmatpush3.msra.mxu0 %v3105_v34 }
 0xfc6   : > { %v2831_v53 = vpop.f32.mrf.mxu1  ;;  %4606 = vmatprep.subr.mxu0 %v4882_v24 }
 0xfc7   : > { %v6051_v8 = vadd.f32 %v6036_v55, %v2831_v53 }
 0xfc8   : > { %v4523_v1 = vpop.f32.mrf.mxu1 }
 0xfc9   : > { %v6054_v42 = vmul.f32 0.70710677, %v6051_v8 }
 0xfca   : > { %v2836_v52 = vpop.f32.mrf.mxu1 }
 0xfcb   : > { %v2857_v2 = vand.u32 2147483647, %v6054_v42  ;;  %v6058_v57 = vadd.f32 %v6036_v55, %v2836_v52  ;;  %vm2957_vm4 = vcmp.ge.f32.partialorder %v6054_v42, 0.0 }
 0xfcc   : > { %v4526_v37 = vpop.f32.mrf.mxu1 }
 0xfcd   : > { %v2862_v62 = vmul.f32 0.3275911, %v2857_v2  ;;  %v6061_v3 = vmul.f32 0.70710677, %v6058_v57  ;;  %v2927_v33 = vsub.f32 0.0, %v2857_v2  ;;  %v2848_v42 = vmul.f32 0.5, %v6058_v57 }
 0xfcf   : > { %v2867_v30 = vadd.f32 1.0, %v2862_v62  ;;  %v2858_v35 = vand.u32 2147483647, %v6061_v3  ;;  %v2841_v11 = vpop.f32.mrf.mxu1  ;;  %v2932_v58 = vmul.f32 %v2927_v33, %v2857_v2  ;;  %vm2958_vm5 = vcmp.ge.f32.partialorder %v6061_v3, 0.0 }
 0xfd0   : > { %v6065_v40 = vadd.f32 %v6036_v55, %v2841_v11 }
 0xfd1   : > { %4856 = vrcp.f32 %v2867_v30  ;;  %v2863_v14 = vmul.f32 0.3275911, %v2858_v35  ;;  %v4529_v22 = vpop.f32.mrf.mxu1  ;;  %v2928_v19 = vsub.f32 0.0, %v2858_v35  ;;  %v2939_v31 = vmul.f32 1.442695, %v2932_v58 }
 0xfd2   : > { %v6068_v26 = vmul.f32 0.70710677, %v6065_v40  ;;  %v2849_v57 = vmul.f32 0.5, %v6065_v40  ;;  %v3111_v40 = vld [vmem:[#allocation2 + $0x48] sm:$0xff] }
 0xfd3   : > { %v2868_v43 = vadd.f32 1.0, %v2863_v14  ;;  %v3195_v6 = vpop.f32.mrf.mxu1  ;;  %v2933_v7 = vmul.f32 %v2928_v19, %v2858_v35 }
 0xfd4   : > { %v2859_v45 = vand.u32 2147483647, %v6068_v26  ;;  %3790 = vst.msk [vmem:[#allocation2] sm:$0xff] %vm242_vm1, %v3195_v6  ;;  %vm2959_vm9 = vcmp.ge.f32.partialorder %v6068_v26, 0.0  ;;  %v3113_v26 = vld [vmem:[#allocation2 + $0x58] sm:$0x1] }
 0xfd5   : > { %4858 = vrcp.f32 %v2868_v43  ;;  %v4569_v47 = vpop.f32.mrf.mxu1  ;;  %v2941_v28 = vmul.f32 1.442695, %v2933_v7 }
 0xfd6   : > { %v2864_v29 = vmul.f32 0.3275911, %v2859_v45  ;;  %v2929_v0 = vsub.f32 0.0, %v2859_v45 }
 0xfd7   : > { %v3200_v56 = vpop.f32.mrf.mxu1 }
 0xfd8   : > { %v2869_v18 = vadd.f32 1.0, %v2864_v29  ;;  %3791 = vst.msk [vmem:[#allocation2 + $0x8] sm:$0xff] %vm242_vm1, %v3200_v56  ;;  %v2934_v36 = vmul.f32 %v2929_v0, %v2859_v45 }
 0xfd9   : > { %v4572_v55 = vpop.f32.mrf.mxu1 }
 0xfda   : > { %4860 = vrcp.f32 %v2869_v18  ;;  %v2943_v30 = vmul.f32 1.442695, %v2934_v36 }
 0xfdb   : > { %v3205_v60 = vpop.f32.mrf.mxu1  ;;  %4862 = vpow2.f32 %v2939_v31 }
 0xfdc   : > { %3792 = vst.msk [vmem:[#allocation2 + $0x10] sm:$0x1] %vm245_vm2, %v3205_v60  ;;  %4864 = vpow2.f32 %v2941_v28 }
 0xfdd   : > { %v4575_v32 = vpop.f32.mrf.mxu1  ;;  %4866 = vpow2.f32 %v2943_v30 }
 0xfde   : > { %v4857_v50 = vpop.eup %4856 }
 0xfdf   : > { %v2882_v10 = vmul.f32 1.0614054, %v4857_v50  ;;  %v3361_v46 = vpop.f32.mrf.mxu1 }
 0xfe0   : > { %3796 = vst.msk [vmem:[#allocation2 + $0x30] sm:$0xff] %vm242_vm1, %v3361_v46 }
 0xfe1   : > { %v2887_v27 = vadd.f32 -1.4531521, %v2882_v10  ;;  %v4599_v20 = vpop.f32.mrf.mxu1 }
 0xfe2   : > { %v4859_v25 = vpop.eup %4858 }
 0xfe3   : > { %v2892_v49 = vmul.f32 %v4857_v50, %v2887_v27  ;;  %v2883_v23 = vmul.f32 1.0614054, %v4859_v25  ;;  %v3366_v21 = vpop.f32.mrf.mxu1 }
 0xfe4   : > { %3797 = vst.msk [vmem:[#allocation2 + $0x38] sm:$0xff] %vm242_vm1, %v3366_v21 }
 0xfe5   : > { %v2897_v38 = vadd.f32 1.4214138, %v2892_v49  ;;  %v2888_v34 = vadd.f32 -1.4531521, %v2883_v23  ;;  %v4602_v53 = vpop.f32.mrf.mxu1 }
 0xfe7   : > { %v4861_v1 = vpop.eup %4860  ;;  %v2902_v52 = vmul.f32 %v4857_v50, %v2897_v38  ;;  %v2893_v2 = vmul.f32 %v4859_v25, %v2888_v34  ;;  %v3371_v37 = vpop.f32.mrf.mxu1 }
 0xfe8   : > { %v2884_v62 = vmul.f32 1.0614054, %v4861_v1  ;;  %3798 = vst.msk [vmem:[#allocation2 + $0x40] sm:$0x1] %vm245_vm2, %v3371_v37  ;;  %v4863_v60 = vpop.eup %4862 }
 0xfe9   : > { %v2907_v35 = vadd.f32 -0.28449672, %v2902_v52  ;;  %v2898_v11 = vadd.f32 1.4214138, %v2893_v2  ;;  %v4605_v14 = vpop.f32.mrf.mxu1  ;;  %v4865_v49 = vpop.eup %4864  ;;  %v2847_v52 = vmul.f32 0.5, %v6051_v8 }
 0xfea   : > { %v2889_v22 = vadd.f32 -1.4531521, %v2884_v62 }
 0xfeb   : > { %v2912_v43 = vmul.f32 %v4857_v50, %v2907_v35  ;;  %v2903_v6 = vmul.f32 %v4859_v25, %v2898_v11  ;;  %v3527_v45 = vpop.f32.mrf.mxu1 }
 0xfec   : > { %v2894_v47 = vmul.f32 %v4861_v1, %v2889_v22  ;;  %3802 = vst.msk [vmem:[#allocation2 + $0x60] sm:$0xff] %vm242_vm1, %v3527_v45 }
 0xfed   : > { %v2917_v29 = vadd.f32 0.2548296, %v2912_v43  ;;  %v2908_v33 = vadd.f32 -0.28449672, %v2903_v6  ;;  %v4629_v56 = vpop.f32.mrf.mxu1 }
 0xfee   : > { %v2899_v18 = vadd.f32 1.4214138, %v2894_v47 }
 0xfef   : > { %v2922_v55 = vmul.f32 %v4857_v50, %v2917_v29  ;;  %v2913_v58 = vmul.f32 %v4859_v25, %v2908_v33  ;;  %v3532_v19 = vpop.f32.mrf.mxu1 }
 0xff0   : > { %v2904_v32 = vmul.f32 %v4861_v1, %v2899_v18  ;;  %3803 = vst.msk [vmem:[#allocation2 + $0x68] sm:$0xff] %vm242_vm1, %v3532_v19  ;;  %v3112_v18 = vld [vmem:[#allocation2 + $0x50] sm:$0xff] }
 0xff1   : > { %v2947_v10 = vmul.f32 %v4863_v60, %v2922_v55  ;;  %v2918_v31 = vadd.f32 0.2548296, %v2913_v58  ;;  %v4632_v7 = vpop.f32.mrf.mxu1  ;;  %v3118_v55 = vld [vmem:[#allocation2 + $0x80] sm:$0xff] }
 0xff2   : > { %v2909_v46 = vadd.f32 -0.28449672, %v2904_v32 }
 0xff3   : > { %v2952_v0 = vsub.f32 1.0, %v2947_v10  ;;  %v2923_v27 = vmul.f32 %v4859_v25, %v2918_v31  ;;  %v3537_v20 = vpop.f32.mrf.mxu1  ;;  %v4867_v25 = vpop.eup %4866 }
 0xff4   : > { %v2914_v23 = vmul.f32 %v4861_v1, %v2909_v46  ;;  %3804 = vst.msk [vmem:[#allocation2 + $0x70] sm:$0x1] %vm245_vm2, %v3537_v20 }
 0xff5   : > { %v2962_v28 = vsub.f32 0.0, %v2952_v0  ;;  %v2948_v21 = vmul.f32 %v4865_v49, %v2923_v27  ;;  %v4635_v50 = vpop.f32.mrf.mxu1 }
 0xff6   : > { %v2919_v36 = vadd.f32 0.2548296, %v2914_v23 }
 0xff7   : > { %v2967_v38 = vsel %vm2957_vm4, %v2952_v0, %v2962_v28  ;;  %v2953_v34 = vsub.f32 1.0, %v2948_v21  ;;  %v3693_v53 = vpop.f32.mrf.mxu1 }
 0xff8   : > { %v2972_v2 = vadd.f32 1.0, %v2967_v38  ;;  %v2924_v37 = vmul.f32 %v4861_v1, %v2919_v36  ;;  %3808 = vst.msk [vmem:[#allocation2 + $0x90] sm:$0xff] %vm242_vm1, %v3693_v53 }
 0xff9   : > { %v2963_v62 = vsub.f32 0.0, %v2953_v34  ;;  %v4659_v30 = vpop.f32.mrf.mxu1 }
 0xffa   : > { %v2977_v35 = vmul.f32 %v2972_v2, %v2847_v52  ;;  %v2949_v11 = vmul.f32 %v4867_v25, %v2924_v37 }
 0xffb   : > { %v2968_v14 = vsel %vm2958_vm5, %v2953_v34, %v2963_v62  ;;  %v3698_v22 = vpop.f32.mrf.mxu1 }
 0xffc   : > { %v2973_v43 = vadd.f32 1.0, %v2968_v14  ;;  %v2954_v6 = vsub.f32 1.0, %v2949_v11  ;;  %3809 = vst.msk [vmem:[#allocation2 + $0x98] sm:$0xff] %vm242_vm1, %v3698_v22  ;;  %4553 = vmatmul.mubr.msk.f32.gmra.mxu0 %vm2986_vm0, %v2977_v35 }
 0xffd   : > { %v4662_v8 = vpop.f32.mrf.mxu1  ;;  %4555 = vmatprep.mubr.msk.f32.mxu0 %vm4883_vm11, %v4882_v24 }
 0xffe   : > { %v2978_v1 = vmul.f32 %v2973_v43, %v2848_v42  ;;  %v2964_v45 = vsub.f32 0.0, %v2954_v6 }
 0xfff   : > { %v3703_v3 = vpop.f32.mrf.mxu1 }
0x1000   : > { %v2969_v47 = vsel %vm2959_vm9, %v2954_v6, %v2964_v45  ;;  %3810 = vst.msk [vmem:[#allocation2 + $0xa0] sm:$0x1] %vm245_vm2, %v3703_v3  ;;  %4556 = vmatmul.mubr.msk.f32.gmra.mxu0 %vm2986_vm0, %v2978_v1  ;;  %v3814_v6 = vld [vmem:[#allocation2] sm:$0x1] (%p270_p0)  ;;  %v3816_v1 = vld [vmem:[#allocation2 + $0x30] sm:$0x1] (%p270_p0) }
0x1001   : > { %v2974_v29 = vadd.f32 1.0, %v2969_v47  ;;  %v4665_v33 = vpop.f32.mrf.mxu1  ;;  %4558 = vmatprep.mubr.msk.f32.mxu0 %vm4883_vm11, %v4882_v24  ;;  %3822 = vst.msk [vmem:[%s6244_s18] sm:$0x1] (%p270_p0), %vm245_vm2, %v3814_v6  ;;  %3824 = vst.msk [vmem:[%s6244_s18 + $0x2] sm:$0x1] (%p270_p0), %vm245_vm2, %v3816_v1 }
0x1002   :  { %v3818_v3 = vld [vmem:[#allocation2 + $0x60] sm:$0x1] (%p270_p0) }
0x1003   : > { %v2979_v56 = vmul.f32 %v2974_v29, %v2849_v57  ;;  %3826 = vst.msk [vmem:[%s6244_s18 + $0x4] sm:$0x1] (%p270_p0), %vm245_vm2, %v3818_v3  ;;  %v3820_v57 = vld [vmem:[#allocation2 + $0x90] sm:$0x1] (%p270_p0) }
0x1004   :  { %3828 = vst.msk [vmem:[%s6244_s18 + $0x6] sm:$0x1] (%p270_p0), %vm245_vm2, %v3820_v57 }
0x1005   : > { %4559 = vmatmul.mubr.msk.f32.gmra.mxu0 %vm2986_vm0, %v2979_v56 }
0x1006   : > { %4582 = vmatprep.mubr.msk.f32.mxu0 %vm4883_vm11, %v4882_v24 }
0x1009   : > { %4583 = vmatmul.mubr.msk.f32.vlgmr.msra.gmra.mxu0 %vm242_vm1, %v5491_v41  ;;  %v3119_v41 = vld [vmem:[#allocation2 + $0x88] sm:$0x1] }
0x100a   : > { %4607 = vmatpush3.msk.msra.mxu0 %vm195_vm7, %v3113_v26  ;;  %4585 = vmatprep.mubr.msk.f32.mxu0 %vm4883_vm11, %v4882_v24 }
0x100b   : > { %4608 = vmatprep.subr.mxu0 %v4882_v24 }
0x100c   : > { %4609 = vmatpush3.msra.mxu0 %v3112_v18 }
0x100d   : > { %4586 = vmatmul.mubr.msk.f32.gmra.mxu0 %vm242_vm1, %v5500_v44  ;;  %4610 = vmatprep.subr.mxu0 %v4882_v24  ;;  %v3117_v44 = vld [vmem:[#allocation2 + $0x78] sm:$0xff] }
0x100e   : > { %4588 = vmatprep.mubr.msk.f32.mxu0 %vm4883_vm11, %v4882_v24  ;;  %4611 = vmatpush3.msra.mxu0 %v3111_v40 }
0x100f   : > { %4636 = vmatprep.subr.mxu0 %v4882_v24 }
0x1011   : > { %4589 = vmatmul.mubr.msk.f32.gmra.mxu0 %vm242_vm1, %v5509_v48  ;;  %v3125_v48 = vld [vmem:[#allocation2 + $0xb8] sm:$0x1] }
0x1012   : > { %4612 = vmatprep.mubr.msk.f32.mxu0 %vm4883_vm11, %v4882_v24 }
0x1015   : > { %4613 = vmatmul.mubr.msk.f32.vlgmr.msra.gmra.mxu0 %vm242_vm1, %v5782_v13  ;;  %v3124_v13 = vld [vmem:[#allocation2 + $0xb0] sm:$0xff] }
0x1016   : > { %4637 = vmatpush3.msk.msra.mxu0 %vm195_vm7, %v3119_v41  ;;  %4615 = vmatprep.mubr.msk.f32.mxu0 %vm4883_vm11, %v4882_v24 }
0x1017   : > { %4638 = vmatprep.subr.mxu0 %v4882_v24 }
0x1018   : > { %4639 = vmatpush3.msra.mxu0 %v3118_v55 }
0x1019   : > { %4616 = vmatmul.mubr.msk.f32.gmra.mxu0 %vm242_vm1, %v5789_v15  ;;  %4640 = vmatprep.subr.mxu0 %v4882_v24  ;;  %v3123_v15 = vld [vmem:[#allocation2 + $0xa8] sm:$0xff] }
0x101a   : > { %4618 = vmatprep.mubr.msk.f32.mxu0 %vm4883_vm11, %v4882_v24  ;;  %4641 = vmatpush3.msra.mxu0 %v3117_v44 }
0x101b   : > { %4666 = vmatprep.subr.mxu0 %v4882_v24 }
0x101d   : > { %4619 = vmatmul.mubr.msk.f32.gmra.mxu0 %vm242_vm1, %v5796_v12 }
0x101e   : > { %4642 = vmatprep.mubr.msk.f32.mxu0 %vm4883_vm11, %v4882_v24 }
0x1021   : > { %4643 = vmatmul.mubr.msk.f32.vlgmr.msra.gmra.mxu0 %vm242_vm1, %v5524_v54  ;;  %v3971_v54 = vld [vmem:[%s319_s6] ss:$0 sm:$0xff] }
0x1022   : > { %4667 = vmatpush3.msk.msra.mxu0 %vm195_vm7, %v3125_v48  ;;  %4645 = vmatprep.mubr.msk.f32.mxu0 %vm4883_vm11, %v4882_v24 }
0x1023   : > { %4668 = vmatprep.subr.mxu0 %v4882_v24 }
0x1024   : > { %4669 = vmatpush3.msra.mxu0 %v3124_v13 }
0x1025   : > { %4646 = vmatmul.mubr.msk.f32.gmra.mxu0 %vm242_vm1, %v5537_v61  ;;  %4670 = vmatprep.subr.mxu0 %v4882_v24 }
0x1026   : > { %4648 = vmatprep.mubr.msk.f32.mxu0 %vm4883_vm11, %v4882_v24  ;;  %4671 = vmatpush3.msra.mxu0 %v3123_v15 }
0x1029   : > { %4649 = vmatmul.mubr.msk.f32.gmra.mxu0 %vm242_vm1, %v5547_v4 }
0x102a   : > { %4672 = vmatprep.mubr.msk.f32.mxu0 %vm4883_vm11, %v4882_v24 }
0x102d   : > { %4673 = vmatmul.mubr.msk.f32.vlgmr.msra.gmra.mxu0 %vm242_vm1, %v5804_v9 }
0x102e   : > { %4675 = vmatprep.mubr.msk.f32.mxu0 %vm4883_vm11, %v4882_v24 }
0x1031   : > { %4676 = vmatmul.mubr.msk.f32.gmra.mxu0 %vm242_vm1, %v5810_v17 }
0x1032   : > { %4678 = vmatprep.mubr.msk.f32.mxu0 %vm4883_vm11, %v4882_v24 }
0x1035   : > { %4679 = vmatmul.mubr.msk.f32.gmra.mxu0 %vm242_vm1, %v5821_v39 }
0x1080   : > { %v3068_v61 = vpop.f32.mrf.mxu0 }
0x1081   : > { %v3069_v4 = vadd.f32 %v3971_v54, %v3068_v61 }
0x1082   : > { %v4548_v12 = vpop.f32.mrf.mxu0 }
0x1083   : > { %v3092_v9 = vadd.f32 %v3069_v4, %v5886_v16 }
0x1084   : > { %v3073_v58 = vpop.f32.mrf.mxu0 }
0x1085   : > { %3097 = vst.msk [vmem:[%s6249_s17] sm:$0xff] %vm220_vm10, %v3092_v9  ;;  %v3074_v24 = vadd.f32 %v3971_v54, %v3073_v58 }
0x1086   : > { %v4551_v17 = vpop.f32.mrf.mxu0 }
0x1087   : > { %v3093_v39 = vadd.f32 %v3074_v24, %v5893_v5 }
0x1089   : > { %3098 = vst.msk [vmem:[%s6249_s17 + $0x8] sm:$0xff] %vm220_vm10, %v3093_v39 }
0x10bc   : > { %v3078_v19 = vpop.f32.mrf.mxu0 }
0x10bd   : > { %v3079_v60 = vadd.f32 %v3971_v54, %v3078_v19 }
0x10be   : > { %v4554_v32 = vpop.f32.mrf.mxu0 }
0x10bf   : > { %v3094_v16 = vadd.f32 %v3079_v60, %v5900_v63 }
0x10c0   : > { %v3083_v10 = vpop.f32.mrf.mxu0 }
0x10c1   : > { %3099 = vst.msk [vmem:[%s6249_s17 + $0x10] sm:$0xff] %vm220_vm10, %v3094_v16  ;;  %v3084_v31 = vadd.f32 %v3971_v54, %v3083_v10 }
0x10c2   : > { %v4557_v7 = vpop.f32.mrf.mxu0 }
0x10c3   : > { %v3095_v5 = vadd.f32 %v3084_v31, %v5907_v51 }
0x10c5   : > { %3100 = vst.msk [vmem:[%s6249_s17 + $0x18] sm:$0xff] %vm220_vm10, %v3095_v5  ;;  %v3088_v46 = vpop.f32.mrf.mxu0 }
0x10c6   : > { %v3089_v0 = vadd.f32 %v3971_v54, %v3088_v46 }
0x10c7   : > { %v4560_v27 = vpop.f32.mrf.mxu0 }
0x10c8   : > { %v3096_v63 = vadd.f32 %v3089_v0, %v5914_v59 }
0x10c9   : > { %v3278_v20 = vpop.f32.mrf.mxu0 }
0x10ca   : > { %3101 = vst.msk [vmem:[%s6249_s17 + $0x20] sm:$0x3] %vm225_vm8, %v3096_v63 }
0x10cb   : > { %3793 = vst.msk [vmem:[#allocation2 + $0x18] sm:$0xff] %vm242_vm1, %v3278_v20  ;;  %v4584_v49 = vpop.f32.mrf.mxu0 }
0x10cd   : > { %v3283_v51 = vpop.f32.mrf.mxu0 }
0x10ce   : > { %3794 = vst.msk [vmem:[#allocation2 + $0x20] sm:$0xff] %vm242_vm1, %v3283_v51 }
0x10cf   : > { %v4587_v23 = vpop.f32.mrf.mxu0 }
0x10d1   : > { %v3288_v28 = vpop.f32.mrf.mxu0 }
0x10d2   : > { %3795 = vst.msk [vmem:[#allocation2 + $0x28] sm:$0x1] %vm245_vm2, %v3288_v28  ;;  %v3815_v8 = vld [vmem:[#allocation2 + $0x18] sm:$0x1] (%p270_p0) }
0x10d3   : > { %v4590_v21 = vpop.f32.mrf.mxu0  ;;  %3823 = vst.msk [vmem:[%s6244_s18 + $0x1] sm:$0x1] (%p270_p0), %vm245_vm2, %v3815_v8 }
0x10d5   : > { %v3444_v50 = vpop.f32.mrf.mxu0 }
0x10d6   : > { %3799 = vst.msk [vmem:[#allocation2 + $0x48] sm:$0xff] %vm242_vm1, %v3444_v50 }
0x10d7   : > { %v4614_v59 = vpop.f32.mrf.mxu0 }
0x10d9   : > { %v3449_v36 = vpop.f32.mrf.mxu0 }
0x10da   : > { %3800 = vst.msk [vmem:[#allocation2 + $0x50] sm:$0xff] %vm242_vm1, %v3449_v36 }
0x10db   : > { %v4617_v38 = vpop.f32.mrf.mxu0 }
0x10dd   : > { %v3454_v34 = vpop.f32.mrf.mxu0  ;;  %v3817_v45 = vld [vmem:[#allocation2 + $0x48] sm:$0x1] (%p270_p0) }
0x10de   : > { %3801 = vst.msk [vmem:[#allocation2 + $0x58] sm:$0x1] %vm245_vm2, %v3454_v34  ;;  %3825 = vst.msk [vmem:[%s6244_s18 + $0x3] sm:$0x1] (%p270_p0), %vm245_vm2, %v3817_v45 }
0x10df   : > { %v4620_v53 = vpop.f32.mrf.mxu0 }
0x10e1   : > { %v3610_v52 = vpop.f32.mrf.mxu0 }
0x10e2   : > { %3805 = vst.msk [vmem:[#allocation2 + $0x78] sm:$0xff] %vm242_vm1, %v3610_v52 }
0x10e3   : > { %v4644_v2 = vpop.f32.mrf.mxu0 }
0x10e5   : > { %v3615_v37 = vpop.f32.mrf.mxu0 }
0x10e6   : > { %3806 = vst.msk [vmem:[#allocation2 + $0x80] sm:$0xff] %vm242_vm1, %v3615_v37 }
0x10e7   : > { %v4647_v25 = vpop.f32.mrf.mxu0 }
0x10e9   : > { %v3620_v62 = vpop.f32.mrf.mxu0  ;;  %v3819_v47 = vld [vmem:[#allocation2 + $0x78] sm:$0x1] (%p270_p0) }
0x10ea   : > { %3807 = vst.msk [vmem:[#allocation2 + $0x88] sm:$0x1] %vm245_vm2, %v3620_v62  ;;  %3827 = vst.msk [vmem:[%s6244_s18 + $0x5] sm:$0x1] (%p270_p0), %vm245_vm2, %v3819_v47 }
0x10eb   : > { %v4650_v30 = vpop.f32.mrf.mxu0 }
0x10ed   : > { %v3776_v35 = vpop.f32.mrf.mxu0 }
0x10ee   : > { %3811 = vst.msk [vmem:[#allocation2 + $0xa8] sm:$0xff] %vm242_vm1, %v3776_v35 }
0x10ef   : > { %v4674_v11 = vpop.f32.mrf.mxu0 }
0x10f1   : > { %v3781_v14 = vpop.f32.mrf.mxu0 }
0x10f2   : > { %3812 = vst.msk [vmem:[#allocation2 + $0xb0] sm:$0xff] %vm242_vm1, %v3781_v14 }
0x10f3   : > { %v4677_v22 = vpop.f32.mrf.mxu0  ;;  %272 = sbr.rel (!%p270_p0) target bundleno = 227 (0xe3), region = 115 }
0x10f5   : > { %v3786_v42 = vpop.f32.mrf.mxu0  ;;  %v3821_v29 = vld [vmem:[#allocation2 + $0xa8] sm:$0x1] (%p270_p0) }
0x10f6   : > { %3813 = vst.msk [vmem:[#allocation2 + $0xb8] sm:$0x1] %vm245_vm2, %v3786_v42  ;;  %3829 = vst.msk [vmem:[%s6244_s18 + $0x7] sm:$0x1] (%p270_p0), %vm245_vm2, %v3821_v29 }
0x10f7   : > { %v4680_v43 = vpop.f32.mrf.mxu0 }

// kernel: vit_forward.4
= control target key start
LH: loop header
LB: loop body
LE: loop exit
PB: predicated region body
PF: predicated region fallthrough
CT: control target
= control target key end

     0   :  { %vm79_vm0 = vcmask 261120   ;;  %vm92_vm1 = vcmask 254976   ;;  %v3637_v35 = vmov 0.0   ;;  %vm3638_vm2 = vmmov 0   ;;  %s3639_s18 = smov 96   ;;  %s3641_s19 = smov 88   ;;  %s4682_s0 = inlined_call_operand.vmem [shape: f32[34,32], index: 0, kind: input, shape index: {}]   ;;  %s4683_s3 = inlined_call_operand.vmem [shape: f32[32,96], index: 3, kind: input, shape index: {}]   ;;  %s4684_s1 = inlined_call_operand.vmem [shape: f32[1,32], index: 1, kind: input, shape index: {}]   ;;  %s4685_s2 = inlined_call_operand.vmem [shape: f32[1,32], index: 2, kind: input, shape index: {}]   ;;  %s4686_s4 = inlined_call_operand.vmem [shape: f32[1,96], index: 4, kind: input, shape index: {}]   ;;  %s4687_s14 = inlined_call_operand.vmem [shape: f32[8,1,17], index: 14, kind: output, shape index: {1}]   ;;  %s4688_s5 = inlined_call_operand.vmem [shape: f32[32,32], index: 5, kind: input, shape index: {}]   ;;  %s4689_s6 = inlined_call_operand.vmem [shape: f32[1,32], index: 6, kind: input, shape index: {}]   ;;  %s4690_s9 = inlined_call_operand.vmem [shape: f32[32,64], index: 9, kind: input, shape index: {}]   ;;  %s4691_s7 = inlined_call_operand.vmem [shape: f32[1,32], index: 7, kind: input, shape index: {}]   ;;  %s4692_s8 = inlined_call_operand.vmem [shape: f32[1,32], index: 8, kind: input, shape index: {}]   ;;  %s4693_s11 = inlined_call_operand.vmem [shape: f32[64,32], index: 11, kind: input, shape index: {}]   ;;  %s4694_s10 = inlined_call_operand.vmem [shape: f32[1,64], index: 10, kind: input, shape index: {}]   ;;  %s4695_s12 = inlined_call_operand.vmem [shape: f32[1,32], index: 12, kind: input, shape index: {}]   ;;  %s4696_s13 = inlined_call_operand.vmem [shape: f32[34,32], index: 13, kind: output, shape index: {0}]  }
   0x1   :  { %v74_v0 = vld [vmem:[%s4682_s0] sm:$0xff]  ;;  %v75_v1 = vld [vmem:[%s4682_s0 + $0x8] sm:$0xff]  ;;  %v76_v2 = vld [vmem:[%s4682_s0 + $0x10] sm:$0xff]  ;;  %3126 = vmatprep.subr.mxu0 %v3637_v35  ;;  %3466 = vmatprep.subr.mxu1 %v3637_v35  ;;  %vm283_vm3 = vcmask 1046528   ;;  %s3642_s20 = smov 120   ;;  %vm297_vm4 = vcmask 64512  }
   0x2   :  { %v80_v3 = vsel %vm79_vm0, %v74_v0, 0.0  ;;  %v83_v4 = vsel %vm79_vm0, %v75_v1, 0.0  ;;  %v77_v5 = vld [vmem:[%s4682_s0 + $0x18] sm:$0xff]  ;;  %v86_v6 = vsel %vm79_vm0, %v76_v2, 0.0  ;;  %v78_v8 = vld [vmem:[%s4682_s0 + $0x20] sm:$0x3]  ;;  %3134 = vmatprep.mubr.msk.f32.mxu0 %vm3638_vm2, %v3637_v35  ;;  %3140 = vmatprep.mubr.msk.f32.mxu1 %vm3638_vm2, %v3637_v35 }
   0x3   :  { %81 = vadd.xlane.f32.xlu0 %v80_v3  ;;  %84 = vadd.xlane.f32.xlu1 %v83_v4  ;;  %v89_v7 = vsel %vm79_vm0, %v77_v5, 0.0  ;;  %v93_v9 = vsel %vm92_vm1, %v78_v8, 0.0  ;;  %v51_v36 = vld [vmem:[%s4683_s3 + $0x18] sm:$0xff]  ;;  %v50_v37 = vld [vmem:[%s4683_s3 + $0x10] sm:$0xff]  ;;  %v49_v38 = vld [vmem:[%s4683_s3 + $0x8] sm:$0xff]  ;;  %vm579_vm5 = vcmask 1040384  }
   0x4   :  { %3127 = vmatpush3.msra.mxu0 %v51_v36  ;;  %3470 = vmatpush3.msra.mxu1 %v51_v36  ;;  %v48_v39 = vld [vmem:[%s4683_s3] sm:$0xff]  ;;  %vm494_vm6 = vcmask 138240   ;;  %vm501_vm7 = vcmask 131072   ;;  %s3643_s25 = smov 56   ;;  %s3644_s26 = smov 80   ;;  %vm2273_vm8 = vcmask 130048  }
   0x5   :  { %3128 = vmatprep.subr.mxu0 %v3637_v35  ;;  %3467 = vmatprep.subr.mxu1 %v3637_v35  ;;  %v2882_v56 = vld [vmem:[%s4684_s1] ss:$0 sm:$0xff]  ;;  %s3645_s27 = smov 112   ;;  %s3646_s15 = smov 48   ;;  %vm2280_vm9 = vcmask 195584   ;;  %vm2750_vm11 = vcmask 523264  }
   0x6   :  { %3129 = vmatpush3.msra.mxu0 %v50_v37  ;;  %3471 = vmatpush3.msra.mxu1 %v50_v37  ;;  %v2883_v58 = vld [vmem:[%s4685_s2] ss:$0 sm:$0xff]  ;;  %s3647_s16 = smov 72   ;;  %s3648_s17 = smov 104  }
   0x7   :  { %87 = vadd.xlane.f32.xlu0 %v86_v6  ;;  %90 = vadd.xlane.f32.xlu1 %v89_v7  ;;  %s3651_s21 = smov 8  }
   0x8   :  { %3130 = vmatprep.subr.mxu0 %v3637_v35  ;;  %3468 = vmatprep.subr.mxu1 %v3637_v35 }
   0x9   :  { %3131 = vmatpush3.msra.mxu0 %v49_v38  ;;  %3472 = vmatpush3.msra.mxu1 %v49_v38 }
   0xa   :  { %3132 = vmatprep.subr.mxu0 %v3637_v35  ;;  %3469 = vmatprep.subr.mxu1 %v3637_v35 }
   0xb   :  { %94 = vadd.xlane.f32.xlu0 %v93_v9  ;;  %3133 = vmatpush3.msra.mxu0 %v48_v39 }
   0xc   :  { %3473 = vmatpush3.msra.mxu1 %v48_v39  ;;  %3179 = vmatprep.subr.mxu0 %v3637_v35 }
   0xd   :  { %3149 = vmatprep.subr.mxu1 %v3637_v35 }
  0x8c   :  { %v82_v10 = vpop.xlane.xlu0 %81  ;;  %v85_v11 = vpop.xlane.xlu1 %84 }
  0x8d   :  { %v97_v12 = vmul.f32 0.03125, %v82_v10  ;;  %v98_v13 = vmul.f32 0.03125, %v85_v11 }
  0x8f   :  { %v3748_v14 = vsub.f32 %v74_v0, %v97_v12  ;;  %v3750_v15 = vsub.f32 %v75_v1, %v98_v13 }
  0x90   :  { %v88_v16 = vpop.xlane.xlu0 %87  ;;  %v91_v17 = vpop.xlane.xlu1 %90 }
  0x91   :  { %v99_v18 = vmul.f32 0.03125, %v88_v16  ;;  %v100_v19 = vmul.f32 0.03125, %v91_v17  ;;  %v107_v20 = vmul.f32 %v3748_v14, %v3748_v14  ;;  %v108_v21 = vmul.f32 %v3750_v15, %v3750_v15 }
  0x93   :  { %v3756_v22 = vsub.f32 %v76_v2, %v99_v18  ;;  %v3758_v23 = vsub.f32 %v77_v5, %v100_v19  ;;  %v112_v24 = vsel %vm79_vm0, %v107_v20, 0.0  ;;  %v115_v27 = vsel %vm79_vm0, %v108_v21, 0.0 }
  0x94   :  { %113 = vadd.xlane.f32.xlu1 %v112_v24  ;;  %v95_v25 = vpop.xlane.xlu0 %94 }
  0x95   :  { %v101_v26 = vmul.f32 0.03125, %v95_v25  ;;  %v109_v28 = vmul.f32 %v3756_v22, %v3756_v22  ;;  %v110_v29 = vmul.f32 %v3758_v23, %v3758_v23 }
  0x97   :  { %v3766_v30 = vsub.f32 %v78_v8, %v101_v26  ;;  %v118_v31 = vsel %vm79_vm0, %v109_v28, 0.0  ;;  %v121_v32 = vsel %vm79_vm0, %v110_v29, 0.0 }
  0x98   :  { %116 = vadd.xlane.f32.xlu1 %v115_v27  ;;  %119 = vadd.xlane.f32.xlu0 %v118_v31 }
  0x99   :  { %v111_v33 = vmul.f32 %v3766_v30, %v3766_v30 }
  0x9b   :  { %v124_v34 = vsel %vm92_vm1, %v111_v33, 0.0 }
  0x9c   :  { %122 = vadd.xlane.f32.xlu0 %v121_v32  ;;  %125 = vadd.xlane.f32.xlu1 %v124_v34 }
 0x11d   :  { %v114_v40 = vpop.xlane.xlu1 %113 }
 0x11e   :  { %v127_v41 = vmul.f32 0.03125, %v114_v40 }
 0x120   :  { %v132_v42 = vadd.f32 1e-06, %v127_v41 }
 0x121   :  { %v117_v43 = vpop.xlane.xlu1 %116  ;;  %v120_v44 = vpop.xlane.xlu0 %119 }
 0x122   :  { %3496 = vrsqrt.f32 %v132_v42  ;;  %v128_v45 = vmul.f32 0.03125, %v117_v43  ;;  %v129_v46 = vmul.f32 0.03125, %v120_v44 }
 0x124   :  { %v133_v47 = vadd.f32 1e-06, %v128_v45  ;;  %v134_v48 = vadd.f32 1e-06, %v129_v46 }
 0x125   :  { %v126_v49 = vpop.xlane.xlu1 %125  ;;  %v123_v50 = vpop.xlane.xlu0 %122 }
 0x126   :  { %3498 = vrsqrt.f32 %v133_v47  ;;  %v131_v51 = vmul.f32 0.03125, %v126_v49  ;;  %v130_v52 = vmul.f32 0.03125, %v123_v50 }
 0x127   :  { %3500 = vrsqrt.f32 %v134_v48 }
 0x128   :  { %v136_v53 = vadd.f32 1e-06, %v131_v51  ;;  %v135_v54 = vadd.f32 1e-06, %v130_v52 }
 0x12a   :  { %3502 = vrsqrt.f32 %v136_v53 }
 0x12b   :  { %3504 = vrsqrt.f32 %v135_v54 }
 0x12f   :  { %v3497_v55 = vpop.eup %3496 }
 0x130   :  { %v142_v57 = vmul.f32 %v3497_v55, %v3748_v14 }
 0x132   :  { %v153_v59 = vmul.f32 %v2882_v56, %v142_v57 }
 0x133   :  { %v3499_v60 = vpop.eup %3498 }
 0x134   :  { %v3501_v61 = vpop.eup %3500  ;;  %v164_v62 = vadd.f32 %v2883_v58, %v153_v59  ;;  %v143_v63 = vmul.f32 %v3499_v60, %v3750_v15  ;;  %v2884_v15 = vld [vmem:[%s4686_s4] ss:$0 sm:$0xff]  ;;  %s3640_s4 = smov 64  }
 0x135   :  { %v144_v0 = vmul.f32 %v3501_v61, %v3756_v22 }
 0x136   :  { %3135 = vmatmul.mubr.msk.f32.vlgmr.msra.gmra.mxu0 %vm79_vm0, %v164_v62  ;;  %v154_v1 = vmul.f32 %v2882_v56, %v143_v63 }
 0x137   :  { %v3503_v2 = vpop.eup %3502  ;;  %3137 = vmatprep.mubr.msk.f32.mxu0 %vm3638_vm2, %v3637_v35  ;;  %v155_v3 = vmul.f32 %v2882_v56, %v144_v0 }
 0x138   :  { %v3505_v4 = vpop.eup %3504  ;;  %v165_v5 = vadd.f32 %v2883_v58, %v154_v1  ;;  %v146_v8 = vmul.f32 %v3503_v2, %v3766_v30 }
 0x139   :  { %v166_v6 = vadd.f32 %v2883_v58, %v155_v3  ;;  %v145_v7 = vmul.f32 %v3505_v4, %v3758_v23 }
 0x13a   :  { %3138 = vmatmul.mubr.msk.f32.gmra.mxu0 %vm79_vm0, %v165_v5  ;;  %v157_v11 = vmul.f32 %v2882_v56, %v146_v8 }
 0x13b   :  { %3141 = vmatmul.mubr.msk.f32.vlgmr.msra.gmra.mxu1 %vm79_vm0, %v166_v6  ;;  %v156_v9 = vmul.f32 %v2882_v56, %v145_v7  ;;  %3185 = vmatprep.mubr.msk.f32.mxu0 %vm3638_vm2, %v3637_v35 }
 0x13c   :  { %3143 = vmatprep.mubr.msk.f32.mxu1 %vm3638_vm2, %v3637_v35  ;;  %v168_v12 = vadd.f32 %v2883_v58, %v157_v11 }
 0x13d   :  { %v167_v10 = vadd.f32 %v2883_v58, %v156_v9 }
 0x13f   :  { %3144 = vmatmul.mubr.msk.f32.gmra.mxu1 %vm79_vm0, %v167_v10 }
 0x140   :  { %3146 = vmatprep.mubr.msk.f32.mxu1 %vm3638_vm2, %v3637_v35 }
 0x143   :  { %3147 = vmatmul.mubr.msk.f32.gmra.mxu1 %vm79_vm0, %v168_v12 }
 0x144   :  { %3155 = vmatprep.mubr.msk.f32.mxu1 %vm3638_vm2, %v3637_v35 }
 0x1f6   :  { %v256_v13 = vpop.f32.mrf.mxu0 }
 0x1f7   :  { %v3834_v22 = vadd.f32 %v2884_v15, %v256_v13 }
 0x1f8   :  { %v3136_v14 = vpop.f32.mrf.mxu0 }
 0x1fa   :  { %v261_v16 = vpop.f32.mrf.mxu0 }
 0x1fb   :  { %v3828_v17 = vadd.f32 %v2884_v15, %v261_v16  ;;  %v266_v18 = vpop.f32.mrf.mxu1 }
 0x1fc   :  { %v3830_v19 = vadd.f32 %v2884_v15, %v266_v18  ;;  %v3139_v20 = vpop.f32.mrf.mxu0 }
 0x1fd   :  { %v3142_v21 = vpop.f32.mrf.mxu1  ;;  %293 = vrot.lane.b32.xlu1 %v3828_v17, %s3639_s18 }
 0x1fe   :  { %295 = vrot.lane.b32.xlu0 %v3830_v19, %s3639_s18  ;;  %v284_v32 = vrot.slane %v3830_v19, 1 }
 0x1ff   :  { %v271_v23 = vpop.f32.mrf.mxu1 }
 0x200   :  { %v272_v25 = vadd.f32 %v2884_v15, %v271_v23 }
 0x201   :  { %v3145_v24 = vpop.f32.mrf.mxu1  ;;  %291 = vrot.lane.b32.xlu1 %v3834_v22, %s3639_s18 }
 0x202   :  { %v285_v29 = vrot.slane %v272_v25, 1 }
 0x203   :  { %v276_v26 = vpop.f32.mrf.mxu1 }
 0x204   :  { %v277_v27 = vadd.f32 %v2884_v15, %v276_v26  ;;  %v3845_v33 = vsel %vm283_vm3, %v284_v32, %v285_v29 }
 0x205   :  { %v3148_v28 = vpop.f32.mrf.mxu1 }
 0x206   :  { %v3837_v30 = vrot.slane %v277_v27, 1 }
 0x208   :  { %394 = vrot.lane.b32.xlu1 %v3837_v30, %s3639_s18  ;;  %v3841_v31 = vsel %vm283_vm3, %v285_v29, %v3837_v30 }
 0x209   :  { %392 = vrot.lane.b32.xlu0 %v3841_v31, %s3639_s18 }
 0x20c   :  { %390 = vrot.lane.b32.xlu1 %v3845_v33, %s3639_s18 }
 0x20d   :  { %564 = vrot.lane.b32.xlu0 %v3828_v17, %s3640_s4 }
 0x210   :  { %566 = vrot.lane.b32.xlu1 %v3830_v19, %s3640_s4 }
 0x211   :  { %666 = vrot.lane.b32.xlu0 %v3837_v30, %s3640_s4 }
 0x214   :  { %562 = vrot.lane.b32.xlu1 %v3834_v22, %s3640_s4 }
 0x215   :  { %664 = vrot.lane.b32.xlu0 %v3841_v31, %s3640_s4 }
 0x218   :  { %771 = vrot.lane.b32.xlu1 %v3830_v19, %s3641_s19 }
 0x21c   :  { %769 = vrot.lane.b32.xlu1 %v3828_v17, %s3641_s19 }
 0x220   :  { %767 = vrot.lane.b32.xlu1 %v3834_v22, %s3641_s19 }
 0x224   :  { %761 = vrot.lane.b32.xlu1 %v3834_v22, %s3642_s20 }
 0x228   :  { %875 = vrot.lane.b32.xlu1 %v3837_v30, %s3641_s19 }
 0x26f   :  { %v294_v34 = vpop.permute.xlu1 %293 }
 0x270   :  { %v296_v36 = vpop.permute.xlu0 %295 }
 0x271   :  { %3150 = vmatpush3.xpose.msk.msra.mxu1 %vm297_vm4, %v296_v36 }
 0x272   :  { %3151 = vmatprep.subr.mxu1 %v3637_v35 }
 0x273   :  { %v292_v37 = vpop.permute.xlu1 %291 }
 0x275   :  { %3152 = vmatpush3.xpose.msk.msra.mxu1 %vm297_vm4, %v294_v34 }
 0x276   :  { %3153 = vmatprep.subr.mxu1 %v3637_v35 }
 0x279   :  { %3154 = vmatpush3.xpose.msk.msra.mxu1 %vm297_vm4, %v292_v37 }
 0x27a   :  { %v395_v38 = vpop.permute.xlu1 %394  ;;  %3164 = vmatprep.subr.mxu1 %v3637_v35 }
 0x27b   :  { %v393_v39 = vpop.permute.xlu0 %392 }
 0x27c   :  { %3156 = vmatmul.mubr.msk.f32.vlgmr.msra.gmra.mxu1 %vm297_vm4, %v3834_v22 }
 0x27d   :  { %3165 = vmatpush3.xpose.msk.msra.mxu1 %vm297_vm4, %v395_v38  ;;  %3158 = vmatprep.mubr.msk.f32.mxu1 %vm3638_vm2, %v3637_v35 }
 0x27e   :  { %v391_v40 = vpop.permute.xlu1 %390  ;;  %3166 = vmatprep.subr.mxu1 %v3637_v35 }
 0x27f   :  { %v565_v41 = vpop.permute.xlu0 %564 }
 0x280   :  { %3159 = vmatmul.mubr.msk.f32.gmra.mxu1 %vm297_vm4, %v3828_v17 }
 0x281   :  { %3167 = vmatpush3.xpose.msk.msra.mxu1 %vm297_vm4, %v393_v39  ;;  %3161 = vmatprep.mubr.msk.f32.mxu1 %vm3638_vm2, %v3637_v35 }
 0x282   :  { %v567_v42 = vpop.permute.xlu1 %566  ;;  %3168 = vmatprep.subr.mxu1 %v3637_v35 }
 0x283   :  { %3180 = vmatpush3.msk.msra.mxu0 %vm579_vm5, %v567_v42  ;;  %v667_v43 = vpop.permute.xlu0 %666 }
 0x284   :  { %3162 = vmatmul.mubr.msk.f32.gmra.mxu1 %vm297_vm4, %v3830_v19  ;;  %3181 = vmatprep.subr.mxu0 %v3637_v35 }
 0x285   :  { %3169 = vmatpush3.xpose.msk.msra.mxu1 %vm297_vm4, %v391_v40  ;;  %3182 = vmatpush3.msra.mxu0 %v565_v41 }
 0x286   :  { %v563_v44 = vpop.permute.xlu1 %562  ;;  %3183 = vmatprep.subr.mxu0 %v3637_v35  ;;  %3170 = vmatprep.mubr.msk.f32.mxu1 %vm3638_vm2, %v3637_v35 }
 0x287   :  { %3184 = vmatpush3.msra.mxu0 %v563_v44  ;;  %3194 = vmatprep.subr.mxu1 %v3637_v35  ;;  %v665_v45 = vpop.permute.xlu0 %664 }
 0x288   :  { %3171 = vmatmul.mubr.msk.f32.vlgmr.msra.gmra.mxu1 %vm297_vm4, %v3845_v33  ;;  %3209 = vmatprep.subr.mxu0 %v3637_v35 }
 0x289   :  { %3195 = vmatpush3.msk.msra.mxu1 %vm579_vm5, %v667_v43  ;;  %3173 = vmatprep.mubr.msk.f32.mxu1 %vm3638_vm2, %v3637_v35 }
 0x28a   :  { %3196 = vmatprep.subr.mxu1 %v3637_v35  ;;  %v3921_v6 = vpop.permute.xlu1 %771 }
 0x28b   :  { %3197 = vmatpush3.msra.mxu1 %v665_v45 }
 0x28c   :  { %3174 = vmatmul.mubr.msk.f32.gmra.mxu1 %vm297_vm4, %v3841_v31  ;;  %3198 = vmatprep.subr.mxu1 %v3637_v35 }
 0x28d   :  { %3176 = vmatprep.mubr.msk.f32.mxu1 %vm3638_vm2, %v3637_v35 }
 0x28e   :  { %v3923_v7 = vpop.permute.xlu1 %769 }
 0x290   :  { %3177 = vmatmul.mubr.msk.f32.gmra.mxu1 %vm297_vm4, %v3837_v30 }
 0x291   :  { %3200 = vmatprep.mubr.msk.f32.mxu1 %vm3638_vm2, %v3637_v35 }
 0x292   :  { %v3925_v8 = vpop.permute.xlu1 %767 }
 0x296   :  { %v3927_v9 = vpop.permute.xlu1 %761 }
 0x29a   :  { %v3929_v10 = vpop.permute.xlu1 %875 }
 0x33c   :  { %v376_v46 = vpop.f32.mrf.mxu1 }
 0x33d   :  { %v488_v47 = vmul.f32 0.35355338, %v376_v46 }
 0x33e   :  { %v3157_v48 = vpop.f32.mrf.mxu1 }
 0x33f   :  { %v495_v49 = vsel %vm494_vm6, %v488_v47, -inf }
 0x340   :  { %496 = vmax.xlane.f32.xlu0 %v495_v49  ;;  %v381_v50 = vpop.f32.mrf.mxu1 }
 0x341   :  { %v489_v51 = vmul.f32 0.35355338, %v381_v50 }
 0x342   :  { %v3160_v52 = vpop.f32.mrf.mxu1 }
 0x343   :  { %v498_v53 = vsel %vm494_vm6, %v489_v51, -inf }
 0x344   :  { %499 = vmax.xlane.f32.xlu1 %v498_v53  ;;  %v386_v54 = vpop.f32.mrf.mxu1 }
 0x345   :  { %v490_v55 = vmul.f32 0.35355338, %v386_v54 }
 0x346   :  { %v3163_v56 = vpop.f32.mrf.mxu1 }
 0x347   :  { %v502_v57 = vsel %vm501_vm7, %v490_v55, -inf }
 0x348   :  { %503 = vmax.xlane.f32.xlu0 %v502_v57  ;;  %v474_v58 = vpop.f32.mrf.mxu1 }
 0x349   :  { %v491_v59 = vmul.f32 0.35355338, %v474_v58 }
 0x34a   :  { %v3172_v60 = vpop.f32.mrf.mxu1 }
 0x34b   :  { %v505_v61 = vsel %vm494_vm6, %v491_v59, -inf }
 0x34c   :  { %506 = vmax.xlane.f32.xlu0 %v505_v61  ;;  %v479_v62 = vpop.f32.mrf.mxu1 }
 0x34d   :  { %v492_v63 = vmul.f32 0.35355338, %v479_v62 }
 0x34e   :  { %v3175_v0 = vpop.f32.mrf.mxu1 }
 0x34f   :  { %v508_v1 = vsel %vm494_vm6, %v492_v63, -inf }
 0x350   :  { %509 = vmax.xlane.f32.xlu0 %v508_v1  ;;  %v484_v2 = vpop.f32.mrf.mxu1 }
 0x351   :  { %v493_v3 = vmul.f32 0.35355338, %v484_v2 }
 0x352   :  { %v3178_v4 = vpop.f32.mrf.mxu1 }
 0x353   :  { %v511_v5 = vsel %vm501_vm7, %v493_v3, -inf }
 0x354   :  { %512 = vmax.xlane.f32.xlu1 %v511_v5 }
 0x365   :  { %763 = vrot.lane.b32.xlu1 %v3828_v17, %s3642_s20 }
 0x366   :  { %662 = vrot.lane.b32.xlu0 %v3845_v33, %s3640_s4 }
 0x3c9   :  { %v497_v11 = vpop.xlane.xlu0 %496 }
 0x3ca   :  { %v514_v12 = vsub.f32 %v488_v47, %v497_v11 }
 0x3cc   :  { %v520_v13 = vmul.f32 1.442695, %v514_v12 }
 0x3cd   :  { %v500_v14 = vpop.xlane.xlu1 %499 }
 0x3ce   :  { %3506 = vpow2.f32 %v520_v13  ;;  %v515_v15 = vsub.f32 %v489_v51, %v500_v14 }
 0x3d0   :  { %v522_v16 = vmul.f32 1.442695, %v515_v15 }
 0x3d1   :  { %v504_v18 = vpop.xlane.xlu0 %503 }
 0x3d2   :  { %3508 = vpow2.f32 %v522_v16  ;;  %v516_v20 = vsub.f32 %v490_v55, %v504_v18 }
 0x3d4   :  { %v524_v21 = vmul.f32 1.442695, %v516_v20 }
 0x3d5   :  { %v507_v23 = vpop.xlane.xlu0 %506 }
 0x3d6   :  { %3510 = vpow2.f32 %v524_v21  ;;  %v517_v36 = vsub.f32 %v491_v59, %v507_v23 }
 0x3d8   :  { %v526_v37 = vmul.f32 1.442695, %v517_v36 }
 0x3d9   :  { %v510_v24 = vpop.xlane.xlu0 %509 }
 0x3da   :  { %v518_v38 = vsub.f32 %v492_v63, %v510_v24  ;;  %3512 = vpow2.f32 %v526_v37 }
 0x3db   :  { %v3507_v25 = vpop.eup %3506 }
 0x3dc   :  { %v532_v26 = vsel %vm494_vm6, %v3507_v25, 0.0  ;;  %v528_v40 = vmul.f32 1.442695, %v518_v38 }
 0x3dd   :  { %533 = vadd.xlane.f32.xlu0 %v532_v26  ;;  %v663_v27 = vpop.permute.xlu0 %662  ;;  %v513_v39 = vpop.xlane.xlu1 %512 }
 0x3de   :  { %3199 = vmatpush3.msra.mxu1 %v663_v27  ;;  %v519_v41 = vsub.f32 %v493_v3, %v513_v39  ;;  %3514 = vpow2.f32 %v528_v40 }
 0x3df   :  { %v3509_v28 = vpop.eup %3508  ;;  %3474 = vmatprep.subr.mxu1 %v3637_v35 }
 0x3e0   :  { %v535_v29 = vsel %vm494_vm6, %v3509_v28, 0.0  ;;  %v530_v42 = vmul.f32 1.442695, %v519_v41 }
 0x3e1   :  { %536 = vadd.xlane.f32.xlu1 %v535_v29  ;;  %v764_v49 = vpop.permute.xlu1 %763 }
 0x3e2   :  { %3516 = vpow2.f32 %v530_v42 }
 0x3e3   :  { %v3511_v32 = vpop.eup %3510 }
 0x3e4   :  { %v538_v34 = vsel %vm501_vm7, %v3511_v32, 0.0 }
 0x3e5   :  { %539 = vadd.xlane.f32.xlu0 %v538_v34 }
 0x3e7   :  { %v3513_v43 = vpop.eup %3512 }
 0x3e8   :  { %v541_v44 = vsel %vm494_vm6, %v3513_v43, 0.0 }
 0x3eb   :  { %v3940_v45 = vpop.eup %3514 }
 0x3ec   :  { %v544_v46 = vsel %vm494_vm6, %v3940_v45, 0.0 }
 0x3ef   :  { %v3944_v47 = vpop.eup %3516 }
 0x3f0   :  { %v547_v48 = vsel %vm501_vm7, %v3944_v47, 0.0 }
 0x3f2   :  { %765 = vrot.lane.b32.xlu1 %v3830_v19, %s3642_s20 }
 0x3fb   :  { %873 = vrot.lane.b32.xlu0 %v3841_v31, %s3641_s19 }
 0x416   :  { %542 = vadd.xlane.f32.xlu1 %v541_v44 }
 0x41a   :  { %545 = vadd.xlane.f32.xlu0 %v544_v46 }
 0x41e   :  { %548 = vadd.xlane.f32.xlu0 %v547_v48 }
 0x427   :  { %865 = vrot.lane.b32.xlu1 %v3845_v33, %s3642_s20 }
 0x42b   :  { %869 = vrot.lane.b32.xlu1 %v3837_v30, %s3642_s20 }
 0x434   :  { %871 = vrot.lane.b32.xlu0 %v3845_v33, %s3641_s19  ;;  %s3649_s19 = smov 40  }
 0x438   :  { %867 = vrot.lane.b32.xlu0 %v3841_v31, %s3642_s20  ;;  %s3650_s20 = smov 16  }
 0x466   :  { %v534_v50 = vpop.xlane.xlu0 %533 }
 0x467   :  { %3518 = vrcp.f32 %v534_v50 }
 0x46a   :  { %v537_v51 = vpop.xlane.xlu1 %536 }
 0x46b   :  { %3520 = vrcp.f32 %v537_v51 }
 0x46e   :  { %v540_v52 = vpop.xlane.xlu0 %539  ;;  %v766_v60 = vpop.permute.xlu1 %765 }
 0x46f   :  { %3522 = vrcp.f32 %v540_v52 }
 0x472   :  { %v874_v59 = vpop.permute.xlu0 %873 }
 0x474   :  { %v3519_v53 = vpop.eup %3518 }
 0x475   :  { %v551_v54 = vmul.f32 %v3519_v53, %v3507_v25 }
 0x477   :  { %2866 = vst.msk [vmem:[%s4687_s14] sm:$0x1] %vm501_vm7, %v551_v54  ;;  %3186 = vmatmul.mubr.msk.f32.vlgmr.msra.gmra.mxu0 %vm494_vm6, %v551_v54 }
 0x478   :  { %v3521_v55 = vpop.eup %3520  ;;  %3210 = vmatpush3.xpose.msk.msra.mxu0 %vm297_vm4, %v3921_v6  ;;  %3188 = vmatprep.mubr.msk.f32.mxu0 %vm3638_vm2, %v3637_v35 }
 0x479   :  { %3211 = vmatprep.subr.mxu0 %v3637_v35  ;;  %v553_v56 = vmul.f32 %v3521_v55, %v3509_v28 }
 0x47b   :  { %3189 = vmatmul.mubr.msk.f32.gmra.mxu0 %vm494_vm6, %v553_v56 }
 0x47c   :  { %v3523_v57 = vpop.eup %3522  ;;  %3212 = vmatpush3.xpose.msk.msra.mxu0 %vm297_vm4, %v3923_v7  ;;  %3191 = vmatprep.mubr.msk.f32.mxu0 %vm3638_vm2, %v3637_v35 }
 0x47d   :  { %3213 = vmatprep.subr.mxu0 %v3637_v35  ;;  %v555_v58 = vmul.f32 %v3523_v57, %v3511_v32 }
 0x47f   :  { %3192 = vmatmul.mubr.msk.f32.gmra.mxu0 %vm494_vm6, %v555_v58 }
 0x480   :  { %3214 = vmatpush3.xpose.msk.msra.mxu0 %vm297_vm4, %v3925_v8  ;;  %3215 = vmatprep.mubr.msk.f32.mxu0 %vm3638_vm2, %v3637_v35 }
 0x481   :  { %3224 = vmatprep.subr.mxu0 %v3637_v35 }
 0x483   :  { %3216 = vmatmul.mubr.msk.f32.vlgmr.msra.gmra.mxu0 %vm297_vm4, %v3927_v9 }
 0x484   :  { %3225 = vmatpush3.xpose.msk.msra.mxu0 %vm297_vm4, %v3929_v10  ;;  %3218 = vmatprep.mubr.msk.f32.mxu0 %vm3638_vm2, %v3637_v35 }
 0x485   :  { %3226 = vmatprep.subr.mxu0 %v3637_v35 }
 0x487   :  { %3219 = vmatmul.mubr.msk.f32.gmra.mxu0 %vm297_vm4, %v764_v49 }
 0x488   :  { %3227 = vmatpush3.xpose.msk.msra.mxu0 %vm297_vm4, %v874_v59  ;;  %3221 = vmatprep.mubr.msk.f32.mxu0 %vm3638_vm2, %v3637_v35 }
 0x489   :  { %3228 = vmatprep.subr.mxu0 %v3637_v35 }
 0x48b   :  { %3222 = vmatmul.mubr.msk.f32.gmra.mxu0 %vm297_vm4, %v766_v60 }
 0x48c   :  { %3230 = vmatprep.mubr.msk.f32.mxu0 %vm3638_vm2, %v3637_v35 }
 0x49f   :  { %v543_v61 = vpop.xlane.xlu1 %542 }
 0x4a0   :  { %3524 = vrcp.f32 %v543_v61 }
 0x4a3   :  { %v546_v62 = vpop.xlane.xlu0 %545  ;;  %v866_v3 = vpop.permute.xlu1 %865 }
 0x4a4   :  { %3526 = vrcp.f32 %v546_v62 }
 0x4a7   :  { %v549_v63 = vpop.xlane.xlu0 %548  ;;  %v870_v9 = vpop.permute.xlu1 %869 }
 0x4a8   :  { %3528 = vrcp.f32 %v549_v63 }
 0x4ab   :  { %v872_v0 = vpop.permute.xlu0 %871 }
 0x4ac   :  { %3229 = vmatpush3.xpose.msk.msra.mxu0 %vm297_vm4, %v872_v0 }
 0x4ad   :  { %v3525_v1 = vpop.eup %3524  ;;  %3239 = vmatprep.subr.mxu0 %v3637_v35 }
 0x4ae   :  { %v557_v2 = vmul.f32 %v3525_v1, %v3513_v43 }
 0x4af   :  { %3231 = vmatmul.mubr.msk.f32.vlgmr.msra.gmra.mxu0 %vm297_vm4, %v866_v3  ;;  %v868_v8 = vpop.permute.xlu0 %867 }
 0x4b0   :  { %2870 = vst.msk [vmem:[%s4687_s14 + $0x4] sm:$0x1] %vm501_vm7, %v557_v2  ;;  %3201 = vmatmul.mubr.msk.f32.vlgmr.msra.gmra.mxu1 %vm494_vm6, %v557_v2  ;;  %3245 = vmatprep.mubr.msk.f32.mxu0 %vm3638_vm2, %v3637_v35 }
 0x4b1   :  { %v3527_v4 = vpop.eup %3526  ;;  %3477 = vmatpush3.xpose.msk.msra.mxu1 %vm297_vm4, %v3929_v10  ;;  %3203 = vmatprep.mubr.msk.f32.mxu1 %vm3638_vm2, %v3637_v35 }
 0x4b2   :  { %3475 = vmatprep.subr.mxu1 %v3637_v35  ;;  %v559_v5 = vmul.f32 %v3527_v4, %v3940_v45 }
 0x4b4   :  { %3204 = vmatmul.mubr.msk.f32.gmra.mxu1 %vm494_vm6, %v559_v5 }
 0x4b5   :  { %v3529_v6 = vpop.eup %3528  ;;  %3478 = vmatpush3.xpose.msk.msra.mxu1 %vm297_vm4, %v874_v59  ;;  %3206 = vmatprep.mubr.msk.f32.mxu1 %vm3638_vm2, %v3637_v35 }
 0x4b6   :  { %3476 = vmatprep.subr.mxu1 %v3637_v35  ;;  %v561_v7 = vmul.f32 %v3529_v6, %v3944_v47 }
 0x4b8   :  { %3207 = vmatmul.mubr.msk.f32.gmra.mxu1 %vm494_vm6, %v561_v7 }
 0x4b9   :  { %3479 = vmatpush3.xpose.msk.msra.mxu1 %vm297_vm4, %v872_v0  ;;  %3233 = vmatprep.mubr.msk.f32.mxu1 %vm3638_vm2, %v3637_v35 }
 0x4ba   :  { %3254 = vmatprep.subr.mxu1 %v3637_v35 }
 0x4bc   :  { %3234 = vmatmul.mubr.msk.f32.vlgmr.msra.gmra.mxu1 %vm297_vm4, %v868_v8 }
 0x4bd   :  { %3236 = vmatprep.mubr.msk.f32.mxu1 %vm3638_vm2, %v3637_v35 }
 0x4c0   :  { %3237 = vmatmul.mubr.msk.f32.gmra.mxu1 %vm297_vm4, %v870_v9 }
 0x4c1   :  { %3260 = vmatprep.mubr.msk.f32.mxu1 %vm3638_vm2, %v3637_v35 }
 0x537   :  { %v4026_v10 = vpop.f32.mrf.mxu0 }
 0x539   :  { %v3187_v11 = vpop.f32.mrf.mxu0 }
 0x53b   :  { %v4028_v12 = vpop.f32.mrf.mxu0 }
 0x53d   :  { %v3190_v13 = vpop.f32.mrf.mxu0 }
 0x53f   :  { %v4030_v14 = vpop.f32.mrf.mxu0 }
 0x541   :  { %v3193_v15 = vpop.f32.mrf.mxu0 }
 0x543   :  { %v851_v16 = vpop.f32.mrf.mxu0 }
 0x544   :  { %v969_v18 = vmul.f32 0.35355338, %v851_v16 }
 0x545   :  { %v3217_v20 = vpop.f32.mrf.mxu0 }
 0x546   :  { %v975_v21 = vsel %vm494_vm6, %v969_v18, -inf }
 0x547   :  { %976 = vmax.xlane.f32.xlu0 %v975_v21  ;;  %v856_v23 = vpop.f32.mrf.mxu0 }
 0x548   :  { %v970_v24 = vmul.f32 0.35355338, %v856_v23 }
 0x549   :  { %v3220_v25 = vpop.f32.mrf.mxu0 }
 0x54a   :  { %v978_v26 = vsel %vm494_vm6, %v970_v24, -inf }
 0x54b   :  { %979 = vmax.xlane.f32.xlu1 %v978_v26  ;;  %v861_v27 = vpop.f32.mrf.mxu0 }
 0x54c   :  { %v971_v28 = vmul.f32 0.35355338, %v861_v27 }
 0x54d   :  { %v3223_v29 = vpop.f32.mrf.mxu0 }
 0x54e   :  { %v981_v32 = vsel %vm501_vm7, %v971_v28, -inf }
 0x54f   :  { %982 = vmax.xlane.f32.xlu0 %v981_v32 }
 0x55c   :  { %1043 = vrot.lane.b32.xlu1 %v3828_v17, %s3643_s25 }
 0x560   :  { %1041 = vrot.lane.b32.xlu1 %v3834_v22, %s3643_s25 }
 0x564   :  { %1144 = vrot.lane.b32.xlu1 %v3837_v30, %s3643_s25 }
 0x568   :  { %1142 = vrot.lane.b32.xlu1 %v3841_v31, %s3643_s25 }
 0x56c   :  { %1247 = vrot.lane.b32.xlu1 %v3828_v17, %s3644_s26 }
 0x56f   :  { %v955_v34 = vpop.f32.mrf.mxu0 }
 0x570   :  { %v972_v36 = vmul.f32 0.35355338, %v955_v34  ;;  %v4045_v37 = vpop.f32.mrf.mxu1 }
 0x571   :  { %v3232_v38 = vpop.f32.mrf.mxu0 }
 0x572   :  { %v3202_v39 = vpop.f32.mrf.mxu1  ;;  %v984_v40 = vsel %vm494_vm6, %v972_v36, -inf }
 0x573   :  { %985 = vmax.xlane.f32.xlu0 %v984_v40 }
 0x574   :  { %v4048_v41 = vpop.f32.mrf.mxu1 }
 0x576   :  { %v3205_v42 = vpop.f32.mrf.mxu1 }
 0x578   :  { %v4050_v43 = vpop.f32.mrf.mxu1 }
 0x57a   :  { %v3208_v44 = vpop.f32.mrf.mxu1 }
 0x57c   :  { %v960_v45 = vpop.f32.mrf.mxu1 }
 0x57d   :  { %v973_v46 = vmul.f32 0.35355338, %v960_v45 }
 0x57e   :  { %v3235_v47 = vpop.f32.mrf.mxu1 }
 0x57f   :  { %v987_v48 = vsel %vm494_vm6, %v973_v46, -inf }
 0x580   :  { %988 = vmax.xlane.f32.xlu0 %v987_v48  ;;  %v965_v49 = vpop.f32.mrf.mxu1 }
 0x581   :  { %v4053_v51 = vmul.f32 0.35355338, %v965_v49 }
 0x582   :  { %v3238_v50 = vpop.f32.mrf.mxu1 }
 0x583   :  { %v990_v52 = vsel %vm501_vm7, %v4053_v51, -inf }
 0x590   :  { %991 = vmax.xlane.f32.xlu1 %v990_v52 }
 0x596   :  { %1045 = vrot.lane.b32.xlu0 %v3830_v19, %s3643_s25 }
 0x59a   :  { %1249 = vrot.lane.b32.xlu0 %v3830_v19, %s3644_s26 }
 0x59e   :  { %1140 = vrot.lane.b32.xlu0 %v3845_v33, %s3643_s25 }
 0x5a1   :  { %1245 = vrot.lane.b32.xlu1 %v3834_v22, %s3644_s26 }
 0x5a2   :  { %1353 = vrot.lane.b32.xlu0 %v3837_v30, %s3644_s26 }
 0x5d0   :  { %v977_v53 = vpop.xlane.xlu0 %976 }
 0x5d1   :  { %v993_v54 = vsub.f32 %v969_v18, %v977_v53 }
 0x5d3   :  { %v999_v55 = vmul.f32 1.442695, %v993_v54 }
 0x5d4   :  { %v980_v56 = vpop.xlane.xlu1 %979 }
 0x5d5   :  { %3530 = vpow2.f32 %v999_v55  ;;  %v994_v57 = vsub.f32 %v970_v24, %v980_v56 }
 0x5d7   :  { %v1001_v58 = vmul.f32 1.442695, %v994_v57 }
 0x5d8   :  { %v1044_v59 = vpop.permute.xlu1 %1043  ;;  %v983_v60 = vpop.xlane.xlu0 %982 }
 0x5d9   :  { %3532 = vpow2.f32 %v1001_v58  ;;  %v995_v61 = vsub.f32 %v971_v28, %v983_v60 }
 0x5db   :  { %v1003_v62 = vmul.f32 1.442695, %v995_v61 }
 0x5dc   :  { %v1042_v63 = vpop.permute.xlu1 %1041 }
 0x5dd   :  { %3534 = vpow2.f32 %v1003_v62 }
 0x5e0   :  { %v1145_v0 = vpop.permute.xlu1 %1144 }
 0x5e1   :  { %3255 = vmatpush3.msk.msra.mxu1 %vm579_vm5, %v1145_v0 }
 0x5e2   :  { %v4068_v1 = vpop.eup %3530  ;;  %3256 = vmatprep.subr.mxu1 %v3637_v35 }
 0x5e3   :  { %v1011_v2 = vsel %vm494_vm6, %v4068_v1, 0.0 }
 0x5e4   :  { %v1143_v3 = vpop.permute.xlu1 %1142  ;;  %1012 = vadd.xlane.f32.xlu0 %v1011_v2 }
 0x5e5   :  { %3257 = vmatpush3.msra.mxu1 %v1143_v3 }
 0x5e6   :  { %v4073_v4 = vpop.eup %3532  ;;  %3258 = vmatprep.subr.mxu1 %v3637_v35 }
 0x5e7   :  { %v1014_v5 = vsel %vm494_vm6, %v4073_v4, 0.0 }
 0x5e8   :  { %1015 = vadd.xlane.f32.xlu1 %v1014_v5  ;;  %v1248_v24 = vpop.permute.xlu1 %1247 }
 0x5ea   :  { %v4078_v6 = vpop.eup %3534 }
 0x5eb   :  { %v1017_v7 = vsel %vm501_vm7, %v4078_v6, 0.0 }
 0x5ec   :  { %1018 = vadd.xlane.f32.xlu1 %v1017_v7 }
 0x5fc   :  { %v986_v8 = vpop.xlane.xlu0 %985 }
 0x5fd   :  { %v996_v9 = vsub.f32 %v972_v36, %v986_v8  ;;  %1239 = vrot.lane.b32.xlu1 %v3834_v22, %s3645_s27 }
 0x5ff   :  { %v1005_v11 = vmul.f32 1.442695, %v996_v9 }
 0x601   :  { %3536 = vpow2.f32 %v1005_v11  ;;  %1241 = vrot.lane.b32.xlu1 %v3828_v17, %s3645_s27 }
 0x609   :  { %v989_v13 = vpop.xlane.xlu0 %988 }
 0x60a   :  { %v997_v15 = vsub.f32 %v973_v46, %v989_v13 }
 0x60c   :  { %v1007_v16 = vmul.f32 1.442695, %v997_v15 }
 0x60d   :  { %v1046_v18 = vpop.permute.xlu0 %1045 }
 0x60e   :  { %v4086_v20 = vpop.eup %3536  ;;  %3538 = vpow2.f32 %v1007_v16  ;;  %3240 = vmatpush3.msk.msra.mxu0 %vm579_vm5, %v1046_v18 }
 0x60f   :  { %3241 = vmatprep.subr.mxu0 %v3637_v35  ;;  %v1020_v21 = vsel %vm494_vm6, %v4086_v20, 0.0 }
 0x610   :  { %1021 = vadd.xlane.f32.xlu0 %v1020_v21  ;;  %3242 = vmatpush3.msra.mxu0 %v1044_v59 }
 0x611   :  { %3243 = vmatprep.subr.mxu0 %v3637_v35  ;;  %v1250_v23 = vpop.permute.xlu0 %1249 }
 0x612   :  { %3244 = vmatpush3.msra.mxu0 %v1042_v63 }
 0x613   :  { %3269 = vmatprep.subr.mxu0 %v3637_v35 }
 0x615   :  { %v1141_v25 = vpop.permute.xlu0 %1140 }
 0x616   :  { %3259 = vmatpush3.msra.mxu1 %v1141_v25 }
 0x617   :  { %3284 = vmatprep.subr.mxu1 %v3637_v35 }
 0x619   :  { %v992_v26 = vpop.xlane.xlu1 %991  ;;  %v1354_v38 = vpop.permute.xlu0 %1353 }
 0x61a   :  { %v998_v27 = vsub.f32 %v4053_v51, %v992_v26 }
 0x61b   :  { %v4096_v28 = vpop.eup %3538 }
 0x61c   :  { %v1009_v29 = vmul.f32 1.442695, %v998_v27  ;;  %v1023_v32 = vsel %vm494_vm6, %v4096_v28, 0.0 }
 0x61d   :  { %1024 = vadd.xlane.f32.xlu0 %v1023_v32  ;;  %v1246_v39 = vpop.permute.xlu1 %1245 }
 0x61e   :  { %3540 = vpow2.f32 %v1009_v29 }
 0x62b   :  { %v4100_v34 = vpop.eup %3540 }
 0x62c   :  { %v1026_v36 = vsel %vm501_vm7, %v4100_v34, 0.0 }
 0x62d   :  { %1027 = vadd.xlane.f32.xlu1 %v1026_v36 }
 0x633   :  { %1351 = vrot.lane.b32.xlu0 %v3841_v31, %s3644_s26 }
 0x637   :  { %1349 = vrot.lane.b32.xlu0 %v3845_v33, %s3644_s26 }
 0x63b   :  { %1343 = vrot.lane.b32.xlu0 %v3845_v33, %s3645_s27 }
 0x63e   :  { %1243 = vrot.lane.b32.xlu1 %v3830_v19, %s3645_s27 }
 0x63f   :  { %1345 = vrot.lane.b32.xlu0 %v3841_v31, %s3645_s27 }
 0x642   :  { %1347 = vrot.lane.b32.xlu1 %v3837_v30, %s3645_s27 }
 0x66d   :  { %v1013_v40 = vpop.xlane.xlu0 %1012 }
 0x66e   :  { %3542 = vrcp.f32 %v1013_v40 }
 0x671   :  { %v1016_v42 = vpop.xlane.xlu1 %1015 }
 0x672   :  { %3544 = vrcp.f32 %v1016_v42 }
 0x675   :  { %v1019_v44 = vpop.xlane.xlu1 %1018 }
 0x676   :  { %3546 = vrcp.f32 %v1019_v44 }
 0x679   :  { %v1240_v51 = vpop.permute.xlu1 %1239 }
 0x67b   :  { %v3543_v45 = vpop.eup %3542 }
 0x67c   :  { %v1030_v46 = vmul.f32 %v3543_v45, %v4068_v1 }
 0x67d   :  { %v1242_v52 = vpop.permute.xlu1 %1241 }
 0x67e   :  { %3246 = vmatmul.mubr.msk.f32.vlgmr.msra.gmra.mxu0 %vm494_vm6, %v1030_v46  ;;  %2867 = vst.msk [vmem:[%s4687_s14 + $0x1] sm:$0x1] %vm501_vm7, %v1030_v46 }
 0x67f   :  { %v3545_v47 = vpop.eup %3544  ;;  %3270 = vmatpush3.xpose.msk.msra.mxu0 %vm297_vm4, %v1250_v23  ;;  %3248 = vmatprep.mubr.msk.f32.mxu0 %vm3638_vm2, %v3637_v35 }
 0x680   :  { %3271 = vmatprep.subr.mxu0 %v3637_v35  ;;  %v1032_v48 = vmul.f32 %v3545_v47, %v4073_v4 }
 0x682   :  { %3249 = vmatmul.mubr.msk.f32.gmra.mxu0 %vm494_vm6, %v1032_v48 }
 0x683   :  { %v3547_v49 = vpop.eup %3546  ;;  %3272 = vmatpush3.xpose.msk.msra.mxu0 %vm297_vm4, %v1248_v24  ;;  %3251 = vmatprep.mubr.msk.f32.mxu0 %vm3638_vm2, %v3637_v35 }
 0x684   :  { %3273 = vmatprep.subr.mxu0 %v3637_v35  ;;  %v1034_v50 = vmul.f32 %v3547_v49, %v4078_v6 }
 0x686   :  { %3252 = vmatmul.mubr.msk.f32.gmra.mxu0 %vm494_vm6, %v1034_v50 }
 0x687   :  { %3274 = vmatpush3.xpose.msk.msra.mxu0 %vm297_vm4, %v1246_v39  ;;  %3275 = vmatprep.mubr.msk.f32.mxu0 %vm3638_vm2, %v3637_v35 }
 0x688   :  { %3299 = vmatprep.subr.mxu0 %v3637_v35 }
 0x68a   :  { %3276 = vmatmul.mubr.msk.f32.vlgmr.msra.gmra.mxu0 %vm297_vm4, %v1240_v51 }
 0x68b   :  { %3278 = vmatprep.mubr.msk.f32.mxu0 %vm3638_vm2, %v3637_v35 }
 0x68e   :  { %3279 = vmatmul.mubr.msk.f32.gmra.mxu0 %vm297_vm4, %v1242_v52 }
 0x68f   :  { %3281 = vmatprep.mubr.msk.f32.mxu0 %vm3638_vm2, %v3637_v35 }
 0x699   :  { %v1022_v53 = vpop.xlane.xlu0 %1021 }
 0x69a   :  { %3548 = vrcp.f32 %v1022_v53 }
 0x6a6   :  { %v1025_v54 = vpop.xlane.xlu0 %1024 }
 0x6a7   :  { %v3549_v55 = vpop.eup %3548  ;;  %3550 = vrcp.f32 %v1025_v54 }
 0x6a8   :  { %v1036_v56 = vmul.f32 %v3549_v55, %v4086_v20 }
 0x6aa   :  { %2871 = vst.msk [vmem:[%s4687_s14 + $0x5] sm:$0x1] %vm501_vm7, %v1036_v56  ;;  %3261 = vmatmul.mubr.msk.f32.vlgmr.msra.gmra.mxu1 %vm494_vm6, %v1036_v56  ;;  %v1352_v57 = vpop.permute.xlu0 %1351 }
 0x6ab   :  { %3285 = vmatpush3.xpose.msk.msra.mxu1 %vm297_vm4, %v1354_v38  ;;  %3263 = vmatprep.mubr.msk.f32.mxu1 %vm3638_vm2, %v3637_v35 }
 0x6ac   :  { %3286 = vmatprep.subr.mxu1 %v3637_v35 }
 0x6ae   :  { %v1350_v58 = vpop.permute.xlu0 %1349 }
 0x6af   :  { %3287 = vmatpush3.xpose.msk.msra.mxu1 %vm297_vm4, %v1352_v57 }
 0x6b0   :  { %3288 = vmatprep.subr.mxu1 %v3637_v35 }
 0x6b2   :  { %v1344_v1 = vpop.permute.xlu0 %1343 }
 0x6b3   :  { %3289 = vmatpush3.xpose.msk.msra.mxu1 %vm297_vm4, %v1350_v58 }
 0x6b4   :  { %v3551_v59 = vpop.eup %3550  ;;  %3314 = vmatprep.subr.mxu1 %v3637_v35 }
 0x6b5   :  { %v1038_v60 = vmul.f32 %v3551_v59, %v4096_v28 }
 0x6b6   :  { %v1028_v61 = vpop.xlane.xlu1 %1027  ;;  %v1346_v2 = vpop.permute.xlu0 %1345 }
 0x6b7   :  { %3552 = vrcp.f32 %v1028_v61  ;;  %3264 = vmatmul.mubr.msk.f32.gmra.mxu1 %vm494_vm6, %v1038_v60 }
 0x6b8   :  { %3266 = vmatprep.mubr.msk.f32.mxu1 %vm3638_vm2, %v3637_v35 }
 0x6ba   :  { %v1244_v62 = vpop.permute.xlu1 %1243 }
 0x6bb   :  { %3282 = vmatmul.mubr.msk.f32.gmra.mxu0 %vm297_vm4, %v1244_v62 }
 0x6bc   :  { %3305 = vmatprep.mubr.msk.f32.mxu0 %vm3638_vm2, %v3637_v35 }
 0x6be   :  { %v1348_v3 = vpop.permute.xlu1 %1347 }
 0x6c4   :  { %v3553_v63 = vpop.eup %3552 }
 0x6c5   :  { %v1040_v0 = vmul.f32 %v3553_v63, %v4100_v34 }
 0x6c7   :  { %3267 = vmatmul.mubr.msk.f32.gmra.mxu1 %vm494_vm6, %v1040_v0 }
 0x6c8   :  { %3290 = vmatprep.mubr.msk.f32.mxu1 %vm3638_vm2, %v3637_v35 }
 0x6cb   :  { %3291 = vmatmul.mubr.msk.f32.vlgmr.msra.gmra.mxu1 %vm297_vm4, %v1344_v1 }
 0x6cc   :  { %3293 = vmatprep.mubr.msk.f32.mxu1 %vm3638_vm2, %v3637_v35 }
 0x6cf   :  { %3294 = vmatmul.mubr.msk.f32.gmra.mxu1 %vm297_vm4, %v1346_v2 }
 0x6d0   :  { %3296 = vmatprep.mubr.msk.f32.mxu1 %vm3638_vm2, %v3637_v35 }
 0x6d3   :  { %3297 = vmatmul.mubr.msk.f32.gmra.mxu1 %vm297_vm4, %v1348_v3 }
 0x6d4   :  { %3320 = vmatprep.mubr.msk.f32.mxu1 %vm3638_vm2, %v3637_v35 }
 0x73e   :  { %v4178_v4 = vpop.f32.mrf.mxu0 }
 0x740   :  { %v3247_v5 = vpop.f32.mrf.mxu0 }
 0x742   :  { %v4180_v6 = vpop.f32.mrf.mxu0 }
 0x744   :  { %v3250_v7 = vpop.f32.mrf.mxu0 }
 0x746   :  { %v4182_v8 = vpop.f32.mrf.mxu0 }
 0x748   :  { %v3253_v9 = vpop.f32.mrf.mxu0 }
 0x74a   :  { %v1329_v11 = vpop.f32.mrf.mxu0 }
 0x74b   :  { %v1447_v13 = vmul.f32 0.35355338, %v1329_v11 }
 0x74c   :  { %v3277_v15 = vpop.f32.mrf.mxu0 }
 0x74d   :  { %v1453_v16 = vsel %vm494_vm6, %v1447_v13, -inf }
 0x74e   :  { %1454 = vmax.xlane.f32.xlu0 %v1453_v16  ;;  %v1334_v18 = vpop.f32.mrf.mxu0 }
 0x74f   :  { %v1448_v20 = vmul.f32 0.35355338, %v1334_v18 }
 0x750   :  { %v3280_v21 = vpop.f32.mrf.mxu0 }
 0x751   :  { %v1456_v23 = vsel %vm494_vm6, %v1448_v20, -inf }
 0x752   :  { %1457 = vmax.xlane.f32.xlu1 %v1456_v23 }
 0x763   :  { %1521 = vrot.lane.b32.xlu1 %v3828_v17, %s3646_s15 }
 0x767   :  { %1519 = vrot.lane.b32.xlu1 %v3834_v22, %s3646_s15 }
 0x76a   :  { %v4190_v24 = vpop.f32.mrf.mxu1 }
 0x76b   :  { %1622 = vrot.lane.b32.xlu1 %v3837_v30, %s3646_s15 }
 0x76c   :  { %v3262_v25 = vpop.f32.mrf.mxu1 }
 0x76f   :  { %1620 = vrot.lane.b32.xlu1 %v3841_v31, %s3646_s15 }
 0x773   :  { %1725 = vrot.lane.b32.xlu1 %v3828_v17, %s3647_s16 }
 0x777   :  { %v4198_v26 = vpop.f32.mrf.mxu1 }
 0x779   :  { %v3265_v27 = vpop.f32.mrf.mxu1 }
 0x77b   :  { %v1339_v28 = vpop.f32.mrf.mxu0 }
 0x77c   :  { %v1449_v29 = vmul.f32 0.35355338, %v1339_v28 }
 0x77d   :  { %v3283_v32 = vpop.f32.mrf.mxu0 }
 0x77e   :  { %v1459_v34 = vsel %vm501_vm7, %v1449_v29, -inf }
 0x77f   :  { %1460 = vmax.xlane.f32.xlu0 %v1459_v34 }
 0x787   :  { %v4201_v36 = vpop.f32.mrf.mxu1 }
 0x789   :  { %v3268_v38 = vpop.f32.mrf.mxu1 }
 0x78b   :  { %v1433_v39 = vpop.f32.mrf.mxu1 }
 0x78c   :  { %v1450_v40 = vmul.f32 0.35355338, %v1433_v39 }
 0x78d   :  { %v3292_v42 = vpop.f32.mrf.mxu1 }
 0x78e   :  { %v1462_v44 = vsel %vm494_vm6, %v1450_v40, -inf }
 0x78f   :  { %1463 = vmax.xlane.f32.xlu0 %v1462_v44  ;;  %v1438_v45 = vpop.f32.mrf.mxu1 }
 0x790   :  { %v1451_v46 = vmul.f32 0.35355338, %v1438_v45 }
 0x791   :  { %v3295_v47 = vpop.f32.mrf.mxu1 }
 0x792   :  { %v1465_v48 = vsel %vm494_vm6, %v1451_v46, -inf }
 0x793   :  { %1466 = vmax.xlane.f32.xlu0 %v1465_v48  ;;  %v1443_v49 = vpop.f32.mrf.mxu1 }
 0x794   :  { %v4205_v50 = vmul.f32 0.35355338, %v1443_v49 }
 0x795   :  { %v3298_v51 = vpop.f32.mrf.mxu1 }
 0x796   :  { %v1468_v52 = vsel %vm501_vm7, %v4205_v50, -inf }
 0x797   :  { %1469 = vmax.xlane.f32.xlu1 %v1468_v52 }
 0x7a8   :  { %1723 = vrot.lane.b32.xlu1 %v3834_v22, %s3647_s16 }
 0x7a9   :  { %1523 = vrot.lane.b32.xlu0 %v3830_v19, %s3646_s15 }
 0x7ad   :  { %1727 = vrot.lane.b32.xlu0 %v3830_v19, %s3647_s16 }
 0x7b1   :  { %1618 = vrot.lane.b32.xlu0 %v3845_v33, %s3646_s15 }
 0x7b5   :  { %1831 = vrot.lane.b32.xlu0 %v3837_v30, %s3647_s16 }
 0x7d7   :  { %v1455_v53 = vpop.xlane.xlu0 %1454 }
 0x7d8   :  { %v1471_v54 = vsub.f32 %v1447_v13, %v1455_v53 }
 0x7da   :  { %v1477_v55 = vmul.f32 1.442695, %v1471_v54 }
 0x7db   :  { %v1458_v56 = vpop.xlane.xlu1 %1457 }
 0x7dc   :  { %3554 = vpow2.f32 %v1477_v55  ;;  %v1472_v57 = vsub.f32 %v1448_v20, %v1458_v56 }
 0x7de   :  { %v1479_v58 = vmul.f32 1.442695, %v1472_v57 }
 0x7df   :  { %v1522_v59 = vpop.permute.xlu1 %1521 }
 0x7e0   :  { %3556 = vpow2.f32 %v1479_v58 }
 0x7e3   :  { %v1520_v60 = vpop.permute.xlu1 %1519 }
 0x7e7   :  { %v1623_v61 = vpop.permute.xlu1 %1622 }
 0x7e8   :  { %3315 = vmatpush3.msk.msra.mxu1 %vm579_vm5, %v1623_v61 }
 0x7e9   :  { %v4220_v62 = vpop.eup %3554  ;;  %3316 = vmatprep.subr.mxu1 %v3637_v35 }
 0x7ea   :  { %v1489_v63 = vsel %vm494_vm6, %v4220_v62, 0.0 }
 0x7eb   :  { %v1621_v0 = vpop.permute.xlu1 %1620  ;;  %1490 = vadd.xlane.f32.xlu0 %v1489_v63 }
 0x7ec   :  { %3317 = vmatpush3.msra.mxu1 %v1621_v0 }
 0x7ed   :  { %v4225_v1 = vpop.eup %3556  ;;  %3318 = vmatprep.subr.mxu1 %v3637_v35 }
 0x7ee   :  { %v1492_v2 = vsel %vm494_vm6, %v4225_v1, 0.0 }
 0x7ef   :  { %1493 = vadd.xlane.f32.xlu1 %v1492_v2  ;;  %v1726_v38 = vpop.permute.xlu1 %1725 }
 0x808   :  { %v1461_v3 = vpop.xlane.xlu0 %1460 }
 0x809   :  { %v1473_v5 = vsub.f32 %v1449_v29, %v1461_v3 }
 0x80b   :  { %v1481_v7 = vmul.f32 1.442695, %v1473_v5 }
 0x80d   :  { %3558 = vpow2.f32 %v1481_v7 }
 0x818   :  { %v1464_v9 = vpop.xlane.xlu0 %1463 }
 0x819   :  { %v1474_v11 = vsub.f32 %v1450_v40, %v1464_v9 }
 0x81a   :  { %v4230_v13 = vpop.eup %3558 }
 0x81b   :  { %v1483_v15 = vmul.f32 1.442695, %v1474_v11  ;;  %v1495_v16 = vsel %vm501_vm7, %v4230_v13, 0.0 }
 0x81c   :  { %1496 = vadd.xlane.f32.xlu1 %v1495_v16  ;;  %v1467_v18 = vpop.xlane.xlu0 %1466 }
 0x81d   :  { %3560 = vpow2.f32 %v1483_v15  ;;  %v1475_v20 = vsub.f32 %v1451_v46, %v1467_v18 }
 0x81f   :  { %v1485_v21 = vmul.f32 1.442695, %v1475_v20 }
 0x820   :  { %v1524_v23 = vpop.permute.xlu0 %1523  ;;  %v1470_v39 = vpop.xlane.xlu1 %1469 }
 0x821   :  { %3562 = vpow2.f32 %v1485_v21  ;;  %3300 = vmatpush3.msk.msra.mxu0 %vm579_vm5, %v1524_v23  ;;  %v1476_v40 = vsub.f32 %v4205_v50, %v1470_v39 }
 0x822   :  { %3301 = vmatprep.subr.mxu0 %v3637_v35 }
 0x823   :  { %3302 = vmatpush3.msra.mxu0 %v1522_v59  ;;  %v1487_v42 = vmul.f32 1.442695, %v1476_v40 }
 0x824   :  { %3303 = vmatprep.subr.mxu0 %v3637_v35  ;;  %v1728_v25 = vpop.permute.xlu0 %1727  ;;  %v1724_v47 = vpop.permute.xlu1 %1723 }
 0x825   :  { %3304 = vmatpush3.msra.mxu0 %v1520_v60  ;;  %3564 = vpow2.f32 %v1487_v42 }
 0x826   :  { %3329 = vmatprep.subr.mxu0 %v3637_v35 }
 0x828   :  { %v1619_v27 = vpop.permute.xlu0 %1618 }
 0x829   :  { %3319 = vmatpush3.msra.mxu1 %v1619_v27 }
 0x82a   :  { %v3561_v28 = vpop.eup %3560  ;;  %3344 = vmatprep.subr.mxu1 %v3637_v35 }
 0x82b   :  { %v1498_v29 = vsel %vm494_vm6, %v3561_v28, 0.0 }
 0x82c   :  { %1499 = vadd.xlane.f32.xlu0 %v1498_v29  ;;  %v1832_v46 = vpop.permute.xlu0 %1831 }
 0x82d   :  { %1717 = vrot.lane.b32.xlu1 %v3834_v22, %s3648_s17 }
 0x82e   :  { %v4241_v32 = vpop.eup %3562 }
 0x82f   :  { %v1501_v34 = vsel %vm494_vm6, %v4241_v32, 0.0 }
 0x830   :  { %1502 = vadd.xlane.f32.xlu0 %v1501_v34 }
 0x831   :  { %1719 = vrot.lane.b32.xlu1 %v3828_v17, %s3648_s17 }
 0x832   :  { %v4252_v44 = vpop.eup %3564 }
 0x833   :  { %v1504_v45 = vsel %vm501_vm7, %v4252_v44, 0.0 }
 0x846   :  { %1829 = vrot.lane.b32.xlu0 %v3841_v31, %s3647_s16 }
 0x84a   :  { %1827 = vrot.lane.b32.xlu0 %v3845_v33, %s3647_s16  ;;  %s3652_s16 = smov 24  }
 0x84e   :  { %1821 = vrot.lane.b32.xlu0 %v3845_v33, %s3648_s17 }
 0x852   :  { %1823 = vrot.lane.b32.xlu0 %v3841_v31, %s3648_s17 }
 0x855   :  { %1505 = vadd.xlane.f32.xlu1 %v1504_v45 }
 0x866   :  { %1721 = vrot.lane.b32.xlu1 %v3830_v19, %s3648_s17 }
 0x86a   :  { %1825 = vrot.lane.b32.xlu1 %v3837_v30, %s3648_s17 }
 0x874   :  { %v1491_v48 = vpop.xlane.xlu0 %1490 }
 0x875   :  { %3566 = vrcp.f32 %v1491_v48 }
 0x878   :  { %v1494_v49 = vpop.xlane.xlu1 %1493 }
 0x879   :  { %3568 = vrcp.f32 %v1494_v49 }
 0x882   :  { %v3567_v50 = vpop.eup %3566 }
 0x883   :  { %v1508_v51 = vmul.f32 %v3567_v50, %v4220_v62 }
 0x885   :  { %2868 = vst.msk [vmem:[%s4687_s14 + $0x2] sm:$0x1] %vm501_vm7, %v1508_v51  ;;  %3306 = vmatmul.mubr.msk.f32.vlgmr.msra.gmra.mxu0 %vm494_vm6, %v1508_v51 }
 0x886   :  { %v3569_v52 = vpop.eup %3568  ;;  %3330 = vmatpush3.xpose.msk.msra.mxu0 %vm297_vm4, %v1728_v25  ;;  %3308 = vmatprep.mubr.msk.f32.mxu0 %vm3638_vm2, %v3637_v35 }
 0x887   :  { %3331 = vmatprep.subr.mxu0 %v3637_v35  ;;  %v1510_v53 = vmul.f32 %v3569_v52, %v4225_v1 }
 0x889   :  { %3309 = vmatmul.mubr.msk.f32.gmra.mxu0 %vm494_vm6, %v1510_v53 }
 0x88a   :  { %3332 = vmatpush3.xpose.msk.msra.mxu0 %vm297_vm4, %v1726_v38  ;;  %3311 = vmatprep.mubr.msk.f32.mxu0 %vm3638_vm2, %v3637_v35 }
 0x88b   :  { %3333 = vmatprep.subr.mxu0 %v3637_v35 }
 0x88e   :  { %3334 = vmatpush3.xpose.msk.msra.mxu0 %vm297_vm4, %v1724_v47 }
 0x88f   :  { %3359 = vmatprep.subr.mxu0 %v3637_v35 }
 0x8a5   :  { %v1497_v54 = vpop.xlane.xlu1 %1496 }
 0x8a6   :  { %3570 = vrcp.f32 %v1497_v54 }
 0x8a9   :  { %v1718_v58 = vpop.permute.xlu1 %1717 }
 0x8ad   :  { %v1720_v60 = vpop.permute.xlu1 %1719 }
 0x8b3   :  { %v3571_v55 = vpop.eup %3570 }
 0x8b4   :  { %v1512_v56 = vmul.f32 %v3571_v55, %v4230_v13 }
 0x8b5   :  { %v1500_v57 = vpop.xlane.xlu0 %1499 }
 0x8b6   :  { %3572 = vrcp.f32 %v1500_v57  ;;  %3312 = vmatmul.mubr.msk.f32.gmra.mxu0 %vm494_vm6, %v1512_v56 }
 0x8b7   :  { %3335 = vmatprep.mubr.msk.f32.mxu0 %vm3638_vm2, %v3637_v35 }
 0x8b9   :  { %v1503_v59 = vpop.xlane.xlu0 %1502 }
 0x8ba   :  { %3574 = vrcp.f32 %v1503_v59  ;;  %3336 = vmatmul.mubr.msk.f32.vlgmr.msra.gmra.mxu0 %vm297_vm4, %v1718_v58 }
 0x8bb   :  { %3338 = vmatprep.mubr.msk.f32.mxu0 %vm3638_vm2, %v3637_v35 }
 0x8bd   :  { %v1830_v0 = vpop.permute.xlu0 %1829 }
 0x8be   :  { %3339 = vmatmul.mubr.msk.f32.gmra.mxu0 %vm297_vm4, %v1720_v60 }
 0x8bf   :  { %3341 = vmatprep.mubr.msk.f32.mxu0 %vm3638_vm2, %v3637_v35 }
 0x8c1   :  { %v1828_v2 = vpop.permute.xlu0 %1827 }
 0x8c3   :  { %v3573_v61 = vpop.eup %3572 }
 0x8c4   :  { %v1514_v62 = vmul.f32 %v3573_v61, %v3561_v28 }
 0x8c5   :  { %v1822_v11 = vpop.permute.xlu0 %1821 }
 0x8c6   :  { %2872 = vst.msk [vmem:[%s4687_s14 + $0x6] sm:$0x1] %vm501_vm7, %v1514_v62  ;;  %3321 = vmatmul.mubr.msk.f32.vlgmr.msra.gmra.mxu1 %vm494_vm6, %v1514_v62 }
 0x8c7   :  { %v3575_v63 = vpop.eup %3574  ;;  %3345 = vmatpush3.xpose.msk.msra.mxu1 %vm297_vm4, %v1832_v46  ;;  %3323 = vmatprep.mubr.msk.f32.mxu1 %vm3638_vm2, %v3637_v35 }
 0x8c8   :  { %3346 = vmatprep.subr.mxu1 %v3637_v35  ;;  %v1516_v1 = vmul.f32 %v3575_v63, %v4241_v32 }
 0x8c9   :  { %v1824_v13 = vpop.permute.xlu0 %1823 }
 0x8ca   :  { %3324 = vmatmul.mubr.msk.f32.gmra.mxu1 %vm494_vm6, %v1516_v1 }
 0x8cb   :  { %3347 = vmatpush3.xpose.msk.msra.mxu1 %vm297_vm4, %v1830_v0  ;;  %3326 = vmatprep.mubr.msk.f32.mxu1 %vm3638_vm2, %v3637_v35 }
 0x8cc   :  { %3348 = vmatprep.subr.mxu1 %v3637_v35 }
 0x8cf   :  { %3349 = vmatpush3.xpose.msk.msra.mxu1 %vm297_vm4, %v1828_v2 }
 0x8d0   :  { %3374 = vmatprep.subr.mxu1 %v3637_v35 }
 0x8de   :  { %v1506_v3 = vpop.xlane.xlu1 %1505 }
 0x8df   :  { %3576 = vrcp.f32 %v1506_v3 }
 0x8e2   :  { %v1722_v5 = vpop.permute.xlu1 %1721 }
 0x8e3   :  { %3342 = vmatmul.mubr.msk.f32.gmra.mxu0 %vm297_vm4, %v1722_v5 }
 0x8e4   :  { %3365 = vmatprep.mubr.msk.f32.mxu0 %vm3638_vm2, %v3637_v35 }
 0x8e6   :  { %v1826_v15 = vpop.permute.xlu1 %1825 }
 0x8ec   :  { %v3577_v7 = vpop.eup %3576 }
 0x8ed   :  { %v1518_v9 = vmul.f32 %v3577_v7, %v4252_v44 }
 0x8ef   :  { %3327 = vmatmul.mubr.msk.f32.gmra.mxu1 %vm494_vm6, %v1518_v9 }
 0x8f0   :  { %3350 = vmatprep.mubr.msk.f32.mxu1 %vm3638_vm2, %v3637_v35 }
 0x8f3   :  { %3351 = vmatmul.mubr.msk.f32.vlgmr.msra.gmra.mxu1 %vm297_vm4, %v1822_v11 }
 0x8f4   :  { %3353 = vmatprep.mubr.msk.f32.mxu1 %vm3638_vm2, %v3637_v35 }
 0x8f7   :  { %3354 = vmatmul.mubr.msk.f32.gmra.mxu1 %vm297_vm4, %v1824_v13 }
 0x8f8   :  { %3356 = vmatprep.mubr.msk.f32.mxu1 %vm3638_vm2, %v3637_v35 }
 0x8fb   :  { %3357 = vmatmul.mubr.msk.f32.gmra.mxu1 %vm297_vm4, %v1826_v15 }
 0x8fc   :  { %3380 = vmatprep.mubr.msk.f32.mxu1 %vm3638_vm2, %v3637_v35 }
 0x945   :  { %v4320_v16 = vpop.f32.mrf.mxu0 }
 0x947   :  { %v3307_v18 = vpop.f32.mrf.mxu0 }
 0x949   :  { %v4322_v20 = vpop.f32.mrf.mxu0 }
 0x94b   :  { %v3310_v21 = vpop.f32.mrf.mxu0 }
 0x976   :  { %v4324_v23 = vpop.f32.mrf.mxu0 }
 0x978   :  { %v3313_v25 = vpop.f32.mrf.mxu0 }
 0x97a   :  { %v1807_v27 = vpop.f32.mrf.mxu0 }
 0x97b   :  { %v1925_v28 = vmul.f32 0.35355338, %v1807_v27 }
 0x97c   :  { %v3337_v29 = vpop.f32.mrf.mxu0 }
 0x97d   :  { %v1931_v32 = vsel %vm494_vm6, %v1925_v28, -inf }
 0x97e   :  { %1932 = vmax.xlane.f32.xlu0 %v1931_v32  ;;  %v1812_v34 = vpop.f32.mrf.mxu0 }
 0x97f   :  { %v1926_v38 = vmul.f32 0.35355338, %v1812_v34 }
 0x980   :  { %v3340_v39 = vpop.f32.mrf.mxu0 }
 0x981   :  { %v1934_v40 = vsel %vm494_vm6, %v1926_v38, -inf }
 0x982   :  { %1935 = vmax.xlane.f32.xlu1 %v1934_v40 }
 0x986   :  { %v4328_v42 = vpop.f32.mrf.mxu1 }
 0x988   :  { %v3322_v44 = vpop.f32.mrf.mxu1 }
 0x98a   :  { %v4330_v45 = vpop.f32.mrf.mxu1 }
 0x98c   :  { %v3325_v46 = vpop.f32.mrf.mxu1 }
 0x9a3   :  { %v1817_v47 = vpop.f32.mrf.mxu0 }
 0x9a4   :  { %v1927_v48 = vmul.f32 0.35355338, %v1817_v47 }
 0x9a5   :  { %v3343_v49 = vpop.f32.mrf.mxu0 }
 0x9a6   :  { %v1937_v50 = vsel %vm501_vm7, %v1927_v48, -inf }
 0x9a7   :  { %1938 = vmax.xlane.f32.xlu0 %v1937_v50 }
 0x9af   :  { %v4333_v51 = vpop.f32.mrf.mxu1 }
 0x9b1   :  { %v3328_v52 = vpop.f32.mrf.mxu1 }
 0x9b3   :  { %v1911_v53 = vpop.f32.mrf.mxu1 }
 0x9b4   :  { %v1928_v54 = vmul.f32 0.35355338, %v1911_v53 }
 0x9b5   :  { %v3352_v55 = vpop.f32.mrf.mxu1 }
 0x9b6   :  { %v1940_v56 = vsel %vm494_vm6, %v1928_v54, -inf }
 0x9b7   :  { %1941 = vmax.xlane.f32.xlu0 %v1940_v56  ;;  %v1916_v57 = vpop.f32.mrf.mxu1 }
 0x9b8   :  { %v1929_v58 = vmul.f32 0.35355338, %v1916_v57 }
 0x9b9   :  { %v3355_v59 = vpop.f32.mrf.mxu1 }
 0x9ba   :  { %v1943_v60 = vsel %vm494_vm6, %v1929_v58, -inf }
 0x9bb   :  { %1944 = vmax.xlane.f32.xlu0 %v1943_v60  ;;  %v1921_v61 = vpop.f32.mrf.mxu1 }
 0x9bc   :  { %v1930_v62 = vmul.f32 0.35355338, %v1921_v61 }
 0x9bd   :  { %v3358_v63 = vpop.f32.mrf.mxu1 }
 0x9be   :  { %v1946_v0 = vsel %vm501_vm7, %v1930_v62, -inf }
 0x9bf   :  { %1947 = vmax.xlane.f32.xlu1 %v1946_v0 }
 0x9d0   :  { %1999 = vrot.lane.b32.xlu1 %v3828_v17, %s3649_s19 }
 0x9d1   :  { %2001 = vrot.lane.b32.xlu0 %v3830_v19, %s3649_s19 }
 0x9d4   :  { %1997 = vrot.lane.b32.xlu1 %v3834_v22, %s3649_s19 }
 0x9d8   :  { %2100 = vrot.lane.b32.xlu1 %v3837_v30, %s3649_s19 }
 0xa07   :  { %v1933_v1 = vpop.xlane.xlu0 %1932 }
 0xa08   :  { %v1949_v2 = vsub.f32 %v1925_v28, %v1933_v1 }
 0xa0a   :  { %v1955_v3 = vmul.f32 1.442695, %v1949_v2 }
 0xa0b   :  { %v1936_v5 = vpop.xlane.xlu1 %1935 }
 0xa0c   :  { %3578 = vpow2.f32 %v1955_v3  ;;  %v1950_v7 = vsub.f32 %v1926_v38, %v1936_v5 }
 0xa0e   :  { %v1957_v9 = vmul.f32 1.442695, %v1950_v7  ;;  %v55_v7 = vld [vmem:[%s4688_s5 + $0x10] sm:$0xff] }
 0xa10   :  { %3580 = vpow2.f32 %v1957_v9  ;;  %v54_v9 = vld [vmem:[%s4688_s5 + $0x8] sm:$0xff] }
 0xa19   :  { %v4346_v11 = vpop.eup %3578 }
 0xa1a   :  { %v1967_v17 = vsel %vm494_vm6, %v4346_v11, 0.0 }
 0xa1b   :  { %1968 = vadd.xlane.f32.xlu0 %v1967_v17 }
 0xa1d   :  { %v4350_v19 = vpop.eup %3580 }
 0xa1e   :  { %v1970_v22 = vsel %vm494_vm6, %v4350_v19, 0.0 }
 0xa1f   :  { %1971 = vadd.xlane.f32.xlu1 %v1970_v22 }
 0xa30   :  { %v1939_v30 = vpop.xlane.xlu0 %1938 }
 0xa31   :  { %v1951_v13 = vsub.f32 %v1927_v48, %v1939_v30 }
 0xa33   :  { %v1959_v15 = vmul.f32 1.442695, %v1951_v13 }
 0xa35   :  { %3582 = vpow2.f32 %v1959_v15 }
 0xa40   :  { %v1942_v18 = vpop.xlane.xlu0 %1941 }
 0xa41   :  { %v1952_v21 = vsub.f32 %v1928_v54, %v1942_v18 }
 0xa42   :  { %v4354_v25 = vpop.eup %3582 }
 0xa43   :  { %v1961_v27 = vmul.f32 1.442695, %v1952_v21  ;;  %v1973_v28 = vsel %vm501_vm7, %v4354_v25, 0.0 }
 0xa44   :  { %1974 = vadd.xlane.f32.xlu1 %v1973_v28  ;;  %v1945_v29 = vpop.xlane.xlu0 %1944 }
 0xa45   :  { %3584 = vpow2.f32 %v1961_v27  ;;  %v1953_v32 = vsub.f32 %v1929_v58, %v1945_v29 }
 0xa47   :  { %v1963_v34 = vmul.f32 1.442695, %v1953_v32 }
 0xa48   :  { %v1948_v38 = vpop.xlane.xlu1 %1947  ;;  %v2002_v39 = vpop.permute.xlu0 %2001 }
 0xa49   :  { %3586 = vpow2.f32 %v1963_v34  ;;  %v1954_v40 = vsub.f32 %v1930_v62, %v1948_v38  ;;  %3360 = vmatpush3.msk.msra.mxu0 %vm579_vm5, %v2002_v39 }
 0xa4a   :  { %3361 = vmatprep.subr.mxu0 %v3637_v35 }
 0xa4b   :  { %v1965_v44 = vmul.f32 1.442695, %v1954_v40 }
 0xa4c   :  { %v2000_v46 = vpop.permute.xlu1 %1999 }
 0xa4d   :  { %3588 = vpow2.f32 %v1965_v44  ;;  %3362 = vmatpush3.msra.mxu0 %v2000_v46 }
 0xa4e   :  { %3363 = vmatprep.subr.mxu0 %v3637_v35 }
 0xa50   :  { %v1998_v47 = vpop.permute.xlu1 %1997 }
 0xa51   :  { %3364 = vmatpush3.msra.mxu0 %v1998_v47 }
 0xa52   :  { %v3585_v48 = vpop.eup %3584  ;;  %3389 = vmatprep.subr.mxu0 %v3637_v35 }
 0xa53   :  { %v1976_v49 = vsel %vm494_vm6, %v3585_v48, 0.0 }
 0xa54   :  { %v2101_v50 = vpop.permute.xlu1 %2100  ;;  %1977 = vadd.xlane.f32.xlu0 %v1976_v49 }
 0xa55   :  { %3375 = vmatpush3.msk.msra.mxu1 %vm579_vm5, %v2101_v50 }
 0xa56   :  { %v3587_v52 = vpop.eup %3586  ;;  %3376 = vmatprep.subr.mxu1 %v3637_v35 }
 0xa57   :  { %v1979_v53 = vsel %vm494_vm6, %v3587_v52, 0.0 }
 0xa58   :  { %1980 = vadd.xlane.f32.xlu0 %v1979_v53 }
 0xa5a   :  { %v4366_v54 = vpop.eup %3588 }
 0xa5b   :  { %v1982_v55 = vsel %vm501_vm7, %v4366_v54, 0.0 }
 0xa5c   :  { %1983 = vadd.xlane.f32.xlu1 %v1982_v55 }
 0xa6d   :  { %2096 = vrot.lane.b32.xlu1 %v3845_v33, %s3649_s19 }
 0xa6e   :  { %2098 = vrot.lane.b32.xlu0 %v3841_v31, %s3649_s19 }
 0xa71   :  { %2225 = vrot.lane.b32.xlu1 %v4320_v16, %s3650_s20 }
 0xa72   :  { %2201 = vrot.lane.b32.xlu0 %v4178_v4, %s3651_s21 }
 0xa75   :  { %2203 = vrot.lane.b32.xlu1 %v4180_v6, %s3651_s21 }
 0xa76   :  { %2207 = vrot.lane.b32.xlu0 %v4190_v24, %s3651_s21 }
 0xa79   :  { %2227 = vrot.lane.b32.xlu1 %v4322_v20, %s3650_s20 }
 0xa7a   :  { %2231 = vrot.lane.b32.xlu0 %v4328_v42, %s3650_s20 }
 0xa7d   :  { %2209 = vrot.lane.b32.xlu1 %v4198_v26, %s3651_s21 }
 0xa7e   :  { %2205 = vrot.lane.b32.xlu0 %v4182_v8, %s3651_s21 }
 0xa81   :  { %2233 = vrot.lane.b32.xlu1 %v4330_v45, %s3650_s20 }
 0xa82   :  { %2229 = vrot.lane.b32.xlu0 %v4324_v23, %s3650_s20 }
 0xaa4   :  { %v1969_v31 = vpop.xlane.xlu0 %1968 }
 0xaa5   :  { %3590 = vrcp.f32 %v1969_v31 }
 0xaa8   :  { %v1972_v33 = vpop.xlane.xlu1 %1971 }
 0xaa9   :  { %3592 = vrcp.f32 %v1972_v33 }
 0xab2   :  { %v3591_v4 = vpop.eup %3590 }
 0xab3   :  { %v1986_v6 = vmul.f32 %v3591_v4, %v4346_v11  ;;  %v53_v11 = vld [vmem:[%s4688_s5] sm:$0xff] }
 0xab5   :  { %2869 = vst.msk [vmem:[%s4687_s14 + $0x3] sm:$0x1] %vm501_vm7, %v1986_v6  ;;  %3366 = vmatmul.mubr.msk.f32.vlgmr.msra.gmra.mxu0 %vm494_vm6, %v1986_v6 }
 0xab6   :  { %v3593_v8 = vpop.eup %3592  ;;  %3368 = vmatprep.mubr.msk.f32.mxu0 %vm3638_vm2, %v3637_v35 }
 0xab7   :  { %v1988_v24 = vmul.f32 %v3593_v8, %v4350_v19 }
 0xab9   :  { %3369 = vmatmul.mubr.msk.f32.gmra.mxu0 %vm494_vm6, %v1988_v24 }
 0xaba   :  { %3371 = vmatprep.mubr.msk.f32.mxu0 %vm3638_vm2, %v3637_v35 }
 0xacd   :  { %v1975_v26 = vpop.xlane.xlu1 %1974 }
 0xace   :  { %3594 = vrcp.f32 %v1975_v26 }
 0xadb   :  { %v3595_v16 = vpop.eup %3594 }
 0xadc   :  { %v1990_v20 = vmul.f32 %v3595_v16, %v4354_v25 }
 0xadd   :  { %v1978_v23 = vpop.xlane.xlu0 %1977 }
 0xade   :  { %3596 = vrcp.f32 %v1978_v23  ;;  %3372 = vmatmul.mubr.msk.f32.gmra.mxu0 %vm494_vm6, %v1990_v20 }
 0xadf   :  { %3397 = vmatprep.mubr.msk.f32.mxu0 %vm3638_vm2, %v3637_v35 }
 0xae1   :  { %v1981_v42 = vpop.xlane.xlu0 %1980 }
 0xae2   :  { %3598 = vrcp.f32 %v1981_v42 }
 0xae5   :  { %v1984_v45 = vpop.xlane.xlu1 %1983  ;;  %v2099_v56 = vpop.permute.xlu0 %2098 }
 0xae6   :  { %3600 = vrcp.f32 %v1984_v45  ;;  %3377 = vmatpush3.msra.mxu1 %v2099_v56 }
 0xae7   :  { %3378 = vmatprep.subr.mxu1 %v3637_v35 }
 0xae9   :  { %v2097_v57 = vpop.permute.xlu1 %2096  ;;  %v4411_v58 = vpop.permute.xlu0 %2201 }
 0xaea   :  { %3379 = vmatpush3.msra.mxu1 %v2097_v57  ;;  %v2267_v46 = vsel %vm297_vm4, %v4026_v10, %v4411_v58 }
 0xaeb   :  { %v3597_v59 = vpop.eup %3596  ;;  %3412 = vmatprep.subr.mxu1 %v3637_v35 }
 0xaec   :  { %v1992_v60 = vmul.f32 %v3597_v59, %v3585_v48 }
 0xaed   :  { %v2208_v61 = vpop.permute.xlu0 %2207  ;;  %v2226_v32 = vpop.permute.xlu1 %2225 }
 0xaee   :  { %2873 = vst.msk [vmem:[%s4687_s14 + $0x7] sm:$0x1] %vm501_vm7, %v1992_v60  ;;  %3381 = vmatmul.mubr.msk.f32.vlgmr.msra.gmra.mxu1 %vm494_vm6, %v1992_v60  ;;  %v2270_v0 = vsel %vm297_vm4, %v4045_v37, %v2208_v61  ;;  %v56_v37 = vld [vmem:[%s4688_s5 + $0x18] sm:$0xff] }
 0xaef   :  { %v3599_v62 = vpop.eup %3598  ;;  %3383 = vmatprep.mubr.msk.f32.mxu1 %vm3638_vm2, %v3637_v35  ;;  %3390 = vmatpush3.msra.mxu0 %v56_v37  ;;  %v3633_v37 = vld [vmem:[%s4682_s0 + $0x8] sm:$0xff] }
 0xaf0   :  { %v1994_v63 = vmul.f32 %v3599_v62, %v3587_v52  ;;  %3391 = vmatprep.subr.mxu0 %v3637_v35 }
 0xaf1   :  { %v2232_v1 = vpop.permute.xlu0 %2231  ;;  %3392 = vmatpush3.msra.mxu0 %v55_v7  ;;  %v2204_v34 = vpop.permute.xlu1 %2203 }
 0xaf2   :  { %v4424_v2 = vsel %vm2273_vm8, %v2270_v0, %v2232_v1  ;;  %3384 = vmatmul.mubr.msk.f32.gmra.mxu1 %vm494_vm6, %v1994_v63  ;;  %3393 = vmatprep.subr.mxu0 %v3637_v35  ;;  %v3632_v63 = vld [vmem:[%s4682_s0] sm:$0xff] }
 0xaf3   :  { %v3601_v3 = vpop.eup %3600  ;;  %3386 = vmatprep.mubr.msk.f32.mxu1 %vm3638_vm2, %v3637_v35  ;;  %3394 = vmatpush3.msra.mxu0 %v54_v9 }
 0xaf4   :  { %v1996_v5 = vmul.f32 %v3601_v3, %v4366_v54  ;;  %3395 = vmatprep.subr.mxu0 %v3637_v35 }
 0xaf5   :  { %3396 = vmatpush3.msra.mxu0 %v53_v11  ;;  %v2228_v38 = vpop.permute.xlu1 %2227  ;;  %v2206_v39 = vpop.permute.xlu0 %2205 }
 0xaf6   :  { %3387 = vmatmul.mubr.msk.f32.gmra.mxu1 %vm494_vm6, %v1996_v5  ;;  %3435 = vmatprep.subr.mxu0 %v3637_v35  ;;  %v2269_v55 = vsel %vm297_vm4, %v4030_v14, %v2206_v39 }
 0xaf7   :  { %3420 = vmatprep.mubr.msk.f32.mxu1 %vm3638_vm2, %v3637_v35 }
 0xaf9   :  { %v2210_v40 = vpop.permute.xlu1 %2209  ;;  %v2230_v44 = vpop.permute.xlu0 %2229 }
 0xafa   :  { %v2276_v31 = vsel %vm2273_vm8, %v2269_v55, %v2230_v44  ;;  %v2271_v4 = vsel %vm297_vm4, %v4048_v41, %v2210_v40  ;;  %v61_v55 = vld [vmem:[%s4690_s9 + $0x8] sm:$0xff] }
 0xafd   :  { %v2234_v47 = vpop.permute.xlu1 %2233 }
 0xafe   :  { %v2278_v8 = vsel %vm2273_vm8, %v2271_v4, %v2234_v47 }
 0xb75   :  { %v2082_v17 = vpop.f32.mrf.mxu0 }
 0xb76   :  { %2249 = vrot.lane.b32.xlu0 %v2082_v17, %s3652_s16 }
 0xb77   :  { %v3367_v19 = vpop.f32.mrf.mxu0 }
 0xb79   :  { %v2087_v22 = vpop.f32.mrf.mxu0 }
 0xb7a   :  { %2251 = vrot.lane.b32.xlu1 %v2087_v22, %s3652_s16  ;;  %v3634_v22 = vld [vmem:[%s4682_s0 + $0x10] sm:$0xff] }
 0xb7b   :  { %v3370_v30 = vpop.f32.mrf.mxu0 }
 0xb9e   :  { %v2092_v13 = vpop.f32.mrf.mxu0 }
 0xb9f   :  { %2253 = vrot.lane.b32.xlu0 %v2092_v13, %s3652_s16 }
 0xba0   :  { %v3373_v15 = vpop.f32.mrf.mxu0 }
 0xbae   :  { %v2181_v18 = vpop.f32.mrf.mxu1 }
 0xbaf   :  { %2255 = vrot.lane.b32.xlu1 %v2181_v18, %s3652_s16 }
 0xbb0   :  { %v3382_v21 = vpop.f32.mrf.mxu1 }
 0xbb2   :  { %v2186_v25 = vpop.f32.mrf.mxu1 }
 0xbb3   :  { %2211 = vrot.lane.b32.xlu1 %v4201_v36, %s3651_s21  ;;  %2257 = vrot.lane.b32.xlu0 %v2186_v25, %s3652_s16  ;;  %v2274_v36 = vsel %vm2273_vm8, %v2267_v46, %v2226_v32  ;;  %v3635_v25 = vld [vmem:[%s4682_s0 + $0x18] sm:$0xff] }
 0xbb4   :  { %v3385_v27 = vpop.f32.mrf.mxu1 }
 0xbb6   :  { %v2191_v28 = vpop.f32.mrf.mxu1 }
 0xbb7   :  { %2235 = vrot.lane.b32.xlu0 %v4333_v51, %s3650_s20  ;;  %2259 = vrot.lane.b32.xlu1 %v2191_v28, %s3652_s16  ;;  %v2268_v51 = vsel %vm297_vm4, %v4028_v12, %v2204_v34 }
 0xbb8   :  { %v3388_v29 = vpop.f32.mrf.mxu1  ;;  %v2275_v50 = vsel %vm2273_vm8, %v2268_v51, %v2228_v38  ;;  %v3636_v38 = vld [vmem:[%s4682_s0 + $0x20] sm:$0x3] }
 0xbe8   :  { %v2250_v48 = vpop.permute.xlu0 %2249 }
 0xbe9   :  { %v2281_v49 = vsel %vm2280_vm9, %v2274_v36, %v2250_v48 }
 0xbea   :  { %3398 = vmatmul.mubr.msk.f32.vlgmr.msra.gmra.mxu0 %vm79_vm0, %v2281_v49 }
 0xbeb   :  { %3400 = vmatprep.mubr.msk.f32.mxu0 %vm3638_vm2, %v3637_v35 }
 0xbec   :  { %v2252_v52 = vpop.permute.xlu1 %2251 }
 0xbed   :  { %v2282_v53 = vsel %vm2280_vm9, %v2275_v50, %v2252_v52 }
 0xbee   :  { %3401 = vmatmul.mubr.msk.f32.gmra.mxu0 %vm79_vm0, %v2282_v53 }
 0xbef   :  { %3403 = vmatprep.mubr.msk.f32.mxu0 %vm3638_vm2, %v3637_v35 }
 0xc11   :  { %v2254_v10 = vpop.permute.xlu0 %2253 }
 0xc12   :  { %v2283_v6 = vsel %vm2280_vm9, %v2276_v31, %v2254_v10  ;;  %v63_v10 = vld [vmem:[%s4690_s9 + $0x18] sm:$0xff] }
 0xc13   :  { %3413 = vmatpush3.msra.mxu1 %v63_v10  ;;  %v70_v10 = vld [vmem:[%s4693_s11 + $0x28] sm:$0xff] }
 0xc14   :  { %3414 = vmatprep.subr.mxu1 %v3637_v35 }
 0xc21   :  { %v2256_v54 = vpop.permute.xlu1 %2255 }
 0xc22   :  { %v2284_v12 = vsel %vm2280_vm9, %v4424_v2, %v2256_v54  ;;  %v62_v54 = vld [vmem:[%s4690_s9 + $0x10] sm:$0xff] }
 0xc23   :  { %v2290_v33 = vrot.slane %v2284_v12, 7  ;;  %3415 = vmatpush3.msra.mxu1 %v62_v54  ;;  %v60_v12 = vld [vmem:[%s4690_s9] sm:$0xff] }
 0xc24   :  { %3416 = vmatprep.subr.mxu1 %v3637_v35  ;;  %v69_v54 = vld [vmem:[%s4693_s11 + $0x20] sm:$0xff] }
 0xc25   :  { %v2212_v24 = vpop.permute.xlu1 %2211  ;;  %v2258_v26 = vpop.permute.xlu0 %2257  ;;  %v2296_v16 = vsel %vm579_vm5, %v2283_v6, %v2290_v33  ;;  %3417 = vmatpush3.msra.mxu1 %v61_v55  ;;  %v68_v55 = vld [vmem:[%s4693_s11 + $0x18] sm:$0xff] }
 0xc26   :  { %v2285_v20 = vsel %vm2280_vm9, %v2278_v8, %v2258_v26  ;;  %3404 = vmatmul.mubr.msk.f32.gmra.mxu0 %vm79_vm0, %v2296_v16  ;;  %v2272_v23 = vsel %vm297_vm4, %v4050_v43, %v2212_v24  ;;  %v2970_v43 = vld [vmem:[%s4689_s6] ss:$0 sm:$0xff]  ;;  %3418 = vmatprep.subr.mxu1 %v3637_v35 }
 0xc27   :  { %v2291_v14 = vrot.slane %v2285_v20, 7  ;;  %3406 = vmatprep.mubr.msk.f32.mxu0 %vm3638_vm2, %v3637_v35  ;;  %3419 = vmatpush3.msra.mxu1 %v60_v12  ;;  %v67_v12 = vld [vmem:[%s4693_s11 + $0x10] sm:$0xff] }
 0xc29   :  { %v2260_v41 = vpop.permute.xlu1 %2259  ;;  %v2236_v42 = vpop.permute.xlu0 %2235  ;;  %v2292_v45 = vsel %vm579_vm5, %v2290_v33, %v2291_v14 }
 0xc2a   :  { %v2279_v56 = vsel %vm2273_vm8, %v2272_v23, %v2236_v42  ;;  %3407 = vmatmul.mubr.msk.f32.gmra.mxu0 %vm79_vm0, %v2292_v45 }
 0xc2b   :  { %v2286_v57 = vsel %vm2280_vm9, %v2279_v56, %v2260_v41  ;;  %3409 = vmatprep.mubr.msk.f32.mxu0 %vm3638_vm2, %v3637_v35 }
 0xc2c   :  { %v2293_v58 = vrot.slane %v2286_v57, 7 }
 0xc2e   :  { %v2294_v59 = vsel %vm579_vm5, %v2291_v14, %v2293_v58 }
 0xc2f   :  { %3410 = vmatmul.mubr.msk.f32.gmra.mxu0 %vm79_vm0, %v2294_v59 }
 0xc30   :  { %3451 = vmatprep.mubr.msk.f32.mxu0 %vm3638_vm2, %v3637_v35 }
 0xcaa   :  { %v2382_v60 = vpop.f32.mrf.mxu0 }
 0xcab   :  { %v2383_v61 = vadd.f32 %v2970_v43, %v2382_v60 }
 0xcac   :  { %v3399_v62 = vpop.f32.mrf.mxu0 }
 0xcad   :  { %v4500_v0 = vadd.f32 %v3632_v63, %v2383_v61  ;;  %v2976_v63 = vld [vmem:[%s4691_s7] ss:$0 sm:$0xff] }
 0xcae   :  { %v2387_v1 = vpop.f32.mrf.mxu0 }
 0xcaf   :  { %v2388_v2 = vadd.f32 %v2970_v43, %v2387_v1  ;;  %v2411_v3 = vsel %vm79_vm0, %v4500_v0, 0.0 }
 0xcb0   :  { %2412 = vadd.xlane.f32.xlu0 %v2411_v3  ;;  %v3402_v5 = vpop.f32.mrf.mxu0 }
 0xcb1   :  { %v4507_v7 = vadd.f32 %v3633_v37, %v2388_v2  ;;  %v2977_v2 = vld [vmem:[%s4692_s8] ss:$0 sm:$0xff] }
 0xcb3   :  { %v2414_v9 = vsel %vm79_vm0, %v4507_v7, 0.0 }
 0xcb4   :  { %2415 = vadd.xlane.f32.xlu1 %v2414_v9 }
 0xce6   :  { %v2392_v11 = vpop.f32.mrf.mxu0 }
 0xce7   :  { %v2393_v17 = vadd.f32 %v2970_v43, %v2392_v11 }
 0xce8   :  { %v3405_v19 = vpop.f32.mrf.mxu0 }
 0xce9   :  { %v4514_v30 = vadd.f32 %v3634_v22, %v2393_v17 }
 0xcea   :  { %v2397_v13 = vpop.f32.mrf.mxu0 }
 0xceb   :  { %v2398_v15 = vadd.f32 %v2970_v43, %v2397_v13  ;;  %v2417_v18 = vsel %vm79_vm0, %v4514_v30, 0.0 }
 0xcec   :  { %2418 = vadd.xlane.f32.xlu0 %v2417_v18  ;;  %v3408_v21 = vpop.f32.mrf.mxu0 }
 0xced   :  { %v4521_v27 = vadd.f32 %v3635_v25, %v2398_v15 }
 0xcef   :  { %v2402_v28 = vpop.f32.mrf.mxu0  ;;  %v2420_v29 = vsel %vm79_vm0, %v4521_v27, 0.0 }
 0xcf0   :  { %v2403_v32 = vadd.f32 %v2970_v43, %v2402_v28  ;;  %2421 = vadd.xlane.f32.xlu0 %v2420_v29 }
 0xcf1   :  { %v3411_v34 = vpop.f32.mrf.mxu0 }
 0xcf2   :  { %v4528_v39 = vadd.f32 %v3636_v38, %v2403_v32 }
 0xcf4   :  { %v2423_v40 = vsel %vm92_vm1, %v4528_v39, 0.0 }
 0xcf5   :  { %2424 = vadd.xlane.f32.xlu0 %v2423_v40 }
 0xd39   :  { %v2413_v44 = vpop.xlane.xlu0 %2412 }
 0xd3a   :  { %v2426_v46 = vmul.f32 0.03125, %v2413_v44 }
 0xd3c   :  { %v2431_v36 = vsub.f32 %v4500_v0, %v2426_v46 }
 0xd3d   :  { %v2416_v47 = vpop.xlane.xlu1 %2415 }
 0xd3e   :  { %v2427_v48 = vmul.f32 0.03125, %v2416_v47  ;;  %v2436_v49 = vmul.f32 %v2431_v36, %v2431_v36 }
 0xd40   :  { %v2432_v51 = vsub.f32 %v4507_v7, %v2427_v48  ;;  %v2441_v50 = vsel %vm79_vm0, %v2436_v49, 0.0 }
 0xd41   :  { %2442 = vadd.xlane.f32.xlu1 %v2441_v50 }
 0xd42   :  { %v2437_v52 = vmul.f32 %v2432_v51, %v2432_v51 }
 0xd44   :  { %v2444_v53 = vsel %vm79_vm0, %v2437_v52, 0.0  ;;  %v72_v52 = vld [vmem:[%s4693_s11 + $0x38] sm:$0xff] }
 0xd45   :  { %2445 = vadd.xlane.f32.xlu0 %v2444_v53  ;;  %3436 = vmatpush3.msra.mxu0 %v72_v52  ;;  %v71_v53 = vld [vmem:[%s4693_s11 + $0x30] sm:$0xff] }
 0xd46   :  { %3437 = vmatprep.subr.mxu0 %v3637_v35 }
 0xd47   :  { %3438 = vmatpush3.msra.mxu0 %v71_v53 }
 0xd48   :  { %3439 = vmatprep.subr.mxu0 %v3637_v35 }
 0xd49   :  { %3440 = vmatpush3.msra.mxu0 %v70_v10 }
 0xd4a   :  { %3441 = vmatprep.subr.mxu0 %v3637_v35 }
 0xd4b   :  { %3442 = vmatpush3.msra.mxu0 %v69_v54 }
 0xd4c   :  { %3443 = vmatprep.subr.mxu0 %v3637_v35 }
 0xd4d   :  { %3444 = vmatpush3.msra.mxu0 %v68_v55 }
 0xd4e   :  { %3445 = vmatprep.subr.mxu0 %v3637_v35 }
 0xd4f   :  { %3446 = vmatpush3.msra.mxu0 %v67_v12 }
 0xd50   :  { %3447 = vmatprep.subr.mxu0 %v3637_v35 }
 0xd75   :  { %v2419_v31 = vpop.xlane.xlu0 %2418 }
 0xd76   :  { %v2428_v33 = vmul.f32 0.03125, %v2419_v31  ;;  %v66_v31 = vld [vmem:[%s4693_s11 + $0x8] sm:$0xff] }
 0xd77   :  { %3448 = vmatpush3.msra.mxu0 %v66_v31 }
 0xd78   :  { %v2433_v4 = vsub.f32 %v4514_v30, %v2428_v33  ;;  %3449 = vmatprep.subr.mxu0 %v3637_v35  ;;  %v65_v33 = vld [vmem:[%s4693_s11] sm:$0xff] }
 0xd79   :  { %v2422_v6 = vpop.xlane.xlu0 %2421  ;;  %3450 = vmatpush3.msra.mxu0 %v65_v33 }
 0xd7a   :  { %v2429_v8 = vmul.f32 0.03125, %v2422_v6  ;;  %v2438_v24 = vmul.f32 %v2433_v4, %v2433_v4 }
 0xd7c   :  { %v2434_v26 = vsub.f32 %v4521_v27, %v2429_v8  ;;  %v2447_v16 = vsel %vm79_vm0, %v2438_v24, 0.0 }
 0xd7d   :  { %2448 = vadd.xlane.f32.xlu1 %v2447_v16 }
 0xd7e   :  { %v2425_v20 = vpop.xlane.xlu0 %2424  ;;  %v2439_v14 = vmul.f32 %v2434_v26, %v2434_v26 }
 0xd7f   :  { %v2430_v23 = vmul.f32 0.03125, %v2425_v20 }
 0xd80   :  { %v2450_v41 = vsel %vm79_vm0, %v2439_v14, 0.0 }
 0xd81   :  { %v2435_v42 = vsub.f32 %v4528_v39, %v2430_v23  ;;  %2451 = vadd.xlane.f32.xlu0 %v2450_v41 }
 0xd83   :  { %v2440_v45 = vmul.f32 %v2435_v42, %v2435_v42 }
 0xd85   :  { %v2453_v56 = vsel %vm92_vm1, %v2440_v45, 0.0 }
 0xd86   :  { %2454 = vadd.xlane.f32.xlu1 %v2453_v56 }
 0xdca   :  { %v2443_v57 = vpop.xlane.xlu1 %2442 }
 0xdcb   :  { %v2456_v58 = vmul.f32 0.03125, %v2443_v57 }
 0xdcd   :  { %v2461_v59 = vadd.f32 1e-06, %v2456_v58 }
 0xdce   :  { %v2446_v43 = vpop.xlane.xlu0 %2445 }
 0xdcf   :  { %3602 = vrsqrt.f32 %v2461_v59  ;;  %v2457_v60 = vmul.f32 0.03125, %v2446_v43 }
 0xdd1   :  { %v2462_v61 = vadd.f32 1e-06, %v2457_v60 }
 0xdd3   :  { %3604 = vrsqrt.f32 %v2462_v61 }
 0xddc   :  { %v3603_v62 = vpop.eup %3602 }
 0xddd   :  { %v2471_v1 = vmul.f32 %v3603_v62, %v2431_v36 }
 0xddf   :  { %v2482_v3 = vmul.f32 %v2976_v63, %v2471_v1 }
 0xde0   :  { %v3605_v5 = vpop.eup %3604 }
 0xde1   :  { %v2493_v37 = vadd.f32 %v2977_v2, %v2482_v3  ;;  %v2472_v9 = vmul.f32 %v3605_v5, %v2432_v51 }
 0xde3   :  { %3421 = vmatmul.mubr.msk.f32.vlgmr.msra.gmra.mxu1 %vm79_vm0, %v2493_v37  ;;  %v2483_v11 = vmul.f32 %v2976_v63, %v2472_v9 }
 0xde4   :  { %3423 = vmatprep.mubr.msk.f32.mxu1 %vm3638_vm2, %v3637_v35 }
 0xde5   :  { %v2494_v17 = vadd.f32 %v2977_v2, %v2483_v11 }
 0xde7   :  { %3424 = vmatmul.mubr.msk.f32.gmra.mxu1 %vm79_vm0, %v2494_v17 }
 0xde8   :  { %3426 = vmatprep.mubr.msk.f32.mxu1 %vm3638_vm2, %v3637_v35 }
 0xe06   :  { %v2449_v19 = vpop.xlane.xlu1 %2448 }
 0xe07   :  { %v2458_v22 = vmul.f32 0.03125, %v2449_v19 }
 0xe09   :  { %v2463_v13 = vadd.f32 1e-06, %v2458_v22 }
 0xe0a   :  { %v2452_v15 = vpop.xlane.xlu0 %2451 }
 0xe0b   :  { %3606 = vrsqrt.f32 %v2463_v13  ;;  %v2459_v18 = vmul.f32 0.03125, %v2452_v15 }
 0xe0d   :  { %v2464_v21 = vadd.f32 1e-06, %v2459_v18 }
 0xe0f   :  { %3608 = vrsqrt.f32 %v2464_v21  ;;  %v2455_v25 = vpop.xlane.xlu1 %2454 }
 0xe10   :  { %v2460_v28 = vmul.f32 0.03125, %v2455_v25 }
 0xe12   :  { %v2465_v29 = vadd.f32 1e-06, %v2460_v28 }
 0xe14   :  { %3610 = vrsqrt.f32 %v2465_v29 }
 0xe18   :  { %v3607_v32 = vpop.eup %3606 }
 0xe19   :  { %v2473_v34 = vmul.f32 %v3607_v32, %v2433_v4  ;;  %v4610_v4 = vld [vmem:[%s4694_s10] ss:$0 sm:$0xff] }
 0xe1b   :  { %v2484_v38 = vmul.f32 %v2976_v63, %v2473_v34 }
 0xe1c   :  { %v3609_v40 = vpop.eup %3608 }
 0xe1d   :  { %v2495_v44 = vadd.f32 %v2977_v2, %v2484_v38  ;;  %v2474_v46 = vmul.f32 %v3609_v40, %v2434_v26 }
 0xe1f   :  { %3427 = vmatmul.mubr.msk.f32.gmra.mxu1 %vm79_vm0, %v2495_v44  ;;  %v2485_v36 = vmul.f32 %v2976_v63, %v2474_v46 }
 0xe20   :  { %3429 = vmatprep.mubr.msk.f32.mxu1 %vm3638_vm2, %v3637_v35 }
 0xe21   :  { %v3611_v47 = vpop.eup %3610  ;;  %v2496_v48 = vadd.f32 %v2977_v2, %v2485_v36 }
 0xe22   :  { %v2475_v49 = vmul.f32 %v3611_v47, %v2435_v42 }
 0xe23   :  { %3430 = vmatmul.mubr.msk.f32.gmra.mxu1 %vm79_vm0, %v2496_v48 }
 0xe24   :  { %3432 = vmatprep.mubr.msk.f32.mxu1 %vm3638_vm2, %v3637_v35  ;;  %v2486_v51 = vmul.f32 %v2976_v63, %v2475_v49 }
 0xe26   :  { %v2497_v50 = vadd.f32 %v2977_v2, %v2486_v51 }
 0xe28   :  { %3433 = vmatmul.mubr.msk.f32.gmra.mxu1 %vm79_vm0, %v2497_v50 }
 0xea3   :  { %v2585_v6 = vpop.f32.mrf.mxu1 }
 0xea4   :  { %v2586_v8 = vadd.f32 %v4610_v4, %v2585_v6 }
 0xea5   :  { %v3422_v24 = vpop.f32.mrf.mxu1 }
 0xea6   :  { %v2614_v26 = vmul.f32 0.70710677, %v2586_v8  ;;  %v2609_v50 = vmul.f32 0.5, %v2586_v8 }
 0xea7   :  { %v2590_v16 = vpop.f32.mrf.mxu1 }
 0xea8   :  { %v2619_v20 = vand.u32 2147483647, %v2614_v26  ;;  %v2591_v14 = vadd.f32 %v4610_v4, %v2590_v16  ;;  %vm2719_vm10 = vcmp.ge.f32.partialorder %v2614_v26, 0.0 }
 0xea9   :  { %v3425_v23 = vpop.f32.mrf.mxu1 }
 0xeaa   :  { %v2624_v41 = vmul.f32 0.3275911, %v2619_v20  ;;  %v2615_v42 = vmul.f32 0.70710677, %v2591_v14  ;;  %v2689_v59 = vsub.f32 0.0, %v2619_v20  ;;  %v2610_v55 = vmul.f32 0.5, %v2591_v14 }
 0xeac   :  { %v2629_v45 = vadd.f32 1.0, %v2624_v41  ;;  %v2620_v56 = vand.u32 2147483647, %v2615_v42  ;;  %v2694_v43 = vmul.f32 %v2689_v59, %v2619_v20  ;;  %vm2720_vm12 = vcmp.ge.f32.partialorder %v2615_v42, 0.0 }
 0xeae   :  { %3612 = vrcp.f32 %v2629_v45  ;;  %v2625_v57 = vmul.f32 0.3275911, %v2620_v56  ;;  %v2690_v60 = vsub.f32 0.0, %v2620_v56  ;;  %v2699_v63 = vmul.f32 1.442695, %v2694_v43 }
 0xeb0   :  { %v2630_v58 = vadd.f32 1.0, %v2625_v57  ;;  %v2695_v1 = vmul.f32 %v2690_v60, %v2620_v56 }
 0xeb2   :  { %3614 = vrcp.f32 %v2630_v58  ;;  %v2701_v9 = vmul.f32 1.442695, %v2695_v1 }
 0xeb3   :  { %3616 = vpow2.f32 %v2699_v63 }
 0xeb4   :  { %3618 = vpow2.f32 %v2701_v9 }
 0xebb   :  { %v3613_v61 = vpop.eup %3612 }
 0xebc   :  { %v2644_v62 = vmul.f32 1.0614054, %v3613_v61 }
 0xebe   :  { %v2649_v2 = vadd.f32 -1.4531521, %v2644_v62 }
 0xebf   :  { %v3615_v3 = vpop.eup %3614 }
 0xec0   :  { %v2654_v5 = vmul.f32 %v3613_v61, %v2649_v2  ;;  %v2645_v37 = vmul.f32 1.0614054, %v3615_v3  ;;  %v3617_v34 = vpop.eup %3616 }
 0xec1   :  { %v3619_v36 = vpop.eup %3618 }
 0xec2   :  { %v2659_v11 = vadd.f32 1.4214138, %v2654_v5  ;;  %v2650_v17 = vadd.f32 -1.4531521, %v2645_v37 }
 0xec4   :  { %v2664_v19 = vmul.f32 %v3613_v61, %v2659_v11  ;;  %v2655_v22 = vmul.f32 %v3615_v3, %v2650_v17 }
 0xec6   :  { %v2669_v13 = vadd.f32 -0.28449672, %v2664_v19  ;;  %v2660_v15 = vadd.f32 1.4214138, %v2655_v22 }
 0xec8   :  { %v2674_v18 = vmul.f32 %v3613_v61, %v2669_v13  ;;  %v2665_v21 = vmul.f32 %v3615_v3, %v2660_v15 }
 0xeca   :  { %v2679_v25 = vadd.f32 0.2548296, %v2674_v18  ;;  %v2670_v28 = vadd.f32 -0.28449672, %v2665_v21 }
 0xecc   :  { %v2684_v29 = vmul.f32 %v3613_v61, %v2679_v25  ;;  %v2675_v32 = vmul.f32 %v3615_v3, %v2670_v28 }
 0xece   :  { %v2709_v38 = vmul.f32 %v3617_v34, %v2684_v29  ;;  %v2680_v40 = vadd.f32 0.2548296, %v2675_v32 }
 0xed0   :  { %v2714_v44 = vsub.f32 1.0, %v2709_v38  ;;  %v2685_v46 = vmul.f32 %v3615_v3, %v2680_v40 }
 0xed2   :  { %v2724_v47 = vsub.f32 0.0, %v2714_v44  ;;  %v2710_v48 = vmul.f32 %v3619_v36, %v2685_v46 }
 0xed4   :  { %v2729_v49 = vsel %vm2719_vm10, %v2714_v44, %v2724_v47  ;;  %v2715_v51 = vsub.f32 1.0, %v2710_v48 }
 0xed5   :  { %v2734_v52 = vadd.f32 1.0, %v2729_v49 }
 0xed6   :  { %v2725_v53 = vsub.f32 0.0, %v2715_v51 }
 0xed7   :  { %v2739_v10 = vmul.f32 %v2734_v52, %v2609_v50 }
 0xed8   :  { %v2730_v54 = vsel %vm2720_vm12, %v2715_v51, %v2725_v53 }
 0xed9   :  { %v2735_v12 = vadd.f32 1.0, %v2730_v54  ;;  %3452 = vmatmul.mubr.msk.f32.vlgmr.msra.gmra.mxu0 %vm2750_vm11, %v2739_v10 }
 0xeda   :  { %3454 = vmatprep.mubr.msk.f32.mxu0 %vm3638_vm2, %v3637_v35 }
 0xedb   :  { %v2740_v31 = vmul.f32 %v2735_v12, %v2610_v55 }
 0xedd   :  { %3455 = vmatmul.mubr.msk.f32.gmra.mxu0 %vm2750_vm11, %v2740_v31 }
 0xede   :  { %3457 = vmatprep.mubr.msk.f32.mxu0 %vm3638_vm2, %v3637_v35 }
 0xedf   :  { %v2595_v33 = vpop.f32.mrf.mxu1 }
 0xee0   :  { %v4621_v6 = vadd.f32 %v4610_v4, %v2595_v33 }
 0xee1   :  { %v3428_v8 = vpop.f32.mrf.mxu1 }
 0xee2   :  { %v4624_v24 = vmul.f32 0.70710677, %v4621_v6 }
 0xee3   :  { %v2600_v26 = vpop.f32.mrf.mxu1 }
 0xee4   :  { %v2621_v16 = vand.u32 2147483647, %v4624_v24  ;;  %v4628_v20 = vadd.f32 %v4610_v4, %v2600_v26  ;;  %vm2721_vm13 = vcmp.ge.f32.partialorder %v4624_v24, 0.0 }
 0xee5   :  { %v3431_v14 = vpop.f32.mrf.mxu1 }
 0xee6   :  { %v2626_v23 = vmul.f32 0.3275911, %v2621_v16  ;;  %v4631_v41 = vmul.f32 0.70710677, %v4628_v20  ;;  %v2691_v63 = vsub.f32 0.0, %v2621_v16 }
 0xee8   :  { %v2631_v42 = vadd.f32 1.0, %v2626_v23  ;;  %v2622_v45 = vand.u32 2147483647, %v4631_v41  ;;  %v2605_v56 = vpop.f32.mrf.mxu1  ;;  %v2696_v2 = vmul.f32 %v2691_v63, %v2621_v16  ;;  %vm2722_vm14 = vcmp.ge.f32.partialorder %v4631_v41, 0.0 }
 0xee9   :  { %v4635_v57 = vadd.f32 %v4610_v4, %v2605_v56 }
 0xeea   :  { %3620 = vrcp.f32 %v2631_v42  ;;  %v2627_v58 = vmul.f32 0.3275911, %v2622_v45  ;;  %v3434_v59 = vpop.f32.mrf.mxu1  ;;  %v2692_v3 = vsub.f32 0.0, %v2622_v45  ;;  %v2703_v4 = vmul.f32 1.442695, %v2696_v2 }
 0xeeb   :  { %v4638_v43 = vmul.f32 0.70710677, %v4635_v57  ;;  %v2613_v41 = vmul.f32 0.5, %v4635_v57 }
 0xeec   :  { %v2632_v60 = vadd.f32 1.0, %v2627_v58  ;;  %v2697_v9 = vmul.f32 %v2692_v3, %v2622_v45  ;;  %v2611_v58 = vmul.f32 0.5, %v4621_v6  ;;  %v2612_v3 = vmul.f32 0.5, %v4628_v20 }
 0xeed   :  { %v2623_v61 = vand.u32 2147483647, %v4638_v43  ;;  %vm2723_vm15 = vcmp.ge.f32.partialorder %v4638_v43, 0.0 }
 0xeee   :  { %3622 = vrcp.f32 %v2632_v60  ;;  %v2705_v15 = vmul.f32 1.442695, %v2697_v9 }
 0xeef   :  { %v2628_v62 = vmul.f32 0.3275911, %v2623_v61  ;;  %v2693_v11 = vsub.f32 0.0, %v2623_v61 }
 0xef1   :  { %v2633_v1 = vadd.f32 1.0, %v2628_v62  ;;  %v2698_v18 = vmul.f32 %v2693_v11, %v2623_v61  ;;  %v2984_v11 = vld [vmem:[%s4695_s12] ss:$0 sm:$0xff] }
 0xef3   :  { %3624 = vrcp.f32 %v2633_v1  ;;  %v2707_v38 = vmul.f32 1.442695, %v2698_v18 }
 0xef4   :  { %3626 = vpow2.f32 %v2703_v4 }
 0xef5   :  { %3628 = vpow2.f32 %v2705_v15 }
 0xef6   :  { %3630 = vpow2.f32 %v2707_v38 }
 0xef7   :  { %v3621_v5 = vpop.eup %3620 }
 0xef8   :  { %v2646_v37 = vmul.f32 1.0614054, %v3621_v5 }
 0xefa   :  { %v2651_v17 = vadd.f32 -1.4531521, %v2646_v37 }
 0xefb   :  { %v3623_v19 = vpop.eup %3622 }
 0xefc   :  { %v2656_v22 = vmul.f32 %v3621_v5, %v2651_v17  ;;  %v2647_v13 = vmul.f32 1.0614054, %v3623_v19 }
 0xefe   :  { %v2661_v21 = vadd.f32 1.4214138, %v2656_v22  ;;  %v2652_v25 = vadd.f32 -1.4531521, %v2647_v13 }
 0xf00   :  { %v3625_v28 = vpop.eup %3624  ;;  %v2666_v29 = vmul.f32 %v3621_v5, %v2661_v21  ;;  %v2657_v32 = vmul.f32 %v3623_v19, %v2652_v25 }
 0xf01   :  { %v2648_v34 = vmul.f32 1.0614054, %v3625_v28  ;;  %v3627_v10 = vpop.eup %3626 }
 0xf02   :  { %v2671_v40 = vadd.f32 -0.28449672, %v2666_v29  ;;  %v2662_v44 = vadd.f32 1.4214138, %v2657_v32  ;;  %v3629_v26 = vpop.eup %3628 }
 0xf03   :  { %v2653_v46 = vadd.f32 -1.4531521, %v2648_v34  ;;  %v3631_v61 = vpop.eup %3630 }
 0xf04   :  { %v2676_v36 = vmul.f32 %v3621_v5, %v2671_v40  ;;  %v2667_v47 = vmul.f32 %v3623_v19, %v2662_v44 }
 0xf05   :  { %v2658_v48 = vmul.f32 %v3625_v28, %v2653_v46 }
 0xf06   :  { %v2681_v49 = vadd.f32 0.2548296, %v2676_v36  ;;  %v2672_v51 = vadd.f32 -0.28449672, %v2667_v47 }
 0xf07   :  { %v2663_v50 = vadd.f32 1.4214138, %v2658_v48 }
 0xf08   :  { %v2686_v52 = vmul.f32 %v3621_v5, %v2681_v49  ;;  %v2677_v53 = vmul.f32 %v3623_v19, %v2672_v51 }
 0xf09   :  { %v2668_v54 = vmul.f32 %v3625_v28, %v2663_v50 }
 0xf0a   :  { %v2711_v55 = vmul.f32 %v3627_v10, %v2686_v52  ;;  %v2682_v12 = vadd.f32 0.2548296, %v2677_v53 }
 0xf0b   :  { %v2673_v31 = vadd.f32 -0.28449672, %v2668_v54 }
 0xf0c   :  { %v2716_v33 = vsub.f32 1.0, %v2711_v55  ;;  %v2687_v8 = vmul.f32 %v3623_v19, %v2682_v12 }
 0xf0d   :  { %v2678_v16 = vmul.f32 %v3625_v28, %v2673_v31 }
 0xf0e   :  { %v2726_v14 = vsub.f32 0.0, %v2716_v33  ;;  %v2712_v23 = vmul.f32 %v3629_v26, %v2687_v8 }
 0xf0f   :  { %v2683_v42 = vadd.f32 0.2548296, %v2678_v16 }
 0xf10   :  { %v2731_v45 = vsel %vm2721_vm13, %v2716_v33, %v2726_v14  ;;  %v2717_v56 = vsub.f32 1.0, %v2712_v23 }
 0xf11   :  { %v2736_v59 = vadd.f32 1.0, %v2731_v45  ;;  %v2688_v60 = vmul.f32 %v3625_v28, %v2683_v42 }
 0xf12   :  { %v2727_v62 = vsub.f32 0.0, %v2717_v56 }
 0xf13   :  { %v2741_v63 = vmul.f32 %v2736_v59, %v2611_v58  ;;  %v2713_v1 = vmul.f32 %v3631_v61, %v2688_v60 }
 0xf14   :  { %v2732_v2 = vsel %vm2722_vm14, %v2717_v56, %v2727_v62 }
 0xf15   :  { %v2737_v5 = vadd.f32 1.0, %v2732_v2  ;;  %v2718_v37 = vsub.f32 1.0, %v2713_v1  ;;  %3458 = vmatmul.mubr.msk.f32.gmra.mxu0 %vm2750_vm11, %v2741_v63 }
 0xf16   :  { %3460 = vmatprep.mubr.msk.f32.mxu0 %vm3638_vm2, %v3637_v35 }
 0xf17   :  { %v2742_v24 = vmul.f32 %v2737_v5, %v2612_v3  ;;  %v2728_v6 = vsub.f32 0.0, %v2718_v37 }
 0xf19   :  { %v2733_v4 = vsel %vm2723_vm15, %v2718_v37, %v2728_v6  ;;  %3461 = vmatmul.mubr.msk.f32.gmra.mxu0 %vm2750_vm11, %v2742_v24 }
 0xf1a   :  { %v2738_v9 = vadd.f32 1.0, %v2733_v4  ;;  %3463 = vmatprep.mubr.msk.f32.mxu0 %vm3638_vm2, %v3637_v35 }
 0xf1c   :  { %v2743_v20 = vmul.f32 %v2738_v9, %v2613_v41 }
 0xf1e   :  { %3464 = vmatmul.mubr.msk.f32.gmra.mxu0 %vm2750_vm11, %v2743_v20 }
 0xf99   :  { %v2832_v17 = vpop.f32.mrf.mxu0 }
 0xf9a   :  { %v2833_v19 = vadd.f32 %v2984_v11, %v2832_v17 }
 0xf9b   :  { %v3453_v22 = vpop.f32.mrf.mxu0 }
 0xf9c   :  { %v2856_v43 = vadd.f32 %v2833_v19, %v4500_v0 }
 0xf9d   :  { %v2837_v13 = vpop.f32.mrf.mxu0 }
 0xf9e   :  { %2861 = vst.msk [vmem:[%s4696_s13] sm:$0xff] %vm79_vm0, %v2856_v43  ;;  %v2838_v57 = vadd.f32 %v2984_v11, %v2837_v13 }
 0xf9f   :  { %v3456_v35 = vpop.f32.mrf.mxu0 }
 0xfa0   :  { %v2857_v15 = vadd.f32 %v2838_v57, %v4507_v7 }
 0xfa2   :  { %2862 = vst.msk [vmem:[%s4696_s13 + $0x8] sm:$0xff] %vm79_vm0, %v2857_v15 }
 0xfd5   :  { %v2842_v18 = vpop.f32.mrf.mxu0 }
 0xfd6   :  { %v2843_v21 = vadd.f32 %v2984_v11, %v2842_v18 }
 0xfd7   :  { %v3459_v25 = vpop.f32.mrf.mxu0 }
 0xfd8   :  { %v2858_v0 = vadd.f32 %v2843_v21, %v4514_v30 }
 0xfd9   :  { %v2847_v28 = vpop.f32.mrf.mxu0 }
 0xfda   :  { %2863 = vst.msk [vmem:[%s4696_s13 + $0x10] sm:$0xff] %vm79_vm0, %v2858_v0  ;;  %v2848_v29 = vadd.f32 %v2984_v11, %v2847_v28 }
 0xfdb   :  { %v3462_v32 = vpop.f32.mrf.mxu0 }
 0xfdc   :  { %v2859_v7 = vadd.f32 %v2848_v29, %v4521_v27 }
 0xfde   :  { %2864 = vst.msk [vmem:[%s4696_s13 + $0x18] sm:$0xff] %vm79_vm0, %v2859_v7  ;;  %v2852_v34 = vpop.f32.mrf.mxu0 }
 0xfdf   :  { %v2853_v38 = vadd.f32 %v2984_v11, %v2852_v34 }
 0xfe0   :  { %v3465_v40 = vpop.f32.mrf.mxu0 }
 0xfe1   :  { %v2860_v30 = vadd.f32 %v2853_v38, %v4528_v39 }
 0xfe3   :  { %2865 = vst.msk [vmem:[%s4696_s13 + $0x20] sm:$0x3] %vm92_vm1, %v2860_v30 }

// kernel: vit_forward.5
= control target key start
LH: loop header
LB: loop body
LE: loop exit
PB: predicated region body
PF: predicated region fallthrough
CT: control target
= control target key end

     0   :  { %s4924_s0 = inlined_call_operand.vmem [shape: f32[34,32], index: 0, kind: input, shape index: {}]   ;;  %s4925_s1 = inlined_call_operand.vmem [shape: f32[1,32], index: 1, kind: input, shape index: {}]   ;;  %s4926_s2 = inlined_call_operand.vmem [shape: f32[1,32], index: 2, kind: input, shape index: {}]   ;;  %s4927_s3 = inlined_call_operand.vmem [shape: f32[32,96], index: 3, kind: input, shape index: {}]   ;;  %s4928_s4 = inlined_call_operand.vmem [shape: f32[1,96], index: 4, kind: input, shape index: {}]   ;;  %s4929_s5 = inlined_call_operand.vmem [shape: f32[32,32], index: 5, kind: input, shape index: {}]   ;;  %s4930_s6 = inlined_call_operand.vmem [shape: f32[1,32], index: 6, kind: input, shape index: {}]   ;;  %s4931_s7 = inlined_call_operand.vmem [shape: f32[1,32], index: 7, kind: input, shape index: {}]   ;;  %s4932_s8 = inlined_call_operand.vmem [shape: f32[1,32], index: 8, kind: input, shape index: {}]   ;;  %s4933_s9 = inlined_call_operand.vmem [shape: f32[32,64], index: 9, kind: input, shape index: {}]   ;;  %s4934_s10 = inlined_call_operand.vmem [shape: f32[1,64], index: 10, kind: input, shape index: {}]   ;;  %s4935_s11 = inlined_call_operand.vmem [shape: f32[64,32], index: 11, kind: input, shape index: {}]   ;;  %s4936_s12 = inlined_call_operand.vmem [shape: f32[1,32], index: 12, kind: input, shape index: {}]   ;;  %s4937_s13 = inlined_call_operand.vmem [shape: f32[1,32], index: 13, kind: input, shape index: {}]   ;;  %s4938_s14 = inlined_call_operand.vmem [shape: f32[1,32], index: 14, kind: input, shape index: {}]   ;;  %s4939_s15 = inlined_call_operand.vmem [shape: f32[32,10], index: 15, kind: input, shape index: {}]   ;;  %s4940_s16 = inlined_call_operand.vmem [shape: f32[1,10], index: 16, kind: input, shape index: {}]   ;;  %s4941_s17 = inlined_call_operand.hbm [shape: f32[2,10], index: 17, kind: output, shape index: {0}]   ;;  %s4942_s18 = inlined_call_operand.vmem [shape: f32[2,4,17,17], index: 18, kind: output, shape index: {1}]  }
   0x1   :  { %4944 = sst [smem:[#allocation5_spill]] %s4924_s0 }
   0x2   :  { %4945 = sst [smem:[#allocation6_spill]] %s4925_s1 }
   0x3   :  { %4946 = sst [smem:[#allocation7_spill]] %s4926_s2 }
   0x4   :  { %s4947_s29 = sld [smem:[#allocation5_spill]]  ;;  %vm92_vm0 = vcmask 261120  }
   0xa   :  { %v87_v0 = vld [vmem:[%s4947_s29] sm:$0xff]  ;;  %v89_v1 = vld [vmem:[%s4947_s29 + $0x10] sm:$0xff]  ;;  %v88_v2 = vld [vmem:[%s4947_s29 + $0x8] sm:$0xff] }
   0xb   :  { %v93_v3 = vsel %vm92_vm0, %v87_v0, 0.0  ;;  %v99_v4 = vsel %vm92_vm0, %v89_v1, 0.0  ;;  %v90_v5 = vld [vmem:[%s4947_s29 + $0x18] sm:$0xff] }
   0xc   :  { %94 = vadd.xlane.f32.xlu0 %v93_v3  ;;  %100 = vadd.xlane.f32.xlu1 %v99_v4 }
   0xd   :  { %24 = vsyncpa [#allocation3], 0  ;;  %v96_v6 = vsel %vm92_vm0, %v88_v2, 0.0  ;;  %v102_v7 = vsel %vm92_vm0, %v90_v5, 0.0  ;;  %v91_v8 = vld [vmem:[%s4947_s29 + $0x20] sm:$0x3] }
   0xe   :  { %vm105_vm1 = vcmask 254976   ;;  %v64_v35 = vld [vmem:[%s4927_s3 + $0x18] sm:$0xff]  ;;  %v3818_v36 = vmov 0.0   ;;  %v63_v37 = vld [vmem:[%s4927_s3 + $0x10] sm:$0xff]  ;;  %vm3819_vm2 = vmmov 0   ;;  %v62_v38 = vld [vmem:[%s4927_s3 + $0x8] sm:$0xff] }
   0xf   :  { %v106_v9 = vsel %vm105_vm1, %v91_v8, 0.0  ;;  %3279 = vmatprep.subr.mxu0 %v3818_v36  ;;  %3287 = vmatprep.mubr.msk.f32.mxu0 %vm3819_vm2, %v3818_v36  ;;  %v61_v39 = vld [vmem:[%s4927_s3] sm:$0xff]  ;;  %s4948_s1 = sld [smem:[#allocation6_spill]]  ;;  %s3820_s24 = smov 96   ;;  %vm296_vm3 = vcmask 1046528   ;;  %vm310_vm4 = vcmask 64512  }
  0x10   :  { %97 = vadd.xlane.f32.xlu0 %v96_v6  ;;  %103 = vadd.xlane.f32.xlu1 %v102_v7  ;;  %s4949_s22 = sld [smem:[#allocation7_spill]]  ;;  %s3822_s25 = smov 88   ;;  %vm592_vm5 = vcmask 1040384   ;;  %vm507_vm6 = vcmask 138240   ;;  %vm514_vm7 = vcmask 131072   ;;  %vm2293_vm8 = vcmask 195584  }
  0x11   :  { %3280 = vmatpush3.msra.mxu0 %v64_v35  ;;  %3302 = vmatprep.subr.mxu1 %v3818_v36  ;;  %s3823_s26 = smov 120   ;;  %s3824_s27 = smov 56   ;;  %vm2286_vm9 = vcmask 130048   ;;  %vm2763_vm11 = vcmask 523264  }
  0x12   :  { %3281 = vmatprep.subr.mxu0 %v3818_v36  ;;  %3308 = vmatprep.mubr.msk.f32.mxu1 %vm3819_vm2, %v3818_v36  ;;  %s3825_s28 = smov 80   ;;  %s3830_s2 = smov 40  }
  0x13   :  { %3282 = vmatpush3.msra.mxu0 %v63_v37  ;;  %s3831_s23 = smov 8  }
  0x14   :  { %107 = vadd.xlane.f32.xlu0 %v106_v9  ;;  %3283 = vmatprep.subr.mxu0 %v3818_v36 }
  0x15   :  { %3284 = vmatpush3.msra.mxu0 %v62_v38  ;;  %v3026_v56 = vld [vmem:[%s4948_s1] ss:$0 sm:$0xff] }
  0x16   :  { %3285 = vmatprep.subr.mxu0 %v3818_v36  ;;  %v3027_v58 = vld [vmem:[%s4949_s22] ss:$0 sm:$0xff]  ;;  %s3834_s22 = smov [#allocation2]  }
  0x17   :  { %3286 = vmatpush3.msra.mxu0 %v61_v39 }
  0x18   :  { %3332 = vmatprep.subr.mxu0 %v3818_v36 }
  0x95   :  { %v95_v10 = vpop.xlane.xlu0 %94  ;;  %v101_v11 = vpop.xlane.xlu1 %100 }
  0x96   :  { %v110_v12 = vmul.f32 0.03125, %v95_v10  ;;  %v112_v13 = vmul.f32 0.03125, %v101_v11 }
  0x98   :  { %v3950_v14 = vsub.f32 %v87_v0, %v110_v12  ;;  %v3952_v15 = vsub.f32 %v89_v1, %v112_v13 }
  0x99   :  { %v98_v16 = vpop.xlane.xlu0 %97  ;;  %v104_v17 = vpop.xlane.xlu1 %103 }
  0x9a   :  { %v111_v18 = vmul.f32 0.03125, %v98_v16  ;;  %v113_v19 = vmul.f32 0.03125, %v104_v17  ;;  %v120_v20 = vmul.f32 %v3950_v14, %v3950_v14  ;;  %v122_v21 = vmul.f32 %v3952_v15, %v3952_v15 }
  0x9c   :  { %v3958_v22 = vsub.f32 %v88_v2, %v111_v18  ;;  %v3960_v23 = vsub.f32 %v90_v5, %v113_v19  ;;  %v125_v24 = vsel %vm92_vm0, %v120_v20, 0.0  ;;  %v131_v27 = vsel %vm92_vm0, %v122_v21, 0.0 }
  0x9d   :  { %126 = vadd.xlane.f32.xlu1 %v125_v24  ;;  %v108_v25 = vpop.xlane.xlu0 %107 }
  0x9e   :  { %v114_v26 = vmul.f32 0.03125, %v108_v25  ;;  %v121_v28 = vmul.f32 %v3958_v22, %v3958_v22  ;;  %v123_v29 = vmul.f32 %v3960_v23, %v3960_v23 }
  0xa0   :  { %v3968_v30 = vsub.f32 %v91_v8, %v114_v26  ;;  %v128_v31 = vsel %vm92_vm0, %v121_v28, 0.0  ;;  %v134_v32 = vsel %vm92_vm0, %v123_v29, 0.0 }
  0xa1   :  { %132 = vadd.xlane.f32.xlu1 %v131_v27  ;;  %129 = vadd.xlane.f32.xlu0 %v128_v31 }
  0xa2   :  { %v124_v33 = vmul.f32 %v3968_v30, %v3968_v30 }
  0xa4   :  { %v137_v34 = vsel %vm105_vm1, %v124_v33, 0.0 }
  0xa5   :  { %135 = vadd.xlane.f32.xlu0 %v134_v32  ;;  %138 = vadd.xlane.f32.xlu1 %v137_v34 }
 0x126   :  { %v127_v40 = vpop.xlane.xlu1 %126 }
 0x127   :  { %v140_v41 = vmul.f32 0.03125, %v127_v40 }
 0x129   :  { %v145_v42 = vadd.f32 1e-06, %v140_v41 }
 0x12a   :  { %v133_v43 = vpop.xlane.xlu1 %132  ;;  %v130_v44 = vpop.xlane.xlu0 %129 }
 0x12b   :  { %3653 = vrsqrt.f32 %v145_v42  ;;  %v142_v45 = vmul.f32 0.03125, %v133_v43  ;;  %v141_v46 = vmul.f32 0.03125, %v130_v44 }
 0x12d   :  { %v147_v47 = vadd.f32 1e-06, %v142_v45  ;;  %v146_v48 = vadd.f32 1e-06, %v141_v46 }
 0x12e   :  { %v139_v49 = vpop.xlane.xlu1 %138  ;;  %v136_v50 = vpop.xlane.xlu0 %135 }
 0x12f   :  { %3655 = vrsqrt.f32 %v147_v47  ;;  %v144_v51 = vmul.f32 0.03125, %v139_v49  ;;  %v143_v52 = vmul.f32 0.03125, %v136_v50 }
 0x130   :  { %3657 = vrsqrt.f32 %v146_v48 }
 0x131   :  { %v148_v53 = vadd.f32 1e-06, %v143_v52  ;;  %v149_v54 = vadd.f32 1e-06, %v144_v51 }
 0x133   :  { %3659 = vrsqrt.f32 %v148_v53 }
 0x134   :  { %3661 = vrsqrt.f32 %v149_v54 }
 0x138   :  { %v3654_v55 = vpop.eup %3653 }
 0x139   :  { %v155_v57 = vmul.f32 %v3654_v55, %v3950_v14 }
 0x13b   :  { %v166_v59 = vmul.f32 %v3026_v56, %v155_v57 }
 0x13c   :  { %v3656_v60 = vpop.eup %3655 }
 0x13d   :  { %v3658_v61 = vpop.eup %3657  ;;  %v177_v62 = vadd.f32 %v3027_v58, %v166_v59  ;;  %v157_v0 = vmul.f32 %v3656_v60, %v3952_v15  ;;  %v3028_v15 = vld [vmem:[%s4928_s4] ss:$0 sm:$0xff]  ;;  %s3821_s4 = smov 64  }
 0x13e   :  { %v156_v63 = vmul.f32 %v3658_v61, %v3958_v22 }
 0x13f   :  { %3288 = vmatmul.mubr.msk.f32.vlgmr.msra.gmra.mxu0 %vm92_vm0, %v177_v62  ;;  %v168_v4 = vmul.f32 %v3026_v56, %v157_v0 }
 0x140   :  { %3290 = vmatprep.mubr.msk.f32.mxu0 %vm3819_vm2, %v3818_v36  ;;  %v167_v1 = vmul.f32 %v3026_v56, %v156_v63  ;;  %v3660_v2 = vpop.eup %3659 }
 0x141   :  { %v158_v5 = vmul.f32 %v3660_v2, %v3960_v23  ;;  %v3662_v6 = vpop.eup %3661  ;;  %v179_v7 = vadd.f32 %v3027_v58, %v168_v4 }
 0x142   :  { %v178_v3 = vadd.f32 %v3027_v58, %v167_v1  ;;  %v159_v9 = vmul.f32 %v3662_v6, %v3968_v30 }
 0x143   :  { %v169_v8 = vmul.f32 %v3026_v56, %v158_v5 }
 0x144   :  { %3291 = vmatmul.mubr.msk.f32.gmra.mxu0 %vm92_vm0, %v178_v3  ;;  %v170_v11 = vmul.f32 %v3026_v56, %v159_v9 }
 0x145   :  { %3293 = vmatprep.mubr.msk.f32.mxu0 %vm3819_vm2, %v3818_v36  ;;  %v180_v10 = vadd.f32 %v3027_v58, %v169_v8 }
 0x146   :  { %v181_v12 = vadd.f32 %v3027_v58, %v170_v11 }
 0x148   :  { %3294 = vmatmul.mubr.msk.f32.gmra.mxu0 %vm92_vm0, %v179_v7 }
 0x149   :  { %3296 = vmatprep.mubr.msk.f32.mxu0 %vm3819_vm2, %v3818_v36 }
 0x14c   :  { %3297 = vmatmul.mubr.msk.f32.gmra.mxu0 %vm92_vm0, %v180_v10 }
 0x14d   :  { %3299 = vmatprep.mubr.msk.f32.mxu0 %vm3819_vm2, %v3818_v36 }
 0x150   :  { %3300 = vmatmul.mubr.msk.f32.gmra.mxu0 %vm92_vm0, %v181_v12 }
 0x151   :  { %3338 = vmatprep.mubr.msk.f32.mxu0 %vm3819_vm2, %v3818_v36 }
 0x1ff   :  { %v269_v13 = vpop.f32.mrf.mxu0 }
 0x200   :  { %v4029_v20 = vadd.f32 %v3028_v15, %v269_v13 }
 0x201   :  { %v3289_v14 = vpop.f32.mrf.mxu0 }
 0x204   :  { %v274_v16 = vpop.f32.mrf.mxu0 }
 0x205   :  { %v4026_v17 = vadd.f32 %v3028_v15, %v274_v16 }
 0x206   :  { %v3292_v18 = vpop.f32.mrf.mxu0 }
 0x207   :  { %306 = vrot.lane.b32.xlu1 %v4026_v17, %s3820_s24 }
 0x208   :  { %v279_v19 = vpop.f32.mrf.mxu0 }
 0x209   :  { %v4031_v21 = vadd.f32 %v3028_v15, %v279_v19 }
 0x20a   :  { %v3295_v22 = vpop.f32.mrf.mxu0 }
 0x20b   :  { %304 = vrot.lane.b32.xlu1 %v4029_v20, %s3820_s24  ;;  %308 = vrot.lane.b32.xlu0 %v4031_v21, %s3820_s24  ;;  %v297_v32 = vrot.slane %v4031_v21, 1 }
 0x20c   :  { %v284_v23 = vpop.f32.mrf.mxu0 }
 0x20d   :  { %v285_v25 = vadd.f32 %v3028_v15, %v284_v23 }
 0x20e   :  { %v3298_v24 = vpop.f32.mrf.mxu0 }
 0x20f   :  { %v298_v29 = vrot.slane %v285_v25, 1 }
 0x210   :  { %v289_v26 = vpop.f32.mrf.mxu0 }
 0x211   :  { %v290_v27 = vadd.f32 %v3028_v15, %v289_v26  ;;  %v4043_v33 = vsel %vm296_vm3, %v297_v32, %v298_v29 }
 0x212   :  { %v3301_v28 = vpop.f32.mrf.mxu0 }
 0x213   :  { %v4035_v30 = vrot.slane %v290_v27, 1 }
 0x215   :  { %407 = vrot.lane.b32.xlu1 %v4035_v30, %s3820_s24  ;;  %v4039_v31 = vsel %vm296_vm3, %v298_v29, %v4035_v30 }
 0x216   :  { %405 = vrot.lane.b32.xlu0 %v4039_v31, %s3820_s24 }
 0x219   :  { %403 = vrot.lane.b32.xlu1 %v4043_v33, %s3820_s24  ;;  %s3832_s24 = smov 16  }
 0x21a   :  { %579 = vrot.lane.b32.xlu0 %v4031_v21, %s3821_s4 }
 0x21d   :  { %577 = vrot.lane.b32.xlu1 %v4026_v17, %s3821_s4 }
 0x21e   :  { %782 = vrot.lane.b32.xlu0 %v4026_v17, %s3822_s25 }
 0x221   :  { %575 = vrot.lane.b32.xlu1 %v4029_v20, %s3821_s4 }
 0x222   :  { %780 = vrot.lane.b32.xlu0 %v4029_v20, %s3822_s25 }
 0x225   :  { %784 = vrot.lane.b32.xlu1 %v4031_v21, %s3822_s25 }
 0x229   :  { %679 = vrot.lane.b32.xlu1 %v4035_v30, %s3821_s4 }
 0x22d   :  { %677 = vrot.lane.b32.xlu1 %v4039_v31, %s3821_s4 }
 0x279   :  { %v307_v34 = vpop.permute.xlu1 %306 }
 0x27d   :  { %v309_v35 = vpop.permute.xlu0 %308  ;;  %v305_v37 = vpop.permute.xlu1 %304 }
 0x27e   :  { %3303 = vmatpush3.xpose.msk.msra.mxu1 %vm310_vm4, %v309_v35 }
 0x27f   :  { %3304 = vmatprep.subr.mxu1 %v3818_v36 }
 0x282   :  { %3305 = vmatpush3.xpose.msk.msra.mxu1 %vm310_vm4, %v307_v34 }
 0x283   :  { %3306 = vmatprep.subr.mxu1 %v3818_v36 }
 0x286   :  { %3307 = vmatpush3.xpose.msk.msra.mxu1 %vm310_vm4, %v305_v37 }
 0x287   :  { %v408_v38 = vpop.permute.xlu1 %407  ;;  %3317 = vmatprep.subr.mxu1 %v3818_v36 }
 0x288   :  { %v406_v39 = vpop.permute.xlu0 %405 }
 0x289   :  { %3309 = vmatmul.mubr.msk.f32.vlgmr.msra.gmra.mxu1 %vm310_vm4, %v4029_v20 }
 0x28a   :  { %3318 = vmatpush3.xpose.msk.msra.mxu1 %vm310_vm4, %v408_v38  ;;  %3311 = vmatprep.mubr.msk.f32.mxu1 %vm3819_vm2, %v3818_v36 }
 0x28b   :  { %v404_v40 = vpop.permute.xlu1 %403  ;;  %3319 = vmatprep.subr.mxu1 %v3818_v36 }
 0x28c   :  { %v580_v41 = vpop.permute.xlu0 %579 }
 0x28d   :  { %3312 = vmatmul.mubr.msk.f32.gmra.mxu1 %vm310_vm4, %v4026_v17  ;;  %3333 = vmatpush3.msk.msra.mxu0 %vm592_vm5, %v580_v41 }
 0x28e   :  { %3320 = vmatpush3.xpose.msk.msra.mxu1 %vm310_vm4, %v406_v39  ;;  %3334 = vmatprep.subr.mxu0 %v3818_v36 }
 0x28f   :  { %v578_v42 = vpop.permute.xlu1 %577  ;;  %3314 = vmatprep.mubr.msk.f32.mxu1 %vm3819_vm2, %v3818_v36  ;;  %3321 = vmatprep.subr.mxu1 %v3818_v36 }
 0x290   :  { %3335 = vmatpush3.msra.mxu0 %v578_v42  ;;  %v4117_v7 = vpop.permute.xlu0 %782 }
 0x291   :  { %3315 = vmatmul.mubr.msk.f32.gmra.mxu1 %vm310_vm4, %v4031_v21  ;;  %3336 = vmatprep.subr.mxu0 %v3818_v36 }
 0x292   :  { %3322 = vmatpush3.xpose.msk.msra.mxu1 %vm310_vm4, %v404_v40  ;;  %3323 = vmatprep.mubr.msk.f32.mxu1 %vm3819_vm2, %v3818_v36 }
 0x293   :  { %v576_v43 = vpop.permute.xlu1 %575  ;;  %3347 = vmatprep.subr.mxu1 %v3818_v36 }
 0x294   :  { %3337 = vmatpush3.msra.mxu0 %v576_v43  ;;  %v4119_v8 = vpop.permute.xlu0 %780 }
 0x295   :  { %3324 = vmatmul.mubr.msk.f32.vlgmr.msra.gmra.mxu1 %vm310_vm4, %v4043_v33  ;;  %3362 = vmatprep.subr.mxu0 %v3818_v36 }
 0x296   :  { %3326 = vmatprep.mubr.msk.f32.mxu1 %vm3819_vm2, %v3818_v36 }
 0x297   :  { %v4094_v44 = vpop.permute.xlu1 %784 }
 0x299   :  { %3327 = vmatmul.mubr.msk.f32.gmra.mxu1 %vm310_vm4, %v4039_v31 }
 0x29a   :  { %3329 = vmatprep.mubr.msk.f32.mxu1 %vm3819_vm2, %v3818_v36 }
 0x29b   :  { %v680_v45 = vpop.permute.xlu1 %679 }
 0x29c   :  { %3348 = vmatpush3.msk.msra.mxu1 %vm592_vm5, %v680_v45 }
 0x29d   :  { %3330 = vmatmul.mubr.msk.f32.gmra.mxu1 %vm310_vm4, %v4035_v30  ;;  %3349 = vmatprep.subr.mxu1 %v3818_v36 }
 0x29e   :  { %3353 = vmatprep.mubr.msk.f32.mxu1 %vm3819_vm2, %v3818_v36 }
 0x29f   :  { %v678_v46 = vpop.permute.xlu1 %677 }
 0x2a0   :  { %3350 = vmatpush3.msra.mxu1 %v678_v46 }
 0x2a1   :  { %3351 = vmatprep.subr.mxu1 %v3818_v36 }
 0x349   :  { %v389_v47 = vpop.f32.mrf.mxu1 }
 0x34a   :  { %v501_v48 = vmul.f32 0.35355338, %v389_v47 }
 0x34b   :  { %v3310_v49 = vpop.f32.mrf.mxu1 }
 0x34c   :  { %v508_v50 = vsel %vm507_vm6, %v501_v48, -inf }
 0x34d   :  { %v394_v51 = vpop.f32.mrf.mxu1  ;;  %509 = vmax.xlane.f32.xlu0 %v508_v50 }
 0x34e   :  { %v502_v52 = vmul.f32 0.35355338, %v394_v51 }
 0x34f   :  { %v3313_v53 = vpop.f32.mrf.mxu1 }
 0x350   :  { %v511_v54 = vsel %vm507_vm6, %v502_v52, -inf }
 0x351   :  { %v399_v55 = vpop.f32.mrf.mxu1  ;;  %512 = vmax.xlane.f32.xlu1 %v511_v54 }
 0x352   :  { %v503_v56 = vmul.f32 0.35355338, %v399_v55 }
 0x353   :  { %v3316_v57 = vpop.f32.mrf.mxu1 }
 0x354   :  { %v515_v58 = vsel %vm514_vm7, %v503_v56, -inf }
 0x355   :  { %516 = vmax.xlane.f32.xlu0 %v515_v58  ;;  %v487_v59 = vpop.f32.mrf.mxu1 }
 0x356   :  { %v504_v60 = vmul.f32 0.35355338, %v487_v59 }
 0x357   :  { %v3325_v61 = vpop.f32.mrf.mxu1 }
 0x358   :  { %v518_v62 = vsel %vm507_vm6, %v504_v60, -inf }
 0x359   :  { %519 = vmax.xlane.f32.xlu0 %v518_v62  ;;  %v492_v63 = vpop.f32.mrf.mxu1 }
 0x35a   :  { %v505_v0 = vmul.f32 0.35355338, %v492_v63 }
 0x35b   :  { %v3328_v1 = vpop.f32.mrf.mxu1 }
 0x35c   :  { %v521_v2 = vsel %vm507_vm6, %v505_v0, -inf }
 0x35d   :  { %522 = vmax.xlane.f32.xlu0 %v521_v2  ;;  %v497_v3 = vpop.f32.mrf.mxu1 }
 0x35e   :  { %v506_v5 = vmul.f32 0.35355338, %v497_v3 }
 0x35f   :  { %v3331_v4 = vpop.f32.mrf.mxu1 }
 0x360   :  { %v524_v6 = vsel %vm514_vm7, %v506_v5, -inf }
 0x362   :  { %774 = vrot.lane.b32.xlu1 %v4029_v20, %s3823_s26 }
 0x373   :  { %675 = vrot.lane.b32.xlu0 %v4043_v33, %s3821_s4  ;;  %s3829_s4 = smov 104  }
 0x386   :  { %525 = vmax.xlane.f32.xlu1 %v524_v6 }
 0x3d6   :  { %v510_v9 = vpop.xlane.xlu0 %509 }
 0x3d7   :  { %v527_v10 = vsub.f32 %v501_v48, %v510_v9 }
 0x3d9   :  { %v533_v11 = vmul.f32 1.442695, %v527_v10 }
 0x3da   :  { %v513_v12 = vpop.xlane.xlu1 %512 }
 0x3db   :  { %3663 = vpow2.f32 %v533_v11  ;;  %v528_v13 = vsub.f32 %v502_v52, %v513_v12 }
 0x3dd   :  { %v535_v14 = vmul.f32 1.442695, %v528_v13 }
 0x3de   :  { %v517_v15 = vpop.xlane.xlu0 %516  ;;  %v775_v42 = vpop.permute.xlu1 %774 }
 0x3df   :  { %3665 = vpow2.f32 %v535_v14  ;;  %v529_v16 = vsub.f32 %v503_v56, %v517_v15 }
 0x3e1   :  { %v537_v18 = vmul.f32 1.442695, %v529_v16 }
 0x3e2   :  { %v520_v19 = vpop.xlane.xlu0 %519 }
 0x3e3   :  { %3667 = vpow2.f32 %v537_v18  ;;  %v530_v32 = vsub.f32 %v504_v60, %v520_v19 }
 0x3e5   :  { %v539_v34 = vmul.f32 1.442695, %v530_v32 }
 0x3e6   :  { %v523_v22 = vpop.xlane.xlu0 %522 }
 0x3e7   :  { %v531_v35 = vsub.f32 %v505_v0, %v523_v22  ;;  %3669 = vpow2.f32 %v539_v34 }
 0x3e8   :  { %v3664_v23 = vpop.eup %3663 }
 0x3e9   :  { %v545_v24 = vsel %vm507_vm6, %v3664_v23, 0.0  ;;  %v541_v37 = vmul.f32 1.442695, %v531_v35 }
 0x3ea   :  { %546 = vadd.xlane.f32.xlu0 %v545_v24  ;;  %v676_v25 = vpop.permute.xlu0 %675 }
 0x3eb   :  { %3352 = vmatpush3.msra.mxu1 %v676_v25  ;;  %3671 = vpow2.f32 %v541_v37 }
 0x3ec   :  { %v3666_v26 = vpop.eup %3665  ;;  %3377 = vmatprep.subr.mxu1 %v3818_v36 }
 0x3ed   :  { %v548_v27 = vsel %vm507_vm6, %v3666_v26, 0.0 }
 0x3ee   :  { %549 = vadd.xlane.f32.xlu1 %v548_v27 }
 0x3f0   :  { %v3668_v28 = vpop.eup %3667 }
 0x3f1   :  { %v551_v29 = vsel %vm514_vm7, %v3668_v28, 0.0 }
 0x3f2   :  { %552 = vadd.xlane.f32.xlu0 %v551_v29 }
 0x3f4   :  { %v4129_v38 = vpop.eup %3669 }
 0x3f5   :  { %v554_v39 = vsel %vm507_vm6, %v4129_v38, 0.0 }
 0x3f8   :  { %v4133_v40 = vpop.eup %3671 }
 0x3f9   :  { %v557_v41 = vsel %vm507_vm6, %v4133_v40, 0.0 }
 0x3ff   :  { %776 = vrot.lane.b32.xlu1 %v4026_v17, %s3823_s26 }
 0x408   :  { %888 = vrot.lane.b32.xlu0 %v4035_v30, %s3822_s25 }
 0x40f   :  { %v526_v43 = vpop.xlane.xlu1 %525 }
 0x410   :  { %v532_v45 = vsub.f32 %v506_v5, %v526_v43 }
 0x412   :  { %v543_v46 = vmul.f32 1.442695, %v532_v45 }
 0x414   :  { %3673 = vpow2.f32 %v543_v46 }
 0x421   :  { %v4151_v47 = vpop.eup %3673 }
 0x422   :  { %v560_v48 = vsel %vm514_vm7, %v4151_v47, 0.0 }
 0x423   :  { %555 = vadd.xlane.f32.xlu1 %v554_v39 }
 0x427   :  { %558 = vadd.xlane.f32.xlu0 %v557_v41 }
 0x434   :  { %778 = vrot.lane.b32.xlu1 %v4031_v21, %s3823_s26 }
 0x43d   :  { %886 = vrot.lane.b32.xlu0 %v4039_v31, %s3822_s25 }
 0x441   :  { %884 = vrot.lane.b32.xlu0 %v4043_v33, %s3822_s25  ;;  %s3826_s25 = smov 112  }
 0x445   :  { %880 = vrot.lane.b32.xlu0 %v4039_v31, %s3823_s26 }
 0x449   :  { %1058 = vrot.lane.b32.xlu0 %v4031_v21, %s3824_s27 }
 0x44d   :  { %1260 = vrot.lane.b32.xlu0 %v4026_v17, %s3825_s28 }
 0x451   :  { %1258 = vrot.lane.b32.xlu0 %v4029_v20, %s3825_s28 }
 0x458   :  { %561 = vadd.xlane.f32.xlu1 %v560_v48 }
 0x469   :  { %878 = vrot.lane.b32.xlu1 %v4043_v33, %s3823_s26 }
 0x46d   :  { %882 = vrot.lane.b32.xlu1 %v4035_v30, %s3823_s26  ;;  %s3827_s26 = smov 48  }
 0x471   :  { %1056 = vrot.lane.b32.xlu1 %v4026_v17, %s3824_s27 }
 0x473   :  { %v547_v49 = vpop.xlane.xlu0 %546 }
 0x474   :  { %3675 = vrcp.f32 %v547_v49 }
 0x475   :  { %1054 = vrot.lane.b32.xlu1 %v4029_v20, %s3824_s27 }
 0x477   :  { %v550_v50 = vpop.xlane.xlu1 %549 }
 0x478   :  { %3677 = vrcp.f32 %v550_v50 }
 0x479   :  { %1262 = vrot.lane.b32.xlu1 %v4031_v21, %s3825_s28 }
 0x47b   :  { %v553_v51 = vpop.xlane.xlu0 %552  ;;  %v777_v57 = vpop.permute.xlu1 %776 }
 0x47c   :  { %3679 = vrcp.f32 %v553_v51 }
 0x47d   :  { %1157 = vrot.lane.b32.xlu1 %v4035_v30, %s3824_s27 }
 0x47f   :  { %v889_v58 = vpop.permute.xlu0 %888 }
 0x481   :  { %v3676_v52 = vpop.eup %3675  ;;  %1155 = vrot.lane.b32.xlu1 %v4039_v31, %s3824_s27 }
 0x482   :  { %v564_v53 = vmul.f32 %v3676_v52, %v3664_v23 }
 0x484   :  { %2868 = vst.msk [vmem:[%s4942_s18] sm:$0xff] %vm507_vm6, %v564_v53  ;;  %3339 = vmatmul.mubr.msk.f32.vlgmr.msra.gmra.mxu0 %vm507_vm6, %v564_v53 }
 0x485   :  { %v3678_v54 = vpop.eup %3677  ;;  %3363 = vmatpush3.xpose.msk.msra.mxu0 %vm310_vm4, %v4094_v44  ;;  %3341 = vmatprep.mubr.msk.f32.mxu0 %vm3819_vm2, %v3818_v36 }
 0x486   :  { %3364 = vmatprep.subr.mxu0 %v3818_v36  ;;  %v566_v55 = vmul.f32 %v3678_v54, %v3666_v26 }
 0x488   :  { %3342 = vmatmul.mubr.msk.f32.gmra.mxu0 %vm507_vm6, %v566_v55  ;;  %2869 = vst.msk [vmem:[%s4942_s18 + $0x8] sm:$0xff] %vm507_vm6, %v566_v55 }
 0x489   :  { %v3680_v56 = vpop.eup %3679  ;;  %3365 = vmatpush3.xpose.msk.msra.mxu0 %vm310_vm4, %v4117_v7  ;;  %3344 = vmatprep.mubr.msk.f32.mxu0 %vm3819_vm2, %v3818_v36 }
 0x48a   :  { %3366 = vmatprep.subr.mxu0 %v3818_v36  ;;  %v568_v44 = vmul.f32 %v3680_v56, %v3668_v28 }
 0x48c   :  { %3345 = vmatmul.mubr.msk.f32.gmra.mxu0 %vm507_vm6, %v568_v44  ;;  %2870 = vst.msk [vmem:[%s4942_s18 + $0x10] sm:$0x1] %vm514_vm7, %v568_v44 }
 0x48d   :  { %3367 = vmatpush3.xpose.msk.msra.mxu0 %vm310_vm4, %v4119_v8  ;;  %3368 = vmatprep.mubr.msk.f32.mxu0 %vm3819_vm2, %v3818_v36 }
 0x48e   :  { %3392 = vmatprep.subr.mxu0 %v3818_v36 }
 0x490   :  { %3369 = vmatmul.mubr.msk.f32.vlgmr.msra.gmra.mxu0 %vm310_vm4, %v775_v42 }
 0x491   :  { %3371 = vmatprep.mubr.msk.f32.mxu0 %vm3819_vm2, %v3818_v36 }
 0x494   :  { %3372 = vmatmul.mubr.msk.f32.gmra.mxu0 %vm310_vm4, %v777_v57 }
 0x495   :  { %3374 = vmatprep.mubr.msk.f32.mxu0 %vm3819_vm2, %v3818_v36 }
 0x4ac   :  { %v556_v59 = vpop.xlane.xlu1 %555 }
 0x4ad   :  { %3681 = vrcp.f32 %v556_v59 }
 0x4b0   :  { %v779_v60 = vpop.permute.xlu1 %778  ;;  %v559_v61 = vpop.xlane.xlu0 %558 }
 0x4b1   :  { %3683 = vrcp.f32 %v559_v61  ;;  %3375 = vmatmul.mubr.msk.f32.gmra.mxu0 %vm310_vm4, %v779_v60 }
 0x4b2   :  { %3398 = vmatprep.mubr.msk.f32.mxu0 %vm3819_vm2, %v3818_v36 }
 0x4b4   :  { %v887_v62 = vpop.permute.xlu0 %886 }
 0x4b8   :  { %v885_v63 = vpop.permute.xlu0 %884 }
 0x4ba   :  { %v3682_v0 = vpop.eup %3681 }
 0x4bb   :  { %v570_v1 = vmul.f32 %v3682_v0, %v4129_v38 }
 0x4bc   :  { %v881_v2 = vpop.permute.xlu0 %880 }
 0x4bd   :  { %2880 = vst.msk [vmem:[%s4942_s18 + $0x60] sm:$0xff] %vm507_vm6, %v570_v1  ;;  %3354 = vmatmul.mubr.msk.f32.vlgmr.msra.gmra.mxu1 %vm507_vm6, %v570_v1 }
 0x4be   :  { %v3684_v3 = vpop.eup %3683  ;;  %3378 = vmatpush3.xpose.msk.msra.mxu1 %vm310_vm4, %v889_v58  ;;  %3356 = vmatprep.mubr.msk.f32.mxu1 %vm3819_vm2, %v3818_v36 }
 0x4bf   :  { %3379 = vmatprep.subr.mxu1 %v3818_v36  ;;  %v572_v4 = vmul.f32 %v3684_v3, %v4133_v40 }
 0x4c0   :  { %v1059_v5 = vpop.permute.xlu0 %1058 }
 0x4c1   :  { %3357 = vmatmul.mubr.msk.f32.gmra.mxu1 %vm507_vm6, %v572_v4  ;;  %2881 = vst.msk [vmem:[%s4942_s18 + $0x68] sm:$0xff] %vm507_vm6, %v572_v4  ;;  %3393 = vmatpush3.msk.msra.mxu0 %vm592_vm5, %v1059_v5 }
 0x4c2   :  { %3380 = vmatpush3.xpose.msk.msra.mxu1 %vm310_vm4, %v887_v62  ;;  %3394 = vmatprep.subr.mxu0 %v3818_v36 }
 0x4c3   :  { %3381 = vmatprep.subr.mxu1 %v3818_v36  ;;  %3359 = vmatprep.mubr.msk.f32.mxu1 %vm3819_vm2, %v3818_v36 }
 0x4c4   :  { %v4276_v59 = vpop.permute.xlu0 %1260 }
 0x4c6   :  { %3382 = vmatpush3.xpose.msk.msra.mxu1 %vm310_vm4, %v885_v63 }
 0x4c7   :  { %3407 = vmatprep.subr.mxu1 %v3818_v36 }
 0x4c8   :  { %v4280_v60 = vpop.permute.xlu0 %1258 }
 0x4e1   :  { %v562_v6 = vpop.xlane.xlu1 %561 }
 0x4e2   :  { %3685 = vrcp.f32 %v562_v6 }
 0x4e5   :  { %v879_v7 = vpop.permute.xlu1 %878 }
 0x4e9   :  { %v883_v8 = vpop.permute.xlu1 %882 }
 0x4ed   :  { %v1057_v9 = vpop.permute.xlu1 %1056 }
 0x4ee   :  { %3395 = vmatpush3.msra.mxu0 %v1057_v9 }
 0x4ef   :  { %v3686_v10 = vpop.eup %3685  ;;  %3396 = vmatprep.subr.mxu0 %v3818_v36 }
 0x4f0   :  { %v574_v11 = vmul.f32 %v3686_v10, %v4151_v47 }
 0x4f1   :  { %v1055_v12 = vpop.permute.xlu1 %1054 }
 0x4f2   :  { %3360 = vmatmul.mubr.msk.f32.gmra.mxu1 %vm507_vm6, %v574_v11  ;;  %2882 = vst.msk [vmem:[%s4942_s18 + $0x70] sm:$0x1] %vm514_vm7, %v574_v11  ;;  %3397 = vmatpush3.msra.mxu0 %v1055_v12 }
 0x4f3   :  { %3383 = vmatprep.mubr.msk.f32.mxu1 %vm3819_vm2, %v3818_v36  ;;  %3422 = vmatprep.subr.mxu0 %v3818_v36 }
 0x4f5   :  { %v4242_v13 = vpop.permute.xlu1 %1262 }
 0x4f6   :  { %3384 = vmatmul.mubr.msk.f32.vlgmr.msra.gmra.mxu1 %vm310_vm4, %v879_v7 }
 0x4f7   :  { %3386 = vmatprep.mubr.msk.f32.mxu1 %vm3819_vm2, %v3818_v36 }
 0x4f9   :  { %v1158_v14 = vpop.permute.xlu1 %1157 }
 0x4fa   :  { %3387 = vmatmul.mubr.msk.f32.gmra.mxu1 %vm310_vm4, %v881_v2 }
 0x4fb   :  { %3408 = vmatpush3.msk.msra.mxu1 %vm592_vm5, %v1158_v14  ;;  %3389 = vmatprep.mubr.msk.f32.mxu1 %vm3819_vm2, %v3818_v36 }
 0x4fc   :  { %3409 = vmatprep.subr.mxu1 %v3818_v36 }
 0x4fd   :  { %v1156_v15 = vpop.permute.xlu1 %1155 }
 0x4fe   :  { %3390 = vmatmul.mubr.msk.f32.gmra.mxu1 %vm310_vm4, %v883_v8 }
 0x4ff   :  { %3410 = vmatpush3.msra.mxu1 %v1156_v15  ;;  %3413 = vmatprep.mubr.msk.f32.mxu1 %vm3819_vm2, %v3818_v36 }
 0x500   :  { %3411 = vmatprep.subr.mxu1 %v3818_v36 }
 0x544   :  { %v4256_v16 = vpop.f32.mrf.mxu0 }
 0x546   :  { %v3340_v18 = vpop.f32.mrf.mxu0 }
 0x548   :  { %v4258_v19 = vpop.f32.mrf.mxu0 }
 0x54a   :  { %v3343_v22 = vpop.f32.mrf.mxu0 }
 0x54c   :  { %v4260_v23 = vpop.f32.mrf.mxu0 }
 0x54e   :  { %v3346_v24 = vpop.f32.mrf.mxu0 }
 0x550   :  { %v864_v25 = vpop.f32.mrf.mxu0 }
 0x551   :  { %v982_v26 = vmul.f32 0.35355338, %v864_v25 }
 0x552   :  { %v3370_v27 = vpop.f32.mrf.mxu0 }
 0x553   :  { %v988_v28 = vsel %vm507_vm6, %v982_v26, -inf }
 0x554   :  { %989 = vmax.xlane.f32.xlu0 %v988_v28  ;;  %v869_v29 = vpop.f32.mrf.mxu0 }
 0x555   :  { %v983_v32 = vmul.f32 0.35355338, %v869_v29 }
 0x556   :  { %v3373_v34 = vpop.f32.mrf.mxu0 }
 0x557   :  { %v991_v35 = vsel %vm507_vm6, %v983_v32, -inf }
 0x558   :  { %992 = vmax.xlane.f32.xlu1 %v991_v35 }
 0x569   :  { %1252 = vrot.lane.b32.xlu1 %v4029_v20, %s3826_s25 }
 0x571   :  { %v874_v37 = vpop.f32.mrf.mxu0 }
 0x572   :  { %v984_v38 = vmul.f32 0.35355338, %v874_v37 }
 0x573   :  { %v3376_v39 = vpop.f32.mrf.mxu0 }
 0x574   :  { %v994_v40 = vsel %vm514_vm7, %v984_v38, -inf }
 0x575   :  { %995 = vmax.xlane.f32.xlu0 %v994_v40 }
 0x57d   :  { %v4267_v41 = vpop.f32.mrf.mxu1 }
 0x57f   :  { %v3355_v42 = vpop.f32.mrf.mxu1 }
 0x581   :  { %v4269_v43 = vpop.f32.mrf.mxu1 }
 0x583   :  { %v3358_v45 = vpop.f32.mrf.mxu1 }
 0x5b2   :  { %v4271_v46 = vpop.f32.mrf.mxu1 }
 0x5b4   :  { %v3361_v47 = vpop.f32.mrf.mxu1 }
 0x5b6   :  { %v968_v48 = vpop.f32.mrf.mxu1 }
 0x5b7   :  { %v985_v49 = vmul.f32 0.35355338, %v968_v48 }
 0x5b8   :  { %v3385_v50 = vpop.f32.mrf.mxu1 }
 0x5b9   :  { %v997_v51 = vsel %vm507_vm6, %v985_v49, -inf }
 0x5ba   :  { %v973_v52 = vpop.f32.mrf.mxu1  ;;  %998 = vmax.xlane.f32.xlu0 %v997_v51 }
 0x5bb   :  { %v986_v53 = vmul.f32 0.35355338, %v973_v52 }
 0x5bc   :  { %v3388_v54 = vpop.f32.mrf.mxu1 }
 0x5bd   :  { %v1000_v55 = vsel %vm507_vm6, %v986_v53, -inf }
 0x5be   :  { %v978_v56 = vpop.f32.mrf.mxu1  ;;  %1001 = vmax.xlane.f32.xlu0 %v1000_v55 }
 0x5bf   :  { %v987_v44 = vmul.f32 0.35355338, %v978_v56 }
 0x5c0   :  { %v3391_v57 = vpop.f32.mrf.mxu1 }
 0x5c1   :  { %v1003_v58 = vsel %vm514_vm7, %v987_v44, -inf }
 0x5c2   :  { %1004 = vmax.xlane.f32.xlu1 %v1003_v58 }
 0x5d4   :  { %1153 = vrot.lane.b32.xlu0 %v4043_v33, %s3824_s27  ;;  %s3828_s27 = smov 72  }
 0x5dd   :  { %v990_v61 = vpop.xlane.xlu0 %989 }
 0x5de   :  { %v1006_v62 = vsub.f32 %v982_v26, %v990_v61 }
 0x5e0   :  { %v1012_v63 = vmul.f32 1.442695, %v1006_v62 }
 0x5e1   :  { %v993_v0 = vpop.xlane.xlu1 %992 }
 0x5e2   :  { %3687 = vpow2.f32 %v1012_v63  ;;  %v1007_v1 = vsub.f32 %v983_v32, %v993_v0 }
 0x5e4   :  { %v1014_v2 = vmul.f32 1.442695, %v1007_v1 }
 0x5e5   :  { %v1253_v32 = vpop.permute.xlu1 %1252 }
 0x5e6   :  { %3689 = vpow2.f32 %v1014_v2 }
 0x5ef   :  { %v3688_v3 = vpop.eup %3687 }
 0x5f0   :  { %v1024_v4 = vsel %vm507_vm6, %v3688_v3, 0.0 }
 0x5f3   :  { %v3690_v5 = vpop.eup %3689  ;;  %1025 = vadd.xlane.f32.xlu0 %v1024_v4 }
 0x5f4   :  { %v1027_v6 = vsel %vm507_vm6, %v3690_v5, 0.0 }
 0x5f5   :  { %1028 = vadd.xlane.f32.xlu1 %v1027_v6 }
 0x5fe   :  { %v996_v7 = vpop.xlane.xlu0 %995 }
 0x5ff   :  { %v1008_v8 = vsub.f32 %v984_v38, %v996_v7 }
 0x601   :  { %v1016_v9 = vmul.f32 1.442695, %v1008_v8 }
 0x603   :  { %3691 = vpow2.f32 %v1016_v9 }
 0x606   :  { %1254 = vrot.lane.b32.xlu1 %v4026_v17, %s3826_s25 }
 0x610   :  { %v4286_v10 = vpop.eup %3691 }
 0x611   :  { %v1030_v11 = vsel %vm514_vm7, %v4286_v10, 0.0 }
 0x612   :  { %1031 = vadd.xlane.f32.xlu0 %v1030_v11 }
 0x628   :  { %1366 = vrot.lane.b32.xlu0 %v4035_v30, %s3825_s28 }
 0x643   :  { %v999_v12 = vpop.xlane.xlu0 %998 }
 0x644   :  { %v1009_v14 = vsub.f32 %v985_v49, %v999_v12 }
 0x646   :  { %v1018_v15 = vmul.f32 1.442695, %v1009_v14 }
 0x647   :  { %v1002_v18 = vpop.xlane.xlu0 %1001 }
 0x648   :  { %3693 = vpow2.f32 %v1018_v15  ;;  %v1010_v22 = vsub.f32 %v986_v53, %v1002_v18 }
 0x64a   :  { %v1020_v24 = vmul.f32 1.442695, %v1010_v22 }
 0x64b   :  { %v1154_v25 = vpop.permute.xlu0 %1153  ;;  %v1005_v34 = vpop.xlane.xlu1 %1004 }
 0x64c   :  { %3695 = vpow2.f32 %v1020_v24  ;;  %3412 = vmatpush3.msra.mxu1 %v1154_v25  ;;  %v1011_v35 = vsub.f32 %v987_v44, %v1005_v34 }
 0x64d   :  { %3437 = vmatprep.subr.mxu1 %v3818_v36 }
 0x64e   :  { %v1022_v37 = vmul.f32 1.442695, %v1011_v35 }
 0x650   :  { %3697 = vpow2.f32 %v1022_v37 }
 0x655   :  { %v4293_v26 = vpop.eup %3693 }
 0x656   :  { %v1033_v27 = vsel %vm507_vm6, %v4293_v26, 0.0 }
 0x657   :  { %1034 = vadd.xlane.f32.xlu1 %v1033_v27 }
 0x659   :  { %v4297_v28 = vpop.eup %3695 }
 0x65a   :  { %v1036_v29 = vsel %vm507_vm6, %v4297_v28, 0.0 }
 0x65b   :  { %1037 = vadd.xlane.f32.xlu0 %v1036_v29 }
 0x65d   :  { %v4315_v40 = vpop.eup %3697 }
 0x65e   :  { %v1039_v47 = vsel %vm514_vm7, %v4315_v40, 0.0 }
 0x668   :  { %1256 = vrot.lane.b32.xlu1 %v4031_v21, %s3826_s25 }
 0x671   :  { %1364 = vrot.lane.b32.xlu0 %v4039_v31, %s3825_s28 }
 0x675   :  { %1362 = vrot.lane.b32.xlu0 %v4043_v33, %s3825_s28 }
 0x679   :  { %1358 = vrot.lane.b32.xlu0 %v4039_v31, %s3826_s25 }
 0x67c   :  { %v1026_v38 = vpop.xlane.xlu0 %1025 }
 0x67d   :  { %3699 = vrcp.f32 %v1026_v38  ;;  %1536 = vrot.lane.b32.xlu0 %v4031_v21, %s3827_s26 }
 0x67e   :  { %v1029_v39 = vpop.xlane.xlu1 %1028 }
 0x67f   :  { %3701 = vrcp.f32 %v1029_v39 }
 0x681   :  { %1738 = vrot.lane.b32.xlu0 %v4026_v17, %s3828_s27 }
 0x682   :  { %v1255_v52 = vpop.permute.xlu1 %1254 }
 0x685   :  { %1736 = vrot.lane.b32.xlu0 %v4029_v20, %s3828_s27 }
 0x68a   :  { %v3700_v42 = vpop.eup %3699 }
 0x68b   :  { %v1043_v45 = vmul.f32 %v3700_v42, %v3688_v3 }
 0x68c   :  { %v3702_v48 = vpop.eup %3701  ;;  %1040 = vadd.xlane.f32.xlu1 %v1039_v47 }
 0x68d   :  { %2871 = vst.msk [vmem:[%s4942_s18 + $0x18] sm:$0xff] %vm507_vm6, %v1043_v45  ;;  %3399 = vmatmul.mubr.msk.f32.vlgmr.msra.gmra.mxu0 %vm507_vm6, %v1043_v45  ;;  %v1045_v49 = vmul.f32 %v3702_v48, %v3690_v5 }
 0x68e   :  { %3423 = vmatpush3.xpose.msk.msra.mxu0 %vm310_vm4, %v4242_v13  ;;  %3401 = vmatprep.mubr.msk.f32.mxu0 %vm3819_vm2, %v3818_v36 }
 0x68f   :  { %3424 = vmatprep.subr.mxu0 %v3818_v36  ;;  %2872 = vst.msk [vmem:[%s4942_s18 + $0x20] sm:$0xff] %vm507_vm6, %v1045_v49 }
 0x691   :  { %3402 = vmatmul.mubr.msk.f32.gmra.mxu0 %vm507_vm6, %v1045_v49 }
 0x692   :  { %3425 = vmatpush3.xpose.msk.msra.mxu0 %vm310_vm4, %v4276_v59  ;;  %3404 = vmatprep.mubr.msk.f32.mxu0 %vm3819_vm2, %v3818_v36 }
 0x693   :  { %3426 = vmatprep.subr.mxu0 %v3818_v36 }
 0x696   :  { %3427 = vmatpush3.xpose.msk.msra.mxu0 %vm310_vm4, %v4280_v60 }
 0x697   :  { %3452 = vmatprep.subr.mxu0 %v3818_v36 }
 0x69b   :  { %v1032_v13 = vpop.xlane.xlu0 %1031 }
 0x69c   :  { %3703 = vrcp.f32 %v1032_v13 }
 0x69d   :  { %1356 = vrot.lane.b32.xlu1 %v4043_v33, %s3826_s25 }
 0x69f   :  { %v1367_v53 = vpop.permute.xlu0 %1366 }
 0x6a1   :  { %1360 = vrot.lane.b32.xlu1 %v4035_v30, %s3826_s25 }
 0x6a5   :  { %1534 = vrot.lane.b32.xlu1 %v4026_v17, %s3827_s26 }
 0x6a9   :  { %v3704_v50 = vpop.eup %3703  ;;  %1532 = vrot.lane.b32.xlu1 %v4029_v20, %s3827_s26 }
 0x6aa   :  { %v1047_v51 = vmul.f32 %v3704_v50, %v4286_v10 }
 0x6ac   :  { %3405 = vmatmul.mubr.msk.f32.gmra.mxu0 %vm507_vm6, %v1047_v51  ;;  %2873 = vst.msk [vmem:[%s4942_s18 + $0x28] sm:$0x1] %vm514_vm7, %v1047_v51 }
 0x6ad   :  { %1740 = vrot.lane.b32.xlu1 %v4031_v21, %s3828_s27  ;;  %3428 = vmatprep.mubr.msk.f32.mxu0 %vm3819_vm2, %v3818_v36 }
 0x6b0   :  { %3429 = vmatmul.mubr.msk.f32.vlgmr.msra.gmra.mxu0 %vm310_vm4, %v1253_v32 }
 0x6b1   :  { %1635 = vrot.lane.b32.xlu1 %v4035_v30, %s3827_s26  ;;  %3431 = vmatprep.mubr.msk.f32.mxu0 %vm3819_vm2, %v3818_v36 }
 0x6b4   :  { %3432 = vmatmul.mubr.msk.f32.gmra.mxu0 %vm310_vm4, %v1255_v52 }
 0x6b5   :  { %1633 = vrot.lane.b32.xlu1 %v4039_v31, %s3827_s26  ;;  %3434 = vmatprep.mubr.msk.f32.mxu0 %vm3819_vm2, %v3818_v36 }
 0x6e0   :  { %v1035_v54 = vpop.xlane.xlu1 %1034 }
 0x6e1   :  { %3705 = vrcp.f32 %v1035_v54 }
 0x6e4   :  { %v1257_v55 = vpop.permute.xlu1 %1256  ;;  %v1038_v56 = vpop.xlane.xlu0 %1037 }
 0x6e5   :  { %3707 = vrcp.f32 %v1038_v56  ;;  %3435 = vmatmul.mubr.msk.f32.gmra.mxu0 %vm310_vm4, %v1257_v55 }
 0x6e6   :  { %3458 = vmatprep.mubr.msk.f32.mxu0 %vm3819_vm2, %v3818_v36 }
 0x6e8   :  { %v1365_v44 = vpop.permute.xlu0 %1364 }
 0x6ec   :  { %v1363_v57 = vpop.permute.xlu0 %1362 }
 0x6ee   :  { %v3706_v58 = vpop.eup %3705 }
 0x6ef   :  { %v1049_v59 = vmul.f32 %v3706_v58, %v4293_v26 }
 0x6f0   :  { %v1359_v60 = vpop.permute.xlu0 %1358 }
 0x6f1   :  { %2883 = vst.msk [vmem:[%s4942_s18 + $0x78] sm:$0xff] %vm507_vm6, %v1049_v59  ;;  %3414 = vmatmul.mubr.msk.f32.vlgmr.msra.gmra.mxu1 %vm507_vm6, %v1049_v59 }
 0x6f2   :  { %v3708_v61 = vpop.eup %3707  ;;  %3438 = vmatpush3.xpose.msk.msra.mxu1 %vm310_vm4, %v1367_v53  ;;  %3416 = vmatprep.mubr.msk.f32.mxu1 %vm3819_vm2, %v3818_v36 }
 0x6f3   :  { %3439 = vmatprep.subr.mxu1 %v3818_v36  ;;  %v1051_v62 = vmul.f32 %v3708_v61, %v4297_v28 }
 0x6f4   :  { %v1537_v63 = vpop.permute.xlu0 %1536 }
 0x6f5   :  { %3417 = vmatmul.mubr.msk.f32.gmra.mxu1 %vm507_vm6, %v1051_v62  ;;  %2884 = vst.msk [vmem:[%s4942_s18 + $0x80] sm:$0xff] %vm507_vm6, %v1051_v62  ;;  %3453 = vmatpush3.msk.msra.mxu0 %vm592_vm5, %v1537_v63 }
 0x6f6   :  { %3440 = vmatpush3.xpose.msk.msra.mxu1 %vm310_vm4, %v1365_v44  ;;  %3454 = vmatprep.subr.mxu0 %v3818_v36 }
 0x6f7   :  { %3441 = vmatprep.subr.mxu1 %v3818_v36  ;;  %3419 = vmatprep.mubr.msk.f32.mxu1 %vm3819_vm2, %v3818_v36 }
 0x6f8   :  { %v4441_v59 = vpop.permute.xlu0 %1738 }
 0x6fa   :  { %3442 = vmatpush3.xpose.msk.msra.mxu1 %vm310_vm4, %v1363_v57 }
 0x6fb   :  { %3467 = vmatprep.subr.mxu1 %v3818_v36 }
 0x6fc   :  { %v4443_v63 = vpop.permute.xlu0 %1736 }
 0x715   :  { %v1041_v0 = vpop.xlane.xlu1 %1040 }
 0x716   :  { %3709 = vrcp.f32 %v1041_v0 }
 0x719   :  { %v1357_v1 = vpop.permute.xlu1 %1356 }
 0x71d   :  { %v1361_v2 = vpop.permute.xlu1 %1360 }
 0x721   :  { %v1535_v3 = vpop.permute.xlu1 %1534 }
 0x722   :  { %3455 = vmatpush3.msra.mxu0 %v1535_v3 }
 0x723   :  { %v3710_v4 = vpop.eup %3709  ;;  %3456 = vmatprep.subr.mxu0 %v3818_v36 }
 0x724   :  { %v1053_v5 = vmul.f32 %v3710_v4, %v4315_v40 }
 0x725   :  { %v1533_v6 = vpop.permute.xlu1 %1532 }
 0x726   :  { %3420 = vmatmul.mubr.msk.f32.gmra.mxu1 %vm507_vm6, %v1053_v5  ;;  %2885 = vst.msk [vmem:[%s4942_s18 + $0x88] sm:$0x1] %vm514_vm7, %v1053_v5  ;;  %3457 = vmatpush3.msra.mxu0 %v1533_v6 }
 0x727   :  { %3443 = vmatprep.mubr.msk.f32.mxu1 %vm3819_vm2, %v3818_v36  ;;  %3482 = vmatprep.subr.mxu0 %v3818_v36 }
 0x729   :  { %v4407_v7 = vpop.permute.xlu1 %1740 }
 0x72a   :  { %3444 = vmatmul.mubr.msk.f32.vlgmr.msra.gmra.mxu1 %vm310_vm4, %v1357_v1 }
 0x72b   :  { %3446 = vmatprep.mubr.msk.f32.mxu1 %vm3819_vm2, %v3818_v36 }
 0x72d   :  { %v1636_v8 = vpop.permute.xlu1 %1635 }
 0x72e   :  { %3447 = vmatmul.mubr.msk.f32.gmra.mxu1 %vm310_vm4, %v1359_v60 }
 0x72f   :  { %3468 = vmatpush3.msk.msra.mxu1 %vm592_vm5, %v1636_v8  ;;  %3449 = vmatprep.mubr.msk.f32.mxu1 %vm3819_vm2, %v3818_v36 }
 0x730   :  { %3469 = vmatprep.subr.mxu1 %v3818_v36 }
 0x731   :  { %v1634_v9 = vpop.permute.xlu1 %1633 }
 0x732   :  { %3450 = vmatmul.mubr.msk.f32.gmra.mxu1 %vm310_vm4, %v1361_v2 }
 0x733   :  { %3470 = vmatpush3.msra.mxu1 %v1634_v9  ;;  %3473 = vmatprep.mubr.msk.f32.mxu1 %vm3819_vm2, %v3818_v36 }
 0x734   :  { %3471 = vmatprep.subr.mxu1 %v3818_v36 }
 0x74d   :  { %v4421_v10 = vpop.f32.mrf.mxu0 }
 0x74f   :  { %v3400_v11 = vpop.f32.mrf.mxu0 }
 0x751   :  { %v4423_v12 = vpop.f32.mrf.mxu0 }
 0x753   :  { %v3403_v14 = vpop.f32.mrf.mxu0 }
 0x76c   :  { %v4425_v15 = vpop.f32.mrf.mxu0 }
 0x76e   :  { %v3406_v18 = vpop.f32.mrf.mxu0 }
 0x770   :  { %v1342_v22 = vpop.f32.mrf.mxu0 }
 0x771   :  { %v1460_v24 = vmul.f32 0.35355338, %v1342_v22 }
 0x772   :  { %v3430_v25 = vpop.f32.mrf.mxu0 }
 0x773   :  { %v1466_v26 = vsel %vm507_vm6, %v1460_v24, -inf }
 0x774   :  { %1467 = vmax.xlane.f32.xlu0 %v1466_v26  ;;  %v1347_v27 = vpop.f32.mrf.mxu0 }
 0x775   :  { %v1461_v28 = vmul.f32 0.35355338, %v1347_v27 }
 0x776   :  { %v3433_v29 = vpop.f32.mrf.mxu0 }
 0x777   :  { %v1469_v32 = vsel %vm507_vm6, %v1461_v28, -inf }
 0x778   :  { %1470 = vmax.xlane.f32.xlu1 %v1469_v32 }
 0x789   :  { %1730 = vrot.lane.b32.xlu1 %v4029_v20, %s3829_s4 }
 0x7a5   :  { %v1352_v34 = vpop.f32.mrf.mxu0 }
 0x7a6   :  { %v1462_v35 = vmul.f32 0.35355338, %v1352_v34 }
 0x7a7   :  { %v3436_v37 = vpop.f32.mrf.mxu0 }
 0x7a8   :  { %v1472_v38 = vsel %vm514_vm7, %v1462_v35, -inf }
 0x7a9   :  { %1473 = vmax.xlane.f32.xlu0 %v1472_v38 }
 0x7b1   :  { %v4432_v39 = vpop.f32.mrf.mxu1 }
 0x7b3   :  { %v3415_v40 = vpop.f32.mrf.mxu1 }
 0x7b5   :  { %v4434_v42 = vpop.f32.mrf.mxu1 }
 0x7b7   :  { %v3418_v45 = vpop.f32.mrf.mxu1 }
 0x7e6   :  { %v4436_v47 = vpop.f32.mrf.mxu1 }
 0x7e8   :  { %v3421_v48 = vpop.f32.mrf.mxu1 }
 0x7ea   :  { %v1446_v49 = vpop.f32.mrf.mxu1 }
 0x7eb   :  { %v1463_v13 = vmul.f32 0.35355338, %v1446_v49 }
 0x7ec   :  { %v3445_v50 = vpop.f32.mrf.mxu1 }
 0x7ed   :  { %v1475_v51 = vsel %vm507_vm6, %v1463_v13, -inf }
 0x7ee   :  { %v1451_v52 = vpop.f32.mrf.mxu1  ;;  %1476 = vmax.xlane.f32.xlu0 %v1475_v51 }
 0x7ef   :  { %v1464_v53 = vmul.f32 0.35355338, %v1451_v52 }
 0x7f0   :  { %v3448_v54 = vpop.f32.mrf.mxu1 }
 0x7f1   :  { %v1478_v55 = vsel %vm507_vm6, %v1464_v53, -inf }
 0x7f2   :  { %v1456_v56 = vpop.f32.mrf.mxu1  ;;  %1479 = vmax.xlane.f32.xlu0 %v1478_v55 }
 0x7f3   :  { %v1465_v44 = vmul.f32 0.35355338, %v1456_v56 }
 0x7f4   :  { %v3451_v57 = vpop.f32.mrf.mxu1 }
 0x7f5   :  { %v1481_v58 = vsel %vm514_vm7, %v1465_v44, -inf }
 0x7f6   :  { %1482 = vmax.xlane.f32.xlu1 %v1481_v58 }
 0x7fd   :  { %v1468_v0 = vpop.xlane.xlu0 %1467 }
 0x7fe   :  { %v1484_v1 = vsub.f32 %v1460_v24, %v1468_v0 }
 0x800   :  { %v1490_v2 = vmul.f32 1.442695, %v1484_v1 }
 0x801   :  { %v1471_v60 = vpop.xlane.xlu1 %1470 }
 0x802   :  { %v1485_v61 = vsub.f32 %v1461_v28, %v1471_v60 }
 0x804   :  { %v1492_v62 = vmul.f32 1.442695, %v1485_v61 }
 0x805   :  { %v1731_v38 = vpop.permute.xlu1 %1730 }
 0x806   :  { %3711 = vpow2.f32 %v1492_v62 }
 0x807   :  { %3713 = vpow2.f32 %v1490_v2 }
 0x808   :  { %1631 = vrot.lane.b32.xlu0 %v4043_v33, %s3827_s26  ;;  %s3833_s26 = smov 24  }
 0x813   :  { %v3712_v3 = vpop.eup %3711 }
 0x814   :  { %v1505_v4 = vsel %vm507_vm6, %v3712_v3, 0.0  ;;  %v3714_v5 = vpop.eup %3713 }
 0x815   :  { %1506 = vadd.xlane.f32.xlu1 %v1505_v4  ;;  %v1502_v6 = vsel %vm507_vm6, %v3714_v5, 0.0 }
 0x826   :  { %1732 = vrot.lane.b32.xlu1 %v4026_v17, %s3829_s4 }
 0x827   :  { %1503 = vadd.xlane.f32.xlu0 %v1502_v6 }
 0x832   :  { %v1474_v8 = vpop.xlane.xlu0 %1473 }
 0x833   :  { %v1486_v9 = vsub.f32 %v1462_v35, %v1474_v8 }
 0x835   :  { %v1494_v11 = vmul.f32 1.442695, %v1486_v9 }
 0x837   :  { %3715 = vpow2.f32 %v1494_v11 }
 0x844   :  { %v3716_v14 = vpop.eup %3715 }
 0x845   :  { %v1508_v18 = vsel %vm514_vm7, %v3716_v14, 0.0 }
 0x846   :  { %1509 = vadd.xlane.f32.xlu0 %v1508_v18 }
 0x85c   :  { %1844 = vrot.lane.b32.xlu0 %v4035_v30, %s3828_s27 }
 0x877   :  { %v1477_v22 = vpop.xlane.xlu0 %1476 }
 0x878   :  { %v1487_v24 = vsub.f32 %v1463_v13, %v1477_v22 }
 0x87a   :  { %v1496_v25 = vmul.f32 1.442695, %v1487_v24 }
 0x87b   :  { %v1480_v26 = vpop.xlane.xlu0 %1479 }
 0x87c   :  { %3717 = vpow2.f32 %v1496_v25  ;;  %v1488_v27 = vsub.f32 %v1464_v53, %v1480_v26 }
 0x87e   :  { %v1498_v28 = vmul.f32 1.442695, %v1488_v27 }
 0x87f   :  { %v1632_v29 = vpop.permute.xlu0 %1631  ;;  %v1483_v40 = vpop.xlane.xlu1 %1482 }
 0x880   :  { %3719 = vpow2.f32 %v1498_v28  ;;  %3472 = vmatpush3.msra.mxu1 %v1632_v29  ;;  %v1489_v48 = vsub.f32 %v1465_v44, %v1483_v40 }
 0x881   :  { %3497 = vmatprep.subr.mxu1 %v3818_v36 }
 0x882   :  { %v1500_v49 = vmul.f32 1.442695, %v1489_v48 }
 0x889   :  { %v3718_v32 = vpop.eup %3717 }
 0x88a   :  { %v1511_v34 = vsel %vm507_vm6, %v3718_v32, 0.0 }
 0x88b   :  { %1512 = vadd.xlane.f32.xlu1 %v1511_v34 }
 0x88d   :  { %v4456_v35 = vpop.eup %3719 }
 0x88e   :  { %v1514_v37 = vsel %vm507_vm6, %v4456_v35, 0.0 }
 0x88f   :  { %1515 = vadd.xlane.f32.xlu0 %v1514_v37 }
 0x89c   :  { %1734 = vrot.lane.b32.xlu1 %v4031_v21, %s3829_s4 }
 0x89e   :  { %v1507_v45 = vpop.xlane.xlu1 %1506 }
 0x89f   :  { %3721 = vrcp.f32 %v1507_v45 }
 0x8a0   :  { %3723 = vpow2.f32 %v1500_v49 }
 0x8a2   :  { %v1733_v57 = vpop.permute.xlu1 %1732 }
 0x8a5   :  { %1842 = vrot.lane.b32.xlu0 %v4039_v31, %s3828_s27 }
 0x8a9   :  { %1840 = vrot.lane.b32.xlu0 %v4043_v33, %s3828_s27 }
 0x8ac   :  { %v3722_v13 = vpop.eup %3721 }
 0x8ad   :  { %v1523_v50 = vmul.f32 %v3722_v13, %v3712_v3  ;;  %v3724_v52 = vpop.eup %3723 }
 0x8ae   :  { %v1517_v55 = vsel %vm514_vm7, %v3724_v52, 0.0 }
 0x8af   :  { %2875 = vst.msk [vmem:[%s4942_s18 + $0x38] sm:$0xff] %vm507_vm6, %v1523_v50 }
 0x8b0   :  { %v1504_v51 = vpop.xlane.xlu0 %1503 }
 0x8b1   :  { %3725 = vrcp.f32 %v1504_v51 }
 0x8be   :  { %v3726_v53 = vpop.eup %3725 }
 0x8bf   :  { %v1521_v54 = vmul.f32 %v3726_v53, %v3714_v5 }
 0x8c0   :  { %1518 = vadd.xlane.f32.xlu1 %v1517_v55 }
 0x8c1   :  { %2874 = vst.msk [vmem:[%s4942_s18 + $0x30] sm:$0xff] %vm507_vm6, %v1521_v54  ;;  %3459 = vmatmul.mubr.msk.f32.vlgmr.msra.gmra.mxu0 %vm507_vm6, %v1521_v54 }
 0x8c2   :  { %3483 = vmatpush3.xpose.msk.msra.mxu0 %vm310_vm4, %v4407_v7  ;;  %3461 = vmatprep.mubr.msk.f32.mxu0 %vm3819_vm2, %v3818_v36 }
 0x8c3   :  { %3484 = vmatprep.subr.mxu0 %v3818_v36 }
 0x8c5   :  { %3462 = vmatmul.mubr.msk.f32.gmra.mxu0 %vm507_vm6, %v1523_v50 }
 0x8c6   :  { %3485 = vmatpush3.xpose.msk.msra.mxu0 %vm310_vm4, %v4441_v59  ;;  %3464 = vmatprep.mubr.msk.f32.mxu0 %vm3819_vm2, %v3818_v36 }
 0x8c7   :  { %3486 = vmatprep.subr.mxu0 %v3818_v36 }
 0x8ca   :  { %3487 = vmatpush3.xpose.msk.msra.mxu0 %vm310_vm4, %v4443_v63 }
 0x8cb   :  { %3512 = vmatprep.subr.mxu0 %v3818_v36 }
 0x8cf   :  { %v1510_v7 = vpop.xlane.xlu0 %1509 }
 0x8d0   :  { %3727 = vrcp.f32 %v1510_v7 }
 0x8d1   :  { %1834 = vrot.lane.b32.xlu1 %v4043_v33, %s3829_s4 }
 0x8d3   :  { %v1845_v58 = vpop.permute.xlu0 %1844 }
 0x8dd   :  { %v3728_v56 = vpop.eup %3727 }
 0x8de   :  { %v1525_v44 = vmul.f32 %v3728_v56, %v3716_v14 }
 0x8e0   :  { %3465 = vmatmul.mubr.msk.f32.gmra.mxu0 %vm507_vm6, %v1525_v44  ;;  %2876 = vst.msk [vmem:[%s4942_s18 + $0x40] sm:$0x1] %vm514_vm7, %v1525_v44 }
 0x8e1   :  { %3488 = vmatprep.mubr.msk.f32.mxu0 %vm3819_vm2, %v3818_v36 }
 0x8e4   :  { %3489 = vmatmul.mubr.msk.f32.vlgmr.msra.gmra.mxu0 %vm310_vm4, %v1731_v38 }
 0x8e5   :  { %3491 = vmatprep.mubr.msk.f32.mxu0 %vm3819_vm2, %v3818_v36 }
 0x8e8   :  { %3492 = vmatmul.mubr.msk.f32.gmra.mxu0 %vm310_vm4, %v1733_v57 }
 0x8e9   :  { %3494 = vmatprep.mubr.msk.f32.mxu0 %vm3819_vm2, %v3818_v36 }
 0x914   :  { %v1513_v59 = vpop.xlane.xlu1 %1512 }
 0x915   :  { %3729 = vrcp.f32 %v1513_v59 }
 0x918   :  { %v1735_v60 = vpop.permute.xlu1 %1734  ;;  %v1516_v61 = vpop.xlane.xlu0 %1515 }
 0x919   :  { %3731 = vrcp.f32 %v1516_v61  ;;  %3495 = vmatmul.mubr.msk.f32.gmra.mxu0 %vm310_vm4, %v1735_v60 }
 0x91a   :  { %3518 = vmatprep.mubr.msk.f32.mxu0 %vm3819_vm2, %v3818_v36 }
 0x91c   :  { %v1843_v1 = vpop.permute.xlu0 %1842 }
 0x920   :  { %v1841_v3 = vpop.permute.xlu0 %1840 }
 0x922   :  { %v3730_v62 = vpop.eup %3729 }
 0x923   :  { %v1527_v63 = vmul.f32 %v3730_v62, %v3718_v32 }
 0x925   :  { %2886 = vst.msk [vmem:[%s4942_s18 + $0x90] sm:$0xff] %vm507_vm6, %v1527_v63  ;;  %3474 = vmatmul.mubr.msk.f32.vlgmr.msra.gmra.mxu1 %vm507_vm6, %v1527_v63 }
 0x926   :  { %v3732_v0 = vpop.eup %3731  ;;  %3498 = vmatpush3.xpose.msk.msra.mxu1 %vm310_vm4, %v1845_v58  ;;  %3476 = vmatprep.mubr.msk.f32.mxu1 %vm3819_vm2, %v3818_v36 }
 0x927   :  { %3499 = vmatprep.subr.mxu1 %v3818_v36  ;;  %v1529_v2 = vmul.f32 %v3732_v0, %v4456_v35 }
 0x929   :  { %3477 = vmatmul.mubr.msk.f32.gmra.mxu1 %vm507_vm6, %v1529_v2  ;;  %2887 = vst.msk [vmem:[%s4942_s18 + $0x98] sm:$0xff] %vm507_vm6, %v1529_v2 }
 0x92a   :  { %3500 = vmatpush3.xpose.msk.msra.mxu1 %vm310_vm4, %v1843_v1  ;;  %3479 = vmatprep.mubr.msk.f32.mxu1 %vm3819_vm2, %v3818_v36 }
 0x92b   :  { %3501 = vmatprep.subr.mxu1 %v3818_v36 }
 0x92e   :  { %3502 = vmatpush3.xpose.msk.msra.mxu1 %vm310_vm4, %v1841_v3 }
 0x92f   :  { %3630 = vmatprep.subr.mxu1 %v3818_v36 }
 0x949   :  { %v1519_v4 = vpop.xlane.xlu1 %1518 }
 0x94a   :  { %3733 = vrcp.f32 %v1519_v4 }
 0x94d   :  { %v1835_v8 = vpop.permute.xlu1 %1834 }
 0x957   :  { %v3734_v5 = vpop.eup %3733 }
 0x958   :  { %v1531_v6 = vmul.f32 %v3734_v5, %v3724_v52 }
 0x95a   :  { %3480 = vmatmul.mubr.msk.f32.gmra.mxu1 %vm507_vm6, %v1531_v6  ;;  %2888 = vst.msk [vmem:[%s4942_s18 + $0xa0] sm:$0x1] %vm514_vm7, %v1531_v6 }
 0x95b   :  { %3503 = vmatprep.mubr.msk.f32.mxu1 %vm3819_vm2, %v3818_v36 }
 0x95e   :  { %3504 = vmatmul.mubr.msk.f32.vlgmr.msra.gmra.mxu1 %vm310_vm4, %v1835_v8 }
 0x95f   :  { %3506 = vmatprep.mubr.msk.f32.mxu1 %vm3819_vm2, %v3818_v36 }
 0x981   :  { %v4539_v9 = vpop.f32.mrf.mxu0 }
 0x983   :  { %v3460_v11 = vpop.f32.mrf.mxu0 }
 0x985   :  { %v4541_v14 = vpop.f32.mrf.mxu0 }
 0x987   :  { %v3463_v18 = vpop.f32.mrf.mxu0 }
 0x9a0   :  { %v4543_v22 = vpop.f32.mrf.mxu0 }
 0x9a2   :  { %v3466_v24 = vpop.f32.mrf.mxu0 }
 0x9a4   :  { %v1820_v25 = vpop.f32.mrf.mxu0 }
 0x9a5   :  { %v1938_v26 = vmul.f32 0.35355338, %v1820_v25 }
 0x9a6   :  { %v3490_v27 = vpop.f32.mrf.mxu0 }
 0x9a7   :  { %v1944_v28 = vsel %vm507_vm6, %v1938_v26, -inf }
 0x9a8   :  { %1945 = vmax.xlane.f32.xlu0 %v1944_v28  ;;  %v1825_v29 = vpop.f32.mrf.mxu0 }
 0x9a9   :  { %v1939_v32 = vmul.f32 0.35355338, %v1825_v29 }
 0x9aa   :  { %v3493_v34 = vpop.f32.mrf.mxu0 }
 0x9ab   :  { %v1947_v35 = vsel %vm507_vm6, %v1939_v32, -inf }
 0x9ac   :  { %1948 = vmax.xlane.f32.xlu0 %v1947_v35 }
 0x9d9   :  { %v1830_v37 = vpop.f32.mrf.mxu0 }
 0x9da   :  { %v1940_v38 = vmul.f32 0.35355338, %v1830_v37 }
 0x9db   :  { %v3496_v40 = vpop.f32.mrf.mxu0 }
 0x9dc   :  { %v1950_v45 = vsel %vm514_vm7, %v1940_v38, -inf }
 0x9dd   :  { %1951 = vmax.xlane.f32.xlu1 %v1950_v45  ;;  %v69_v45 = vld [vmem:[%s4929_s5 + $0x18] sm:$0xff] }
 0x9e5   :  { %v1716_v48 = vpop.f32.mrf.mxu1 }
 0x9e7   :  { %v3475_v49 = vpop.f32.mrf.mxu1 }
 0x9e8   :  { %v67_v49 = vld [vmem:[%s4929_s5 + $0x8] sm:$0xff] }
 0x9e9   :  { %v4548_v13 = vpop.f32.mrf.mxu1 }
 0x9eb   :  { %v3478_v50 = vpop.f32.mrf.mxu1 }
 0x9ec   :  { %v66_v50 = vld [vmem:[%s4929_s5] sm:$0xff] }
 0x9ee   :  { %2014 = vrot.lane.b32.xlu1 %v4031_v21, %s3830_s2 }
 0x9f2   :  { %1838 = vrot.lane.b32.xlu1 %v4035_v30, %s3829_s4 }
 0x9f6   :  { %2012 = vrot.lane.b32.xlu1 %v4026_v17, %s3830_s2 }
 0x9fa   :  { %2113 = vrot.lane.b32.xlu1 %v4035_v30, %s3830_s2 }
 0xa1a   :  { %v4558_v51 = vpop.f32.mrf.mxu1 }
 0xa1c   :  { %v3481_v52 = vpop.f32.mrf.mxu1 }
 0xa1e   :  { %v1924_v53 = vpop.f32.mrf.mxu1 }
 0xa1f   :  { %v1941_v54 = vmul.f32 0.35355338, %v1924_v53 }
 0xa20   :  { %v3505_v55 = vpop.f32.mrf.mxu1 }
 0xa21   :  { %v1953_v7 = vsel %vm507_vm6, %v1941_v54, -inf }
 0xa22   :  { %1954 = vmax.xlane.f32.xlu0 %v1953_v7 }
 0xa31   :  { %v1946_v21 = vpop.xlane.xlu0 %1945 }
 0xa32   :  { %v1962_v17 = vsub.f32 %v1938_v26, %v1946_v21 }
 0xa34   :  { %v1968_v44 = vmul.f32 1.442695, %v1962_v17 }
 0xa35   :  { %v1949_v56 = vpop.xlane.xlu0 %1948 }
 0xa36   :  { %v1963_v30 = vsub.f32 %v1939_v32, %v1949_v56  ;;  %3735 = vpow2.f32 %v1968_v44 }
 0xa38   :  { %1836 = vrot.lane.b32.xlu0 %v4039_v31, %s3829_s4  ;;  %v1970_v57 = vmul.f32 1.442695, %v1963_v30 }
 0xa3a   :  { %3737 = vpow2.f32 %v1970_v57 }
 0xa3c   :  { %2010 = vrot.lane.b32.xlu0 %v4029_v20, %s3830_s2 }
 0xa43   :  { %v3736_v58 = vpop.eup %3735 }
 0xa44   :  { %v1980_v59 = vsel %vm507_vm6, %v3736_v58, 0.0 }
 0xa47   :  { %v3738_v60 = vpop.eup %3737 }
 0xa48   :  { %v1983_v61 = vsel %vm507_vm6, %v3738_v60, 0.0 }
 0xa5b   :  { %1981 = vadd.xlane.f32.xlu0 %v1980_v59 }
 0xa5f   :  { %1984 = vadd.xlane.f32.xlu0 %v1983_v61 }
 0xa66   :  { %v1952_v62 = vpop.xlane.xlu1 %1951 }
 0xa67   :  { %v1964_v63 = vsub.f32 %v1940_v38, %v1952_v62 }
 0xa69   :  { %v1972_v0 = vmul.f32 1.442695, %v1964_v63 }
 0xa6a   :  { %v2015_v20 = vpop.permute.xlu1 %2014 }
 0xa6b   :  { %3739 = vpow2.f32 %v1972_v0  ;;  %3513 = vmatpush3.msk.msra.mxu0 %vm592_vm5, %v2015_v20  ;;  %3633 = vmatpush3.msk.msra.mxu1 %vm592_vm5, %v2015_v20 }
 0xa6c   :  { %3514 = vmatprep.subr.mxu0 %v3818_v36  ;;  %3631 = vmatprep.subr.mxu1 %v3818_v36 }
 0xa6e   :  { %v1839_v1 = vpop.permute.xlu1 %1838 }
 0xa72   :  { %v2013_v2 = vpop.permute.xlu1 %2012 }
 0xa73   :  { %3515 = vmatpush3.msra.mxu0 %v2013_v2  ;;  %3634 = vmatpush3.msra.mxu1 %v2013_v2 }
 0xa74   :  { %3516 = vmatprep.subr.mxu0 %v3818_v36  ;;  %3632 = vmatprep.subr.mxu1 %v3818_v36 }
 0xa75   :  { %2111 = vrot.lane.b32.xlu0 %v4039_v31, %s3830_s2 }
 0xa78   :  { %v3740_v3 = vpop.eup %3739 }
 0xa79   :  { %2214 = vrot.lane.b32.xlu0 %v4421_v10, %s3831_s23  ;;  %v1986_v4 = vsel %vm514_vm7, %v3740_v3, 0.0 }
 0xa7a   :  { %1987 = vadd.xlane.f32.xlu1 %v1986_v4 }
 0xa7d   :  { %2220 = vrot.lane.b32.xlu0 %v4432_v39, %s3831_s23 }
 0xa81   :  { %2244 = vrot.lane.b32.xlu0 %v1716_v48, %s3832_s24  ;;  %v68_v48 = vld [vmem:[%s4929_s5 + $0x10] sm:$0xff] }
 0xaab   :  { %v1955_v5 = vpop.xlane.xlu0 %1954 }
 0xaac   :  { %v1965_v6 = vsub.f32 %v1941_v54, %v1955_v5 }
 0xaae   :  { %v1974_v8 = vmul.f32 1.442695, %v1965_v6 }
 0xaaf   :  { %v1837_v11 = vpop.permute.xlu0 %1836 }
 0xab0   :  { %3741 = vpow2.f32 %v1974_v8  ;;  %3507 = vmatmul.mubr.msk.f32.gmra.mxu1 %vm310_vm4, %v1837_v11 }
 0xab1   :  { %3509 = vmatprep.mubr.msk.f32.mxu1 %vm3819_vm2, %v3818_v36 }
 0xab3   :  { %v2011_v31 = vpop.permute.xlu0 %2010 }
 0xab4   :  { %3510 = vmatmul.mubr.msk.f32.gmra.mxu1 %vm310_vm4, %v1839_v1  ;;  %3517 = vmatpush3.msra.mxu0 %v2011_v31 }
 0xab5   :  { %3635 = vmatpush3.msra.mxu1 %v2011_v31  ;;  %3524 = vmatprep.mubr.msk.f32.mxu1 %vm3819_vm2, %v3818_v36 }
 0xab6   :  { %3527 = vmatprep.subr.mxu1 %v3818_v36  ;;  %3542 = vmatprep.subr.mxu0 %v3818_v36 }
 0xabd   :  { %v3742_v10 = vpop.eup %3741 }
 0xabe   :  { %v1989_v39 = vsel %vm507_vm6, %v3742_v10, 0.0 }
 0xabf   :  { %1990 = vadd.xlane.f32.xlu1 %v1989_v39 }
 0xad0   :  { %2109 = vrot.lane.b32.xlu1 %v4043_v33, %s3830_s2 }
 0xad4   :  { %2238 = vrot.lane.b32.xlu1 %v4539_v9, %s3832_s24  ;;  %v2114_v9 = vpop.permute.xlu1 %2113 }
 0xad8   :  { %2216 = vrot.lane.b32.xlu1 %v4423_v12, %s3831_s23 }
 0xadc   :  { %2240 = vrot.lane.b32.xlu1 %v4541_v14, %s3832_s24 }
 0xae0   :  { %2218 = vrot.lane.b32.xlu1 %v4425_v15, %s3831_s23 }
 0xae4   :  { %v1982_v18 = vpop.xlane.xlu0 %1981  ;;  %2242 = vrot.lane.b32.xlu1 %v4543_v22, %s3832_s24 }
 0xae5   :  { %3743 = vrcp.f32 %v1982_v18 }
 0xae8   :  { %v1985_v24 = vpop.xlane.xlu0 %1984 }
 0xae9   :  { %3745 = vrcp.f32 %v1985_v24 }
 0xaec   :  { %v2112_v27 = vpop.permute.xlu0 %2111 }
 0xaf0   :  { %v2215_v57 = vpop.permute.xlu0 %2214 }
 0xaf1   :  { %v2280_v0 = vsel %vm310_vm4, %v4256_v16, %v2215_v57 }
 0xaf2   :  { %v3744_v33 = vpop.eup %3743 }
 0xaf3   :  { %v1999_v25 = vmul.f32 %v3744_v33, %v3736_v58 }
 0xaf4   :  { %v2221_v61 = vpop.permute.xlu0 %2220 }
 0xaf5   :  { %2877 = vst.msk [vmem:[%s4942_s18 + $0x48] sm:$0xff] %vm507_vm6, %v1999_v25  ;;  %3519 = vmatmul.mubr.msk.f32.vlgmr.msra.gmra.mxu0 %vm507_vm6, %v1999_v25  ;;  %v2283_v33 = vsel %vm310_vm4, %v4267_v41, %v2221_v61 }
 0xaf6   :  { %v3746_v12 = vpop.eup %3745  ;;  %3521 = vmatprep.mubr.msk.f32.mxu0 %vm3819_vm2, %v3818_v36  ;;  %3543 = vmatpush3.msra.mxu0 %v69_v45 }
 0xaf7   :  { %v2001_v15 = vmul.f32 %v3746_v12, %v3738_v60  ;;  %3544 = vmatprep.subr.mxu0 %v3818_v36 }
 0xaf8   :  { %3545 = vmatpush3.msra.mxu0 %v68_v48  ;;  %v2245_v63 = vpop.permute.xlu0 %2244 }
 0xaf9   :  { %3522 = vmatmul.mubr.msk.f32.gmra.mxu0 %vm507_vm6, %v2001_v15  ;;  %2878 = vst.msk [vmem:[%s4942_s18 + $0x50] sm:$0xff] %vm507_vm6, %v2001_v15  ;;  %3546 = vmatprep.subr.mxu0 %v3818_v36  ;;  %v2290_v25 = vsel %vm2286_vm9, %v2283_v33, %v2245_v63 }
 0xafa   :  { %3550 = vmatprep.mubr.msk.f32.mxu0 %vm3819_vm2, %v3818_v36  ;;  %3547 = vmatpush3.msra.mxu0 %v67_v49 }
 0xafb   :  { %3548 = vmatprep.subr.mxu0 %v3818_v36 }
 0xafc   :  { %3549 = vmatpush3.msra.mxu0 %v66_v50 }
 0xafd   :  { %3588 = vmatprep.subr.mxu0 %v3818_v36 }
 0xb03   :  { %v1988_v14 = vpop.xlane.xlu1 %1987 }
 0xb04   :  { %3747 = vrcp.f32 %v1988_v14 }
 0xb11   :  { %v3748_v22 = vpop.eup %3747 }
 0xb12   :  { %v2003_v26 = vmul.f32 %v3748_v22, %v3740_v3 }
 0xb14   :  { %2879 = vst.msk [vmem:[%s4942_s18 + $0x58] sm:$0x1] %vm514_vm7, %v2003_v26  ;;  %3525 = vmatmul.mubr.msk.f32.vlgmr.msra.gmra.mxu1 %vm507_vm6, %v2003_v26 }
 0xb15   :  { %3528 = vmatpush3.msk.msra.mxu1 %vm592_vm5, %v2114_v9  ;;  %3533 = vmatprep.mubr.msk.f32.mxu1 %vm3819_vm2, %v3818_v36 }
 0xb16   :  { %3529 = vmatprep.subr.mxu1 %v3818_v36 }
 0xb17   :  { %3530 = vmatpush3.msra.mxu1 %v2112_v27 }
 0xb18   :  { %3531 = vmatprep.subr.mxu1 %v3818_v36 }
 0xb48   :  { %v1991_v28 = vpop.xlane.xlu1 %1990 }
 0xb49   :  { %3749 = vrcp.f32 %v1991_v28 }
 0xb4c   :  { %v2110_v29 = vpop.permute.xlu1 %2109 }
 0xb4d   :  { %3532 = vmatpush3.msra.mxu1 %v2110_v29 }
 0xb4e   :  { %3565 = vmatprep.subr.mxu1 %v3818_v36 }
 0xb50   :  { %v2239_v44 = vpop.permute.xlu1 %2238 }
 0xb51   :  { %v2287_v20 = vsel %vm2286_vm9, %v2280_v0, %v2239_v44 }
 0xb54   :  { %v2217_v30 = vpop.permute.xlu1 %2216 }
 0xb55   :  { %v2281_v4 = vsel %vm310_vm4, %v4258_v19, %v2217_v30  ;;  %v3793_v30 = vld [vmem:[%s4947_s29 + $0x10] sm:$0xff] }
 0xb56   :  { %v3750_v32 = vpop.eup %3749 }
 0xb57   :  { %v2005_v34 = vmul.f32 %v3750_v32, %v3742_v10  ;;  %v4694_v32 = vld [vmem:[%s4930_s6] ss:$0 sm:$0xff] }
 0xb58   :  { %v2241_v60 = vpop.permute.xlu1 %2240 }
 0xb59   :  { %3534 = vmatmul.mubr.msk.f32.vlgmr.msra.gmra.mxu1 %vm507_vm6, %v2005_v34  ;;  %2889 = vst.msk [vmem:[%s4942_s18 + $0xa8] sm:$0xff] %vm507_vm6, %v2005_v34  ;;  %v2288_v5 = vsel %vm2286_vm9, %v2281_v4, %v2241_v60 }
 0xb5a   :  { %3536 = vmatprep.mubr.msk.f32.mxu1 %vm3819_vm2, %v3818_v36 }
 0xb5c   :  { %v2219_v62 = vpop.permute.xlu1 %2218 }
 0xb5d   :  { %v2282_v15 = vsel %vm310_vm4, %v4260_v23, %v2219_v62 }
 0xb60   :  { %v2243_v1 = vpop.permute.xlu1 %2242 }
 0xb61   :  { %v2289_v9 = vsel %vm2286_vm9, %v2282_v15, %v2243_v1 }
 0xb70   :  { %v1929_v35 = vpop.f32.mrf.mxu1 }
 0xb71   :  { %v1942_v7 = vmul.f32 0.35355338, %v1929_v35 }
 0xb72   :  { %v3508_v37 = vpop.f32.mrf.mxu1 }
 0xb73   :  { %v1956_v17 = vsel %vm507_vm6, %v1942_v7, -inf }
 0xb74   :  { %v1934_v38 = vpop.f32.mrf.mxu1 }
 0xb75   :  { %v1943_v8 = vmul.f32 0.35355338, %v1934_v38  ;;  %v3791_v38 = vld [vmem:[%s4947_s29] sm:$0xff] }
 0xb76   :  { %v3511_v40 = vpop.f32.mrf.mxu1 }
 0xb77   :  { %v1959_v11 = vsel %vm514_vm7, %v1943_v8, -inf }
 0xbb5   :  { %v2095_v52 = vpop.f32.mrf.mxu0 }
 0xbb6   :  { %2262 = vrot.lane.b32.xlu0 %v2095_v52, %s3833_s26  ;;  %v3792_v52 = vld [vmem:[%s4947_s29 + $0x8] sm:$0xff] }
 0xbb7   :  { %v3520_v53 = vpop.f32.mrf.mxu0 }
 0xbb9   :  { %v2100_v54 = vpop.f32.mrf.mxu0 }
 0xbba   :  { %2264 = vrot.lane.b32.xlu1 %v2100_v54, %s3833_s26 }
 0xbbb   :  { %v3523_v55 = vpop.f32.mrf.mxu0 }
 0xbd4   :  { %v2105_v21 = vpop.f32.mrf.mxu1 }
 0xbd5   :  { %1957 = vmax.xlane.f32.xlu0 %v1956_v17  ;;  %2266 = vrot.lane.b32.xlu1 %v2105_v21, %s3833_s26 }
 0xbd6   :  { %v3526_v56 = vpop.f32.mrf.mxu1 }
 0xc19   :  { %v2194_v58 = vpop.f32.mrf.mxu1 }
 0xc1a   :  { %2268 = vrot.lane.b32.xlu1 %v2194_v58, %s3833_s26 }
 0xc1b   :  { %v3535_v59 = vpop.f32.mrf.mxu1 }
 0xc28   :  { %v2263_v2 = vpop.permute.xlu0 %2262 }
 0xc29   :  { %v2294_v3 = vsel %vm2293_vm8, %v2287_v20, %v2263_v2 }
 0xc2a   :  { %3551 = vmatmul.mubr.msk.f32.vlgmr.msra.gmra.mxu0 %vm92_vm0, %v2294_v3 }
 0xc2b   :  { %3553 = vmatprep.mubr.msk.f32.mxu0 %vm3819_vm2, %v3818_v36 }
 0xc2c   :  { %v2265_v6 = vpop.permute.xlu1 %2264 }
 0xc2d   :  { %v2295_v16 = vsel %vm2293_vm8, %v2288_v5, %v2265_v6 }
 0xc2e   :  { %3554 = vmatmul.mubr.msk.f32.gmra.mxu0 %vm92_vm0, %v2295_v16  ;;  %v76_v16 = vld [vmem:[%s4933_s9 + $0x18] sm:$0xff] }
 0xc2f   :  { %3556 = vmatprep.mubr.msk.f32.mxu0 %vm3819_vm2, %v3818_v36  ;;  %3566 = vmatpush3.msra.mxu1 %v76_v16 }
 0xc30   :  { %3567 = vmatprep.subr.mxu1 %v3818_v36 }
 0xc3e   :  { %1960 = vmax.xlane.f32.xlu1 %v1959_v11  ;;  %v74_v11 = vld [vmem:[%s4933_s9 + $0x8] sm:$0xff] }
 0xc47   :  { %v2267_v24 = vpop.permute.xlu1 %2266 }
 0xc48   :  { %v2296_v22 = vsel %vm2293_vm8, %v2289_v9, %v2267_v24 }
 0xc4f   :  { %2246 = vrot.lane.b32.xlu1 %v4548_v13, %s3832_s24 }
 0xc5e   :  { %v1958_v19 = vpop.xlane.xlu0 %1957 }
 0xc5f   :  { %v1966_v31 = vsub.f32 %v1942_v7, %v1958_v19 }
 0xc61   :  { %v1976_v10 = vmul.f32 1.442695, %v1966_v31 }
 0xc63   :  { %3751 = vpow2.f32 %v1976_v10 }
 0xc70   :  { %v3752_v39 = vpop.eup %3751 }
 0xc71   :  { %v1992_v18 = vsel %vm507_vm6, %v3752_v39, 0.0 }
 0xc72   :  { %1993 = vadd.xlane.f32.xlu0 %v1992_v18 }
 0xc8c   :  { %v2269_v12 = vpop.permute.xlu1 %2268 }
 0xc8d   :  { %v4679_v13 = vsel %vm2293_vm8, %v2290_v25, %v2269_v12 }
 0xc8e   :  { %v2303_v14 = vrot.slane %v4679_v13, 7  ;;  %v84_v13 = vld [vmem:[%s4935_s11 + $0x30] sm:$0xff] }
 0xc90   :  { %v2309_v26 = vsel %vm592_vm5, %v2296_v22, %v2303_v14 }
 0xc91   :  { %3557 = vmatmul.mubr.msk.f32.gmra.mxu0 %vm92_vm0, %v2309_v26 }
 0xc92   :  { %3559 = vmatprep.mubr.msk.f32.mxu0 %vm3819_vm2, %v3818_v36 }
 0xcc7   :  { %v1961_v41 = vpop.xlane.xlu1 %1960 }
 0xcc8   :  { %v1967_v23 = vsub.f32 %v1943_v8, %v1961_v41  ;;  %v75_v8 = vld [vmem:[%s4933_s9 + $0x10] sm:$0xff] }
 0xcc9   :  { %3568 = vmatpush3.msra.mxu1 %v75_v8  ;;  %v4837_v8 = vld [vmem:[%s4934_s10] ss:$0 sm:$0xff] }
 0xcca   :  { %v1978_v27 = vmul.f32 1.442695, %v1967_v23  ;;  %3569 = vmatprep.subr.mxu1 %v3818_v36  ;;  %v4767_v23 = vld [vmem:[%s4932_s8] ss:$0 sm:$0xff] }
 0xccb   :  { %3570 = vmatpush3.msra.mxu1 %v74_v11 }
 0xccc   :  { %3753 = vpow2.f32 %v1978_v27  ;;  %3571 = vmatprep.subr.mxu1 %v3818_v36 }
 0xcd9   :  { %v3754_v28 = vpop.eup %3753 }
 0xcda   :  { %v1995_v29 = vsel %vm514_vm7, %v3754_v28, 0.0 }
 0xcdb   :  { %1996 = vadd.xlane.f32.xlu0 %v1995_v29 }
 0xcea   :  { %v2395_v34 = vpop.f32.mrf.mxu0 }
 0xceb   :  { %v2396_v35 = vadd.f32 %v4694_v32, %v2395_v34 }
 0xcec   :  { %v3552_v37 = vpop.f32.mrf.mxu0 }
 0xced   :  { %v4700_v40 = vadd.f32 %v3791_v38, %v2396_v35 }
 0xcee   :  { %v2400_v45 = vpop.f32.mrf.mxu0 }
 0xcef   :  { %v2401_v48 = vadd.f32 %v4694_v32, %v2400_v45  ;;  %v2424_v49 = vsel %vm92_vm0, %v4700_v40, 0.0 }
 0xcf0   :  { %2425 = vadd.xlane.f32.xlu0 %v2424_v49  ;;  %v3555_v50 = vpop.f32.mrf.mxu0  ;;  %v2247_v49 = vpop.permute.xlu1 %2246 }
 0xcf1   :  { %v2420_v53 = vadd.f32 %v3792_v52, %v2401_v48 }
 0xcf3   :  { %v2427_v54 = vsel %vm92_vm0, %v2420_v53, 0.0 }
 0xcf4   :  { %2428 = vadd.xlane.f32.xlu0 %v2427_v54 }
 0xcfb   :  { %v1994_v55 = vpop.xlane.xlu0 %1993 }
 0xcfc   :  { %3755 = vrcp.f32 %v1994_v55 }
 0xd09   :  { %v3756_v7 = vpop.eup %3755 }
 0xd0a   :  { %v2007_v21 = vmul.f32 %v3756_v7, %v3752_v39 }
 0xd0c   :  { %3537 = vmatmul.mubr.msk.f32.gmra.mxu1 %vm507_vm6, %v2007_v21  ;;  %2890 = vst.msk [vmem:[%s4942_s18 + $0xb0] sm:$0xff] %vm507_vm6, %v2007_v21 }
 0xd0d   :  { %3539 = vmatprep.mubr.msk.f32.mxu1 %vm3819_vm2, %v3818_v36 }
 0xd51   :  { %v2405_v17 = vpop.f32.mrf.mxu0 }
 0xd52   :  { %v2406_v56 = vadd.f32 %v4694_v32, %v2405_v17 }
 0xd53   :  { %v3558_v44 = vpop.f32.mrf.mxu0 }
 0xd54   :  { %v4720_v57 = vadd.f32 %v3793_v30, %v2406_v56 }
 0xd56   :  { %v2430_v58 = vsel %vm92_vm0, %v4720_v57, 0.0 }
 0xd57   :  { %2431 = vadd.xlane.f32.xlu0 %v2430_v58  ;;  %v82_v58 = vld [vmem:[%s4935_s11 + $0x20] sm:$0xff] }
 0xd64   :  { %v1997_v59 = vpop.xlane.xlu0 %1996 }
 0xd65   :  { %3757 = vrcp.f32 %v1997_v59 }
 0xd72   :  { %v3758_v60 = vpop.eup %3757 }
 0xd73   :  { %v2009_v61 = vmul.f32 %v3758_v60, %v3754_v28  ;;  %v81_v60 = vld [vmem:[%s4935_s11 + $0x18] sm:$0xff] }
 0xd75   :  { %3540 = vmatmul.mubr.msk.f32.gmra.mxu1 %vm507_vm6, %v2009_v61  ;;  %2891 = vst.msk [vmem:[%s4942_s18 + $0xb8] sm:$0x1] %vm514_vm7, %v2009_v61  ;;  %s3014_s18 = sshll.u32 %s3834_s22, 4  ;;  %s3015_s18 = int_to_ptr.vmem [resolvable:$true] %s3014_s18 }
 0xd76   :  { %3573 = vmatprep.mubr.msk.f32.mxu1 %vm3819_vm2, %v3818_v36  ;;  %s3796_s2 = scalar_lea.vmem %s3015_s18, 32  ;;  %p3801_p1 = scmp.lt.s32.totalorder %s3015_s18, %s3015_s18 }
 0xd77   :  { %p3797_p0 = scmp.ne.s32.totalorder %s3015_s18, %s3796_s2  ;;  %p3802_p2 = scmp.lt.s32.totalorder %s3796_s2, %s3796_s2 }
 0xd79   :  { %v2426_v62 = vpop.xlane.xlu0 %2425  ;;  %p3803_p3 = por %p3802_p2, %p3801_p1 }
 0xd7a   :  { %v2439_v63 = vmul.f32 0.03125, %v2426_v62  ;;  %v80_v62 = vld [vmem:[%s4935_s11 + $0x10] sm:$0xff] }
 0xd7b   :  { %p3804_p4 = pnand %p3803_p3, %p3797_p0 }
 0xd7c   :  { %v2444_v0 = vsub.f32 %v4700_v40, %v2439_v63 }
 0xd7d   :  { %v2429_v20 = vpop.xlane.xlu0 %2428 }
 0xd7e   :  { %v2440_v1 = vmul.f32 0.03125, %v2429_v20  ;;  %v2449_v2 = vmul.f32 %v2444_v0, %v2444_v0  ;;  %v78_v20 = vld [vmem:[%s4935_s11] sm:$0xff] }
 0xd80   :  { %v2445_v3 = vsub.f32 %v2420_v53, %v2440_v1  ;;  %v2454_v4 = vsel %vm92_vm0, %v2449_v2, 0.0 }
 0xd81   :  { %2455 = vadd.xlane.f32.xlu0 %v2454_v4 }
 0xd82   :  { %v2450_v5 = vmul.f32 %v2445_v3, %v2445_v3 }
 0xd84   :  { %v2457_v6 = vsel %vm92_vm0, %v2450_v5, 0.0 }
 0xd85   :  { %2458 = vadd.xlane.f32.xlu0 %v2457_v6 }
 0xd9b   :  { %2222 = vrot.lane.b32.xlu0 %v4434_v42, %s3831_s23  ;;  %v73_v42 = vld [vmem:[%s4933_s9] sm:$0xff] }
 0xd9c   :  { %3572 = vmatpush3.msra.mxu1 %v73_v42 }
 0xd9d   :  { %3619 = vmatprep.subr.mxu1 %v3818_v36 }
 0xd9f   :  { %2248 = vrot.lane.b32.xlu0 %v4558_v51, %s3832_s24 }
 0xdcc   :  { %v2199_v19 = vpop.f32.mrf.mxu1 }
 0xdcd   :  { %2270 = vrot.lane.b32.xlu1 %v2199_v19, %s3833_s26 }
 0xdce   :  { %v3538_v51 = vpop.f32.mrf.mxu1 }
 0xdd1   :  { %2224 = vrot.lane.b32.xlu1 %v4436_v47, %s3831_s23  ;;  %v4762_v47 = vld [vmem:[%s4931_s7] ss:$0 sm:$0xff] }
 0xde0   :  { %v2432_v31 = vpop.xlane.xlu0 %2431 }
 0xde1   :  { %v2441_v10 = vmul.f32 0.03125, %v2432_v31 }
 0xde3   :  { %v2446_v39 = vsub.f32 %v4720_v57, %v2441_v10 }
 0xde5   :  { %v2451_v18 = vmul.f32 %v2446_v39, %v2446_v39 }
 0xde7   :  { %v2460_v24 = vsel %vm92_vm0, %v2451_v18, 0.0 }
 0xdf5   :  { %2461 = vadd.xlane.f32.xlu1 %v2460_v24 }
 0xe0a   :  { %v2456_v33 = vpop.xlane.xlu0 %2455 }
 0xe0b   :  { %v2469_v25 = vmul.f32 0.03125, %v2456_v33 }
 0xe0d   :  { %v2474_v12 = vadd.f32 1e-06, %v2469_v25 }
 0xe0e   :  { %v2459_v15 = vpop.xlane.xlu0 %2458 }
 0xe0f   :  { %3759 = vrsqrt.f32 %v2474_v12  ;;  %v2470_v9 = vmul.f32 0.03125, %v2459_v15 }
 0xe11   :  { %v2475_v22 = vadd.f32 1e-06, %v2470_v9 }
 0xe12   :  { %v2223_v48 = vpop.permute.xlu0 %2222 }
 0xe13   :  { %3761 = vrsqrt.f32 %v2475_v22  ;;  %v2284_v50 = vsel %vm310_vm4, %v4269_v43, %v2223_v48  ;;  %v85_v43 = vld [vmem:[%s4935_s11 + $0x38] sm:$0xff] }
 0xe14   :  { %v2291_v53 = vsel %vm2286_vm9, %v2284_v50, %v2247_v49  ;;  %3589 = vmatpush3.msra.mxu0 %v85_v43 }
 0xe15   :  { %3590 = vmatprep.subr.mxu0 %v3818_v36 }
 0xe16   :  { %3591 = vmatpush3.msra.mxu0 %v84_v13  ;;  %v2249_v2 = vpop.permute.xlu0 %2248 }
 0xe17   :  { %3592 = vmatprep.subr.mxu0 %v3818_v36 }
 0xe1c   :  { %v3760_v26 = vpop.eup %3759 }
 0xe1d   :  { %v2484_v41 = vmul.f32 %v3760_v26, %v2444_v0  ;;  %v79_v0 = vld [vmem:[%s4935_s11 + $0x8] sm:$0xff] }
 0xe1f   :  { %v2495_v27 = vmul.f32 %v4762_v47, %v2484_v41 }
 0xe20   :  { %v3762_v28 = vpop.eup %3761 }
 0xe21   :  { %v2506_v29 = vadd.f32 %v4767_v23, %v2495_v27  ;;  %v2485_v34 = vmul.f32 %v3762_v28, %v2445_v3 }
 0xe23   :  { %3574 = vmatmul.mubr.msk.f32.vlgmr.msra.gmra.mxu1 %vm92_vm0, %v2506_v29  ;;  %v2496_v35 = vmul.f32 %v4762_v47, %v2485_v34 }
 0xe24   :  { %3576 = vmatprep.mubr.msk.f32.mxu1 %vm3819_vm2, %v3818_v36 }
 0xe25   :  { %v2507_v37 = vadd.f32 %v4767_v23, %v2496_v35 }
 0xe27   :  { %3577 = vmatmul.mubr.msk.f32.gmra.mxu1 %vm92_vm0, %v2507_v37 }
 0xe28   :  { %3579 = vmatprep.mubr.msk.f32.mxu1 %vm3819_vm2, %v3818_v36 }
 0xe35   :  { %v2204_v38 = vpop.f32.mrf.mxu1 }
 0xe36   :  { %2272 = vrot.lane.b32.xlu1 %v2204_v38, %s3833_s26 }
 0xe37   :  { %v3541_v45 = vpop.f32.mrf.mxu1 }
 0xe3f   :  { %v2271_v52 = vpop.permute.xlu1 %2270 }
 0xe40   :  { %v2298_v54 = vsel %vm2293_vm8, %v2291_v53, %v2271_v52 }
 0xe41   :  { %v2304_v55 = vrot.slane %v2298_v54, 7 }
 0xe43   :  { %v2305_v7 = vsel %vm592_vm5, %v2303_v14, %v2304_v55  ;;  %v2225_v21 = vpop.permute.xlu1 %2224  ;;  %v83_v14 = vld [vmem:[%s4935_s11 + $0x28] sm:$0xff] }
 0xe44   :  { %3560 = vmatmul.mubr.msk.f32.gmra.mxu0 %vm92_vm0, %v2305_v7  ;;  %v2285_v1 = vsel %vm310_vm4, %v4271_v46, %v2225_v21 }
 0xe45   :  { %3562 = vmatprep.mubr.msk.f32.mxu0 %vm3819_vm2, %v3818_v36  ;;  %3593 = vmatpush3.msra.mxu0 %v83_v14  ;;  %v2292_v4 = vsel %vm2286_vm9, %v2285_v1, %v2249_v2 }
 0xe46   :  { %3594 = vmatprep.subr.mxu0 %v3818_v36 }
 0xe47   :  { %3595 = vmatpush3.msra.mxu0 %v82_v58 }
 0xe48   :  { %3596 = vmatprep.subr.mxu0 %v3818_v36 }
 0xe49   :  { %3597 = vmatpush3.msra.mxu0 %v81_v60 }
 0xe4a   :  { %3598 = vmatprep.subr.mxu0 %v3818_v36 }
 0xe4b   :  { %3599 = vmatpush3.msra.mxu0 %v80_v62 }
 0xe4c   :  { %3600 = vmatprep.subr.mxu0 %v3818_v36 }
 0xe4d   :  { %3601 = vmatpush3.msra.mxu0 %v79_v0 }
 0xe4e   :  { %3602 = vmatprep.subr.mxu0 %v3818_v36 }
 0xe4f   :  { %3603 = vmatpush3.msra.mxu0 %v78_v20 }
 0xe7e   :  { %v2462_v17 = vpop.xlane.xlu1 %2461 }
 0xe7f   :  { %v2471_v56 = vmul.f32 0.03125, %v2462_v17  ;;  %v3794_v17 = vld [vmem:[%s4947_s29 + $0x18] sm:$0xff] }
 0xe81   :  { %v2476_v44 = vadd.f32 1e-06, %v2471_v56 }
 0xe83   :  { %3763 = vrsqrt.f32 %v2476_v44 }
 0xe90   :  { %v3764_v30 = vpop.eup %3763 }
 0xe91   :  { %v2486_v59 = vmul.f32 %v3764_v30, %v2446_v39 }
 0xe93   :  { %v2497_v61 = vmul.f32 %v4762_v47, %v2486_v59 }
 0xe95   :  { %v2508_v63 = vadd.f32 %v4767_v23, %v2497_v61 }
 0xe97   :  { %3580 = vmatmul.mubr.msk.f32.gmra.mxu1 %vm92_vm0, %v2508_v63 }
 0xe98   :  { %3582 = vmatprep.mubr.msk.f32.mxu1 %vm3819_vm2, %v3818_v36 }
 0xea8   :  { %v2273_v3 = vpop.permute.xlu1 %2272 }
 0xea9   :  { %v2299_v5 = vsel %vm2293_vm8, %v2292_v4, %v2273_v3 }
 0xeaa   :  { %v2306_v6 = vrot.slane %v2299_v5, 7 }
 0xeac   :  { %v2307_v16 = vsel %vm592_vm5, %v2304_v55, %v2306_v6 }
 0xead   :  { %3563 = vmatmul.mubr.msk.f32.gmra.mxu0 %vm92_vm0, %v2307_v16 }
 0xeae   :  { %3604 = vmatprep.mubr.msk.f32.mxu0 %vm3819_vm2, %v3818_v36 }
 0xee3   :  { %v2598_v46 = vpop.f32.mrf.mxu1 }
 0xee4   :  { %v2599_v11 = vadd.f32 %v4837_v8, %v2598_v46 }
 0xee5   :  { %v3575_v42 = vpop.f32.mrf.mxu1 }
 0xee6   :  { %v2627_v19 = vmul.f32 0.70710677, %v2599_v11  ;;  %v2622_v5 = vmul.f32 0.5, %v2599_v11 }
 0xee7   :  { %v2603_v51 = vpop.f32.mrf.mxu1 }
 0xee8   :  { %v2632_v31 = vand.u32 2147483647, %v2627_v19  ;;  %v2604_v10 = vadd.f32 %v4837_v8, %v2603_v51  ;;  %vm2732_vm10 = vcmp.ge.f32.partialorder %v2627_v19, 0.0 }
 0xee9   :  { %v3578_v39 = vpop.f32.mrf.mxu1 }
 0xeea   :  { %v2637_v18 = vmul.f32 0.3275911, %v2632_v31  ;;  %v2628_v24 = vmul.f32 0.70710677, %v2604_v10  ;;  %v2702_v9 = vsub.f32 0.0, %v2632_v31  ;;  %v2623_v51 = vmul.f32 0.5, %v2604_v10 }
 0xeec   :  { %v2642_v33 = vadd.f32 1.0, %v2637_v18  ;;  %v2633_v25 = vand.u32 2147483647, %v2628_v24  ;;  %v2707_v22 = vmul.f32 %v2702_v9, %v2632_v31  ;;  %vm2733_vm12 = vcmp.ge.f32.partialorder %v2628_v24, 0.0 }
 0xeee   :  { %3765 = vrcp.f32 %v2642_v33  ;;  %v2638_v12 = vmul.f32 0.3275911, %v2633_v25  ;;  %v2703_v26 = vsub.f32 0.0, %v2633_v25  ;;  %v2712_v28 = vmul.f32 1.442695, %v2707_v22 }
 0xef0   :  { %v2643_v15 = vadd.f32 1.0, %v2638_v12  ;;  %v2708_v29 = vmul.f32 %v2703_v26, %v2633_v25 }
 0xef2   :  { %3767 = vrcp.f32 %v2643_v15  ;;  %v2714_v45 = vmul.f32 1.442695, %v2708_v29  ;;  %v3795_v29 = vld [vmem:[%s4947_s29 + $0x20] sm:$0x3] }
 0xef3   :  { %3769 = vpow2.f32 %v2712_v28 }
 0xef4   :  { %3771 = vpow2.f32 %v2714_v45 }
 0xefb   :  { %v3766_v41 = vpop.eup %3765 }
 0xefc   :  { %v2657_v27 = vmul.f32 1.0614054, %v3766_v41 }
 0xefe   :  { %v2662_v34 = vadd.f32 -1.4531521, %v2657_v27 }
 0xeff   :  { %v3768_v35 = vpop.eup %3767 }
 0xf00   :  { %v2667_v37 = vmul.f32 %v3766_v41, %v2662_v34  ;;  %v2658_v38 = vmul.f32 1.0614054, %v3768_v35  ;;  %v3770_v60 = vpop.eup %3769 }
 0xf01   :  { %v3772_v20 = vpop.eup %3771 }
 0xf02   :  { %v2672_v48 = vadd.f32 1.4214138, %v2667_v37  ;;  %v2663_v49 = vadd.f32 -1.4531521, %v2658_v38 }
 0xf04   :  { %v2677_v50 = vmul.f32 %v3766_v41, %v2672_v48  ;;  %v2668_v52 = vmul.f32 %v3768_v35, %v2663_v49  ;;  %v2410_v53 = vpop.f32.mrf.mxu0 }
 0xf05   :  { %v2411_v54 = vadd.f32 %v4694_v32, %v2410_v53 }
 0xf06   :  { %v2682_v55 = vadd.f32 -0.28449672, %v2677_v50  ;;  %v2673_v7 = vadd.f32 1.4214138, %v2668_v52  ;;  %v3561_v21 = vpop.f32.mrf.mxu0 }
 0xf07   :  { %v4845_v56 = vadd.f32 %v3794_v17, %v2411_v54 }
 0xf08   :  { %v2687_v44 = vmul.f32 %v3766_v41, %v2682_v55  ;;  %v2678_v43 = vmul.f32 %v3768_v35, %v2673_v7 }
 0xf09   :  { %v2433_v13 = vsel %vm92_vm0, %v4845_v56, 0.0 }
 0xf0a   :  { %v2692_v14 = vadd.f32 0.2548296, %v2687_v44  ;;  %v2683_v30 = vadd.f32 -0.28449672, %v2678_v43  ;;  %2434 = vadd.xlane.f32.xlu0 %v2433_v13 }
 0xf0c   :  { %v2697_v58 = vmul.f32 %v3766_v41, %v2692_v14  ;;  %v2688_v59 = vmul.f32 %v3768_v35, %v2683_v30 }
 0xf0e   :  { %v2722_v61 = vmul.f32 %v3770_v60, %v2697_v58  ;;  %v2693_v62 = vadd.f32 0.2548296, %v2688_v59 }
 0xf10   :  { %v2727_v63 = vsub.f32 1.0, %v2722_v61  ;;  %v2698_v0 = vmul.f32 %v3768_v35, %v2693_v62 }
 0xf12   :  { %v2737_v1 = vsub.f32 0.0, %v2727_v63  ;;  %v2723_v2 = vmul.f32 %v3772_v20, %v2698_v0 }
 0xf14   :  { %v2742_v3 = vsel %vm2732_vm10, %v2727_v63, %v2737_v1  ;;  %v2728_v4 = vsub.f32 1.0, %v2723_v2 }
 0xf15   :  { %v2747_v6 = vadd.f32 1.0, %v2742_v3 }
 0xf16   :  { %v2738_v16 = vsub.f32 0.0, %v2728_v4 }
 0xf17   :  { %v2752_v46 = vmul.f32 %v2747_v6, %v2622_v5 }
 0xf18   :  { %v2743_v42 = vsel %vm2733_vm12, %v2728_v4, %v2738_v16 }
 0xf19   :  { %v2748_v31 = vadd.f32 1.0, %v2743_v42  ;;  %3605 = vmatmul.mubr.msk.f32.vlgmr.msra.gmra.mxu0 %vm2763_vm11, %v2752_v46 }
 0xf1a   :  { %3607 = vmatprep.mubr.msk.f32.mxu0 %vm3819_vm2, %v3818_v36 }
 0xf1b   :  { %v2753_v39 = vmul.f32 %v2748_v31, %v2623_v51  ;;  %v3128_v51 = vld [vmem:[%s4936_s12] ss:$0 sm:$0xff] }
 0xf1d   :  { %3608 = vmatmul.mubr.msk.f32.gmra.mxu0 %vm2763_vm11, %v2753_v39 }
 0xf1e   :  { %3610 = vmatprep.mubr.msk.f32.mxu0 %vm3819_vm2, %v3818_v36 }
 0xf57   :  { %v2608_v11 = vpop.f32.mrf.mxu1 }
 0xf58   :  { %v2609_v19 = vadd.f32 %v4837_v8, %v2608_v11 }
 0xf59   :  { %v3581_v18 = vpop.f32.mrf.mxu1 }
 0xf5a   :  { %v2629_v33 = vmul.f32 0.70710677, %v2609_v19  ;;  %v2624_v17 = vmul.f32 0.5, %v2609_v19 }
 0xf5c   :  { %v2634_v24 = vand.u32 2147483647, %v2629_v33  ;;  %vm2734_vm13 = vcmp.ge.f32.partialorder %v2629_v33, 0.0 }
 0xf5e   :  { %v2639_v25 = vmul.f32 0.3275911, %v2634_v24  ;;  %v2704_v12 = vsub.f32 0.0, %v2634_v24 }
 0xf60   :  { %v2644_v10 = vadd.f32 1.0, %v2639_v25  ;;  %v2709_v15 = vmul.f32 %v2704_v12, %v2634_v24 }
 0xf62   :  { %3773 = vrcp.f32 %v2644_v10  ;;  %v2716_v28 = vmul.f32 1.442695, %v2709_v15 }
 0xf64   :  { %3775 = vpow2.f32 %v2716_v28 }
 0xf6d   :  { %v2415_v9 = vpop.f32.mrf.mxu0 }
 0xf6e   :  { %v2416_v22 = vadd.f32 %v4694_v32, %v2415_v9 }
 0xf6f   :  { %v3774_v26 = vpop.eup %3773  ;;  %v3564_v41 = vpop.f32.mrf.mxu0 }
 0xf70   :  { %v2659_v27 = vmul.f32 1.0614054, %v3774_v26  ;;  %v2423_v34 = vadd.f32 %v3795_v29, %v2416_v22 }
 0xf71   :  { %v3776_v53 = vpop.eup %3775 }
 0xf72   :  { %v2664_v35 = vadd.f32 -1.4531521, %v2659_v27  ;;  %v2436_v37 = vsel %vm105_vm1, %v2423_v34, 0.0 }
 0xf73   :  { %2437 = vadd.xlane.f32.xlu1 %v2436_v37  ;;  %v2925_v37 = vld [vmem:[%s4939_s15 + $0x18] sm:$0xff] }
 0xf74   :  { %v2669_v38 = vmul.f32 %v3774_v26, %v2664_v35  ;;  %3620 = vmatpush3.msra.mxu1 %v2925_v37 }
 0xf75   :  { %3621 = vmatprep.subr.mxu1 %v3818_v36 }
 0xf76   :  { %v2674_v45 = vadd.f32 1.4214138, %v2669_v38 }
 0xf78   :  { %v2679_v48 = vmul.f32 %v3774_v26, %v2674_v45  ;;  %v2924_v45 = vld [vmem:[%s4939_s15 + $0x10] sm:$0xff] }
 0xf79   :  { %3622 = vmatpush3.msra.mxu1 %v2924_v45 }
 0xf7a   :  { %v2684_v49 = vadd.f32 -0.28449672, %v2679_v48  ;;  %3623 = vmatprep.subr.mxu1 %v3818_v36 }
 0xf7c   :  { %v2689_v50 = vmul.f32 %v3774_v26, %v2684_v49  ;;  %v2923_v49 = vld [vmem:[%s4939_s15 + $0x8] sm:$0xff] }
 0xf7d   :  { %3624 = vmatpush3.msra.mxu1 %v2923_v49 }
 0xf7e   :  { %v2694_v32 = vadd.f32 0.2548296, %v2689_v50  ;;  %3625 = vmatprep.subr.mxu1 %v3818_v36 }
 0xf80   :  { %v2699_v52 = vmul.f32 %v3774_v26, %v2694_v32  ;;  %v2922_v32 = vld [vmem:[%s4939_s15] sm:$0xff] }
 0xf81   :  { %3626 = vmatpush3.msra.mxu1 %v2922_v32 }
 0xf82   :  { %v2724_v54 = vmul.f32 %v3776_v53, %v2699_v52 }
 0xf84   :  { %v2729_v55 = vsub.f32 1.0, %v2724_v54 }
 0xf86   :  { %v2739_v7 = vsub.f32 0.0, %v2729_v55 }
 0xf88   :  { %v2744_v21 = vsel %vm2734_vm13, %v2729_v55, %v2739_v7 }
 0xf89   :  { %v2749_v44 = vadd.f32 1.0, %v2744_v21 }
 0xf8b   :  { %v2754_v43 = vmul.f32 %v2749_v44, %v2624_v17 }
 0xf8d   :  { %3611 = vmatmul.mubr.msk.f32.gmra.mxu0 %vm2763_vm11, %v2754_v43 }
 0xf8e   :  { %3613 = vmatprep.mubr.msk.f32.mxu0 %vm3819_vm2, %v3818_v36 }
 0xf93   :  { %v2435_v13 = vpop.xlane.xlu0 %2434 }
 0xf94   :  { %v2442_v14 = vmul.f32 0.03125, %v2435_v13 }
 0xf96   :  { %v2447_v30 = vsub.f32 %v4845_v56, %v2442_v14 }
 0xf98   :  { %v2452_v58 = vmul.f32 %v2447_v30, %v2447_v30 }
 0xf9a   :  { %v2463_v59 = vsel %vm92_vm0, %v2452_v58, 0.0 }
 0xf9b   :  { %2464 = vadd.xlane.f32.xlu0 %v2463_v59 }
 0xfd9   :  { %v2845_v60 = vpop.f32.mrf.mxu0 }
 0xfda   :  { %v2846_v31 = vadd.f32 %v3128_v51, %v2845_v60 }
 0xfdb   :  { %v3606_v61 = vpop.f32.mrf.mxu0 }
 0xfdc   :  { %v2866_v18 = vadd.f32 %v2846_v31, %v4700_v40 }
 0xfdd   :  { %v2850_v62 = vpop.f32.mrf.mxu0 }
 0xfdf   :  { %v3609_v63 = vpop.f32.mrf.mxu0 }
 0xffc   :  { %v2438_v0 = vpop.xlane.xlu1 %2437 }
 0xffd   :  { %v2443_v20 = vmul.f32 0.03125, %v2438_v0 }
 0xfff   :  { %v2448_v1 = vsub.f32 %v2423_v34, %v2443_v20 }
0x1001   :  { %v2453_v2 = vmul.f32 %v2448_v1, %v2448_v1 }
0x1003   :  { %v2466_v3 = vsel %vm105_vm1, %v2453_v2, 0.0 }
0x1004   :  { %2467 = vadd.xlane.f32.xlu0 %v2466_v3 }
0x1024   :  { %v2465_v4 = vpop.xlane.xlu0 %2464 }
0x1025   :  { %v2472_v5 = vmul.f32 0.03125, %v2465_v4 }
0x1027   :  { %v2477_v6 = vadd.f32 1e-06, %v2472_v5 }
0x1029   :  { %3777 = vrsqrt.f32 %v2477_v6 }
0x1036   :  { %v3778_v56 = vpop.eup %3777 }
0x1037   :  { %v2487_v16 = vmul.f32 %v3778_v56, %v2447_v30 }
0x1039   :  { %v2498_v46 = vmul.f32 %v4762_v47, %v2487_v16 }
0x103b   :  { %v2509_v42 = vadd.f32 %v4767_v23, %v2498_v46 }
0x103d   :  { %3583 = vmatmul.mubr.msk.f32.gmra.mxu1 %vm92_vm0, %v2509_v42 }
0x103e   :  { %3585 = vmatprep.mubr.msk.f32.mxu1 %vm3819_vm2, %v3818_v36 }
0x104d   :  { %v2854_v39 = vpop.f32.mrf.mxu0 }
0x104e   :  { %v2855_v11 = vadd.f32 %v3128_v51, %v2854_v39 }
0x104f   :  { %v3612_v19 = vpop.f32.mrf.mxu0 }
0x1050   :  { %v2867_v33 = vadd.f32 %v2855_v11, %v4720_v57 }
0x1052   :  { %v2892_v24 = vsel %vm592_vm5, %v2866_v18, %v2867_v33 }
0x1053   :  { %v2895_v25 = vsel %vm105_vm1, %v2892_v24, 0.0 }
0x1054   :  { %2896 = vadd.xlane.f32.xlu0 %v2895_v25 }
0x108d   :  { %v2468_v10 = vpop.xlane.xlu0 %2467 }
0x108e   :  { %v2473_v12 = vmul.f32 0.03125, %v2468_v10  ;;  %v3135_v10 = vld [vmem:[%s4938_s14] ss:$0 sm:$0xff] }
0x1090   :  { %v2478_v15 = vadd.f32 1e-06, %v2473_v12 }
0x1092   :  { %3779 = vrsqrt.f32 %v2478_v15 }
0x109f   :  { %v3780_v9 = vpop.eup %3779 }
0x10a0   :  { %v2488_v22 = vmul.f32 %v3780_v9, %v2448_v1 }
0x10a2   :  { %v2499_v26 = vmul.f32 %v4762_v47, %v2488_v22 }
0x10a4   :  { %v2510_v41 = vadd.f32 %v4767_v23, %v2499_v26 }
0x10a6   :  { %3586 = vmatmul.mubr.msk.f32.gmra.mxu1 %vm92_vm0, %v2510_v41 }
0x10a7   :  { %3627 = vmatprep.mubr.msk.f32.mxu1 %vm3819_vm2, %v3818_v36 }
0x10dd   :  { %v2897_v40 = vpop.xlane.xlu0 %2896 }
0x10de   :  { %v2898_v57 = vmul.f32 0.03125, %v2897_v40 }
0x10e0   :  { %v4884_v27 = vsub.f32 %v2892_v24, %v2898_v57 }
0x10e2   :  { %v2900_v28 = vmul.f32 %v4884_v27, %v4884_v27 }
0x10e4   :  { %v2901_v29 = vsel %vm105_vm1, %v2900_v28, 0.0 }
0x10e5   :  { %2902 = vadd.xlane.f32.xlu1 %v2901_v29 }
0x10fd   :  { %v2613_v34 = vpop.f32.mrf.mxu1 }
0x10fe   :  { %v2614_v47 = vadd.f32 %v4837_v8, %v2613_v34 }
0x10ff   :  { %v3584_v35 = vpop.f32.mrf.mxu1 }
0x1100   :  { %v2630_v23 = vmul.f32 0.70710677, %v2614_v47  ;;  %v2625_v0 = vmul.f32 0.5, %v2614_v47 }
0x1102   :  { %v2635_v38 = vand.u32 2147483647, %v2630_v23  ;;  %vm2735_vm14 = vcmp.ge.f32.partialorder %v2630_v23, 0.0 }
0x1104   :  { %v2640_v48 = vmul.f32 0.3275911, %v2635_v38  ;;  %v2705_v52 = vsub.f32 0.0, %v2635_v38 }
0x1106   :  { %v2645_v50 = vadd.f32 1.0, %v2640_v48  ;;  %v2710_v53 = vmul.f32 %v2705_v52, %v2635_v38  ;;  %v3136_v48 = vld [vmem:[%s4940_s16] ss:$0 sm:$0xff] }
0x1108   :  { %3781 = vrcp.f32 %v2645_v50  ;;  %v2718_v7 = vmul.f32 1.442695, %v2710_v53 }
0x110a   :  { %3783 = vpow2.f32 %v2718_v7 }
0x1115   :  { %v3782_v54 = vpop.eup %3781 }
0x1116   :  { %v2660_v55 = vmul.f32 1.0614054, %v3782_v54 }
0x1117   :  { %v3784_v59 = vpop.eup %3783 }
0x1118   :  { %v2665_v21 = vadd.f32 -1.4531521, %v2660_v55 }
0x111a   :  { %v2670_v17 = vmul.f32 %v3782_v54, %v2665_v21 }
0x111c   :  { %v2675_v44 = vadd.f32 1.4214138, %v2670_v17 }
0x111e   :  { %v2680_v43 = vmul.f32 %v3782_v54, %v2675_v44 }
0x1120   :  { %v2685_v13 = vadd.f32 -0.28449672, %v2680_v43 }
0x1122   :  { %v2690_v14 = vmul.f32 %v3782_v54, %v2685_v13 }
0x1124   :  { %v2695_v30 = vadd.f32 0.2548296, %v2690_v14 }
0x1126   :  { %v2700_v58 = vmul.f32 %v3782_v54, %v2695_v30 }
0x1128   :  { %v2725_v60 = vmul.f32 %v3784_v59, %v2700_v58 }
0x112a   :  { %v2730_v61 = vsub.f32 1.0, %v2725_v60 }
0x112c   :  { %v2740_v62 = vsub.f32 0.0, %v2730_v61 }
0x112e   :  { %v2745_v63 = vsel %vm2735_vm14, %v2730_v61, %v2740_v62 }
0x112f   :  { %v2750_v20 = vadd.f32 1.0, %v2745_v63 }
0x1131   :  { %v2755_v1 = vmul.f32 %v2750_v20, %v2625_v0 }
0x1133   :  { %3614 = vmatmul.mubr.msk.f32.gmra.mxu0 %vm2763_vm11, %v2755_v1 }
0x1134   :  { %3616 = vmatprep.mubr.msk.f32.mxu0 %vm3819_vm2, %v3818_v36 }
0x1166   :  { %v2618_v2 = vpop.f32.mrf.mxu1 }
0x1167   :  { %v2619_v3 = vadd.f32 %v4837_v8, %v2618_v2  ;;  %v3134_v8 = vld [vmem:[%s4937_s13] ss:$0 sm:$0xff] }
0x1168   :  { %v3587_v4 = vpop.f32.mrf.mxu1 }
0x1169   :  { %v2631_v5 = vmul.f32 0.70710677, %v2619_v3  ;;  %v2626_v35 = vmul.f32 0.5, %v2619_v3 }
0x116b   :  { %v2636_v6 = vand.u32 2147483647, %v2631_v5  ;;  %vm2736_vm15 = vcmp.ge.f32.partialorder %v2631_v5, 0.0 }
0x116d   :  { %v2641_v56 = vmul.f32 0.3275911, %v2636_v6  ;;  %v2706_v31 = vsub.f32 0.0, %v2636_v6 }
0x116e   :  { %v2903_v16 = vpop.xlane.xlu1 %2902 }
0x116f   :  { %v2646_v46 = vadd.f32 1.0, %v2641_v56  ;;  %v2904_v42 = vmul.f32 0.03125, %v2903_v16  ;;  %v2711_v39 = vmul.f32 %v2706_v31, %v2636_v6 }
0x1171   :  { %3785 = vrcp.f32 %v2646_v46  ;;  %v2905_v51 = vadd.f32 1e-06, %v2904_v42  ;;  %v2720_v18 = vmul.f32 1.442695, %v2711_v39 }
0x1173   :  { %3787 = vrsqrt.f32 %v2905_v51 }
0x1174   :  { %3789 = vpow2.f32 %v2720_v18 }
0x117e   :  { %v3786_v11 = vpop.eup %3785 }
0x117f   :  { %v2661_v19 = vmul.f32 1.0614054, %v3786_v11 }
0x1180   :  { %v3788_v33 = vpop.eup %3787 }
0x1181   :  { %v2666_v36 = vadd.f32 -1.4531521, %v2661_v19  ;;  %v2907_v24 = vmul.f32 %v3788_v33, %v4884_v27  ;;  %v3790_v28 = vpop.eup %3789 }
0x1183   :  { %v2671_v25 = vmul.f32 %v3786_v11, %v2666_v36  ;;  %v2914_v12 = vmul.f32 %v3134_v8, %v2907_v24 }
0x1185   :  { %v2676_v15 = vadd.f32 1.4214138, %v2671_v25  ;;  %v2921_v9 = vadd.f32 %v3135_v10, %v2914_v12 }
0x1187   :  { %v2681_v22 = vmul.f32 %v3786_v11, %v2676_v15  ;;  %3628 = vmatmul.mubr.msk.f32.vlgmr.msra.gmra.mxu1 %vm92_vm0, %v2921_v9  ;;  %vm3006_vm0 = vcmask 74752  }
0x1189   :  { %v2686_v26 = vadd.f32 -0.28449672, %v2681_v22 }
0x118b   :  { %v2691_v41 = vmul.f32 %v3786_v11, %v2686_v26 }
0x118d   :  { %v2696_v40 = vadd.f32 0.2548296, %v2691_v41 }
0x118f   :  { %v2701_v57 = vmul.f32 %v3786_v11, %v2696_v40 }
0x1191   :  { %v2726_v29 = vmul.f32 %v3790_v28, %v2701_v57 }
0x1193   :  { %v2731_v34 = vsub.f32 1.0, %v2726_v29 }
0x1195   :  { %v2741_v27 = vsub.f32 0.0, %v2731_v34 }
0x1197   :  { %v2746_v47 = vsel %vm2736_vm15, %v2731_v34, %v2741_v27 }
0x1198   :  { %v2751_v23 = vadd.f32 1.0, %v2746_v47 }
0x119a   :  { %v2756_v37 = vmul.f32 %v2751_v23, %v2626_v35 }
0x119c   :  { %3617 = vmatmul.mubr.msk.f32.gmra.mxu0 %vm2763_vm11, %v2756_v37 }
0x11f3   :  { %v2859_v38 = vpop.f32.mrf.mxu0 }
0x11f5   :  { %v3615_v45 = vpop.f32.mrf.mxu0 }
0x1247   :  { %v3002_v49 = vpop.f32.mrf.mxu1 }
0x1248   :  { %v3003_v50 = vadd.f32 %v3136_v48, %v3002_v49 }
0x1249   :  { %v3629_v32 = vpop.f32.mrf.mxu1 }
0x124a   :  { %3007 = vst.msk [vmem:[#allocation2] sm:$0x3] %vm3006_vm0, %v3003_v50 }
0x124b   :  { %3807 = shalt.err (!%p3804_p4)
}
0x124c   :  { %3017 = dma.vmem_to_hbm [thread:$0]  %s3015_s18, 32, %s4941_s17, [#allocation3]  }
0x125c   :  { %v2863_v52 = vpop.f32.mrf.mxu0 }
0x125e   :  { %v3618_v53 = vpop.f32.mrf.mxu0 }
0x125f   :  { %3816 = dma.done.wait [#allocation3], 32  }
0x1260   :  { %3817 = vsyncadd [#allocation3], 4294967264 }
0x1261   :  { %3025 = vsyncpa [#allocation3], 1 }

</bundles_post_ra>
